<compile_context>
chip_gen: v6e
topology: v6e:2x2x1
jax: 0.10.0
libtpu: 0.0.40
codegen_flags: <defaults>
</compile_context>

<pallas_src>
import functools

import jax
import jax.numpy as jnp
from jax.experimental import pallas as pl
from jax.experimental.pallas import tpu as pltpu

EPS = 1e-5  # nn.InstanceNorm2d default


# ----------------------------------------------------------------------------
# Pallas kernel: conv (k*k per-tap MXU matmuls) + InstanceNorm + activation
#                (+ fused residual add, + fused reparameterization noise)
# ----------------------------------------------------------------------------
def _fused_conv_kernel(k, stride, wq, ho, wo, act, has_res, has_noise, *refs):
    """One grid step = one sample.

    refs (in order):
      x_ref : (1, s*s, Cin_p, L_in)  bf16  polyphase, row-flattened padded input
      w_ref : (k*k, Cout, Cin_p)     bf16  per-tap weights
      m_ref : (1, L_out)             f32   1.0 on valid wrapped columns else 0.0
      r_ref : (1, Cout, L_out)       f32   [optional] residual (wrapped layout)
      n_ref : (1, Cout, L_out)       f32   [optional] reparam noise (wrapped)
      o_ref : (1, Cout, L_out)       f32   output (mu for the final layer)
      z_ref : (1, Cout, L_out)       f32   [optional] z = mu + noise
    """
    it = iter(refs)
    x_ref = next(it)
    w_ref = next(it)
    m_ref = next(it)
    r_ref = next(it) if has_res else None
    n_ref = next(it) if has_noise else None
    o_ref = next(it)
    z_ref = next(it) if has_noise else None

    cout = o_ref.shape[1]
    l_out = o_ref.shape[2]

    # Conv as k*k small (Cout, Cin) x (Cin, L_out) bf16 MXU matmuls, f32 acc.
    # Column j of the accumulator corresponds to output position
    # (j // wq, j % wq); columns with (j % wq) >= wo or j >= ho*wq are
    # wrap-around garbage and are excluded from the InstanceNorm statistics.
    acc = jnp.zeros((cout, l_out), jnp.float32)
    for kh in range(k):
        for kw in range(k):
            tap = kh * k + kw
            phase = (kh % stride) * stride + (kw % stride)
            start = (kh // stride) * wq + (kw // stride)
            x_slab = x_ref[0, phase, :, pl.ds(start, l_out)]      # (Cin_p, L_out)
            acc = acc + jnp.dot(w_ref[tap], x_slab,
                                preferred_element_type=jnp.float32)

    # InstanceNorm2d (affine=False, biased variance, eps=1e-5) over the valid
    # spatial columns only.  (The conv bias is skipped entirely: IN subtracts
    # the per-channel mean, so a per-channel bias cancels exactly.)
    m = m_ref[...]                                   # (1, L_out)
    inv_cnt = 1.0 / float(ho * wo)
    mean = jnp.sum(acc * m, axis=-1, keepdims=True) * inv_cnt
    cen = (acc - mean) * m
    var = jnp.sum(cen * cen, axis=-1, keepdims=True) * inv_cnt
    y = (acc - mean) * jax.lax.rsqrt(var + EPS)

    if act == "lrelu":
        y = jnp.where(y > 0, y, 0.2 * y)
    elif act == "relu":
        y = jnp.maximum(y, 0.0)
    # act == "none": identity

    if has_res:
        y = y + r_ref[0]

    o_ref[0] = y
    if has_noise:
        z_ref[0] = y + n_ref[0]


# ----------------------------------------------------------------------------
# Wrapper (glue: padding, polyphase split, row-flatten, pallas_call setup)
# ----------------------------------------------------------------------------
def _round_up(x, m):
    return (x + m - 1) // m * m


def _wrap_rows(t, wq, l_out):
    """(N, C, H, W) -> (N, C, L_out) in the wrapped row-flattened layout."""
    n, c, h, w = t.shape
    t = jnp.pad(t, ((0, 0), (0, 0), (0, 0), (0, wq - w)))
    t = t.reshape(n, c, h * wq)
    return jnp.pad(t, ((0, 0), (0, 0), (0, l_out - h * wq))).astype(jnp.float32)


def conv_in_act(x, w_oihw, *, stride, pad, pad_mode, act,
                residual=None, noise=None):
    """Fused Conv2d + InstanceNorm2d + activation (+residual) (+noise).

    x: (N, Cin, H, W) f32 NCHW.  w_oihw: (Cout, Cin, k, k) (PyTorch layout).
    Returns (N, Cout, Ho, Wo) f32, or a (mu, z) pair if `noise` is given.
    """
    n, cin, h, w = x.shape
    cout, cin_w, k, _ = w_oihw.shape
    assert cin == cin_w
    s = stride
    ho = (h + 2 * pad - k) // s + 1
    wo = (w + 2 * pad - k) // s + 1
    dmax = (k - 1) // s
    hq, wq = ho + dmax, wo + dmax

    # --- wrapper glue (plain JAX): pad, polyphase split, row-flatten ----------
    xp = x
    if pad > 0:
        xp = jnp.pad(xp, ((0, 0), (0, 0), (pad, pad), (pad, pad)), mode=pad_mode)
    hp, wp = xp.shape[2], xp.shape[3]
    # zero-pad so every polyphase view has exactly (hq, wq) extent
    xp = jnp.pad(xp, ((0, 0), (0, 0), (0, s * hq - hp), (0, s * wq - wp)))
    phases = [xp[:, :, a::s, b::s] for a in range(s) for b in range(s)]
    ph = jnp.stack(phases, axis=1)                       # (N, s*s, Cin, hq, wq)

    # pad Cin to a sublane-friendly multiple of 8 (zero channels are inert)
    cin_p = max(8, _round_up(cin, 8))
    if cin_p != cin:
        ph = jnp.pad(ph, ((0, 0), (0, 0), (0, cin_p - cin), (0, 0), (0, 0)))

    l_out = _round_up(ho * wq, 128)      # lane-dense output length (x128)
    max_start = dmax * wq + dmax
    l_in = max_start + l_out
    ph = ph.reshape(n, s * s, cin_p, hq * wq)
    ph = jnp.pad(ph, ((0, 0), (0, 0), (0, 0), (0, l_in - hq * wq)))
    ph = ph.astype(jnp.bfloat16)

    # per-tap weights (k*k, Cout, Cin_p), bf16 for the MXU
    w_taps = jnp.transpose(w_oihw, (2, 3, 0, 1)).reshape(k * k, cout, cin)
    if cin_p != cin:
        w_taps = jnp.pad(w_taps, ((0, 0), (0, 0), (0, cin_p - cin)))
    w_taps = w_taps.astype(jnp.bfloat16)

    # validity mask over wrapped output columns
    col = jnp.arange(l_out, dtype=jnp.int32)
    mask = (((col % wq) < wo) & (col < ho * wq)).astype(jnp.float32)
    mask = mask.reshape(1, l_out)

    args = [ph, w_taps, mask]
    in_specs = [
        pl.BlockSpec((1, s * s, cin_p, l_in), lambda i: (i, 0, 0, 0)),
        pl.BlockSpec((k * k, cout, cin_p), lambda i: (0, 0, 0)),
        pl.BlockSpec((1, l_out), lambda i: (0, 0)),
    ]
    has_res = residual is not None
    has_noise = noise is not None
    if has_res:
        args.append(_wrap_rows(residual, wq, l_out))
        in_specs.append(pl.BlockSpec((1, cout, l_out), lambda i: (i, 0, 0)))
    if has_noise:
        args.append(_wrap_rows(noise, wq, l_out))
        in_specs.append(pl.BlockSpec((1, cout, l_out), lambda i: (i, 0, 0)))

    out_spec = pl.BlockSpec((1, cout, l_out), lambda i: (i, 0, 0))
    if has_noise:
        out_shape = (jax.ShapeDtypeStruct((n, cout, l_out), jnp.float32),
                     jax.ShapeDtypeStruct((n, cout, l_out), jnp.float32))
        out_specs = (out_spec, out_spec)
    else:
        out_shape = jax.ShapeDtypeStruct((n, cout, l_out), jnp.float32)
        out_specs = out_spec

    kernel = functools.partial(_fused_conv_kernel, k, s, wq, ho, wo, act,
                               has_res, has_noise)
    # TODO(synk): for very large images (e.g. 256x256 on v7x, 64 MiB VMEM) the
    # (Cout, L) block should additionally be tiled over L with an
    # accumulator-based two-pass InstanceNorm; at these sizes it fits VMEM.
    out = pl.pallas_call(
        kernel,
        out_shape=out_shape,
        grid=(n,),
        in_specs=in_specs,
        out_specs=out_specs,
        compiler_params=pltpu.CompilerParams(
            dimension_semantics=("parallel",),
            vmem_limit_bytes=48 * 1024 * 1024,
        ),
    )(*args)

    def unwrap(o):
        return o[:, :, :ho * wq].reshape(n, cout, ho, wq)[:, :, :, :wo]

    if has_noise:
        return unwrap(out[0]), unwrap(out[1])
    return unwrap(out)


# ----------------------------------------------------------------------------
# Model: parameter init + forward
# ----------------------------------------------------------------------------
def _conv_params(key, k, cin, cout):
    """PyTorch-style (Cout, Cin, k, k) weight + (Cout,) bias.  The bias is kept
    only for shape parity: InstanceNorm2d(affine=False) cancels it exactly."""
    kw_, kb_ = jax.random.split(key)
    scale = 1.0 / jnp.sqrt(float(k * k * cin))
    wgt = jax.random.normal(kw_, (cout, cin, k, k), jnp.float32) * scale
    b = jax.random.normal(kb_, (cout,), jnp.float32) * scale
    return wgt, b


def init_encoder_params(key, in_channels=3, dim=8, n_downsample=2):
    params = {}
    keys = jax.random.split(key, 16)
    ki = 0

    # ReflectionPad2d(3) + Conv2d(in_channels, dim, 7) + IN + LeakyReLU(0.2)
    params["stem"] = _conv_params(keys[ki], 7, in_channels, dim); ki += 1

    # downsampling: Conv2d(dim, 2*dim, 3, stride=2, pad=1) + IN + ReLU
    params["down"] = []
    d = dim
    for _ in range(n_downsample):
        params["down"].append(_conv_params(keys[ki], 3, d, 2 * d)); ki += 1
        d *= 2

    # 3 residual blocks at channel count d
    params["res"] = []
    for _ in range(3):
        w1, b1 = _conv_params(keys[ki], 3, d, d); ki += 1
        w2, b2 = _conv_params(keys[ki], 3, d, d); ki += 1
        params["res"].append((w1, b1, w2, b2))

    # shared_block defaults to None in the PyTorch module (forward would fail);
    # instantiated here as ResidualBlock(d), the canonical UNIT choice.
    w1, b1 = _conv_params(keys[ki], 3, d, d); ki += 1
    w2, b2 = _conv_params(keys[ki], 3, d, d); ki += 1
    params["shared"] = (w1, b1, w2, b2)
    return params


def residual_block(x, w1, b1, w2, b2, noise=None):
    """x + (Conv-IN-ReLU -> Conv-IN[-Dropout]); with `noise`, the second conv
    kernel also emits z = (x + block(x)) + noise."""
    # TODO(synk): nn.Dropout(p=0.5) is stochastic in train mode; modeled as
    # eval-mode identity here.
    del b1, b2  # conv bias is exactly cancelled by InstanceNorm(affine=False)
    h = conv_in_act(x, w1, stride=1, pad=1, pad_mode="constant", act="relu")
    return conv_in_act(h, w2, stride=1, pad=1, pad_mode="constant", act="none",
                       residual=x, noise=noise)


def encoder_forward(params, x_nchw, noise_key):
    """Returns (mu, z) in NCHW, matching the PyTorch Encoder.forward semantics."""
    x = x_nchw.astype(jnp.float32)

    # stem: ReflectionPad2d(3), Conv 7x7, InstanceNorm, LeakyReLU(0.2)
    w, _ = params["stem"]
    x = conv_in_act(x, w, stride=1, pad=3, pad_mode="reflect", act="lrelu")

    # downsampling: Conv 3x3 s2 p1 (zero pad), InstanceNorm, ReLU
    for (w, _) in params["down"]:
        x = conv_in_act(x, w, stride=2, pad=1, pad_mode="constant", act="relu")

    # 3 residual blocks
    for (w1, b1, w2, b2) in params["res"]:
        x = residual_block(x, w1, b1, w2, b2)

    # shared block -> mu ; z = mu + N(0,1) fused into the final conv kernel
    noise = jax.random.normal(noise_key, x.shape, jnp.float32)
    w1, b1, w2, b2 = params["shared"]
    mu, z = residual_block(x, w1, b1, w2, b2, noise=noise)
    return mu, z


# ----------------------------------------------------------------------------
# Demo
# ----------------------------------------------------------------------------
if __name__ == "__main__":
    key = jax.random.PRNGKey(0)
    k_params, k_input, k_noise = jax.random.split(key, 3)

    in_channels, dim, n_downsample = 3, 8, 2
    batch, spatial = 2, 16

    params = init_encoder_params(k_params, in_channels=in_channels,
                                 dim=dim, n_downsample=n_downsample)
    x = jax.random.normal(k_input, (batch, in_channels, spatial, spatial),
                          jnp.float32)

    fwd = jax.jit(encoder_forward)
    mu, z = fwd(params, x, k_noise)
    mu, z = jax.block_until_ready((mu, z))

    final_dim = dim * (2 ** n_downsample)
    final_sp = spatial // (2 ** n_downsample)
    assert mu.shape == (batch, final_dim, final_sp, final_sp), mu.shape
    assert z.shape == mu.shape, z.shape
    assert bool(jnp.all(jnp.isfinite(mu))) and bool(jnp.all(jnp.isfinite(z)))

    print("KERNEL_OK")
</pallas_src>

<mosaic_0001>
module attributes {stable_mosaic.version = 11 : i64} {
  func.func @_fused_conv_kernel(%arg0: i32, %arg1: memref<1x1x8x522xbf16, #tpu.memory_space<vmem>>, %arg2: memref<49x8x8xbf16, #tpu.memory_space<vmem>>, %arg3: memref<1x384xf32, #tpu.memory_space<vmem>>, %arg4: memref<1x8x384xf32, #tpu.memory_space<vmem>>) attributes {dimension_semantics = [#tpu.dimension_semantics<parallel>], iteration_bounds = array<i64: 2>, scalar_prefetch = 0 : i64, scratch_operands = 0 : i64, tpu.core_type = #tpu.core_type<tc>, window_params = [{transform_indices = @transform_0, window_bounds = array<i64: 1, 1, 8, 522>}, {pipeline_mode = #tpu.pipeline_mode<synchronous>, transform_indices = @transform_1, window_bounds = array<i64: 49, 8, 8>}, {pipeline_mode = #tpu.pipeline_mode<synchronous>, transform_indices = @transform_2, window_bounds = array<i64: 1, 384>}, {transform_indices = @transform_3, window_bounds = array<i64: 1, 8, 384>}]} {
    %cst = arith.constant 0.000000e+00 : f32
    %0 = vector.broadcast %cst : f32 to vector<8x384xf32>
    %c0 = arith.constant 0 : index
    %c0_0 = arith.constant 0 : index
    %c0_1 = arith.constant 0 : index
    %c0_2 = arith.constant 0 : index
    %1 = vector.load %arg1[%c0, %c0_0, %c0_1, %c0_2] : memref<1x1x8x522xbf16, #tpu.memory_space<vmem>>, vector<1x1x8x384xbf16>
    %2 = vector.shape_cast %1 : vector<1x1x8x384xbf16> to vector<8x384xbf16>
    %c0_3 = arith.constant 0 : index
    %c0_4 = arith.constant 0 : index
    %c0_5 = arith.constant 0 : index
    %3 = vector.load %arg2[%c0_3, %c0_4, %c0_5] : memref<49x8x8xbf16, #tpu.memory_space<vmem>>, vector<1x8x8xbf16>
    %4 = vector.shape_cast %3 : vector<1x8x8xbf16> to vector<8x8xbf16>
    %cst_6 = arith.constant dense<0.000000e+00> : vector<8x384xf32>
    %5 = tpu.matmul %4, %2, %cst_6 {dimension_numbers = #tpu.dot_dimension_numbers<[1], [0], [0], [1], [0, 0, 1, 1], [], []>} : vector<8x8xbf16>, vector<8x384xbf16>, vector<8x384xf32> -> vector<8x384xf32>
    %6 = arith.addf %0, %5 : vector<8x384xf32>
    %c0_7 = arith.constant 0 : index
    %c0_8 = arith.constant 0 : index
    %c0_9 = arith.constant 0 : index
    %c1 = arith.constant 1 : index
    %7 = vector.load %arg1[%c0_7, %c0_8, %c0_9, %c1] : memref<1x1x8x522xbf16, #tpu.memory_space<vmem>>, vector<1x1x8x384xbf16>
    %8 = vector.shape_cast %7 : vector<1x1x8x384xbf16> to vector<8x384xbf16>
    %c1_10 = arith.constant 1 : index
    %c0_11 = arith.constant 0 : index
    %c0_12 = arith.constant 0 : index
    %9 = vector.load %arg2[%c1_10, %c0_11, %c0_12] : memref<49x8x8xbf16, #tpu.memory_space<vmem>>, vector<1x8x8xbf16>
    %10 = vector.shape_cast %9 : vector<1x8x8xbf16> to vector<8x8xbf16>
    %cst_13 = arith.constant dense<0.000000e+00> : vector<8x384xf32>
    %11 = tpu.matmul %10, %8, %cst_13 {dimension_numbers = #tpu.dot_dimension_numbers<[1], [0], [0], [1], [0, 0, 1, 1], [], []>} : vector<8x8xbf16>, vector<8x384xbf16>, vector<8x384xf32> -> vector<8x384xf32>
    %12 = arith.addf %6, %11 : vector<8x384xf32>
    %c0_14 = arith.constant 0 : index
    %c0_15 = arith.constant 0 : index
    %c0_16 = arith.constant 0 : index
    %c2 = arith.constant 2 : index
    %13 = vector.load %arg1[%c0_14, %c0_15, %c0_16, %c2] : memref<1x1x8x522xbf16, #tpu.memory_space<vmem>>, vector<1x1x8x384xbf16>
    %14 = vector.shape_cast %13 : vector<1x1x8x384xbf16> to vector<8x384xbf16>
    %c2_17 = arith.constant 2 : index
    %c0_18 = arith.constant 0 : index
    %c0_19 = arith.constant 0 : index
    %15 = vector.load %arg2[%c2_17, %c0_18, %c0_19] : memref<49x8x8xbf16, #tpu.memory_space<vmem>>, vector<1x8x8xbf16>
    %16 = vector.shape_cast %15 : vector<1x8x8xbf16> to vector<8x8xbf16>
    %cst_20 = arith.constant dense<0.000000e+00> : vector<8x384xf32>
    %17 = tpu.matmul %16, %14, %cst_20 {dimension_numbers = #tpu.dot_dimension_numbers<[1], [0], [0], [1], [0, 0, 1, 1], [], []>} : vector<8x8xbf16>, vector<8x384xbf16>, vector<8x384xf32> -> vector<8x384xf32>
    %18 = arith.addf %12, %17 : vector<8x384xf32>
    %c0_21 = arith.constant 0 : index
    %c0_22 = arith.constant 0 : index
    %c0_23 = arith.constant 0 : index
    %c3 = arith.constant 3 : index
    %19 = vector.load %arg1[%c0_21, %c0_22, %c0_23, %c3] : memref<1x1x8x522xbf16, #tpu.memory_space<vmem>>, vector<1x1x8x384xbf16>
    %20 = vector.shape_cast %19 : vector<1x1x8x384xbf16> to vector<8x384xbf16>
    %c3_24 = arith.constant 3 : index
    %c0_25 = arith.constant 0 : index
    %c0_26 = arith.constant 0 : index
    %21 = vector.load %arg2[%c3_24, %c0_25, %c0_26] : memref<49x8x8xbf16, #tpu.memory_space<vmem>>, vector<1x8x8xbf16>
    %22 = vector.shape_cast %21 : vector<1x8x8xbf16> to vector<8x8xbf16>
    %cst_27 = arith.constant dense<0.000000e+00> : vector<8x384xf32>
    %23 = tpu.matmul %22, %20, %cst_27 {dimension_numbers = #tpu.dot_dimension_numbers<[1], [0], [0], [1], [0, 0, 1, 1], [], []>} : vector<8x8xbf16>, vector<8x384xbf16>, vector<8x384xf32> -> vector<8x384xf32>
    %24 = arith.addf %18, %23 : vector<8x384xf32>
    %c0_28 = arith.constant 0 : index
    %c0_29 = arith.constant 0 : index
    %c0_30 = arith.constant 0 : index
    %c4 = arith.constant 4 : index
    %25 = vector.load %arg1[%c0_28, %c0_29, %c0_30, %c4] : memref<1x1x8x522xbf16, #tpu.memory_space<vmem>>, vector<1x1x8x384xbf16>
    %26 = vector.shape_cast %25 : vector<1x1x8x384xbf16> to vector<8x384xbf16>
    %c4_31 = arith.constant 4 : index
    %c0_32 = arith.constant 0 : index
    %c0_33 = arith.constant 0 : index
    %27 = vector.load %arg2[%c4_31, %c0_32, %c0_33] : memref<49x8x8xbf16, #tpu.memory_space<vmem>>, vector<1x8x8xbf16>
    %28 = vector.shape_cast %27 : vector<1x8x8xbf16> to vector<8x8xbf16>
    %cst_34 = arith.constant dense<0.000000e+00> : vector<8x384xf32>
    %29 = tpu.matmul %28, %26, %cst_34 {dimension_numbers = #tpu.dot_dimension_numbers<[1], [0], [0], [1], [0, 0, 1, 1], [], []>} : vector<8x8xbf16>, vector<8x384xbf16>, vector<8x384xf32> -> vector<8x384xf32>
    %30 = arith.addf %24, %29 : vector<8x384xf32>
    %c0_35 = arith.constant 0 : index
    %c0_36 = arith.constant 0 : index
    %c0_37 = arith.constant 0 : index
    %c5 = arith.constant 5 : index
    %31 = vector.load %arg1[%c0_35, %c0_36, %c0_37, %c5] : memref<1x1x8x522xbf16, #tpu.memory_space<vmem>>, vector<1x1x8x384xbf16>
    %32 = vector.shape_cast %31 : vector<1x1x8x384xbf16> to vector<8x384xbf16>
    %c5_38 = arith.constant 5 : index
    %c0_39 = arith.constant 0 : index
    %c0_40 = arith.constant 0 : index
    %33 = vector.load %arg2[%c5_38, %c0_39, %c0_40] : memref<49x8x8xbf16, #tpu.memory_space<vmem>>, vector<1x8x8xbf16>
    %34 = vector.shape_cast %33 : vector<1x8x8xbf16> to vector<8x8xbf16>
    %cst_41 = arith.constant dense<0.000000e+00> : vector<8x384xf32>
    %35 = tpu.matmul %34, %32, %cst_41 {dimension_numbers = #tpu.dot_dimension_numbers<[1], [0], [0], [1], [0, 0, 1, 1], [], []>} : vector<8x8xbf16>, vector<8x384xbf16>, vector<8x384xf32> -> vector<8x384xf32>
    %36 = arith.addf %30, %35 : vector<8x384xf32>
    %c0_42 = arith.constant 0 : index
    %c0_43 = arith.constant 0 : index
    %c0_44 = arith.constant 0 : index
    %c6 = arith.constant 6 : index
    %37 = vector.load %arg1[%c0_42, %c0_43, %c0_44, %c6] : memref<1x1x8x522xbf16, #tpu.memory_space<vmem>>, vector<1x1x8x384xbf16>
    %38 = vector.shape_cast %37 : vector<1x1x8x384xbf16> to vector<8x384xbf16>
    %c6_45 = arith.constant 6 : index
    %c0_46 = arith.constant 0 : index
    %c0_47 = arith.constant 0 : index
    %39 = vector.load %arg2[%c6_45, %c0_46, %c0_47] : memref<49x8x8xbf16, #tpu.memory_space<vmem>>, vector<1x8x8xbf16>
    %40 = vector.shape_cast %39 : vector<1x8x8xbf16> to vector<8x8xbf16>
    %cst_48 = arith.constant dense<0.000000e+00> : vector<8x384xf32>
    %41 = tpu.matmul %40, %38, %cst_48 {dimension_numbers = #tpu.dot_dimension_numbers<[1], [0], [0], [1], [0, 0, 1, 1], [], []>} : vector<8x8xbf16>, vector<8x384xbf16>, vector<8x384xf32> -> vector<8x384xf32>
    %42 = arith.addf %36, %41 : vector<8x384xf32>
    %c0_49 = arith.constant 0 : index
    %c0_50 = arith.constant 0 : index
    %c0_51 = arith.constant 0 : index
    %c22 = arith.constant 22 : index
    %43 = vector.load %arg1[%c0_49, %c0_50, %c0_51, %c22] : memref<1x1x8x522xbf16, #tpu.memory_space<vmem>>, vector<1x1x8x384xbf16>
    %44 = vector.shape_cast %43 : vector<1x1x8x384xbf16> to vector<8x384xbf16>
    %c7 = arith.constant 7 : index
    %c0_52 = arith.constant 0 : index
    %c0_53 = arith.constant 0 : index
    %45 = vector.load %arg2[%c7, %c0_52, %c0_53] : memref<49x8x8xbf16, #tpu.memory_space<vmem>>, vector<1x8x8xbf16>
    %46 = vector.shape_cast %45 : vector<1x8x8xbf16> to vector<8x8xbf16>
    %cst_54 = arith.constant dense<0.000000e+00> : vector<8x384xf32>
    %47 = tpu.matmul %46, %44, %cst_54 {dimension_numbers = #tpu.dot_dimension_numbers<[1], [0], [0], [1], [0, 0, 1, 1], [], []>} : vector<8x8xbf16>, vector<8x384xbf16>, vector<8x384xf32> -> vector<8x384xf32>
    %48 = arith.addf %42, %47 : vector<8x384xf32>
    %c0_55 = arith.constant 0 : index
    %c0_56 = arith.constant 0 : index
    %c0_57 = arith.constant 0 : index
    %c23 = arith.constant 23 : index
    %49 = vector.load %arg1[%c0_55, %c0_56, %c0_57, %c23] : memref<1x1x8x522xbf16, #tpu.memory_space<vmem>>, vector<1x1x8x384xbf16>
    %50 = vector.shape_cast %49 : vector<1x1x8x384xbf16> to vector<8x384xbf16>
    %c8 = arith.constant 8 : index
    %c0_58 = arith.constant 0 : index
    %c0_59 = arith.constant 0 : index
    %51 = vector.load %arg2[%c8, %c0_58, %c0_59] : memref<49x8x8xbf16, #tpu.memory_space<vmem>>, vector<1x8x8xbf16>
    %52 = vector.shape_cast %51 : vector<1x8x8xbf16> to vector<8x8xbf16>
    %cst_60 = arith.constant dense<0.000000e+00> : vector<8x384xf32>
    %53 = tpu.matmul %52, %50, %cst_60 {dimension_numbers = #tpu.dot_dimension_numbers<[1], [0], [0], [1], [0, 0, 1, 1], [], []>} : vector<8x8xbf16>, vector<8x384xbf16>, vector<8x384xf32> -> vector<8x384xf32>
    %54 = arith.addf %48, %53 : vector<8x384xf32>
    %c0_61 = arith.constant 0 : index
    %c0_62 = arith.constant 0 : index
    %c0_63 = arith.constant 0 : index
    %c24 = arith.constant 24 : index
    %55 = vector.load %arg1[%c0_61, %c0_62, %c0_63, %c24] : memref<1x1x8x522xbf16, #tpu.memory_space<vmem>>, vector<1x1x8x384xbf16>
    %56 = vector.shape_cast %55 : vector<1x1x8x384xbf16> to vector<8x384xbf16>
    %c9 = arith.constant 9 : index
    %c0_64 = arith.constant 0 : index
    %c0_65 = arith.constant 0 : index
    %57 = vector.load %arg2[%c9, %c0_64, %c0_65] : memref<49x8x8xbf16, #tpu.memory_space<vmem>>, vector<1x8x8xbf16>
    %58 = vector.shape_cast %57 : vector<1x8x8xbf16> to vector<8x8xbf16>
    %cst_66 = arith.constant dense<0.000000e+00> : vector<8x384xf32>
    %59 = tpu.matmul %58, %56, %cst_66 {dimension_numbers = #tpu.dot_dimension_numbers<[1], [0], [0], [1], [0, 0, 1, 1], [], []>} : vector<8x8xbf16>, vector<8x384xbf16>, vector<8x384xf32> -> vector<8x384xf32>
    %60 = arith.addf %54, %59 : vector<8x384xf32>
    %c0_67 = arith.constant 0 : index
    %c0_68 = arith.constant 0 : index
    %c0_69 = arith.constant 0 : index
    %c25 = arith.constant 25 : index
    %61 = vector.load %arg1[%c0_67, %c0_68, %c0_69, %c25] : memref<1x1x8x522xbf16, #tpu.memory_space<vmem>>, vector<1x1x8x384xbf16>
    %62 = vector.shape_cast %61 : vector<1x1x8x384xbf16> to vector<8x384xbf16>
    %c10 = arith.constant 10 : index
    %c0_70 = arith.constant 0 : index
    %c0_71 = arith.constant 0 : index
    %63 = vector.load %arg2[%c10, %c0_70, %c0_71] : memref<49x8x8xbf16, #tpu.memory_space<vmem>>, vector<1x8x8xbf16>
    %64 = vector.shape_cast %63 : vector<1x8x8xbf16> to vector<8x8xbf16>
    %cst_72 = arith.constant dense<0.000000e+00> : vector<8x384xf32>
    %65 = tpu.matmul %64, %62, %cst_72 {dimension_numbers = #tpu.dot_dimension_numbers<[1], [0], [0], [1], [0, 0, 1, 1], [], []>} : vector<8x8xbf16>, vector<8x384xbf16>, vector<8x384xf32> -> vector<8x384xf32>
    %66 = arith.addf %60, %65 : vector<8x384xf32>
    %c0_73 = arith.constant 0 : index
    %c0_74 = arith.constant 0 : index
    %c0_75 = arith.constant 0 : index
    %c26 = arith.constant 26 : index
    %67 = vector.load %arg1[%c0_73, %c0_74, %c0_75, %c26] : memref<1x1x8x522xbf16, #tpu.memory_space<vmem>>, vector<1x1x8x384xbf16>
    %68 = vector.shape_cast %67 : vector<1x1x8x384xbf16> to vector<8x384xbf16>
    %c11 = arith.constant 11 : index
    %c0_76 = arith.constant 0 : index
    %c0_77 = arith.constant 0 : index
    %69 = vector.load %arg2[%c11, %c0_76, %c0_77] : memref<49x8x8xbf16, #tpu.memory_space<vmem>>, vector<1x8x8xbf16>
    %70 = vector.shape_cast %69 : vector<1x8x8xbf16> to vector<8x8xbf16>
    %cst_78 = arith.constant dense<0.000000e+00> : vector<8x384xf32>
    %71 = tpu.matmul %70, %68, %cst_78 {dimension_numbers = #tpu.dot_dimension_numbers<[1], [0], [0], [1], [0, 0, 1, 1], [], []>} : vector<8x8xbf16>, vector<8x384xbf16>, vector<8x384xf32> -> vector<8x384xf32>
    %72 = arith.addf %66, %71 : vector<8x384xf32>
    %c0_79 = arith.constant 0 : index
    %c0_80 = arith.constant 0 : index
    %c0_81 = arith.constant 0 : index
    %c27 = arith.constant 27 : index
    %73 = vector.load %arg1[%c0_79, %c0_80, %c0_81, %c27] : memref<1x1x8x522xbf16, #tpu.memory_space<vmem>>, vector<1x1x8x384xbf16>
    %74 = vector.shape_cast %73 : vector<1x1x8x384xbf16> to vector<8x384xbf16>
    %c12 = arith.constant 12 : index
    %c0_82 = arith.constant 0 : index
    %c0_83 = arith.constant 0 : index
    %75 = vector.load %arg2[%c12, %c0_82, %c0_83] : memref<49x8x8xbf16, #tpu.memory_space<vmem>>, vector<1x8x8xbf16>
    %76 = vector.shape_cast %75 : vector<1x8x8xbf16> to vector<8x8xbf16>
    %cst_84 = arith.constant dense<0.000000e+00> : vector<8x384xf32>
    %77 = tpu.matmul %76, %74, %cst_84 {dimension_numbers = #tpu.dot_dimension_numbers<[1], [0], [0], [1], [0, 0, 1, 1], [], []>} : vector<8x8xbf16>, vector<8x384xbf16>, vector<8x384xf32> -> vector<8x384xf32>
    %78 = arith.addf %72, %77 : vector<8x384xf32>
    %c0_85 = arith.constant 0 : index
    %c0_86 = arith.constant 0 : index
    %c0_87 = arith.constant 0 : index
    %c28 = arith.constant 28 : index
    %79 = vector.load %arg1[%c0_85, %c0_86, %c0_87, %c28] : memref<1x1x8x522xbf16, #tpu.memory_space<vmem>>, vector<1x1x8x384xbf16>
    %80 = vector.shape_cast %79 : vector<1x1x8x384xbf16> to vector<8x384xbf16>
    %c13 = arith.constant 13 : index
    %c0_88 = arith.constant 0 : index
    %c0_89 = arith.constant 0 : index
    %81 = vector.load %arg2[%c13, %c0_88, %c0_89] : memref<49x8x8xbf16, #tpu.memory_space<vmem>>, vector<1x8x8xbf16>
    %82 = vector.shape_cast %81 : vector<1x8x8xbf16> to vector<8x8xbf16>
    %cst_90 = arith.constant dense<0.000000e+00> : vector<8x384xf32>
    %83 = tpu.matmul %82, %80, %cst_90 {dimension_numbers = #tpu.dot_dimension_numbers<[1], [0], [0], [1], [0, 0, 1, 1], [], []>} : vector<8x8xbf16>, vector<8x384xbf16>, vector<8x384xf32> -> vector<8x384xf32>
    %84 = arith.addf %78, %83 : vector<8x384xf32>
    %c0_91 = arith.constant 0 : index
    %c0_92 = arith.constant 0 : index
    %c0_93 = arith.constant 0 : index
    %c44 = arith.constant 44 : index
    %85 = vector.load %arg1[%c0_91, %c0_92, %c0_93, %c44] : memref<1x1x8x522xbf16, #tpu.memory_space<vmem>>, vector<1x1x8x384xbf16>
    %86 = vector.shape_cast %85 : vector<1x1x8x384xbf16> to vector<8x384xbf16>
    %c14 = arith.constant 14 : index
    %c0_94 = arith.constant 0 : index
    %c0_95 = arith.constant 0 : index
    %87 = vector.load %arg2[%c14, %c0_94, %c0_95] : memref<49x8x8xbf16, #tpu.memory_space<vmem>>, vector<1x8x8xbf16>
    %88 = vector.shape_cast %87 : vector<1x8x8xbf16> to vector<8x8xbf16>
    %cst_96 = arith.constant dense<0.000000e+00> : vector<8x384xf32>
    %89 = tpu.matmul %88, %86, %cst_96 {dimension_numbers = #tpu.dot_dimension_numbers<[1], [0], [0], [1], [0, 0, 1, 1], [], []>} : vector<8x8xbf16>, vector<8x384xbf16>, vector<8x384xf32> -> vector<8x384xf32>
    %90 = arith.addf %84, %89 : vector<8x384xf32>
    %c0_97 = arith.constant 0 : index
    %c0_98 = arith.constant 0 : index
    %c0_99 = arith.constant 0 : index
    %c45 = arith.constant 45 : index
    %91 = vector.load %arg1[%c0_97, %c0_98, %c0_99, %c45] : memref<1x1x8x522xbf16, #tpu.memory_space<vmem>>, vector<1x1x8x384xbf16>
    %92 = vector.shape_cast %91 : vector<1x1x8x384xbf16> to vector<8x384xbf16>
    %c15 = arith.constant 15 : index
    %c0_100 = arith.constant 0 : index
    %c0_101 = arith.constant 0 : index
    %93 = vector.load %arg2[%c15, %c0_100, %c0_101] : memref<49x8x8xbf16, #tpu.memory_space<vmem>>, vector<1x8x8xbf16>
    %94 = vector.shape_cast %93 : vector<1x8x8xbf16> to vector<8x8xbf16>
    %cst_102 = arith.constant dense<0.000000e+00> : vector<8x384xf32>
    %95 = tpu.matmul %94, %92, %cst_102 {dimension_numbers = #tpu.dot_dimension_numbers<[1], [0], [0], [1], [0, 0, 1, 1], [], []>} : vector<8x8xbf16>, vector<8x384xbf16>, vector<8x384xf32> -> vector<8x384xf32>
    %96 = arith.addf %90, %95 : vector<8x384xf32>
    %c0_103 = arith.constant 0 : index
    %c0_104 = arith.constant 0 : index
    %c0_105 = arith.constant 0 : index
    %c46 = arith.constant 46 : index
    %97 = vector.load %arg1[%c0_103, %c0_104, %c0_105, %c46] : memref<1x1x8x522xbf16, #tpu.memory_space<vmem>>, vector<1x1x8x384xbf16>
    %98 = vector.shape_cast %97 : vector<1x1x8x384xbf16> to vector<8x384xbf16>
    %c16 = arith.constant 16 : index
    %c0_106 = arith.constant 0 : index
    %c0_107 = arith.constant 0 : index
    %99 = vector.load %arg2[%c16, %c0_106, %c0_107] : memref<49x8x8xbf16, #tpu.memory_space<vmem>>, vector<1x8x8xbf16>
    %100 = vector.shape_cast %99 : vector<1x8x8xbf16> to vector<8x8xbf16>
    %cst_108 = arith.constant dense<0.000000e+00> : vector<8x384xf32>
    %101 = tpu.matmul %100, %98, %cst_108 {dimension_numbers = #tpu.dot_dimension_numbers<[1], [0], [0], [1], [0, 0, 1, 1], [], []>} : vector<8x8xbf16>, vector<8x384xbf16>, vector<8x384xf32> -> vector<8x384xf32>
    %102 = arith.addf %96, %101 : vector<8x384xf32>
    %c0_109 = arith.constant 0 : index
    %c0_110 = arith.constant 0 : index
    %c0_111 = arith.constant 0 : index
    %c47 = arith.constant 47 : index
    %103 = vector.load %arg1[%c0_109, %c0_110, %c0_111, %c47] : memref<1x1x8x522xbf16, #tpu.memory_space<vmem>>, vector<1x1x8x384xbf16>
    %104 = vector.shape_cast %103 : vector<1x1x8x384xbf16> to vector<8x384xbf16>
    %c17 = arith.constant 17 : index
    %c0_112 = arith.constant 0 : index
    %c0_113 = arith.constant 0 : index
    %105 = vector.load %arg2[%c17, %c0_112, %c0_113] : memref<49x8x8xbf16, #tpu.memory_space<vmem>>, vector<1x8x8xbf16>
    %106 = vector.shape_cast %105 : vector<1x8x8xbf16> to vector<8x8xbf16>
    %cst_114 = arith.constant dense<0.000000e+00> : vector<8x384xf32>
    %107 = tpu.matmul %106, %104, %cst_114 {dimension_numbers = #tpu.dot_dimension_numbers<[1], [0], [0], [1], [0, 0, 1, 1], [], []>} : vector<8x8xbf16>, vector<8x384xbf16>, vector<8x384xf32> -> vector<8x384xf32>
    %108 = arith.addf %102, %107 : vector<8x384xf32>
    %c0_115 = arith.constant 0 : index
    %c0_116 = arith.constant 0 : index
    %c0_117 = arith.constant 0 : index
    %c48 = arith.constant 48 : index
    %109 = vector.load %arg1[%c0_115, %c0_116, %c0_117, %c48] : memref<1x1x8x522xbf16, #tpu.memory_space<vmem>>, vector<1x1x8x384xbf16>
    %110 = vector.shape_cast %109 : vector<1x1x8x384xbf16> to vector<8x384xbf16>
    %c18 = arith.constant 18 : index
    %c0_118 = arith.constant 0 : index
    %c0_119 = arith.constant 0 : index
    %111 = vector.load %arg2[%c18, %c0_118, %c0_119] : memref<49x8x8xbf16, #tpu.memory_space<vmem>>, vector<1x8x8xbf16>
    %112 = vector.shape_cast %111 : vector<1x8x8xbf16> to vector<8x8xbf16>
    %cst_120 = arith.constant dense<0.000000e+00> : vector<8x384xf32>
    %113 = tpu.matmul %112, %110, %cst_120 {dimension_numbers = #tpu.dot_dimension_numbers<[1], [0], [0], [1], [0, 0, 1, 1], [], []>} : vector<8x8xbf16>, vector<8x384xbf16>, vector<8x384xf32> -> vector<8x384xf32>
    %114 = arith.addf %108, %113 : vector<8x384xf32>
    %c0_121 = arith.constant 0 : index
    %c0_122 = arith.constant 0 : index
    %c0_123 = arith.constant 0 : index
    %c49 = arith.constant 49 : index
    %115 = vector.load %arg1[%c0_121, %c0_122, %c0_123, %c49] : memref<1x1x8x522xbf16, #tpu.memory_space<vmem>>, vector<1x1x8x384xbf16>
    %116 = vector.shape_cast %115 : vector<1x1x8x384xbf16> to vector<8x384xbf16>
    %c19 = arith.constant 19 : index
    %c0_124 = arith.constant 0 : index
    %c0_125 = arith.constant 0 : index
    %117 = vector.load %arg2[%c19, %c0_124, %c0_125] : memref<49x8x8xbf16, #tpu.memory_space<vmem>>, vector<1x8x8xbf16>
    %118 = vector.shape_cast %117 : vector<1x8x8xbf16> to vector<8x8xbf16>
    %cst_126 = arith.constant dense<0.000000e+00> : vector<8x384xf32>
    %119 = tpu.matmul %118, %116, %cst_126 {dimension_numbers = #tpu.dot_dimension_numbers<[1], [0], [0], [1], [0, 0, 1, 1], [], []>} : vector<8x8xbf16>, vector<8x384xbf16>, vector<8x384xf32> -> vector<8x384xf32>
    %120 = arith.addf %114, %119 : vector<8x384xf32>
    %c0_127 = arith.constant 0 : index
    %c0_128 = arith.constant 0 : index
    %c0_129 = arith.constant 0 : index
    %c50 = arith.constant 50 : index
    %121 = vector.load %arg1[%c0_127, %c0_128, %c0_129, %c50] : memref<1x1x8x522xbf16, #tpu.memory_space<vmem>>, vector<1x1x8x384xbf16>
    %122 = vector.shape_cast %121 : vector<1x1x8x384xbf16> to vector<8x384xbf16>
    %c20 = arith.constant 20 : index
    %c0_130 = arith.constant 0 : index
    %c0_131 = arith.constant 0 : index
    %123 = vector.load %arg2[%c20, %c0_130, %c0_131] : memref<49x8x8xbf16, #tpu.memory_space<vmem>>, vector<1x8x8xbf16>
    %124 = vector.shape_cast %123 : vector<1x8x8xbf16> to vector<8x8xbf16>
    %cst_132 = arith.constant dense<0.000000e+00> : vector<8x384xf32>
    %125 = tpu.matmul %124, %122, %cst_132 {dimension_numbers = #tpu.dot_dimension_numbers<[1], [0], [0], [1], [0, 0, 1, 1], [], []>} : vector<8x8xbf16>, vector<8x384xbf16>, vector<8x384xf32> -> vector<8x384xf32>
    %126 = arith.addf %120, %125 : vector<8x384xf32>
    %c0_133 = arith.constant 0 : index
    %c0_134 = arith.constant 0 : index
    %c0_135 = arith.constant 0 : index
    %c66 = arith.constant 66 : index
    %127 = vector.load %arg1[%c0_133, %c0_134, %c0_135, %c66] : memref<1x1x8x522xbf16, #tpu.memory_space<vmem>>, vector<1x1x8x384xbf16>
    %128 = vector.shape_cast %127 : vector<1x1x8x384xbf16> to vector<8x384xbf16>
    %c21 = arith.constant 21 : index
    %c0_136 = arith.constant 0 : index
    %c0_137 = arith.constant 0 : index
    %129 = vector.load %arg2[%c21, %c0_136, %c0_137] : memref<49x8x8xbf16, #tpu.memory_space<vmem>>, vector<1x8x8xbf16>
    %130 = vector.shape_cast %129 : vector<1x8x8xbf16> to vector<8x8xbf16>
    %cst_138 = arith.constant dense<0.000000e+00> : vector<8x384xf32>
    %131 = tpu.matmul %130, %128, %cst_138 {dimension_numbers = #tpu.dot_dimension_numbers<[1], [0], [0], [1], [0, 0, 1, 1], [], []>} : vector<8x8xbf16>, vector<8x384xbf16>, vector<8x384xf32> -> vector<8x384xf32>
    %132 = arith.addf %126, %131 : vector<8x384xf32>
    %c0_139 = arith.constant 0 : index
    %c0_140 = arith.constant 0 : index
    %c0_141 = arith.constant 0 : index
    %c67 = arith.constant 67 : index
    %133 = vector.load %arg1[%c0_139, %c0_140, %c0_141, %c67] : memref<1x1x8x522xbf16, #tpu.memory_space<vmem>>, vector<1x1x8x384xbf16>
    %134 = vector.shape_cast %133 : vector<1x1x8x384xbf16> to vector<8x384xbf16>
    %c22_142 = arith.constant 22 : index
    %c0_143 = arith.constant 0 : index
    %c0_144 = arith.constant 0 : index
    %135 = vector.load %arg2[%c22_142, %c0_143, %c0_144] : memref<49x8x8xbf16, #tpu.memory_space<vmem>>, vector<1x8x8xbf16>
    %136 = vector.shape_cast %135 : vector<1x8x8xbf16> to vector<8x8xbf16>
    %cst_145 = arith.constant dense<0.000000e+00> : vector<8x384xf32>
    %137 = tpu.matmul %136, %134, %cst_145 {dimension_numbers = #tpu.dot_dimension_numbers<[1], [0], [0], [1], [0, 0, 1, 1], [], []>} : vector<8x8xbf16>, vector<8x384xbf16>, vector<8x384xf32> -> vector<8x384xf32>
    %138 = arith.addf %132, %137 : vector<8x384xf32>
    %c0_146 = arith.constant 0 : index
    %c0_147 = arith.constant 0 : index
    %c0_148 = arith.constant 0 : index
    %c68 = arith.constant 68 : index
    %139 = vector.load %arg1[%c0_146, %c0_147, %c0_148, %c68] : memref<1x1x8x522xbf16, #tpu.memory_space<vmem>>, vector<1x1x8x384xbf16>
    %140 = vector.shape_cast %139 : vector<1x1x8x384xbf16> to vector<8x384xbf16>
    %c23_149 = arith.constant 23 : index
    %c0_150 = arith.constant 0 : index
    %c0_151 = arith.constant 0 : index
    %141 = vector.load %arg2[%c23_149, %c0_150, %c0_151] : memref<49x8x8xbf16, #tpu.memory_space<vmem>>, vector<1x8x8xbf16>
    %142 = vector.shape_cast %141 : vector<1x8x8xbf16> to vector<8x8xbf16>
    %cst_152 = arith.constant dense<0.000000e+00> : vector<8x384xf32>
    %143 = tpu.matmul %142, %140, %cst_152 {dimension_numbers = #tpu.dot_dimension_numbers<[1], [0], [0], [1], [0, 0, 1, 1], [], []>} : vector<8x8xbf16>, vector<8x384xbf16>, vector<8x384xf32> -> vector<8x384xf32>
    %144 = arith.addf %138, %143 : vector<8x384xf32>
    %c0_153 = arith.constant 0 : index
    %c0_154 = arith.constant 0 : index
    %c0_155 = arith.constant 0 : index
    %c69 = arith.constant 69 : index
    %145 = vector.load %arg1[%c0_153, %c0_154, %c0_155, %c69] : memref<1x1x8x522xbf16, #tpu.memory_space<vmem>>, vector<1x1x8x384xbf16>
    %146 = vector.shape_cast %145 : vector<1x1x8x384xbf16> to vector<8x384xbf16>
    %c24_156 = arith.constant 24 : index
    %c0_157 = arith.constant 0 : index
    %c0_158 = arith.constant 0 : index
    %147 = vector.load %arg2[%c24_156, %c0_157, %c0_158] : memref<49x8x8xbf16, #tpu.memory_space<vmem>>, vector<1x8x8xbf16>
    %148 = vector.shape_cast %147 : vector<1x8x8xbf16> to vector<8x8xbf16>
    %cst_159 = arith.constant dense<0.000000e+00> : vector<8x384xf32>
    %149 = tpu.matmul %148, %146, %cst_159 {dimension_numbers = #tpu.dot_dimension_numbers<[1], [0], [0], [1], [0, 0, 1, 1], [], []>} : vector<8x8xbf16>, vector<8x384xbf16>, vector<8x384xf32> -> vector<8x384xf32>
    %150 = arith.addf %144, %149 : vector<8x384xf32>
    %c0_160 = arith.constant 0 : index
    %c0_161 = arith.constant 0 : index
    %c0_162 = arith.constant 0 : index
    %c70 = arith.constant 70 : index
    %151 = vector.load %arg1[%c0_160, %c0_161, %c0_162, %c70] : memref<1x1x8x522xbf16, #tpu.memory_space<vmem>>, vector<1x1x8x384xbf16>
    %152 = vector.shape_cast %151 : vector<1x1x8x384xbf16> to vector<8x384xbf16>
    %c25_163 = arith.constant 25 : index
    %c0_164 = arith.constant 0 : index
    %c0_165 = arith.constant 0 : index
    %153 = vector.load %arg2[%c25_163, %c0_164, %c0_165] : memref<49x8x8xbf16, #tpu.memory_space<vmem>>, vector<1x8x8xbf16>
    %154 = vector.shape_cast %153 : vector<1x8x8xbf16> to vector<8x8xbf16>
    %cst_166 = arith.constant dense<0.000000e+00> : vector<8x384xf32>
    %155 = tpu.matmul %154, %152, %cst_166 {dimension_numbers = #tpu.dot_dimension_numbers<[1], [0], [0], [1], [0, 0, 1, 1], [], []>} : vector<8x8xbf16>, vector<8x384xbf16>, vector<8x384xf32> -> vector<8x384xf32>
    %156 = arith.addf %150, %155 : vector<8x384xf32>
    %c0_167 = arith.constant 0 : index
    %c0_168 = arith.constant 0 : index
    %c0_169 = arith.constant 0 : index
    %c71 = arith.constant 71 : index
    %157 = vector.load %arg1[%c0_167, %c0_168, %c0_169, %c71] : memref<1x1x8x522xbf16, #tpu.memory_space<vmem>>, vector<1x1x8x384xbf16>
    %158 = vector.shape_cast %157 : vector<1x1x8x384xbf16> to vector<8x384xbf16>
    %c26_170 = arith.constant 26 : index
    %c0_171 = arith.constant 0 : index
    %c0_172 = arith.constant 0 : index
    %159 = vector.load %arg2[%c26_170, %c0_171, %c0_172] : memref<49x8x8xbf16, #tpu.memory_space<vmem>>, vector<1x8x8xbf16>
    %160 = vector.shape_cast %159 : vector<1x8x8xbf16> to vector<8x8xbf16>
    %cst_173 = arith.constant dense<0.000000e+00> : vector<8x384xf32>
    %161 = tpu.matmul %160, %158, %cst_173 {dimension_numbers = #tpu.dot_dimension_numbers<[1], [0], [0], [1], [0, 0, 1, 1], [], []>} : vector<8x8xbf16>, vector<8x384xbf16>, vector<8x384xf32> -> vector<8x384xf32>
    %162 = arith.addf %156, %161 : vector<8x384xf32>
    %c0_174 = arith.constant 0 : index
    %c0_175 = arith.constant 0 : index
    %c0_176 = arith.constant 0 : index
    %c72 = arith.constant 72 : index
    %163 = vector.load %arg1[%c0_174, %c0_175, %c0_176, %c72] : memref<1x1x8x522xbf16, #tpu.memory_space<vmem>>, vector<1x1x8x384xbf16>
    %164 = vector.shape_cast %163 : vector<1x1x8x384xbf16> to vector<8x384xbf16>
    %c27_177 = arith.constant 27 : index
    %c0_178 = arith.constant 0 : index
    %c0_179 = arith.constant 0 : index
    %165 = vector.load %arg2[%c27_177, %c0_178, %c0_179] : memref<49x8x8xbf16, #tpu.memory_space<vmem>>, vector<1x8x8xbf16>
    %166 = vector.shape_cast %165 : vector<1x8x8xbf16> to vector<8x8xbf16>
    %cst_180 = arith.constant dense<0.000000e+00> : vector<8x384xf32>
    %167 = tpu.matmul %166, %164, %cst_180 {dimension_numbers = #tpu.dot_dimension_numbers<[1], [0], [0], [1], [0, 0, 1, 1], [], []>} : vector<8x8xbf16>, vector<8x384xbf16>, vector<8x384xf32> -> vector<8x384xf32>
    %168 = arith.addf %162, %167 : vector<8x384xf32>
    %c0_181 = arith.constant 0 : index
    %c0_182 = arith.constant 0 : index
    %c0_183 = arith.constant 0 : index
    %c88 = arith.constant 88 : index
    %169 = vector.load %arg1[%c0_181, %c0_182, %c0_183, %c88] : memref<1x1x8x522xbf16, #tpu.memory_space<vmem>>, vector<1x1x8x384xbf16>
    %170 = vector.shape_cast %169 : vector<1x1x8x384xbf16> to vector<8x384xbf16>
    %c28_184 = arith.constant 28 : index
    %c0_185 = arith.constant 0 : index
    %c0_186 = arith.constant 0 : index
    %171 = vector.load %arg2[%c28_184, %c0_185, %c0_186] : memref<49x8x8xbf16, #tpu.memory_space<vmem>>, vector<1x8x8xbf16>
    %172 = vector.shape_cast %171 : vector<1x8x8xbf16> to vector<8x8xbf16>
    %cst_187 = arith.constant dense<0.000000e+00> : vector<8x384xf32>
    %173 = tpu.matmul %172, %170, %cst_187 {dimension_numbers = #tpu.dot_dimension_numbers<[1], [0], [0], [1], [0, 0, 1, 1], [], []>} : vector<8x8xbf16>, vector<8x384xbf16>, vector<8x384xf32> -> vector<8x384xf32>
    %174 = arith.addf %168, %173 : vector<8x384xf32>
    %c0_188 = arith.constant 0 : index
    %c0_189 = arith.constant 0 : index
    %c0_190 = arith.constant 0 : index
    %c89 = arith.constant 89 : index
    %175 = vector.load %arg1[%c0_188, %c0_189, %c0_190, %c89] : memref<1x1x8x522xbf16, #tpu.memory_space<vmem>>, vector<1x1x8x384xbf16>
    %176 = vector.shape_cast %175 : vector<1x1x8x384xbf16> to vector<8x384xbf16>
    %c29 = arith.constant 29 : index
    %c0_191 = arith.constant 0 : index
    %c0_192 = arith.constant 0 : index
    %177 = vector.load %arg2[%c29, %c0_191, %c0_192] : memref<49x8x8xbf16, #tpu.memory_space<vmem>>, vector<1x8x8xbf16>
    %178 = vector.shape_cast %177 : vector<1x8x8xbf16> to vector<8x8xbf16>
    %cst_193 = arith.constant dense<0.000000e+00> : vector<8x384xf32>
    %179 = tpu.matmul %178, %176, %cst_193 {dimension_numbers = #tpu.dot_dimension_numbers<[1], [0], [0], [1], [0, 0, 1, 1], [], []>} : vector<8x8xbf16>, vector<8x384xbf16>, vector<8x384xf32> -> vector<8x384xf32>
    %180 = arith.addf %174, %179 : vector<8x384xf32>
    %c0_194 = arith.constant 0 : index
    %c0_195 = arith.constant 0 : index
    %c0_196 = arith.constant 0 : index
    %c90 = arith.constant 90 : index
    %181 = vector.load %arg1[%c0_194, %c0_195, %c0_196, %c90] : memref<1x1x8x522xbf16, #tpu.memory_space<vmem>>, vector<1x1x8x384xbf16>
    %182 = vector.shape_cast %181 : vector<1x1x8x384xbf16> to vector<8x384xbf16>
    %c30 = arith.constant 30 : index
    %c0_197 = arith.constant 0 : index
    %c0_198 = arith.constant 0 : index
    %183 = vector.load %arg2[%c30, %c0_197, %c0_198] : memref<49x8x8xbf16, #tpu.memory_space<vmem>>, vector<1x8x8xbf16>
    %184 = vector.shape_cast %183 : vector<1x8x8xbf16> to vector<8x8xbf16>
    %cst_199 = arith.constant dense<0.000000e+00> : vector<8x384xf32>
    %185 = tpu.matmul %184, %182, %cst_199 {dimension_numbers = #tpu.dot_dimension_numbers<[1], [0], [0], [1], [0, 0, 1, 1], [], []>} : vector<8x8xbf16>, vector<8x384xbf16>, vector<8x384xf32> -> vector<8x384xf32>
    %186 = arith.addf %180, %185 : vector<8x384xf32>
    %c0_200 = arith.constant 0 : index
    %c0_201 = arith.constant 0 : index
    %c0_202 = arith.constant 0 : index
    %c91 = arith.constant 91 : index
    %187 = vector.load %arg1[%c0_200, %c0_201, %c0_202, %c91] : memref<1x1x8x522xbf16, #tpu.memory_space<vmem>>, vector<1x1x8x384xbf16>
    %188 = vector.shape_cast %187 : vector<1x1x8x384xbf16> to vector<8x384xbf16>
    %c31 = arith.constant 31 : index
    %c0_203 = arith.constant 0 : index
    %c0_204 = arith.constant 0 : index
    %189 = vector.load %arg2[%c31, %c0_203, %c0_204] : memref<49x8x8xbf16, #tpu.memory_space<vmem>>, vector<1x8x8xbf16>
    %190 = vector.shape_cast %189 : vector<1x8x8xbf16> to vector<8x8xbf16>
    %cst_205 = arith.constant dense<0.000000e+00> : vector<8x384xf32>
    %191 = tpu.matmul %190, %188, %cst_205 {dimension_numbers = #tpu.dot_dimension_numbers<[1], [0], [0], [1], [0, 0, 1, 1], [], []>} : vector<8x8xbf16>, vector<8x384xbf16>, vector<8x384xf32> -> vector<8x384xf32>
    %192 = arith.addf %186, %191 : vector<8x384xf32>
    %c0_206 = arith.constant 0 : index
    %c0_207 = arith.constant 0 : index
    %c0_208 = arith.constant 0 : index
    %c92 = arith.constant 92 : index
    %193 = vector.load %arg1[%c0_206, %c0_207, %c0_208, %c92] : memref<1x1x8x522xbf16, #tpu.memory_space<vmem>>, vector<1x1x8x384xbf16>
    %194 = vector.shape_cast %193 : vector<1x1x8x384xbf16> to vector<8x384xbf16>
    %c32 = arith.constant 32 : index
    %c0_209 = arith.constant 0 : index
    %c0_210 = arith.constant 0 : index
    %195 = vector.load %arg2[%c32, %c0_209, %c0_210] : memref<49x8x8xbf16, #tpu.memory_space<vmem>>, vector<1x8x8xbf16>
    %196 = vector.shape_cast %195 : vector<1x8x8xbf16> to vector<8x8xbf16>
    %cst_211 = arith.constant dense<0.000000e+00> : vector<8x384xf32>
    %197 = tpu.matmul %196, %194, %cst_211 {dimension_numbers = #tpu.dot_dimension_numbers<[1], [0], [0], [1], [0, 0, 1, 1], [], []>} : vector<8x8xbf16>, vector<8x384xbf16>, vector<8x384xf32> -> vector<8x384xf32>
    %198 = arith.addf %192, %197 : vector<8x384xf32>
    %c0_212 = arith.constant 0 : index
    %c0_213 = arith.constant 0 : index
    %c0_214 = arith.constant 0 : index
    %c93 = arith.constant 93 : index
    %199 = vector.load %arg1[%c0_212, %c0_213, %c0_214, %c93] : memref<1x1x8x522xbf16, #tpu.memory_space<vmem>>, vector<1x1x8x384xbf16>
    %200 = vector.shape_cast %199 : vector<1x1x8x384xbf16> to vector<8x384xbf16>
    %c33 = arith.constant 33 : index
    %c0_215 = arith.constant 0 : index
    %c0_216 = arith.constant 0 : index
    %201 = vector.load %arg2[%c33, %c0_215, %c0_216] : memref<49x8x8xbf16, #tpu.memory_space<vmem>>, vector<1x8x8xbf16>
    %202 = vector.shape_cast %201 : vector<1x8x8xbf16> to vector<8x8xbf16>
    %cst_217 = arith.constant dense<0.000000e+00> : vector<8x384xf32>
    %203 = tpu.matmul %202, %200, %cst_217 {dimension_numbers = #tpu.dot_dimension_numbers<[1], [0], [0], [1], [0, 0, 1, 1], [], []>} : vector<8x8xbf16>, vector<8x384xbf16>, vector<8x384xf32> -> vector<8x384xf32>
    %204 = arith.addf %198, %203 : vector<8x384xf32>
    %c0_218 = arith.constant 0 : index
    %c0_219 = arith.constant 0 : index
    %c0_220 = arith.constant 0 : index
    %c94 = arith.constant 94 : index
    %205 = vector.load %arg1[%c0_218, %c0_219, %c0_220, %c94] : memref<1x1x8x522xbf16, #tpu.memory_space<vmem>>, vector<1x1x8x384xbf16>
    %206 = vector.shape_cast %205 : vector<1x1x8x384xbf16> to vector<8x384xbf16>
    %c34 = arith.constant 34 : index
    %c0_221 = arith.constant 0 : index
    %c0_222 = arith.constant 0 : index
    %207 = vector.load %arg2[%c34, %c0_221, %c0_222] : memref<49x8x8xbf16, #tpu.memory_space<vmem>>, vector<1x8x8xbf16>
    %208 = vector.shape_cast %207 : vector<1x8x8xbf16> to vector<8x8xbf16>
    %cst_223 = arith.constant dense<0.000000e+00> : vector<8x384xf32>
    %209 = tpu.matmul %208, %206, %cst_223 {dimension_numbers = #tpu.dot_dimension_numbers<[1], [0], [0], [1], [0, 0, 1, 1], [], []>} : vector<8x8xbf16>, vector<8x384xbf16>, vector<8x384xf32> -> vector<8x384xf32>
    %210 = arith.addf %204, %209 : vector<8x384xf32>
    %c0_224 = arith.constant 0 : index
    %c0_225 = arith.constant 0 : index
    %c0_226 = arith.constant 0 : index
    %c110 = arith.constant 110 : index
    %211 = vector.load %arg1[%c0_224, %c0_225, %c0_226, %c110] : memref<1x1x8x522xbf16, #tpu.memory_space<vmem>>, vector<1x1x8x384xbf16>
    %212 = vector.shape_cast %211 : vector<1x1x8x384xbf16> to vector<8x384xbf16>
    %c35 = arith.constant 35 : index
    %c0_227 = arith.constant 0 : index
    %c0_228 = arith.constant 0 : index
    %213 = vector.load %arg2[%c35, %c0_227, %c0_228] : memref<49x8x8xbf16, #tpu.memory_space<vmem>>, vector<1x8x8xbf16>
    %214 = vector.shape_cast %213 : vector<1x8x8xbf16> to vector<8x8xbf16>
    %cst_229 = arith.constant dense<0.000000e+00> : vector<8x384xf32>
    %215 = tpu.matmul %214, %212, %cst_229 {dimension_numbers = #tpu.dot_dimension_numbers<[1], [0], [0], [1], [0, 0, 1, 1], [], []>} : vector<8x8xbf16>, vector<8x384xbf16>, vector<8x384xf32> -> vector<8x384xf32>
    %216 = arith.addf %210, %215 : vector<8x384xf32>
    %c0_230 = arith.constant 0 : index
    %c0_231 = arith.constant 0 : index
    %c0_232 = arith.constant 0 : index
    %c111 = arith.constant 111 : index
    %217 = vector.load %arg1[%c0_230, %c0_231, %c0_232, %c111] : memref<1x1x8x522xbf16, #tpu.memory_space<vmem>>, vector<1x1x8x384xbf16>
    %218 = vector.shape_cast %217 : vector<1x1x8x384xbf16> to vector<8x384xbf16>
    %c36 = arith.constant 36 : index
    %c0_233 = arith.constant 0 : index
    %c0_234 = arith.constant 0 : index
    %219 = vector.load %arg2[%c36, %c0_233, %c0_234] : memref<49x8x8xbf16, #tpu.memory_space<vmem>>, vector<1x8x8xbf16>
    %220 = vector.shape_cast %219 : vector<1x8x8xbf16> to vector<8x8xbf16>
    %cst_235 = arith.constant dense<0.000000e+00> : vector<8x384xf32>
    %221 = tpu.matmul %220, %218, %cst_235 {dimension_numbers = #tpu.dot_dimension_numbers<[1], [0], [0], [1], [0, 0, 1, 1], [], []>} : vector<8x8xbf16>, vector<8x384xbf16>, vector<8x384xf32> -> vector<8x384xf32>
    %222 = arith.addf %216, %221 : vector<8x384xf32>
    %c0_236 = arith.constant 0 : index
    %c0_237 = arith.constant 0 : index
    %c0_238 = arith.constant 0 : index
    %c112 = arith.constant 112 : index
    %223 = vector.load %arg1[%c0_236, %c0_237, %c0_238, %c112] : memref<1x1x8x522xbf16, #tpu.memory_space<vmem>>, vector<1x1x8x384xbf16>
    %224 = vector.shape_cast %223 : vector<1x1x8x384xbf16> to vector<8x384xbf16>
    %c37 = arith.constant 37 : index
    %c0_239 = arith.constant 0 : index
    %c0_240 = arith.constant 0 : index
    %225 = vector.load %arg2[%c37, %c0_239, %c0_240] : memref<49x8x8xbf16, #tpu.memory_space<vmem>>, vector<1x8x8xbf16>
    %226 = vector.shape_cast %225 : vector<1x8x8xbf16> to vector<8x8xbf16>
    %cst_241 = arith.constant dense<0.000000e+00> : vector<8x384xf32>
    %227 = tpu.matmul %226, %224, %cst_241 {dimension_numbers = #tpu.dot_dimension_numbers<[1], [0], [0], [1], [0, 0, 1, 1], [], []>} : vector<8x8xbf16>, vector<8x384xbf16>, vector<8x384xf32> -> vector<8x384xf32>
    %228 = arith.addf %222, %227 : vector<8x384xf32>
    %c0_242 = arith.constant 0 : index
    %c0_243 = arith.constant 0 : index
    %c0_244 = arith.constant 0 : index
    %c113 = arith.constant 113 : index
    %229 = vector.load %arg1[%c0_242, %c0_243, %c0_244, %c113] : memref<1x1x8x522xbf16, #tpu.memory_space<vmem>>, vector<1x1x8x384xbf16>
    %230 = vector.shape_cast %229 : vector<1x1x8x384xbf16> to vector<8x384xbf16>
    %c38 = arith.constant 38 : index
    %c0_245 = arith.constant 0 : index
    %c0_246 = arith.constant 0 : index
    %231 = vector.load %arg2[%c38, %c0_245, %c0_246] : memref<49x8x8xbf16, #tpu.memory_space<vmem>>, vector<1x8x8xbf16>
    %232 = vector.shape_cast %231 : vector<1x8x8xbf16> to vector<8x8xbf16>
    %cst_247 = arith.constant dense<0.000000e+00> : vector<8x384xf32>
    %233 = tpu.matmul %232, %230, %cst_247 {dimension_numbers = #tpu.dot_dimension_numbers<[1], [0], [0], [1], [0, 0, 1, 1], [], []>} : vector<8x8xbf16>, vector<8x384xbf16>, vector<8x384xf32> -> vector<8x384xf32>
    %234 = arith.addf %228, %233 : vector<8x384xf32>
    %c0_248 = arith.constant 0 : index
    %c0_249 = arith.constant 0 : index
    %c0_250 = arith.constant 0 : index
    %c114 = arith.constant 114 : index
    %235 = vector.load %arg1[%c0_248, %c0_249, %c0_250, %c114] : memref<1x1x8x522xbf16, #tpu.memory_space<vmem>>, vector<1x1x8x384xbf16>
    %236 = vector.shape_cast %235 : vector<1x1x8x384xbf16> to vector<8x384xbf16>
    %c39 = arith.constant 39 : index
    %c0_251 = arith.constant 0 : index
    %c0_252 = arith.constant 0 : index
    %237 = vector.load %arg2[%c39, %c0_251, %c0_252] : memref<49x8x8xbf16, #tpu.memory_space<vmem>>, vector<1x8x8xbf16>
    %238 = vector.shape_cast %237 : vector<1x8x8xbf16> to vector<8x8xbf16>
    %cst_253 = arith.constant dense<0.000000e+00> : vector<8x384xf32>
    %239 = tpu.matmul %238, %236, %cst_253 {dimension_numbers = #tpu.dot_dimension_numbers<[1], [0], [0], [1], [0, 0, 1, 1], [], []>} : vector<8x8xbf16>, vector<8x384xbf16>, vector<8x384xf32> -> vector<8x384xf32>
    %240 = arith.addf %234, %239 : vector<8x384xf32>
    %c0_254 = arith.constant 0 : index
    %c0_255 = arith.constant 0 : index
    %c0_256 = arith.constant 0 : index
    %c115 = arith.constant 115 : index
    %241 = vector.load %arg1[%c0_254, %c0_255, %c0_256, %c115] : memref<1x1x8x522xbf16, #tpu.memory_space<vmem>>, vector<1x1x8x384xbf16>
    %242 = vector.shape_cast %241 : vector<1x1x8x384xbf16> to vector<8x384xbf16>
    %c40 = arith.constant 40 : index
    %c0_257 = arith.constant 0 : index
    %c0_258 = arith.constant 0 : index
    %243 = vector.load %arg2[%c40, %c0_257, %c0_258] : memref<49x8x8xbf16, #tpu.memory_space<vmem>>, vector<1x8x8xbf16>
    %244 = vector.shape_cast %243 : vector<1x8x8xbf16> to vector<8x8xbf16>
    %cst_259 = arith.constant dense<0.000000e+00> : vector<8x384xf32>
    %245 = tpu.matmul %244, %242, %cst_259 {dimension_numbers = #tpu.dot_dimension_numbers<[1], [0], [0], [1], [0, 0, 1, 1], [], []>} : vector<8x8xbf16>, vector<8x384xbf16>, vector<8x384xf32> -> vector<8x384xf32>
    %246 = arith.addf %240, %245 : vector<8x384xf32>
    %c0_260 = arith.constant 0 : index
    %c0_261 = arith.constant 0 : index
    %c0_262 = arith.constant 0 : index
    %c116 = arith.constant 116 : index
    %247 = vector.load %arg1[%c0_260, %c0_261, %c0_262, %c116] : memref<1x1x8x522xbf16, #tpu.memory_space<vmem>>, vector<1x1x8x384xbf16>
    %248 = vector.shape_cast %247 : vector<1x1x8x384xbf16> to vector<8x384xbf16>
    %c41 = arith.constant 41 : index
    %c0_263 = arith.constant 0 : index
    %c0_264 = arith.constant 0 : index
    %249 = vector.load %arg2[%c41, %c0_263, %c0_264] : memref<49x8x8xbf16, #tpu.memory_space<vmem>>, vector<1x8x8xbf16>
    %250 = vector.shape_cast %249 : vector<1x8x8xbf16> to vector<8x8xbf16>
    %cst_265 = arith.constant dense<0.000000e+00> : vector<8x384xf32>
    %251 = tpu.matmul %250, %248, %cst_265 {dimension_numbers = #tpu.dot_dimension_numbers<[1], [0], [0], [1], [0, 0, 1, 1], [], []>} : vector<8x8xbf16>, vector<8x384xbf16>, vector<8x384xf32> -> vector<8x384xf32>
    %252 = arith.addf %246, %251 : vector<8x384xf32>
    %c0_266 = arith.constant 0 : index
    %c0_267 = arith.constant 0 : index
    %c0_268 = arith.constant 0 : index
    %c132 = arith.constant 132 : index
    %253 = vector.load %arg1[%c0_266, %c0_267, %c0_268, %c132] : memref<1x1x8x522xbf16, #tpu.memory_space<vmem>>, vector<1x1x8x384xbf16>
    %254 = vector.shape_cast %253 : vector<1x1x8x384xbf16> to vector<8x384xbf16>
    %c42 = arith.constant 42 : index
    %c0_269 = arith.constant 0 : index
    %c0_270 = arith.constant 0 : index
    %255 = vector.load %arg2[%c42, %c0_269, %c0_270] : memref<49x8x8xbf16, #tpu.memory_space<vmem>>, vector<1x8x8xbf16>
    %256 = vector.shape_cast %255 : vector<1x8x8xbf16> to vector<8x8xbf16>
    %cst_271 = arith.constant dense<0.000000e+00> : vector<8x384xf32>
    %257 = tpu.matmul %256, %254, %cst_271 {dimension_numbers = #tpu.dot_dimension_numbers<[1], [0], [0], [1], [0, 0, 1, 1], [], []>} : vector<8x8xbf16>, vector<8x384xbf16>, vector<8x384xf32> -> vector<8x384xf32>
    %258 = arith.addf %252, %257 : vector<8x384xf32>
    %c0_272 = arith.constant 0 : index
    %c0_273 = arith.constant 0 : index
    %c0_274 = arith.constant 0 : index
    %c133 = arith.constant 133 : index
    %259 = vector.load %arg1[%c0_272, %c0_273, %c0_274, %c133] : memref<1x1x8x522xbf16, #tpu.memory_space<vmem>>, vector<1x1x8x384xbf16>
    %260 = vector.shape_cast %259 : vector<1x1x8x384xbf16> to vector<8x384xbf16>
    %c43 = arith.constant 43 : index
    %c0_275 = arith.constant 0 : index
    %c0_276 = arith.constant 0 : index
    %261 = vector.load %arg2[%c43, %c0_275, %c0_276] : memref<49x8x8xbf16, #tpu.memory_space<vmem>>, vector<1x8x8xbf16>
    %262 = vector.shape_cast %261 : vector<1x8x8xbf16> to vector<8x8xbf16>
    %cst_277 = arith.constant dense<0.000000e+00> : vector<8x384xf32>
    %263 = tpu.matmul %262, %260, %cst_277 {dimension_numbers = #tpu.dot_dimension_numbers<[1], [0], [0], [1], [0, 0, 1, 1], [], []>} : vector<8x8xbf16>, vector<8x384xbf16>, vector<8x384xf32> -> vector<8x384xf32>
    %264 = arith.addf %258, %263 : vector<8x384xf32>
    %c0_278 = arith.constant 0 : index
    %c0_279 = arith.constant 0 : index
    %c0_280 = arith.constant 0 : index
    %c134 = arith.constant 134 : index
    %265 = vector.load %arg1[%c0_278, %c0_279, %c0_280, %c134] : memref<1x1x8x522xbf16, #tpu.memory_space<vmem>>, vector<1x1x8x384xbf16>
    %266 = vector.shape_cast %265 : vector<1x1x8x384xbf16> to vector<8x384xbf16>
    %c44_281 = arith.constant 44 : index
    %c0_282 = arith.constant 0 : index
    %c0_283 = arith.constant 0 : index
    %267 = vector.load %arg2[%c44_281, %c0_282, %c0_283] : memref<49x8x8xbf16, #tpu.memory_space<vmem>>, vector<1x8x8xbf16>
    %268 = vector.shape_cast %267 : vector<1x8x8xbf16> to vector<8x8xbf16>
    %cst_284 = arith.constant dense<0.000000e+00> : vector<8x384xf32>
    %269 = tpu.matmul %268, %266, %cst_284 {dimension_numbers = #tpu.dot_dimension_numbers<[1], [0], [0], [1], [0, 0, 1, 1], [], []>} : vector<8x8xbf16>, vector<8x384xbf16>, vector<8x384xf32> -> vector<8x384xf32>
    %270 = arith.addf %264, %269 : vector<8x384xf32>
    %c0_285 = arith.constant 0 : index
    %c0_286 = arith.constant 0 : index
    %c0_287 = arith.constant 0 : index
    %c135 = arith.constant 135 : index
    %271 = vector.load %arg1[%c0_285, %c0_286, %c0_287, %c135] : memref<1x1x8x522xbf16, #tpu.memory_space<vmem>>, vector<1x1x8x384xbf16>
    %272 = vector.shape_cast %271 : vector<1x1x8x384xbf16> to vector<8x384xbf16>
    %c45_288 = arith.constant 45 : index
    %c0_289 = arith.constant 0 : index
    %c0_290 = arith.constant 0 : index
    %273 = vector.load %arg2[%c45_288, %c0_289, %c0_290] : memref<49x8x8xbf16, #tpu.memory_space<vmem>>, vector<1x8x8xbf16>
    %274 = vector.shape_cast %273 : vector<1x8x8xbf16> to vector<8x8xbf16>
    %cst_291 = arith.constant dense<0.000000e+00> : vector<8x384xf32>
    %275 = tpu.matmul %274, %272, %cst_291 {dimension_numbers = #tpu.dot_dimension_numbers<[1], [0], [0], [1], [0, 0, 1, 1], [], []>} : vector<8x8xbf16>, vector<8x384xbf16>, vector<8x384xf32> -> vector<8x384xf32>
    %276 = arith.addf %270, %275 : vector<8x384xf32>
    %c0_292 = arith.constant 0 : index
    %c0_293 = arith.constant 0 : index
    %c0_294 = arith.constant 0 : index
    %c136 = arith.constant 136 : index
    %277 = vector.load %arg1[%c0_292, %c0_293, %c0_294, %c136] : memref<1x1x8x522xbf16, #tpu.memory_space<vmem>>, vector<1x1x8x384xbf16>
    %278 = vector.shape_cast %277 : vector<1x1x8x384xbf16> to vector<8x384xbf16>
    %c46_295 = arith.constant 46 : index
    %c0_296 = arith.constant 0 : index
    %c0_297 = arith.constant 0 : index
    %279 = vector.load %arg2[%c46_295, %c0_296, %c0_297] : memref<49x8x8xbf16, #tpu.memory_space<vmem>>, vector<1x8x8xbf16>
    %280 = vector.shape_cast %279 : vector<1x8x8xbf16> to vector<8x8xbf16>
    %cst_298 = arith.constant dense<0.000000e+00> : vector<8x384xf32>
    %281 = tpu.matmul %280, %278, %cst_298 {dimension_numbers = #tpu.dot_dimension_numbers<[1], [0], [0], [1], [0, 0, 1, 1], [], []>} : vector<8x8xbf16>, vector<8x384xbf16>, vector<8x384xf32> -> vector<8x384xf32>
    %282 = arith.addf %276, %281 : vector<8x384xf32>
    %c0_299 = arith.constant 0 : index
    %c0_300 = arith.constant 0 : index
    %c0_301 = arith.constant 0 : index
    %c137 = arith.constant 137 : index
    %283 = vector.load %arg1[%c0_299, %c0_300, %c0_301, %c137] : memref<1x1x8x522xbf16, #tpu.memory_space<vmem>>, vector<1x1x8x384xbf16>
    %284 = vector.shape_cast %283 : vector<1x1x8x384xbf16> to vector<8x384xbf16>
    %c47_302 = arith.constant 47 : index
    %c0_303 = arith.constant 0 : index
    %c0_304 = arith.constant 0 : index
    %285 = vector.load %arg2[%c47_302, %c0_303, %c0_304] : memref<49x8x8xbf16, #tpu.memory_space<vmem>>, vector<1x8x8xbf16>
    %286 = vector.shape_cast %285 : vector<1x8x8xbf16> to vector<8x8xbf16>
    %cst_305 = arith.constant dense<0.000000e+00> : vector<8x384xf32>
    %287 = tpu.matmul %286, %284, %cst_305 {dimension_numbers = #tpu.dot_dimension_numbers<[1], [0], [0], [1], [0, 0, 1, 1], [], []>} : vector<8x8xbf16>, vector<8x384xbf16>, vector<8x384xf32> -> vector<8x384xf32>
    %288 = arith.addf %282, %287 : vector<8x384xf32>
    %c0_306 = arith.constant 0 : index
    %c0_307 = arith.constant 0 : index
    %c0_308 = arith.constant 0 : index
    %c138 = arith.constant 138 : index
    %289 = vector.load %arg1[%c0_306, %c0_307, %c0_308, %c138] : memref<1x1x8x522xbf16, #tpu.memory_space<vmem>>, vector<1x1x8x384xbf16>
    %290 = vector.shape_cast %289 : vector<1x1x8x384xbf16> to vector<8x384xbf16>
    %c48_309 = arith.constant 48 : index
    %c0_310 = arith.constant 0 : index
    %c0_311 = arith.constant 0 : index
    %291 = vector.load %arg2[%c48_309, %c0_310, %c0_311] : memref<49x8x8xbf16, #tpu.memory_space<vmem>>, vector<1x8x8xbf16>
    %292 = vector.shape_cast %291 : vector<1x8x8xbf16> to vector<8x8xbf16>
    %cst_312 = arith.constant dense<0.000000e+00> : vector<8x384xf32>
    %293 = tpu.matmul %292, %290, %cst_312 {dimension_numbers = #tpu.dot_dimension_numbers<[1], [0], [0], [1], [0, 0, 1, 1], [], []>} : vector<8x8xbf16>, vector<8x384xbf16>, vector<8x384xf32> -> vector<8x384xf32>
    %294 = arith.addf %288, %293 : vector<8x384xf32>
    %c0_313 = arith.constant 0 : index
    %c0_314 = arith.constant 0 : index
    %295 = vector.load %arg3[%c0_313, %c0_314] : memref<1x384xf32, #tpu.memory_space<vmem>>, vector<1x384xf32>
    %296 = vector.broadcast %295 : vector<1x384xf32> to vector<8x384xf32>
    %297 = arith.mulf %294, %296 : vector<8x384xf32>
    %cst_315 = arith.constant dense<0.000000e+00> : vector<8xf32>
    %298 = vector.multi_reduction <add>, %297, %cst_315 [1] : vector<8x384xf32> to vector<8xf32>
    %299 = vector.shape_cast %298 : vector<8xf32> to vector<8x1xf32>
    %cst_316 = arith.constant 3.906250e-03 : f32
    %300 = vector.broadcast %cst_316 : f32 to vector<8x1xf32>
    %301 = arith.mulf %299, %300 : vector<8x1xf32>
    %302 = vector.broadcast %301 : vector<8x1xf32> to vector<8x384xf32>
    %303 = arith.subf %294, %302 : vector<8x384xf32>
    %304 = vector.broadcast %295 : vector<1x384xf32> to vector<8x384xf32>
    %305 = arith.mulf %303, %304 : vector<8x384xf32>
    %306 = arith.mulf %305, %305 : vector<8x384xf32>
    %cst_317 = arith.constant dense<0.000000e+00> : vector<8xf32>
    %307 = vector.multi_reduction <add>, %306, %cst_317 [1] : vector<8x384xf32> to vector<8xf32>
    %308 = vector.shape_cast %307 : vector<8xf32> to vector<8x1xf32>
    %cst_318 = arith.constant 3.906250e-03 : f32
    %309 = vector.broadcast %cst_318 : f32 to vector<8x1xf32>
    %310 = arith.mulf %308, %309 : vector<8x1xf32>
    %311 = vector.broadcast %301 : vector<8x1xf32> to vector<8x384xf32>
    %312 = arith.subf %294, %311 : vector<8x384xf32>
    %cst_319 = arith.constant 9.99999974E-6 : f32
    %313 = vector.broadcast %cst_319 : f32 to vector<8x1xf32>
    %314 = arith.addf %310, %313 : vector<8x1xf32>
    %315 = math.rsqrt %314 : vector<8x1xf32>
    %316 = vector.broadcast %315 : vector<8x1xf32> to vector<8x384xf32>
    %317 = arith.mulf %312, %316 : vector<8x384xf32>
    %cst_320 = arith.constant 0.000000e+00 : f32
    %318 = vector.broadcast %cst_320 : f32 to vector<8x384xf32>
    %319 = arith.cmpf ogt, %317, %318 : vector<8x384xf32>
    %cst_321 = arith.constant 2.000000e-01 : f32
    %320 = vector.broadcast %cst_321 : f32 to vector<8x384xf32>
    %321 = arith.mulf %320, %317 : vector<8x384xf32>
    %322 = arith.select %319, %317, %321 : vector<8x384xi1>, vector<8x384xf32>
    %c0_322 = arith.constant 0 : index
    %c0_323 = arith.constant 0 : index
    %c0_324 = arith.constant 0 : index
    %323 = vector.load %arg4[%c0_322, %c0_323, %c0_324] : memref<1x8x384xf32, #tpu.memory_space<vmem>>, vector<1x8x384xf32>
    %324 = vector.shape_cast %323 : vector<1x8x384xf32> to vector<8x384xf32>
    %325 = vector.shape_cast %322 : vector<8x384xf32> to vector<1x8x384xf32>
    tpu.vector_store %arg4[%c0_322, %c0_323, %c0_324], %325 {strides = array<i32>} : memref<1x8x384xf32, #tpu.memory_space<vmem>>, vector<1x8x384xf32>,
    return
  }
  func.func @transform_0(%arg0: i32) -> (i32, i32, i32, i32) {
    %c0_i32 = arith.constant 0 : i32
    %c0_i32_0 = arith.constant 0 : i32
    %c0_i32_1 = arith.constant 0 : i32
    %c0_i32_2 = arith.constant 0 : i32
    return %arg0, %c0_i32, %c0_i32_0, %c0_i32_1 : i32, i32, i32, i32
  }
  func.func @transform_1(%arg0: i32) -> (i32, i32, i32) {
    %c0_i32 = arith.constant 0 : i32
    %c0_i32_0 = arith.constant 0 : i32
    %c0_i32_1 = arith.constant 0 : i32
    %c0_i32_2 = arith.constant 0 : i32
    return %c0_i32, %c0_i32_0, %c0_i32_1 : i32, i32, i32
  }
  func.func @transform_2(%arg0: i32) -> (i32, i32) {
    %c0_i32 = arith.constant 0 : i32
    %c0_i32_0 = arith.constant 0 : i32
    %c0_i32_1 = arith.constant 0 : i32
    return %c0_i32, %c0_i32_0 : i32, i32
  }
  func.func @transform_3(%arg0: i32) -> (i32, i32, i32) {
    %c0_i32 = arith.constant 0 : i32
    %c0_i32_0 = arith.constant 0 : i32
    %c0_i32_1 = arith.constant 0 : i32
    return %arg0, %c0_i32, %c0_i32_0 : i32, i32, i32
  }
}

module attributes {stable_mosaic.version = 11 : i64} {
  func.func @_fused_conv_kernel(%arg0: i32, %arg1: memref<1x4x8x138xbf16, #tpu.memory_space<vmem>>, %arg2: memref<9x16x8xbf16, #tpu.memory_space<vmem>>, %arg3: memref<1x128xf32, #tpu.memory_space<vmem>>, %arg4: memref<1x16x128xf32, #tpu.memory_space<vmem>>) attributes {dimension_semantics = [#tpu.dimension_semantics<parallel>], iteration_bounds = array<i64: 2>, scalar_prefetch = 0 : i64, scratch_operands = 0 : i64, tpu.core_type = #tpu.core_type<tc>, window_params = [{transform_indices = @transform_0, window_bounds = array<i64: 1, 4, 8, 138>}, {pipeline_mode = #tpu.pipeline_mode<synchronous>, transform_indices = @transform_1, window_bounds = array<i64: 9, 16, 8>}, {pipeline_mode = #tpu.pipeline_mode<synchronous>, transform_indices = @transform_2, window_bounds = array<i64: 1, 128>}, {transform_indices = @transform_3, window_bounds = array<i64: 1, 16, 128>}]} {
    %cst = arith.constant 0.000000e+00 : f32
    %0 = vector.broadcast %cst : f32 to vector<16x128xf32>
    %c0 = arith.constant 0 : index
    %c0_0 = arith.constant 0 : index
    %c0_1 = arith.constant 0 : index
    %c0_2 = arith.constant 0 : index
    %1 = vector.load %arg1[%c0, %c0_0, %c0_1, %c0_2] : memref<1x4x8x138xbf16, #tpu.memory_space<vmem>>, vector<1x1x8x128xbf16>
    %2 = vector.shape_cast %1 : vector<1x1x8x128xbf16> to vector<8x128xbf16>
    %c0_3 = arith.constant 0 : index
    %c0_4 = arith.constant 0 : index
    %c0_5 = arith.constant 0 : index
    %3 = vector.load %arg2[%c0_3, %c0_4, %c0_5] : memref<9x16x8xbf16, #tpu.memory_space<vmem>>, vector<1x16x8xbf16>
    %4 = vector.shape_cast %3 : vector<1x16x8xbf16> to vector<16x8xbf16>
    %cst_6 = arith.constant dense<0.000000e+00> : vector<16x128xf32>
    %5 = tpu.matmul %4, %2, %cst_6 {dimension_numbers = #tpu.dot_dimension_numbers<[1], [0], [0], [1], [0, 0, 1, 1], [], []>} : vector<16x8xbf16>, vector<8x128xbf16>, vector<16x128xf32> -> vector<16x128xf32>
    %6 = arith.addf %0, %5 : vector<16x128xf32>
    %c0_7 = arith.constant 0 : index
    %c1 = arith.constant 1 : index
    %c0_8 = arith.constant 0 : index
    %c0_9 = arith.constant 0 : index
    %7 = vector.load %arg1[%c0_7, %c1, %c0_8, %c0_9] : memref<1x4x8x138xbf16, #tpu.memory_space<vmem>>, vector<1x1x8x128xbf16>
    %8 = vector.shape_cast %7 : vector<1x1x8x128xbf16> to vector<8x128xbf16>
    %c1_10 = arith.constant 1 : index
    %c0_11 = arith.constant 0 : index
    %c0_12 = arith.constant 0 : index
    %9 = vector.load %arg2[%c1_10, %c0_11, %c0_12] : memref<9x16x8xbf16, #tpu.memory_space<vmem>>, vector<1x16x8xbf16>
    %10 = vector.shape_cast %9 : vector<1x16x8xbf16> to vector<16x8xbf16>
    %cst_13 = arith.constant dense<0.000000e+00> : vector<16x128xf32>
    %11 = tpu.matmul %10, %8, %cst_13 {dimension_numbers = #tpu.dot_dimension_numbers<[1], [0], [0], [1], [0, 0, 1, 1], [], []>} : vector<16x8xbf16>, vector<8x128xbf16>, vector<16x128xf32> -> vector<16x128xf32>
    %12 = arith.addf %6, %11 : vector<16x128xf32>
    %c0_14 = arith.constant 0 : index
    %c0_15 = arith.constant 0 : index
    %c0_16 = arith.constant 0 : index
    %c1_17 = arith.constant 1 : index
    %13 = vector.load %arg1[%c0_14, %c0_15, %c0_16, %c1_17] : memref<1x4x8x138xbf16, #tpu.memory_space<vmem>>, vector<1x1x8x128xbf16>
    %14 = vector.shape_cast %13 : vector<1x1x8x128xbf16> to vector<8x128xbf16>
    %c2 = arith.constant 2 : index
    %c0_18 = arith.constant 0 : index
    %c0_19 = arith.constant 0 : index
    %15 = vector.load %arg2[%c2, %c0_18, %c0_19] : memref<9x16x8xbf16, #tpu.memory_space<vmem>>, vector<1x16x8xbf16>
    %16 = vector.shape_cast %15 : vector<1x16x8xbf16> to vector<16x8xbf16>
    %cst_20 = arith.constant dense<0.000000e+00> : vector<16x128xf32>
    %17 = tpu.matmul %16, %14, %cst_20 {dimension_numbers = #tpu.dot_dimension_numbers<[1], [0], [0], [1], [0, 0, 1, 1], [], []>} : vector<16x8xbf16>, vector<8x128xbf16>, vector<16x128xf32> -> vector<16x128xf32>
    %18 = arith.addf %12, %17 : vector<16x128xf32>
    %c0_21 = arith.constant 0 : index
    %c2_22 = arith.constant 2 : index
    %c0_23 = arith.constant 0 : index
    %c0_24 = arith.constant 0 : index
    %19 = vector.load %arg1[%c0_21, %c2_22, %c0_23, %c0_24] : memref<1x4x8x138xbf16, #tpu.memory_space<vmem>>, vector<1x1x8x128xbf16>
    %20 = vector.shape_cast %19 : vector<1x1x8x128xbf16> to vector<8x128xbf16>
    %c3 = arith.constant 3 : index
    %c0_25 = arith.constant 0 : index
    %c0_26 = arith.constant 0 : index
    %21 = vector.load %arg2[%c3, %c0_25, %c0_26] : memref<9x16x8xbf16, #tpu.memory_space<vmem>>, vector<1x16x8xbf16>
    %22 = vector.shape_cast %21 : vector<1x16x8xbf16> to vector<16x8xbf16>
    %cst_27 = arith.constant dense<0.000000e+00> : vector<16x128xf32>
    %23 = tpu.matmul %22, %20, %cst_27 {dimension_numbers = #tpu.dot_dimension_numbers<[1], [0], [0], [1], [0, 0, 1, 1], [], []>} : vector<16x8xbf16>, vector<8x128xbf16>, vector<16x128xf32> -> vector<16x128xf32>
    %24 = arith.addf %18, %23 : vector<16x128xf32>
    %c0_28 = arith.constant 0 : index
    %c3_29 = arith.constant 3 : index
    %c0_30 = arith.constant 0 : index
    %c0_31 = arith.constant 0 : index
    %25 = vector.load %arg1[%c0_28, %c3_29, %c0_30, %c0_31] : memref<1x4x8x138xbf16, #tpu.memory_space<vmem>>, vector<1x1x8x128xbf16>
    %26 = vector.shape_cast %25 : vector<1x1x8x128xbf16> to vector<8x128xbf16>
    %c4 = arith.constant 4 : index
    %c0_32 = arith.constant 0 : index
    %c0_33 = arith.constant 0 : index
    %27 = vector.load %arg2[%c4, %c0_32, %c0_33] : memref<9x16x8xbf16, #tpu.memory_space<vmem>>, vector<1x16x8xbf16>
    %28 = vector.shape_cast %27 : vector<1x16x8xbf16> to vector<16x8xbf16>
    %cst_34 = arith.constant dense<0.000000e+00> : vector<16x128xf32>
    %29 = tpu.matmul %28, %26, %cst_34 {dimension_numbers = #tpu.dot_dimension_numbers<[1], [0], [0], [1], [0, 0, 1, 1], [], []>} : vector<16x8xbf16>, vector<8x128xbf16>, vector<16x128xf32> -> vector<16x128xf32>
    %30 = arith.addf %24, %29 : vector<16x128xf32>
    %c0_35 = arith.constant 0 : index
    %c2_36 = arith.constant 2 : index
    %c0_37 = arith.constant 0 : index
    %c1_38 = arith.constant 1 : index
    %31 = vector.load %arg1[%c0_35, %c2_36, %c0_37, %c1_38] : memref<1x4x8x138xbf16, #tpu.memory_space<vmem>>, vector<1x1x8x128xbf16>
    %32 = vector.shape_cast %31 : vector<1x1x8x128xbf16> to vector<8x128xbf16>
    %c5 = arith.constant 5 : index
    %c0_39 = arith.constant 0 : index
    %c0_40 = arith.constant 0 : index
    %33 = vector.load %arg2[%c5, %c0_39, %c0_40] : memref<9x16x8xbf16, #tpu.memory_space<vmem>>, vector<1x16x8xbf16>
    %34 = vector.shape_cast %33 : vector<1x16x8xbf16> to vector<16x8xbf16>
    %cst_41 = arith.constant dense<0.000000e+00> : vector<16x128xf32>
    %35 = tpu.matmul %34, %32, %cst_41 {dimension_numbers = #tpu.dot_dimension_numbers<[1], [0], [0], [1], [0, 0, 1, 1], [], []>} : vector<16x8xbf16>, vector<8x128xbf16>, vector<16x128xf32> -> vector<16x128xf32>
    %36 = arith.addf %30, %35 : vector<16x128xf32>
    %c0_42 = arith.constant 0 : index
    %c0_43 = arith.constant 0 : index
    %c0_44 = arith.constant 0 : index
    %c9 = arith.constant 9 : index
    %37 = vector.load %arg1[%c0_42, %c0_43, %c0_44, %c9] : memref<1x4x8x138xbf16, #tpu.memory_space<vmem>>, vector<1x1x8x128xbf16>
    %38 = vector.shape_cast %37 : vector<1x1x8x128xbf16> to vector<8x128xbf16>
    %c6 = arith.constant 6 : index
    %c0_45 = arith.constant 0 : index
    %c0_46 = arith.constant 0 : index
    %39 = vector.load %arg2[%c6, %c0_45, %c0_46] : memref<9x16x8xbf16, #tpu.memory_space<vmem>>, vector<1x16x8xbf16>
    %40 = vector.shape_cast %39 : vector<1x16x8xbf16> to vector<16x8xbf16>
    %cst_47 = arith.constant dense<0.000000e+00> : vector<16x128xf32>
    %41 = tpu.matmul %40, %38, %cst_47 {dimension_numbers = #tpu.dot_dimension_numbers<[1], [0], [0], [1], [0, 0, 1, 1], [], []>} : vector<16x8xbf16>, vector<8x128xbf16>, vector<16x128xf32> -> vector<16x128xf32>
    %42 = arith.addf %36, %41 : vector<16x128xf32>
    %c0_48 = arith.constant 0 : index
    %c1_49 = arith.constant 1 : index
    %c0_50 = arith.constant 0 : index
    %c9_51 = arith.constant 9 : index
    %43 = vector.load %arg1[%c0_48, %c1_49, %c0_50, %c9_51] : memref<1x4x8x138xbf16, #tpu.memory_space<vmem>>, vector<1x1x8x128xbf16>
    %44 = vector.shape_cast %43 : vector<1x1x8x128xbf16> to vector<8x128xbf16>
    %c7 = arith.constant 7 : index
    %c0_52 = arith.constant 0 : index
    %c0_53 = arith.constant 0 : index
    %45 = vector.load %arg2[%c7, %c0_52, %c0_53] : memref<9x16x8xbf16, #tpu.memory_space<vmem>>, vector<1x16x8xbf16>
    %46 = vector.shape_cast %45 : vector<1x16x8xbf16> to vector<16x8xbf16>
    %cst_54 = arith.constant dense<0.000000e+00> : vector<16x128xf32>
    %47 = tpu.matmul %46, %44, %cst_54 {dimension_numbers = #tpu.dot_dimension_numbers<[1], [0], [0], [1], [0, 0, 1, 1], [], []>} : vector<16x8xbf16>, vector<8x128xbf16>, vector<16x128xf32> -> vector<16x128xf32>
    %48 = arith.addf %42, %47 : vector<16x128xf32>
    %c0_55 = arith.constant 0 : index
    %c0_56 = arith.constant 0 : index
    %c0_57 = arith.constant 0 : index
    %c10 = arith.constant 10 : index
    %49 = vector.load %arg1[%c0_55, %c0_56, %c0_57, %c10] : memref<1x4x8x138xbf16, #tpu.memory_space<vmem>>, vector<1x1x8x128xbf16>
    %50 = vector.shape_cast %49 : vector<1x1x8x128xbf16> to vector<8x128xbf16>
    %c8 = arith.constant 8 : index
    %c0_58 = arith.constant 0 : index
    %c0_59 = arith.constant 0 : index
    %51 = vector.load %arg2[%c8, %c0_58, %c0_59] : memref<9x16x8xbf16, #tpu.memory_space<vmem>>, vector<1x16x8xbf16>
    %52 = vector.shape_cast %51 : vector<1x16x8xbf16> to vector<16x8xbf16>
    %cst_60 = arith.constant dense<0.000000e+00> : vector<16x128xf32>
    %53 = tpu.matmul %52, %50, %cst_60 {dimension_numbers = #tpu.dot_dimension_numbers<[1], [0], [0], [1], [0, 0, 1, 1], [], []>} : vector<16x8xbf16>, vector<8x128xbf16>, vector<16x128xf32> -> vector<16x128xf32>
    %54 = arith.addf %48, %53 : vector<16x128xf32>
    %c0_61 = arith.constant 0 : index
    %c0_62 = arith.constant 0 : index
    %55 = vector.load %arg3[%c0_61, %c0_62] : memref<1x128xf32, #tpu.memory_space<vmem>>, vector<1x128xf32>
    %56 = vector.broadcast %55 : vector<1x128xf32> to vector<16x128xf32>
    %57 = arith.mulf %54, %56 : vector<16x128xf32>
    %cst_63 = arith.constant dense<0.000000e+00> : vector<16xf32>
    %58 = vector.multi_reduction <add>, %57, %cst_63 [1] : vector<16x128xf32> to vector<16xf32>
    %59 = vector.shape_cast %58 : vector<16xf32> to vector<16x1xf32>
    %cst_64 = arith.constant 1.562500e-02 : f32
    %60 = vector.broadcast %cst_64 : f32 to vector<16x1xf32>
    %61 = arith.mulf %59, %60 : vector<16x1xf32>
    %62 = vector.broadcast %61 : vector<16x1xf32> to vector<16x128xf32>
    %63 = arith.subf %54, %62 : vector<16x128xf32>
    %64 = vector.broadcast %55 : vector<1x128xf32> to vector<16x128xf32>
    %65 = arith.mulf %63, %64 : vector<16x128xf32>
    %66 = arith.mulf %65, %65 : vector<16x128xf32>
    %cst_65 = arith.constant dense<0.000000e+00> : vector<16xf32>
    %67 = vector.multi_reduction <add>, %66, %cst_65 [1] : vector<16x128xf32> to vector<16xf32>
    %68 = vector.shape_cast %67 : vector<16xf32> to vector<16x1xf32>
    %cst_66 = arith.constant 1.562500e-02 : f32
    %69 = vector.broadcast %cst_66 : f32 to vector<16x1xf32>
    %70 = arith.mulf %68, %69 : vector<16x1xf32>
    %71 = vector.broadcast %61 : vector<16x1xf32> to vector<16x128xf32>
    %72 = arith.subf %54, %71 : vector<16x128xf32>
    %cst_67 = arith.constant 9.99999974E-6 : f32
    %73 = vector.broadcast %cst_67 : f32 to vector<16x1xf32>
    %74 = arith.addf %70, %73 : vector<16x1xf32>
    %75 = math.rsqrt %74 : vector<16x1xf32>
    %76 = vector.broadcast %75 : vector<16x1xf32> to vector<16x128xf32>
    %77 = arith.mulf %72, %76 : vector<16x128xf32>
    %cst_68 = arith.constant 0.000000e+00 : f32
    %78 = vector.broadcast %cst_68 : f32 to vector<16x128xf32>
    %79 = arith.maximumf %77, %78 : vector<16x128xf32>
    %c0_69 = arith.constant 0 : index
    %c0_70 = arith.constant 0 : index
    %c0_71 = arith.constant 0 : index
    %80 = vector.load %arg4[%c0_69, %c0_70, %c0_71] : memref<1x16x128xf32, #tpu.memory_space<vmem>>, vector<1x16x128xf32>
    %81 = vector.shape_cast %80 : vector<1x16x128xf32> to vector<16x128xf32>
    %82 = vector.shape_cast %79 : vector<16x128xf32> to vector<1x16x128xf32>
    tpu.vector_store %arg4[%c0_69, %c0_70, %c0_71], %82 {strides = array<i32>} : memref<1x16x128xf32, #tpu.memory_space<vmem>>, vector<1x16x128xf32>,
    return
  }
  func.func @transform_0(%arg0: i32) -> (i32, i32, i32, i32) {
    %c0_i32 = arith.constant 0 : i32
    %c0_i32_0 = arith.constant 0 : i32
    %c0_i32_1 = arith.constant 0 : i32
    %c0_i32_2 = arith.constant 0 : i32
    return %arg0, %c0_i32, %c0_i32_0, %c0_i32_1 : i32, i32, i32, i32
  }
  func.func @transform_1(%arg0: i32) -> (i32, i32, i32) {
    %c0_i32 = arith.constant 0 : i32
    %c0_i32_0 = arith.constant 0 : i32
    %c0_i32_1 = arith.constant 0 : i32
    %c0_i32_2 = arith.constant 0 : i32
    return %c0_i32, %c0_i32_0, %c0_i32_1 : i32, i32, i32
  }
  func.func @transform_2(%arg0: i32) -> (i32, i32) {
    %c0_i32 = arith.constant 0 : i32
    %c0_i32_0 = arith.constant 0 : i32
    %c0_i32_1 = arith.constant 0 : i32
    return %c0_i32, %c0_i32_0 : i32, i32
  }
  func.func @transform_3(%arg0: i32) -> (i32, i32, i32) {
    %c0_i32 = arith.constant 0 : i32
    %c0_i32_0 = arith.constant 0 : i32
    %c0_i32_1 = arith.constant 0 : i32
    return %arg0, %c0_i32, %c0_i32_0 : i32, i32, i32
  }
}

module attributes {stable_mosaic.version = 11 : i64} {
  func.func @_fused_conv_kernel(%arg0: i32, %arg1: memref<1x4x16x134xbf16, #tpu.memory_space<vmem>>, %arg2: memref<9x32x16xbf16, #tpu.memory_space<vmem>>, %arg3: memref<1x128xf32, #tpu.memory_space<vmem>>, %arg4: memref<1x32x128xf32, #tpu.memory_space<vmem>>) attributes {dimension_semantics = [#tpu.dimension_semantics<parallel>], iteration_bounds = array<i64: 2>, scalar_prefetch = 0 : i64, scratch_operands = 0 : i64, tpu.core_type = #tpu.core_type<tc>, window_params = [{transform_indices = @transform_0, window_bounds = array<i64: 1, 4, 16, 134>}, {pipeline_mode = #tpu.pipeline_mode<synchronous>, transform_indices = @transform_1, window_bounds = array<i64: 9, 32, 16>}, {pipeline_mode = #tpu.pipeline_mode<synchronous>, transform_indices = @transform_2, window_bounds = array<i64: 1, 128>}, {transform_indices = @transform_3, window_bounds = array<i64: 1, 32, 128>}]} {
    %cst = arith.constant 0.000000e+00 : f32
    %0 = vector.broadcast %cst : f32 to vector<32x128xf32>
    %c0 = arith.constant 0 : index
    %c0_0 = arith.constant 0 : index
    %c0_1 = arith.constant 0 : index
    %c0_2 = arith.constant 0 : index
    %1 = vector.load %arg1[%c0, %c0_0, %c0_1, %c0_2] : memref<1x4x16x134xbf16, #tpu.memory_space<vmem>>, vector<1x1x16x128xbf16>
    %2 = vector.shape_cast %1 : vector<1x1x16x128xbf16> to vector<16x128xbf16>
    %c0_3 = arith.constant 0 : index
    %c0_4 = arith.constant 0 : index
    %c0_5 = arith.constant 0 : index
    %3 = vector.load %arg2[%c0_3, %c0_4, %c0_5] : memref<9x32x16xbf16, #tpu.memory_space<vmem>>, vector<1x32x16xbf16>
    %4 = vector.shape_cast %3 : vector<1x32x16xbf16> to vector<32x16xbf16>
    %cst_6 = arith.constant dense<0.000000e+00> : vector<32x128xf32>
    %5 = tpu.matmul %4, %2, %cst_6 {dimension_numbers = #tpu.dot_dimension_numbers<[1], [0], [0], [1], [0, 0, 1, 1], [], []>} : vector<32x16xbf16>, vector<16x128xbf16>, vector<32x128xf32> -> vector<32x128xf32>
    %6 = arith.addf %0, %5 : vector<32x128xf32>
    %c0_7 = arith.constant 0 : index
    %c1 = arith.constant 1 : index
    %c0_8 = arith.constant 0 : index
    %c0_9 = arith.constant 0 : index
    %7 = vector.load %arg1[%c0_7, %c1, %c0_8, %c0_9] : memref<1x4x16x134xbf16, #tpu.memory_space<vmem>>, vector<1x1x16x128xbf16>
    %8 = vector.shape_cast %7 : vector<1x1x16x128xbf16> to vector<16x128xbf16>
    %c1_10 = arith.constant 1 : index
    %c0_11 = arith.constant 0 : index
    %c0_12 = arith.constant 0 : index
    %9 = vector.load %arg2[%c1_10, %c0_11, %c0_12] : memref<9x32x16xbf16, #tpu.memory_space<vmem>>, vector<1x32x16xbf16>
    %10 = vector.shape_cast %9 : vector<1x32x16xbf16> to vector<32x16xbf16>
    %cst_13 = arith.constant dense<0.000000e+00> : vector<32x128xf32>
    %11 = tpu.matmul %10, %8, %cst_13 {dimension_numbers = #tpu.dot_dimension_numbers<[1], [0], [0], [1], [0, 0, 1, 1], [], []>} : vector<32x16xbf16>, vector<16x128xbf16>, vector<32x128xf32> -> vector<32x128xf32>
    %12 = arith.addf %6, %11 : vector<32x128xf32>
    %c0_14 = arith.constant 0 : index
    %c0_15 = arith.constant 0 : index
    %c0_16 = arith.constant 0 : index
    %c1_17 = arith.constant 1 : index
    %13 = vector.load %arg1[%c0_14, %c0_15, %c0_16, %c1_17] : memref<1x4x16x134xbf16, #tpu.memory_space<vmem>>, vector<1x1x16x128xbf16>
    %14 = vector.shape_cast %13 : vector<1x1x16x128xbf16> to vector<16x128xbf16>
    %c2 = arith.constant 2 : index
    %c0_18 = arith.constant 0 : index
    %c0_19 = arith.constant 0 : index
    %15 = vector.load %arg2[%c2, %c0_18, %c0_19] : memref<9x32x16xbf16, #tpu.memory_space<vmem>>, vector<1x32x16xbf16>
    %16 = vector.shape_cast %15 : vector<1x32x16xbf16> to vector<32x16xbf16>
    %cst_20 = arith.constant dense<0.000000e+00> : vector<32x128xf32>
    %17 = tpu.matmul %16, %14, %cst_20 {dimension_numbers = #tpu.dot_dimension_numbers<[1], [0], [0], [1], [0, 0, 1, 1], [], []>} : vector<32x16xbf16>, vector<16x128xbf16>, vector<32x128xf32> -> vector<32x128xf32>
    %18 = arith.addf %12, %17 : vector<32x128xf32>
    %c0_21 = arith.constant 0 : index
    %c2_22 = arith.constant 2 : index
    %c0_23 = arith.constant 0 : index
    %c0_24 = arith.constant 0 : index
    %19 = vector.load %arg1[%c0_21, %c2_22, %c0_23, %c0_24] : memref<1x4x16x134xbf16, #tpu.memory_space<vmem>>, vector<1x1x16x128xbf16>
    %20 = vector.shape_cast %19 : vector<1x1x16x128xbf16> to vector<16x128xbf16>
    %c3 = arith.constant 3 : index
    %c0_25 = arith.constant 0 : index
    %c0_26 = arith.constant 0 : index
    %21 = vector.load %arg2[%c3, %c0_25, %c0_26] : memref<9x32x16xbf16, #tpu.memory_space<vmem>>, vector<1x32x16xbf16>
    %22 = vector.shape_cast %21 : vector<1x32x16xbf16> to vector<32x16xbf16>
    %cst_27 = arith.constant dense<0.000000e+00> : vector<32x128xf32>
    %23 = tpu.matmul %22, %20, %cst_27 {dimension_numbers = #tpu.dot_dimension_numbers<[1], [0], [0], [1], [0, 0, 1, 1], [], []>} : vector<32x16xbf16>, vector<16x128xbf16>, vector<32x128xf32> -> vector<32x128xf32>
    %24 = arith.addf %18, %23 : vector<32x128xf32>
    %c0_28 = arith.constant 0 : index
    %c3_29 = arith.constant 3 : index
    %c0_30 = arith.constant 0 : index
    %c0_31 = arith.constant 0 : index
    %25 = vector.load %arg1[%c0_28, %c3_29, %c0_30, %c0_31] : memref<1x4x16x134xbf16, #tpu.memory_space<vmem>>, vector<1x1x16x128xbf16>
    %26 = vector.shape_cast %25 : vector<1x1x16x128xbf16> to vector<16x128xbf16>
    %c4 = arith.constant 4 : index
    %c0_32 = arith.constant 0 : index
    %c0_33 = arith.constant 0 : index
    %27 = vector.load %arg2[%c4, %c0_32, %c0_33] : memref<9x32x16xbf16, #tpu.memory_space<vmem>>, vector<1x32x16xbf16>
    %28 = vector.shape_cast %27 : vector<1x32x16xbf16> to vector<32x16xbf16>
    %cst_34 = arith.constant dense<0.000000e+00> : vector<32x128xf32>
    %29 = tpu.matmul %28, %26, %cst_34 {dimension_numbers = #tpu.dot_dimension_numbers<[1], [0], [0], [1], [0, 0, 1, 1], [], []>} : vector<32x16xbf16>, vector<16x128xbf16>, vector<32x128xf32> -> vector<32x128xf32>
    %30 = arith.addf %24, %29 : vector<32x128xf32>
    %c0_35 = arith.constant 0 : index
    %c2_36 = arith.constant 2 : index
    %c0_37 = arith.constant 0 : index
    %c1_38 = arith.constant 1 : index
    %31 = vector.load %arg1[%c0_35, %c2_36, %c0_37, %c1_38] : memref<1x4x16x134xbf16, #tpu.memory_space<vmem>>, vector<1x1x16x128xbf16>
    %32 = vector.shape_cast %31 : vector<1x1x16x128xbf16> to vector<16x128xbf16>
    %c5 = arith.constant 5 : index
    %c0_39 = arith.constant 0 : index
    %c0_40 = arith.constant 0 : index
    %33 = vector.load %arg2[%c5, %c0_39, %c0_40] : memref<9x32x16xbf16, #tpu.memory_space<vmem>>, vector<1x32x16xbf16>
    %34 = vector.shape_cast %33 : vector<1x32x16xbf16> to vector<32x16xbf16>
    %cst_41 = arith.constant dense<0.000000e+00> : vector<32x128xf32>
    %35 = tpu.matmul %34, %32, %cst_41 {dimension_numbers = #tpu.dot_dimension_numbers<[1], [0], [0], [1], [0, 0, 1, 1], [], []>} : vector<32x16xbf16>, vector<16x128xbf16>, vector<32x128xf32> -> vector<32x128xf32>
    %36 = arith.addf %30, %35 : vector<32x128xf32>
    %c0_42 = arith.constant 0 : index
    %c0_43 = arith.constant 0 : index
    %c0_44 = arith.constant 0 : index
    %c5_45 = arith.constant 5 : index
    %37 = vector.load %arg1[%c0_42, %c0_43, %c0_44, %c5_45] : memref<1x4x16x134xbf16, #tpu.memory_space<vmem>>, vector<1x1x16x128xbf16>
    %38 = vector.shape_cast %37 : vector<1x1x16x128xbf16> to vector<16x128xbf16>
    %c6 = arith.constant 6 : index
    %c0_46 = arith.constant 0 : index
    %c0_47 = arith.constant 0 : index
    %39 = vector.load %arg2[%c6, %c0_46, %c0_47] : memref<9x32x16xbf16, #tpu.memory_space<vmem>>, vector<1x32x16xbf16>
    %40 = vector.shape_cast %39 : vector<1x32x16xbf16> to vector<32x16xbf16>
    %cst_48 = arith.constant dense<0.000000e+00> : vector<32x128xf32>
    %41 = tpu.matmul %40, %38, %cst_48 {dimension_numbers = #tpu.dot_dimension_numbers<[1], [0], [0], [1], [0, 0, 1, 1], [], []>} : vector<32x16xbf16>, vector<16x128xbf16>, vector<32x128xf32> -> vector<32x128xf32>
    %42 = arith.addf %36, %41 : vector<32x128xf32>
    %c0_49 = arith.constant 0 : index
    %c1_50 = arith.constant 1 : index
    %c0_51 = arith.constant 0 : index
    %c5_52 = arith.constant 5 : index
    %43 = vector.load %arg1[%c0_49, %c1_50, %c0_51, %c5_52] : memref<1x4x16x134xbf16, #tpu.memory_space<vmem>>, vector<1x1x16x128xbf16>
    %44 = vector.shape_cast %43 : vector<1x1x16x128xbf16> to vector<16x128xbf16>
    %c7 = arith.constant 7 : index
    %c0_53 = arith.constant 0 : index
    %c0_54 = arith.constant 0 : index
    %45 = vector.load %arg2[%c7, %c0_53, %c0_54] : memref<9x32x16xbf16, #tpu.memory_space<vmem>>, vector<1x32x16xbf16>
    %46 = vector.shape_cast %45 : vector<1x32x16xbf16> to vector<32x16xbf16>
    %cst_55 = arith.constant dense<0.000000e+00> : vector<32x128xf32>
    %47 = tpu.matmul %46, %44, %cst_55 {dimension_numbers = #tpu.dot_dimension_numbers<[1], [0], [0], [1], [0, 0, 1, 1], [], []>} : vector<32x16xbf16>, vector<16x128xbf16>, vector<32x128xf32> -> vector<32x128xf32>
    %48 = arith.addf %42, %47 : vector<32x128xf32>
    %c0_56 = arith.constant 0 : index
    %c0_57 = arith.constant 0 : index
    %c0_58 = arith.constant 0 : index
    %c6_59 = arith.constant 6 : index
    %49 = vector.load %arg1[%c0_56, %c0_57, %c0_58, %c6_59] : memref<1x4x16x134xbf16, #tpu.memory_space<vmem>>, vector<1x1x16x128xbf16>
    %50 = vector.shape_cast %49 : vector<1x1x16x128xbf16> to vector<16x128xbf16>
    %c8 = arith.constant 8 : index
    %c0_60 = arith.constant 0 : index
    %c0_61 = arith.constant 0 : index
    %51 = vector.load %arg2[%c8, %c0_60, %c0_61] : memref<9x32x16xbf16, #tpu.memory_space<vmem>>, vector<1x32x16xbf16>
    %52 = vector.shape_cast %51 : vector<1x32x16xbf16> to vector<32x16xbf16>
    %cst_62 = arith.constant dense<0.000000e+00> : vector<32x128xf32>
    %53 = tpu.matmul %52, %50, %cst_62 {dimension_numbers = #tpu.dot_dimension_numbers<[1], [0], [0], [1], [0, 0, 1, 1], [], []>} : vector<32x16xbf16>, vector<16x128xbf16>, vector<32x128xf32> -> vector<32x128xf32>
    %54 = arith.addf %48, %53 : vector<32x128xf32>
    %c0_63 = arith.constant 0 : index
    %c0_64 = arith.constant 0 : index
    %55 = vector.load %arg3[%c0_63, %c0_64] : memref<1x128xf32, #tpu.memory_space<vmem>>, vector<1x128xf32>
    %56 = vector.broadcast %55 : vector<1x128xf32> to vector<32x128xf32>
    %57 = arith.mulf %54, %56 : vector<32x128xf32>
    %cst_65 = arith.constant dense<0.000000e+00> : vector<32xf32>
    %58 = vector.multi_reduction <add>, %57, %cst_65 [1] : vector<32x128xf32> to vector<32xf32>
    %59 = vector.shape_cast %58 : vector<32xf32> to vector<32x1xf32>
    %cst_66 = arith.constant 6.250000e-02 : f32
    %60 = vector.broadcast %cst_66 : f32 to vector<32x1xf32>
    %61 = arith.mulf %59, %60 : vector<32x1xf32>
    %62 = vector.broadcast %61 : vector<32x1xf32> to vector<32x128xf32>
    %63 = arith.subf %54, %62 : vector<32x128xf32>
    %64 = vector.broadcast %55 : vector<1x128xf32> to vector<32x128xf32>
    %65 = arith.mulf %63, %64 : vector<32x128xf32>
    %66 = arith.mulf %65, %65 : vector<32x128xf32>
    %cst_67 = arith.constant dense<0.000000e+00> : vector<32xf32>
    %67 = vector.multi_reduction <add>, %66, %cst_67 [1] : vector<32x128xf32> to vector<32xf32>
    %68 = vector.shape_cast %67 : vector<32xf32> to vector<32x1xf32>
    %cst_68 = arith.constant 6.250000e-02 : f32
    %69 = vector.broadcast %cst_68 : f32 to vector<32x1xf32>
    %70 = arith.mulf %68, %69 : vector<32x1xf32>
    %71 = vector.broadcast %61 : vector<32x1xf32> to vector<32x128xf32>
    %72 = arith.subf %54, %71 : vector<32x128xf32>
    %cst_69 = arith.constant 9.99999974E-6 : f32
    %73 = vector.broadcast %cst_69 : f32 to vector<32x1xf32>
    %74 = arith.addf %70, %73 : vector<32x1xf32>
    %75 = math.rsqrt %74 : vector<32x1xf32>
    %76 = vector.broadcast %75 : vector<32x1xf32> to vector<32x128xf32>
    %77 = arith.mulf %72, %76 : vector<32x128xf32>
    %cst_70 = arith.constant 0.000000e+00 : f32
    %78 = vector.broadcast %cst_70 : f32 to vector<32x128xf32>
    %79 = arith.maximumf %77, %78 : vector<32x128xf32>
    %c0_71 = arith.constant 0 : index
    %c0_72 = arith.constant 0 : index
    %c0_73 = arith.constant 0 : index
    %80 = vector.load %arg4[%c0_71, %c0_72, %c0_73] : memref<1x32x128xf32, #tpu.memory_space<vmem>>, vector<1x32x128xf32>
    %81 = vector.shape_cast %80 : vector<1x32x128xf32> to vector<32x128xf32>
    %82 = vector.shape_cast %79 : vector<32x128xf32> to vector<1x32x128xf32>
    tpu.vector_store %arg4[%c0_71, %c0_72, %c0_73], %82 {strides = array<i32>} : memref<1x32x128xf32, #tpu.memory_space<vmem>>, vector<1x32x128xf32>,
    return
  }
  func.func @transform_0(%arg0: i32) -> (i32, i32, i32, i32) {
    %c0_i32 = arith.constant 0 : i32
    %c0_i32_0 = arith.constant 0 : i32
    %c0_i32_1 = arith.constant 0 : i32
    %c0_i32_2 = arith.constant 0 : i32
    return %arg0, %c0_i32, %c0_i32_0, %c0_i32_1 : i32, i32, i32, i32
  }
  func.func @transform_1(%arg0: i32) -> (i32, i32, i32) {
    %c0_i32 = arith.constant 0 : i32
    %c0_i32_0 = arith.constant 0 : i32
    %c0_i32_1 = arith.constant 0 : i32
    %c0_i32_2 = arith.constant 0 : i32
    return %c0_i32, %c0_i32_0, %c0_i32_1 : i32, i32, i32
  }
  func.func @transform_2(%arg0: i32) -> (i32, i32) {
    %c0_i32 = arith.constant 0 : i32
    %c0_i32_0 = arith.constant 0 : i32
    %c0_i32_1 = arith.constant 0 : i32
    return %c0_i32, %c0_i32_0 : i32, i32
  }
  func.func @transform_3(%arg0: i32) -> (i32, i32, i32) {
    %c0_i32 = arith.constant 0 : i32
    %c0_i32_0 = arith.constant 0 : i32
    %c0_i32_1 = arith.constant 0 : i32
    return %arg0, %c0_i32, %c0_i32_0 : i32, i32, i32
  }
}

module attributes {stable_mosaic.version = 11 : i64} {
  func.func @_fused_conv_kernel(%arg0: i32, %arg1: memref<1x1x32x142xbf16, #tpu.memory_space<vmem>>, %arg2: memref<9x32x32xbf16, #tpu.memory_space<vmem>>, %arg3: memref<1x128xf32, #tpu.memory_space<vmem>>, %arg4: memref<1x32x128xf32, #tpu.memory_space<vmem>>) attributes {dimension_semantics = [#tpu.dimension_semantics<parallel>], iteration_bounds = array<i64: 2>, scalar_prefetch = 0 : i64, scratch_operands = 0 : i64, tpu.core_type = #tpu.core_type<tc>, window_params = [{transform_indices = @transform_0, window_bounds = array<i64: 1, 1, 32, 142>}, {pipeline_mode = #tpu.pipeline_mode<synchronous>, transform_indices = @transform_1, window_bounds = array<i64: 9, 32, 32>}, {pipeline_mode = #tpu.pipeline_mode<synchronous>, transform_indices = @transform_2, window_bounds = array<i64: 1, 128>}, {transform_indices = @transform_3, window_bounds = array<i64: 1, 32, 128>}]} {
    %cst = arith.constant 0.000000e+00 : f32
    %0 = vector.broadcast %cst : f32 to vector<32x128xf32>
    %c0 = arith.constant 0 : index
    %c0_0 = arith.constant 0 : index
    %c0_1 = arith.constant 0 : index
    %c0_2 = arith.constant 0 : index
    %1 = vector.load %arg1[%c0, %c0_0, %c0_1, %c0_2] : memref<1x1x32x142xbf16, #tpu.memory_space<vmem>>, vector<1x1x32x128xbf16>
    %2 = vector.shape_cast %1 : vector<1x1x32x128xbf16> to vector<32x128xbf16>
    %c0_3 = arith.constant 0 : index
    %c0_4 = arith.constant 0 : index
    %c0_5 = arith.constant 0 : index
    %3 = vector.load %arg2[%c0_3, %c0_4, %c0_5] : memref<9x32x32xbf16, #tpu.memory_space<vmem>>, vector<1x32x32xbf16>
    %4 = vector.shape_cast %3 : vector<1x32x32xbf16> to vector<32x32xbf16>
    %cst_6 = arith.constant dense<0.000000e+00> : vector<32x128xf32>
    %5 = tpu.matmul %4, %2, %cst_6 {dimension_numbers = #tpu.dot_dimension_numbers<[1], [0], [0], [1], [0, 0, 1, 1], [], []>} : vector<32x32xbf16>, vector<32x128xbf16>, vector<32x128xf32> -> vector<32x128xf32>
    %6 = arith.addf %0, %5 : vector<32x128xf32>
    %c0_7 = arith.constant 0 : index
    %c0_8 = arith.constant 0 : index
    %c0_9 = arith.constant 0 : index
    %c1 = arith.constant 1 : index
    %7 = vector.load %arg1[%c0_7, %c0_8, %c0_9, %c1] : memref<1x1x32x142xbf16, #tpu.memory_space<vmem>>, vector<1x1x32x128xbf16>
    %8 = vector.shape_cast %7 : vector<1x1x32x128xbf16> to vector<32x128xbf16>
    %c1_10 = arith.constant 1 : index
    %c0_11 = arith.constant 0 : index
    %c0_12 = arith.constant 0 : index
    %9 = vector.load %arg2[%c1_10, %c0_11, %c0_12] : memref<9x32x32xbf16, #tpu.memory_space<vmem>>, vector<1x32x32xbf16>
    %10 = vector.shape_cast %9 : vector<1x32x32xbf16> to vector<32x32xbf16>
    %cst_13 = arith.constant dense<0.000000e+00> : vector<32x128xf32>
    %11 = tpu.matmul %10, %8, %cst_13 {dimension_numbers = #tpu.dot_dimension_numbers<[1], [0], [0], [1], [0, 0, 1, 1], [], []>} : vector<32x32xbf16>, vector<32x128xbf16>, vector<32x128xf32> -> vector<32x128xf32>
    %12 = arith.addf %6, %11 : vector<32x128xf32>
    %c0_14 = arith.constant 0 : index
    %c0_15 = arith.constant 0 : index
    %c0_16 = arith.constant 0 : index
    %c2 = arith.constant 2 : index
    %13 = vector.load %arg1[%c0_14, %c0_15, %c0_16, %c2] : memref<1x1x32x142xbf16, #tpu.memory_space<vmem>>, vector<1x1x32x128xbf16>
    %14 = vector.shape_cast %13 : vector<1x1x32x128xbf16> to vector<32x128xbf16>
    %c2_17 = arith.constant 2 : index
    %c0_18 = arith.constant 0 : index
    %c0_19 = arith.constant 0 : index
    %15 = vector.load %arg2[%c2_17, %c0_18, %c0_19] : memref<9x32x32xbf16, #tpu.memory_space<vmem>>, vector<1x32x32xbf16>
    %16 = vector.shape_cast %15 : vector<1x32x32xbf16> to vector<32x32xbf16>
    %cst_20 = arith.constant dense<0.000000e+00> : vector<32x128xf32>
    %17 = tpu.matmul %16, %14, %cst_20 {dimension_numbers = #tpu.dot_dimension_numbers<[1], [0], [0], [1], [0, 0, 1, 1], [], []>} : vector<32x32xbf16>, vector<32x128xbf16>, vector<32x128xf32> -> vector<32x128xf32>
    %18 = arith.addf %12, %17 : vector<32x128xf32>
    %c0_21 = arith.constant 0 : index
    %c0_22 = arith.constant 0 : index
    %c0_23 = arith.constant 0 : index
    %c6 = arith.constant 6 : index
    %19 = vector.load %arg1[%c0_21, %c0_22, %c0_23, %c6] : memref<1x1x32x142xbf16, #tpu.memory_space<vmem>>, vector<1x1x32x128xbf16>
    %20 = vector.shape_cast %19 : vector<1x1x32x128xbf16> to vector<32x128xbf16>
    %c3 = arith.constant 3 : index
    %c0_24 = arith.constant 0 : index
    %c0_25 = arith.constant 0 : index
    %21 = vector.load %arg2[%c3, %c0_24, %c0_25] : memref<9x32x32xbf16, #tpu.memory_space<vmem>>, vector<1x32x32xbf16>
    %22 = vector.shape_cast %21 : vector<1x32x32xbf16> to vector<32x32xbf16>
    %cst_26 = arith.constant dense<0.000000e+00> : vector<32x128xf32>
    %23 = tpu.matmul %22, %20, %cst_26 {dimension_numbers = #tpu.dot_dimension_numbers<[1], [0], [0], [1], [0, 0, 1, 1], [], []>} : vector<32x32xbf16>, vector<32x128xbf16>, vector<32x128xf32> -> vector<32x128xf32>
    %24 = arith.addf %18, %23 : vector<32x128xf32>
    %c0_27 = arith.constant 0 : index
    %c0_28 = arith.constant 0 : index
    %c0_29 = arith.constant 0 : index
    %c7 = arith.constant 7 : index
    %25 = vector.load %arg1[%c0_27, %c0_28, %c0_29, %c7] : memref<1x1x32x142xbf16, #tpu.memory_space<vmem>>, vector<1x1x32x128xbf16>
    %26 = vector.shape_cast %25 : vector<1x1x32x128xbf16> to vector<32x128xbf16>
    %c4 = arith.constant 4 : index
    %c0_30 = arith.constant 0 : index
    %c0_31 = arith.constant 0 : index
    %27 = vector.load %arg2[%c4, %c0_30, %c0_31] : memref<9x32x32xbf16, #tpu.memory_space<vmem>>, vector<1x32x32xbf16>
    %28 = vector.shape_cast %27 : vector<1x32x32xbf16> to vector<32x32xbf16>
    %cst_32 = arith.constant dense<0.000000e+00> : vector<32x128xf32>
    %29 = tpu.matmul %28, %26, %cst_32 {dimension_numbers = #tpu.dot_dimension_numbers<[1], [0], [0], [1], [0, 0, 1, 1], [], []>} : vector<32x32xbf16>, vector<32x128xbf16>, vector<32x128xf32> -> vector<32x128xf32>
    %30 = arith.addf %24, %29 : vector<32x128xf32>
    %c0_33 = arith.constant 0 : index
    %c0_34 = arith.constant 0 : index
    %c0_35 = arith.constant 0 : index
    %c8 = arith.constant 8 : index
    %31 = vector.load %arg1[%c0_33, %c0_34, %c0_35, %c8] : memref<1x1x32x142xbf16, #tpu.memory_space<vmem>>, vector<1x1x32x128xbf16>
    %32 = vector.shape_cast %31 : vector<1x1x32x128xbf16> to vector<32x128xbf16>
    %c5 = arith.constant 5 : index
    %c0_36 = arith.constant 0 : index
    %c0_37 = arith.constant 0 : index
    %33 = vector.load %arg2[%c5, %c0_36, %c0_37] : memref<9x32x32xbf16, #tpu.memory_space<vmem>>, vector<1x32x32xbf16>
    %34 = vector.shape_cast %33 : vector<1x32x32xbf16> to vector<32x32xbf16>
    %cst_38 = arith.constant dense<0.000000e+00> : vector<32x128xf32>
    %35 = tpu.matmul %34, %32, %cst_38 {dimension_numbers = #tpu.dot_dimension_numbers<[1], [0], [0], [1], [0, 0, 1, 1], [], []>} : vector<32x32xbf16>, vector<32x128xbf16>, vector<32x128xf32> -> vector<32x128xf32>
    %36 = arith.addf %30, %35 : vector<32x128xf32>
    %c0_39 = arith.constant 0 : index
    %c0_40 = arith.constant 0 : index
    %c0_41 = arith.constant 0 : index
    %c12 = arith.constant 12 : index
    %37 = vector.load %arg1[%c0_39, %c0_40, %c0_41, %c12] : memref<1x1x32x142xbf16, #tpu.memory_space<vmem>>, vector<1x1x32x128xbf16>
    %38 = vector.shape_cast %37 : vector<1x1x32x128xbf16> to vector<32x128xbf16>
    %c6_42 = arith.constant 6 : index
    %c0_43 = arith.constant 0 : index
    %c0_44 = arith.constant 0 : index
    %39 = vector.load %arg2[%c6_42, %c0_43, %c0_44] : memref<9x32x32xbf16, #tpu.memory_space<vmem>>, vector<1x32x32xbf16>
    %40 = vector.shape_cast %39 : vector<1x32x32xbf16> to vector<32x32xbf16>
    %cst_45 = arith.constant dense<0.000000e+00> : vector<32x128xf32>
    %41 = tpu.matmul %40, %38, %cst_45 {dimension_numbers = #tpu.dot_dimension_numbers<[1], [0], [0], [1], [0, 0, 1, 1], [], []>} : vector<32x32xbf16>, vector<32x128xbf16>, vector<32x128xf32> -> vector<32x128xf32>
    %42 = arith.addf %36, %41 : vector<32x128xf32>
    %c0_46 = arith.constant 0 : index
    %c0_47 = arith.constant 0 : index
    %c0_48 = arith.constant 0 : index
    %c13 = arith.constant 13 : index
    %43 = vector.load %arg1[%c0_46, %c0_47, %c0_48, %c13] : memref<1x1x32x142xbf16, #tpu.memory_space<vmem>>, vector<1x1x32x128xbf16>
    %44 = vector.shape_cast %43 : vector<1x1x32x128xbf16> to vector<32x128xbf16>
    %c7_49 = arith.constant 7 : index
    %c0_50 = arith.constant 0 : index
    %c0_51 = arith.constant 0 : index
    %45 = vector.load %arg2[%c7_49, %c0_50, %c0_51] : memref<9x32x32xbf16, #tpu.memory_space<vmem>>, vector<1x32x32xbf16>
    %46 = vector.shape_cast %45 : vector<1x32x32xbf16> to vector<32x32xbf16>
    %cst_52 = arith.constant dense<0.000000e+00> : vector<32x128xf32>
    %47 = tpu.matmul %46, %44, %cst_52 {dimension_numbers = #tpu.dot_dimension_numbers<[1], [0], [0], [1], [0, 0, 1, 1], [], []>} : vector<32x32xbf16>, vector<32x128xbf16>, vector<32x128xf32> -> vector<32x128xf32>
    %48 = arith.addf %42, %47 : vector<32x128xf32>
    %c0_53 = arith.constant 0 : index
    %c0_54 = arith.constant 0 : index
    %c0_55 = arith.constant 0 : index
    %c14 = arith.constant 14 : index
    %49 = vector.load %arg1[%c0_53, %c0_54, %c0_55, %c14] : memref<1x1x32x142xbf16, #tpu.memory_space<vmem>>, vector<1x1x32x128xbf16>
    %50 = vector.shape_cast %49 : vector<1x1x32x128xbf16> to vector<32x128xbf16>
    %c8_56 = arith.constant 8 : index
    %c0_57 = arith.constant 0 : index
    %c0_58 = arith.constant 0 : index
    %51 = vector.load %arg2[%c8_56, %c0_57, %c0_58] : memref<9x32x32xbf16, #tpu.memory_space<vmem>>, vector<1x32x32xbf16>
    %52 = vector.shape_cast %51 : vector<1x32x32xbf16> to vector<32x32xbf16>
    %cst_59 = arith.constant dense<0.000000e+00> : vector<32x128xf32>
    %53 = tpu.matmul %52, %50, %cst_59 {dimension_numbers = #tpu.dot_dimension_numbers<[1], [0], [0], [1], [0, 0, 1, 1], [], []>} : vector<32x32xbf16>, vector<32x128xbf16>, vector<32x128xf32> -> vector<32x128xf32>
    %54 = arith.addf %48, %53 : vector<32x128xf32>
    %c0_60 = arith.constant 0 : index
    %c0_61 = arith.constant 0 : index
    %55 = vector.load %arg3[%c0_60, %c0_61] : memref<1x128xf32, #tpu.memory_space<vmem>>, vector<1x128xf32>
    %56 = vector.broadcast %55 : vector<1x128xf32> to vector<32x128xf32>
    %57 = arith.mulf %54, %56 : vector<32x128xf32>
    %cst_62 = arith.constant dense<0.000000e+00> : vector<32xf32>
    %58 = vector.multi_reduction <add>, %57, %cst_62 [1] : vector<32x128xf32> to vector<32xf32>
    %59 = vector.shape_cast %58 : vector<32xf32> to vector<32x1xf32>
    %cst_63 = arith.constant 6.250000e-02 : f32
    %60 = vector.broadcast %cst_63 : f32 to vector<32x1xf32>
    %61 = arith.mulf %59, %60 : vector<32x1xf32>
    %62 = vector.broadcast %61 : vector<32x1xf32> to vector<32x128xf32>
    %63 = arith.subf %54, %62 : vector<32x128xf32>
    %64 = vector.broadcast %55 : vector<1x128xf32> to vector<32x128xf32>
    %65 = arith.mulf %63, %64 : vector<32x128xf32>
    %66 = arith.mulf %65, %65 : vector<32x128xf32>
    %cst_64 = arith.constant dense<0.000000e+00> : vector<32xf32>
    %67 = vector.multi_reduction <add>, %66, %cst_64 [1] : vector<32x128xf32> to vector<32xf32>
    %68 = vector.shape_cast %67 : vector<32xf32> to vector<32x1xf32>
    %cst_65 = arith.constant 6.250000e-02 : f32
    %69 = vector.broadcast %cst_65 : f32 to vector<32x1xf32>
    %70 = arith.mulf %68, %69 : vector<32x1xf32>
    %71 = vector.broadcast %61 : vector<32x1xf32> to vector<32x128xf32>
    %72 = arith.subf %54, %71 : vector<32x128xf32>
    %cst_66 = arith.constant 9.99999974E-6 : f32
    %73 = vector.broadcast %cst_66 : f32 to vector<32x1xf32>
    %74 = arith.addf %70, %73 : vector<32x1xf32>
    %75 = math.rsqrt %74 : vector<32x1xf32>
    %76 = vector.broadcast %75 : vector<32x1xf32> to vector<32x128xf32>
    %77 = arith.mulf %72, %76 : vector<32x128xf32>
    %cst_67 = arith.constant 0.000000e+00 : f32
    %78 = vector.broadcast %cst_67 : f32 to vector<32x128xf32>
    %79 = arith.maximumf %77, %78 : vector<32x128xf32>
    %c0_68 = arith.constant 0 : index
    %c0_69 = arith.constant 0 : index
    %c0_70 = arith.constant 0 : index
    %80 = vector.load %arg4[%c0_68, %c0_69, %c0_70] : memref<1x32x128xf32, #tpu.memory_space<vmem>>, vector<1x32x128xf32>
    %81 = vector.shape_cast %80 : vector<1x32x128xf32> to vector<32x128xf32>
    %82 = vector.shape_cast %79 : vector<32x128xf32> to vector<1x32x128xf32>
    tpu.vector_store %arg4[%c0_68, %c0_69, %c0_70], %82 {strides = array<i32>} : memref<1x32x128xf32, #tpu.memory_space<vmem>>, vector<1x32x128xf32>,
    return
  }
  func.func @transform_0(%arg0: i32) -> (i32, i32, i32, i32) {
    %c0_i32 = arith.constant 0 : i32
    %c0_i32_0 = arith.constant 0 : i32
    %c0_i32_1 = arith.constant 0 : i32
    %c0_i32_2 = arith.constant 0 : i32
    return %arg0, %c0_i32, %c0_i32_0, %c0_i32_1 : i32, i32, i32, i32
  }
  func.func @transform_1(%arg0: i32) -> (i32, i32, i32) {
    %c0_i32 = arith.constant 0 : i32
    %c0_i32_0 = arith.constant 0 : i32
    %c0_i32_1 = arith.constant 0 : i32
    %c0_i32_2 = arith.constant 0 : i32
    return %c0_i32, %c0_i32_0, %c0_i32_1 : i32, i32, i32
  }
  func.func @transform_2(%arg0: i32) -> (i32, i32) {
    %c0_i32 = arith.constant 0 : i32
    %c0_i32_0 = arith.constant 0 : i32
    %c0_i32_1 = arith.constant 0 : i32
    return %c0_i32, %c0_i32_0 : i32, i32
  }
  func.func @transform_3(%arg0: i32) -> (i32, i32, i32) {
    %c0_i32 = arith.constant 0 : i32
    %c0_i32_0 = arith.constant 0 : i32
    %c0_i32_1 = arith.constant 0 : i32
    return %arg0, %c0_i32, %c0_i32_0 : i32, i32, i32
  }
}

module attributes {stable_mosaic.version = 11 : i64} {
  func.func @_fused_conv_kernel(%arg0: i32, %arg1: memref<1x1x32x142xbf16, #tpu.memory_space<vmem>>, %arg2: memref<9x32x32xbf16, #tpu.memory_space<vmem>>, %arg3: memref<1x128xf32, #tpu.memory_space<vmem>>, %arg4: memref<1x32x128xf32, #tpu.memory_space<vmem>>, %arg5: memref<1x32x128xf32, #tpu.memory_space<vmem>>) attributes {dimension_semantics = [#tpu.dimension_semantics<parallel>], iteration_bounds = array<i64: 2>, scalar_prefetch = 0 : i64, scratch_operands = 0 : i64, tpu.core_type = #tpu.core_type<tc>, window_params = [{transform_indices = @transform_0, window_bounds = array<i64: 1, 1, 32, 142>}, {pipeline_mode = #tpu.pipeline_mode<synchronous>, transform_indices = @transform_1, window_bounds = array<i64: 9, 32, 32>}, {pipeline_mode = #tpu.pipeline_mode<synchronous>, transform_indices = @transform_2, window_bounds = array<i64: 1, 128>}, {transform_indices = @transform_3, window_bounds = array<i64: 1, 32, 128>}, {transform_indices = @transform_4, window_bounds = array<i64: 1, 32, 128>}]} {
    %cst = arith.constant 0.000000e+00 : f32
    %0 = vector.broadcast %cst : f32 to vector<32x128xf32>
    %c0 = arith.constant 0 : index
    %c0_0 = arith.constant 0 : index
    %c0_1 = arith.constant 0 : index
    %c0_2 = arith.constant 0 : index
    %1 = vector.load %arg1[%c0, %c0_0, %c0_1, %c0_2] : memref<1x1x32x142xbf16, #tpu.memory_space<vmem>>, vector<1x1x32x128xbf16>
    %2 = vector.shape_cast %1 : vector<1x1x32x128xbf16> to vector<32x128xbf16>
    %c0_3 = arith.constant 0 : index
    %c0_4 = arith.constant 0 : index
    %c0_5 = arith.constant 0 : index
    %3 = vector.load %arg2[%c0_3, %c0_4, %c0_5] : memref<9x32x32xbf16, #tpu.memory_space<vmem>>, vector<1x32x32xbf16>
    %4 = vector.shape_cast %3 : vector<1x32x32xbf16> to vector<32x32xbf16>
    %cst_6 = arith.constant dense<0.000000e+00> : vector<32x128xf32>
    %5 = tpu.matmul %4, %2, %cst_6 {dimension_numbers = #tpu.dot_dimension_numbers<[1], [0], [0], [1], [0, 0, 1, 1], [], []>} : vector<32x32xbf16>, vector<32x128xbf16>, vector<32x128xf32> -> vector<32x128xf32>
    %6 = arith.addf %0, %5 : vector<32x128xf32>
    %c0_7 = arith.constant 0 : index
    %c0_8 = arith.constant 0 : index
    %c0_9 = arith.constant 0 : index
    %c1 = arith.constant 1 : index
    %7 = vector.load %arg1[%c0_7, %c0_8, %c0_9, %c1] : memref<1x1x32x142xbf16, #tpu.memory_space<vmem>>, vector<1x1x32x128xbf16>
    %8 = vector.shape_cast %7 : vector<1x1x32x128xbf16> to vector<32x128xbf16>
    %c1_10 = arith.constant 1 : index
    %c0_11 = arith.constant 0 : index
    %c0_12 = arith.constant 0 : index
    %9 = vector.load %arg2[%c1_10, %c0_11, %c0_12] : memref<9x32x32xbf16, #tpu.memory_space<vmem>>, vector<1x32x32xbf16>
    %10 = vector.shape_cast %9 : vector<1x32x32xbf16> to vector<32x32xbf16>
    %cst_13 = arith.constant dense<0.000000e+00> : vector<32x128xf32>
    %11 = tpu.matmul %10, %8, %cst_13 {dimension_numbers = #tpu.dot_dimension_numbers<[1], [0], [0], [1], [0, 0, 1, 1], [], []>} : vector<32x32xbf16>, vector<32x128xbf16>, vector<32x128xf32> -> vector<32x128xf32>
    %12 = arith.addf %6, %11 : vector<32x128xf32>
    %c0_14 = arith.constant 0 : index
    %c0_15 = arith.constant 0 : index
    %c0_16 = arith.constant 0 : index
    %c2 = arith.constant 2 : index
    %13 = vector.load %arg1[%c0_14, %c0_15, %c0_16, %c2] : memref<1x1x32x142xbf16, #tpu.memory_space<vmem>>, vector<1x1x32x128xbf16>
    %14 = vector.shape_cast %13 : vector<1x1x32x128xbf16> to vector<32x128xbf16>
    %c2_17 = arith.constant 2 : index
    %c0_18 = arith.constant 0 : index
    %c0_19 = arith.constant 0 : index
    %15 = vector.load %arg2[%c2_17, %c0_18, %c0_19] : memref<9x32x32xbf16, #tpu.memory_space<vmem>>, vector<1x32x32xbf16>
    %16 = vector.shape_cast %15 : vector<1x32x32xbf16> to vector<32x32xbf16>
    %cst_20 = arith.constant dense<0.000000e+00> : vector<32x128xf32>
    %17 = tpu.matmul %16, %14, %cst_20 {dimension_numbers = #tpu.dot_dimension_numbers<[1], [0], [0], [1], [0, 0, 1, 1], [], []>} : vector<32x32xbf16>, vector<32x128xbf16>, vector<32x128xf32> -> vector<32x128xf32>
    %18 = arith.addf %12, %17 : vector<32x128xf32>
    %c0_21 = arith.constant 0 : index
    %c0_22 = arith.constant 0 : index
    %c0_23 = arith.constant 0 : index
    %c6 = arith.constant 6 : index
    %19 = vector.load %arg1[%c0_21, %c0_22, %c0_23, %c6] : memref<1x1x32x142xbf16, #tpu.memory_space<vmem>>, vector<1x1x32x128xbf16>
    %20 = vector.shape_cast %19 : vector<1x1x32x128xbf16> to vector<32x128xbf16>
    %c3 = arith.constant 3 : index
    %c0_24 = arith.constant 0 : index
    %c0_25 = arith.constant 0 : index
    %21 = vector.load %arg2[%c3, %c0_24, %c0_25] : memref<9x32x32xbf16, #tpu.memory_space<vmem>>, vector<1x32x32xbf16>
    %22 = vector.shape_cast %21 : vector<1x32x32xbf16> to vector<32x32xbf16>
    %cst_26 = arith.constant dense<0.000000e+00> : vector<32x128xf32>
    %23 = tpu.matmul %22, %20, %cst_26 {dimension_numbers = #tpu.dot_dimension_numbers<[1], [0], [0], [1], [0, 0, 1, 1], [], []>} : vector<32x32xbf16>, vector<32x128xbf16>, vector<32x128xf32> -> vector<32x128xf32>
    %24 = arith.addf %18, %23 : vector<32x128xf32>
    %c0_27 = arith.constant 0 : index
    %c0_28 = arith.constant 0 : index
    %c0_29 = arith.constant 0 : index
    %c7 = arith.constant 7 : index
    %25 = vector.load %arg1[%c0_27, %c0_28, %c0_29, %c7] : memref<1x1x32x142xbf16, #tpu.memory_space<vmem>>, vector<1x1x32x128xbf16>
    %26 = vector.shape_cast %25 : vector<1x1x32x128xbf16> to vector<32x128xbf16>
    %c4 = arith.constant 4 : index
    %c0_30 = arith.constant 0 : index
    %c0_31 = arith.constant 0 : index
    %27 = vector.load %arg2[%c4, %c0_30, %c0_31] : memref<9x32x32xbf16, #tpu.memory_space<vmem>>, vector<1x32x32xbf16>
    %28 = vector.shape_cast %27 : vector<1x32x32xbf16> to vector<32x32xbf16>
    %cst_32 = arith.constant dense<0.000000e+00> : vector<32x128xf32>
    %29 = tpu.matmul %28, %26, %cst_32 {dimension_numbers = #tpu.dot_dimension_numbers<[1], [0], [0], [1], [0, 0, 1, 1], [], []>} : vector<32x32xbf16>, vector<32x128xbf16>, vector<32x128xf32> -> vector<32x128xf32>
    %30 = arith.addf %24, %29 : vector<32x128xf32>
    %c0_33 = arith.constant 0 : index
    %c0_34 = arith.constant 0 : index
    %c0_35 = arith.constant 0 : index
    %c8 = arith.constant 8 : index
    %31 = vector.load %arg1[%c0_33, %c0_34, %c0_35, %c8] : memref<1x1x32x142xbf16, #tpu.memory_space<vmem>>, vector<1x1x32x128xbf16>
    %32 = vector.shape_cast %31 : vector<1x1x32x128xbf16> to vector<32x128xbf16>
    %c5 = arith.constant 5 : index
    %c0_36 = arith.constant 0 : index
    %c0_37 = arith.constant 0 : index
    %33 = vector.load %arg2[%c5, %c0_36, %c0_37] : memref<9x32x32xbf16, #tpu.memory_space<vmem>>, vector<1x32x32xbf16>
    %34 = vector.shape_cast %33 : vector<1x32x32xbf16> to vector<32x32xbf16>
    %cst_38 = arith.constant dense<0.000000e+00> : vector<32x128xf32>
    %35 = tpu.matmul %34, %32, %cst_38 {dimension_numbers = #tpu.dot_dimension_numbers<[1], [0], [0], [1], [0, 0, 1, 1], [], []>} : vector<32x32xbf16>, vector<32x128xbf16>, vector<32x128xf32> -> vector<32x128xf32>
    %36 = arith.addf %30, %35 : vector<32x128xf32>
    %c0_39 = arith.constant 0 : index
    %c0_40 = arith.constant 0 : index
    %c0_41 = arith.constant 0 : index
    %c12 = arith.constant 12 : index
    %37 = vector.load %arg1[%c0_39, %c0_40, %c0_41, %c12] : memref<1x1x32x142xbf16, #tpu.memory_space<vmem>>, vector<1x1x32x128xbf16>
    %38 = vector.shape_cast %37 : vector<1x1x32x128xbf16> to vector<32x128xbf16>
    %c6_42 = arith.constant 6 : index
    %c0_43 = arith.constant 0 : index
    %c0_44 = arith.constant 0 : index
    %39 = vector.load %arg2[%c6_42, %c0_43, %c0_44] : memref<9x32x32xbf16, #tpu.memory_space<vmem>>, vector<1x32x32xbf16>
    %40 = vector.shape_cast %39 : vector<1x32x32xbf16> to vector<32x32xbf16>
    %cst_45 = arith.constant dense<0.000000e+00> : vector<32x128xf32>
    %41 = tpu.matmul %40, %38, %cst_45 {dimension_numbers = #tpu.dot_dimension_numbers<[1], [0], [0], [1], [0, 0, 1, 1], [], []>} : vector<32x32xbf16>, vector<32x128xbf16>, vector<32x128xf32> -> vector<32x128xf32>
    %42 = arith.addf %36, %41 : vector<32x128xf32>
    %c0_46 = arith.constant 0 : index
    %c0_47 = arith.constant 0 : index
    %c0_48 = arith.constant 0 : index
    %c13 = arith.constant 13 : index
    %43 = vector.load %arg1[%c0_46, %c0_47, %c0_48, %c13] : memref<1x1x32x142xbf16, #tpu.memory_space<vmem>>, vector<1x1x32x128xbf16>
    %44 = vector.shape_cast %43 : vector<1x1x32x128xbf16> to vector<32x128xbf16>
    %c7_49 = arith.constant 7 : index
    %c0_50 = arith.constant 0 : index
    %c0_51 = arith.constant 0 : index
    %45 = vector.load %arg2[%c7_49, %c0_50, %c0_51] : memref<9x32x32xbf16, #tpu.memory_space<vmem>>, vector<1x32x32xbf16>
    %46 = vector.shape_cast %45 : vector<1x32x32xbf16> to vector<32x32xbf16>
    %cst_52 = arith.constant dense<0.000000e+00> : vector<32x128xf32>
    %47 = tpu.matmul %46, %44, %cst_52 {dimension_numbers = #tpu.dot_dimension_numbers<[1], [0], [0], [1], [0, 0, 1, 1], [], []>} : vector<32x32xbf16>, vector<32x128xbf16>, vector<32x128xf32> -> vector<32x128xf32>
    %48 = arith.addf %42, %47 : vector<32x128xf32>
    %c0_53 = arith.constant 0 : index
    %c0_54 = arith.constant 0 : index
    %c0_55 = arith.constant 0 : index
    %c14 = arith.constant 14 : index
    %49 = vector.load %arg1[%c0_53, %c0_54, %c0_55, %c14] : memref<1x1x32x142xbf16, #tpu.memory_space<vmem>>, vector<1x1x32x128xbf16>
    %50 = vector.shape_cast %49 : vector<1x1x32x128xbf16> to vector<32x128xbf16>
    %c8_56 = arith.constant 8 : index
    %c0_57 = arith.constant 0 : index
    %c0_58 = arith.constant 0 : index
    %51 = vector.load %arg2[%c8_56, %c0_57, %c0_58] : memref<9x32x32xbf16, #tpu.memory_space<vmem>>, vector<1x32x32xbf16>
    %52 = vector.shape_cast %51 : vector<1x32x32xbf16> to vector<32x32xbf16>
    %cst_59 = arith.constant dense<0.000000e+00> : vector<32x128xf32>
    %53 = tpu.matmul %52, %50, %cst_59 {dimension_numbers = #tpu.dot_dimension_numbers<[1], [0], [0], [1], [0, 0, 1, 1], [], []>} : vector<32x32xbf16>, vector<32x128xbf16>, vector<32x128xf32> -> vector<32x128xf32>
    %54 = arith.addf %48, %53 : vector<32x128xf32>
    %c0_60 = arith.constant 0 : index
    %c0_61 = arith.constant 0 : index
    %55 = vector.load %arg3[%c0_60, %c0_61] : memref<1x128xf32, #tpu.memory_space<vmem>>, vector<1x128xf32>
    %56 = vector.broadcast %55 : vector<1x128xf32> to vector<32x128xf32>
    %57 = arith.mulf %54, %56 : vector<32x128xf32>
    %cst_62 = arith.constant dense<0.000000e+00> : vector<32xf32>
    %58 = vector.multi_reduction <add>, %57, %cst_62 [1] : vector<32x128xf32> to vector<32xf32>
    %59 = vector.shape_cast %58 : vector<32xf32> to vector<32x1xf32>
    %cst_63 = arith.constant 6.250000e-02 : f32
    %60 = vector.broadcast %cst_63 : f32 to vector<32x1xf32>
    %61 = arith.mulf %59, %60 : vector<32x1xf32>
    %62 = vector.broadcast %61 : vector<32x1xf32> to vector<32x128xf32>
    %63 = arith.subf %54, %62 : vector<32x128xf32>
    %64 = vector.broadcast %55 : vector<1x128xf32> to vector<32x128xf32>
    %65 = arith.mulf %63, %64 : vector<32x128xf32>
    %66 = arith.mulf %65, %65 : vector<32x128xf32>
    %cst_64 = arith.constant dense<0.000000e+00> : vector<32xf32>
    %67 = vector.multi_reduction <add>, %66, %cst_64 [1] : vector<32x128xf32> to vector<32xf32>
    %68 = vector.shape_cast %67 : vector<32xf32> to vector<32x1xf32>
    %cst_65 = arith.constant 6.250000e-02 : f32
    %69 = vector.broadcast %cst_65 : f32 to vector<32x1xf32>
    %70 = arith.mulf %68, %69 : vector<32x1xf32>
    %71 = vector.broadcast %61 : vector<32x1xf32> to vector<32x128xf32>
    %72 = arith.subf %54, %71 : vector<32x128xf32>
    %cst_66 = arith.constant 9.99999974E-6 : f32
    %73 = vector.broadcast %cst_66 : f32 to vector<32x1xf32>
    %74 = arith.addf %70, %73 : vector<32x1xf32>
    %75 = math.rsqrt %74 : vector<32x1xf32>
    %76 = vector.broadcast %75 : vector<32x1xf32> to vector<32x128xf32>
    %77 = arith.mulf %72, %76 : vector<32x128xf32>
    %c0_67 = arith.constant 0 : index
    %c0_68 = arith.constant 0 : index
    %c0_69 = arith.constant 0 : index
    %78 = vector.load %arg4[%c0_67, %c0_68, %c0_69] : memref<1x32x128xf32, #tpu.memory_space<vmem>>, vector<1x32x128xf32>
    %79 = vector.shape_cast %78 : vector<1x32x128xf32> to vector<32x128xf32>
    %80 = arith.addf %77, %79 : vector<32x128xf32>
    %c0_70 = arith.constant 0 : index
    %c0_71 = arith.constant 0 : index
    %c0_72 = arith.constant 0 : index
    %81 = vector.load %arg5[%c0_70, %c0_71, %c0_72] : memref<1x32x128xf32, #tpu.memory_space<vmem>>, vector<1x32x128xf32>
    %82 = vector.shape_cast %81 : vector<1x32x128xf32> to vector<32x128xf32>
    %83 = vector.shape_cast %80 : vector<32x128xf32> to vector<1x32x128xf32>
    tpu.vector_store %arg5[%c0_70, %c0_71, %c0_72], %83 {strides = array<i32>} : memref<1x32x128xf32, #tpu.memory_space<vmem>>, vector<1x32x128xf32>,
    return
  }
  func.func @transform_0(%arg0: i32) -> (i32, i32, i32, i32) {
    %c0_i32 = arith.constant 0 : i32
    %c0_i32_0 = arith.constant 0 : i32
    %c0_i32_1 = arith.constant 0 : i32
    %c0_i32_2 = arith.constant 0 : i32
    return %arg0, %c0_i32, %c0_i32_0, %c0_i32_1 : i32, i32, i32, i32
  }
  func.func @transform_1(%arg0: i32) -> (i32, i32, i32) {
    %c0_i32 = arith.constant 0 : i32
    %c0_i32_0 = arith.constant 0 : i32
    %c0_i32_1 = arith.constant 0 : i32
    %c0_i32_2 = arith.constant 0 : i32
    return %c0_i32, %c0_i32_0, %c0_i32_1 : i32, i32, i32
  }
  func.func @transform_2(%arg0: i32) -> (i32, i32) {
    %c0_i32 = arith.constant 0 : i32
    %c0_i32_0 = arith.constant 0 : i32
    %c0_i32_1 = arith.constant 0 : i32
    return %c0_i32, %c0_i32_0 : i32, i32
  }
  func.func @transform_3(%arg0: i32) -> (i32, i32, i32) {
    %c0_i32 = arith.constant 0 : i32
    %c0_i32_0 = arith.constant 0 : i32
    %c0_i32_1 = arith.constant 0 : i32
    return %arg0, %c0_i32, %c0_i32_0 : i32, i32, i32
  }
  func.func @transform_4(%arg0: i32) -> (i32, i32, i32) {
    %c0_i32 = arith.constant 0 : i32
    %c0_i32_0 = arith.constant 0 : i32
    %c0_i32_1 = arith.constant 0 : i32
    return %arg0, %c0_i32, %c0_i32_0 : i32, i32, i32
  }
}

module attributes {stable_mosaic.version = 11 : i64} {
  func.func @_fused_conv_kernel(%arg0: i32, %arg1: memref<1x1x32x142xbf16, #tpu.memory_space<vmem>>, %arg2: memref<9x32x32xbf16, #tpu.memory_space<vmem>>, %arg3: memref<1x128xf32, #tpu.memory_space<vmem>>, %arg4: memref<1x32x128xf32, #tpu.memory_space<vmem>>, %arg5: memref<1x32x128xf32, #tpu.memory_space<vmem>>, %arg6: memref<1x32x128xf32, #tpu.memory_space<vmem>>, %arg7: memref<1x32x128xf32, #tpu.memory_space<vmem>>) attributes {dimension_semantics = [#tpu.dimension_semantics<parallel>], iteration_bounds = array<i64: 2>, scalar_prefetch = 0 : i64, scratch_operands = 0 : i64, tpu.core_type = #tpu.core_type<tc>, window_params = [{transform_indices = @transform_0, window_bounds = array<i64: 1, 1, 32, 142>}, {pipeline_mode = #tpu.pipeline_mode<synchronous>, transform_indices = @transform_1, window_bounds = array<i64: 9, 32, 32>}, {pipeline_mode = #tpu.pipeline_mode<synchronous>, transform_indices = @transform_2, window_bounds = array<i64: 1, 128>}, {transform_indices = @transform_3, window_bounds = array<i64: 1, 32, 128>}, {transform_indices = @transform_4, window_bounds = array<i64: 1, 32, 128>}, {transform_indices = @transform_5, window_bounds = array<i64: 1, 32, 128>}, {transform_indices = @transform_6, window_bounds = array<i64: 1, 32, 128>}]} {
    %cst = arith.constant 0.000000e+00 : f32
    %0 = vector.broadcast %cst : f32 to vector<32x128xf32>
    %c0 = arith.constant 0 : index
    %c0_0 = arith.constant 0 : index
    %c0_1 = arith.constant 0 : index
    %c0_2 = arith.constant 0 : index
    %1 = vector.load %arg1[%c0, %c0_0, %c0_1, %c0_2] : memref<1x1x32x142xbf16, #tpu.memory_space<vmem>>, vector<1x1x32x128xbf16>
    %2 = vector.shape_cast %1 : vector<1x1x32x128xbf16> to vector<32x128xbf16>
    %c0_3 = arith.constant 0 : index
    %c0_4 = arith.constant 0 : index
    %c0_5 = arith.constant 0 : index
    %3 = vector.load %arg2[%c0_3, %c0_4, %c0_5] : memref<9x32x32xbf16, #tpu.memory_space<vmem>>, vector<1x32x32xbf16>
    %4 = vector.shape_cast %3 : vector<1x32x32xbf16> to vector<32x32xbf16>
    %cst_6 = arith.constant dense<0.000000e+00> : vector<32x128xf32>
    %5 = tpu.matmul %4, %2, %cst_6 {dimension_numbers = #tpu.dot_dimension_numbers<[1], [0], [0], [1], [0, 0, 1, 1], [], []>} : vector<32x32xbf16>, vector<32x128xbf16>, vector<32x128xf32> -> vector<32x128xf32>
    %6 = arith.addf %0, %5 : vector<32x128xf32>
    %c0_7 = arith.constant 0 : index
    %c0_8 = arith.constant 0 : index
    %c0_9 = arith.constant 0 : index
    %c1 = arith.constant 1 : index
    %7 = vector.load %arg1[%c0_7, %c0_8, %c0_9, %c1] : memref<1x1x32x142xbf16, #tpu.memory_space<vmem>>, vector<1x1x32x128xbf16>
    %8 = vector.shape_cast %7 : vector<1x1x32x128xbf16> to vector<32x128xbf16>
    %c1_10 = arith.constant 1 : index
    %c0_11 = arith.constant 0 : index
    %c0_12 = arith.constant 0 : index
    %9 = vector.load %arg2[%c1_10, %c0_11, %c0_12] : memref<9x32x32xbf16, #tpu.memory_space<vmem>>, vector<1x32x32xbf16>
    %10 = vector.shape_cast %9 : vector<1x32x32xbf16> to vector<32x32xbf16>
    %cst_13 = arith.constant dense<0.000000e+00> : vector<32x128xf32>
    %11 = tpu.matmul %10, %8, %cst_13 {dimension_numbers = #tpu.dot_dimension_numbers<[1], [0], [0], [1], [0, 0, 1, 1], [], []>} : vector<32x32xbf16>, vector<32x128xbf16>, vector<32x128xf32> -> vector<32x128xf32>
    %12 = arith.addf %6, %11 : vector<32x128xf32>
    %c0_14 = arith.constant 0 : index
    %c0_15 = arith.constant 0 : index
    %c0_16 = arith.constant 0 : index
    %c2 = arith.constant 2 : index
    %13 = vector.load %arg1[%c0_14, %c0_15, %c0_16, %c2] : memref<1x1x32x142xbf16, #tpu.memory_space<vmem>>, vector<1x1x32x128xbf16>
    %14 = vector.shape_cast %13 : vector<1x1x32x128xbf16> to vector<32x128xbf16>
    %c2_17 = arith.constant 2 : index
    %c0_18 = arith.constant 0 : index
    %c0_19 = arith.constant 0 : index
    %15 = vector.load %arg2[%c2_17, %c0_18, %c0_19] : memref<9x32x32xbf16, #tpu.memory_space<vmem>>, vector<1x32x32xbf16>
    %16 = vector.shape_cast %15 : vector<1x32x32xbf16> to vector<32x32xbf16>
    %cst_20 = arith.constant dense<0.000000e+00> : vector<32x128xf32>
    %17 = tpu.matmul %16, %14, %cst_20 {dimension_numbers = #tpu.dot_dimension_numbers<[1], [0], [0], [1], [0, 0, 1, 1], [], []>} : vector<32x32xbf16>, vector<32x128xbf16>, vector<32x128xf32> -> vector<32x128xf32>
    %18 = arith.addf %12, %17 : vector<32x128xf32>
    %c0_21 = arith.constant 0 : index
    %c0_22 = arith.constant 0 : index
    %c0_23 = arith.constant 0 : index
    %c6 = arith.constant 6 : index
    %19 = vector.load %arg1[%c0_21, %c0_22, %c0_23, %c6] : memref<1x1x32x142xbf16, #tpu.memory_space<vmem>>, vector<1x1x32x128xbf16>
    %20 = vector.shape_cast %19 : vector<1x1x32x128xbf16> to vector<32x128xbf16>
    %c3 = arith.constant 3 : index
    %c0_24 = arith.constant 0 : index
    %c0_25 = arith.constant 0 : index
    %21 = vector.load %arg2[%c3, %c0_24, %c0_25] : memref<9x32x32xbf16, #tpu.memory_space<vmem>>, vector<1x32x32xbf16>
    %22 = vector.shape_cast %21 : vector<1x32x32xbf16> to vector<32x32xbf16>
    %cst_26 = arith.constant dense<0.000000e+00> : vector<32x128xf32>
    %23 = tpu.matmul %22, %20, %cst_26 {dimension_numbers = #tpu.dot_dimension_numbers<[1], [0], [0], [1], [0, 0, 1, 1], [], []>} : vector<32x32xbf16>, vector<32x128xbf16>, vector<32x128xf32> -> vector<32x128xf32>
    %24 = arith.addf %18, %23 : vector<32x128xf32>
    %c0_27 = arith.constant 0 : index
    %c0_28 = arith.constant 0 : index
    %c0_29 = arith.constant 0 : index
    %c7 = arith.constant 7 : index
    %25 = vector.load %arg1[%c0_27, %c0_28, %c0_29, %c7] : memref<1x1x32x142xbf16, #tpu.memory_space<vmem>>, vector<1x1x32x128xbf16>
    %26 = vector.shape_cast %25 : vector<1x1x32x128xbf16> to vector<32x128xbf16>
    %c4 = arith.constant 4 : index
    %c0_30 = arith.constant 0 : index
    %c0_31 = arith.constant 0 : index
    %27 = vector.load %arg2[%c4, %c0_30, %c0_31] : memref<9x32x32xbf16, #tpu.memory_space<vmem>>, vector<1x32x32xbf16>
    %28 = vector.shape_cast %27 : vector<1x32x32xbf16> to vector<32x32xbf16>
    %cst_32 = arith.constant dense<0.000000e+00> : vector<32x128xf32>
    %29 = tpu.matmul %28, %26, %cst_32 {dimension_numbers = #tpu.dot_dimension_numbers<[1], [0], [0], [1], [0, 0, 1, 1], [], []>} : vector<32x32xbf16>, vector<32x128xbf16>, vector<32x128xf32> -> vector<32x128xf32>
    %30 = arith.addf %24, %29 : vector<32x128xf32>
    %c0_33 = arith.constant 0 : index
    %c0_34 = arith.constant 0 : index
    %c0_35 = arith.constant 0 : index
    %c8 = arith.constant 8 : index
    %31 = vector.load %arg1[%c0_33, %c0_34, %c0_35, %c8] : memref<1x1x32x142xbf16, #tpu.memory_space<vmem>>, vector<1x1x32x128xbf16>
    %32 = vector.shape_cast %31 : vector<1x1x32x128xbf16> to vector<32x128xbf16>
    %c5 = arith.constant 5 : index
    %c0_36 = arith.constant 0 : index
    %c0_37 = arith.constant 0 : index
    %33 = vector.load %arg2[%c5, %c0_36, %c0_37] : memref<9x32x32xbf16, #tpu.memory_space<vmem>>, vector<1x32x32xbf16>
    %34 = vector.shape_cast %33 : vector<1x32x32xbf16> to vector<32x32xbf16>
    %cst_38 = arith.constant dense<0.000000e+00> : vector<32x128xf32>
    %35 = tpu.matmul %34, %32, %cst_38 {dimension_numbers = #tpu.dot_dimension_numbers<[1], [0], [0], [1], [0, 0, 1, 1], [], []>} : vector<32x32xbf16>, vector<32x128xbf16>, vector<32x128xf32> -> vector<32x128xf32>
    %36 = arith.addf %30, %35 : vector<32x128xf32>
    %c0_39 = arith.constant 0 : index
    %c0_40 = arith.constant 0 : index
    %c0_41 = arith.constant 0 : index
    %c12 = arith.constant 12 : index
    %37 = vector.load %arg1[%c0_39, %c0_40, %c0_41, %c12] : memref<1x1x32x142xbf16, #tpu.memory_space<vmem>>, vector<1x1x32x128xbf16>
    %38 = vector.shape_cast %37 : vector<1x1x32x128xbf16> to vector<32x128xbf16>
    %c6_42 = arith.constant 6 : index
    %c0_43 = arith.constant 0 : index
    %c0_44 = arith.constant 0 : index
    %39 = vector.load %arg2[%c6_42, %c0_43, %c0_44] : memref<9x32x32xbf16, #tpu.memory_space<vmem>>, vector<1x32x32xbf16>
    %40 = vector.shape_cast %39 : vector<1x32x32xbf16> to vector<32x32xbf16>
    %cst_45 = arith.constant dense<0.000000e+00> : vector<32x128xf32>
    %41 = tpu.matmul %40, %38, %cst_45 {dimension_numbers = #tpu.dot_dimension_numbers<[1], [0], [0], [1], [0, 0, 1, 1], [], []>} : vector<32x32xbf16>, vector<32x128xbf16>, vector<32x128xf32> -> vector<32x128xf32>
    %42 = arith.addf %36, %41 : vector<32x128xf32>
    %c0_46 = arith.constant 0 : index
    %c0_47 = arith.constant 0 : index
    %c0_48 = arith.constant 0 : index
    %c13 = arith.constant 13 : index
    %43 = vector.load %arg1[%c0_46, %c0_47, %c0_48, %c13] : memref<1x1x32x142xbf16, #tpu.memory_space<vmem>>, vector<1x1x32x128xbf16>
    %44 = vector.shape_cast %43 : vector<1x1x32x128xbf16> to vector<32x128xbf16>
    %c7_49 = arith.constant 7 : index
    %c0_50 = arith.constant 0 : index
    %c0_51 = arith.constant 0 : index
    %45 = vector.load %arg2[%c7_49, %c0_50, %c0_51] : memref<9x32x32xbf16, #tpu.memory_space<vmem>>, vector<1x32x32xbf16>
    %46 = vector.shape_cast %45 : vector<1x32x32xbf16> to vector<32x32xbf16>
    %cst_52 = arith.constant dense<0.000000e+00> : vector<32x128xf32>
    %47 = tpu.matmul %46, %44, %cst_52 {dimension_numbers = #tpu.dot_dimension_numbers<[1], [0], [0], [1], [0, 0, 1, 1], [], []>} : vector<32x32xbf16>, vector<32x128xbf16>, vector<32x128xf32> -> vector<32x128xf32>
    %48 = arith.addf %42, %47 : vector<32x128xf32>
    %c0_53 = arith.constant 0 : index
    %c0_54 = arith.constant 0 : index
    %c0_55 = arith.constant 0 : index
    %c14 = arith.constant 14 : index
    %49 = vector.load %arg1[%c0_53, %c0_54, %c0_55, %c14] : memref<1x1x32x142xbf16, #tpu.memory_space<vmem>>, vector<1x1x32x128xbf16>
    %50 = vector.shape_cast %49 : vector<1x1x32x128xbf16> to vector<32x128xbf16>
    %c8_56 = arith.constant 8 : index
    %c0_57 = arith.constant 0 : index
    %c0_58 = arith.constant 0 : index
    %51 = vector.load %arg2[%c8_56, %c0_57, %c0_58] : memref<9x32x32xbf16, #tpu.memory_space<vmem>>, vector<1x32x32xbf16>
    %52 = vector.shape_cast %51 : vector<1x32x32xbf16> to vector<32x32xbf16>
    %cst_59 = arith.constant dense<0.000000e+00> : vector<32x128xf32>
    %53 = tpu.matmul %52, %50, %cst_59 {dimension_numbers = #tpu.dot_dimension_numbers<[1], [0], [0], [1], [0, 0, 1, 1], [], []>} : vector<32x32xbf16>, vector<32x128xbf16>, vector<32x128xf32> -> vector<32x128xf32>
    %54 = arith.addf %48, %53 : vector<32x128xf32>
    %c0_60 = arith.constant 0 : index
    %c0_61 = arith.constant 0 : index
    %55 = vector.load %arg3[%c0_60, %c0_61] : memref<1x128xf32, #tpu.memory_space<vmem>>, vector<1x128xf32>
    %56 = vector.broadcast %55 : vector<1x128xf32> to vector<32x128xf32>
    %57 = arith.mulf %54, %56 : vector<32x128xf32>
    %cst_62 = arith.constant dense<0.000000e+00> : vector<32xf32>
    %58 = vector.multi_reduction <add>, %57, %cst_62 [1] : vector<32x128xf32> to vector<32xf32>
    %59 = vector.shape_cast %58 : vector<32xf32> to vector<32x1xf32>
    %cst_63 = arith.constant 6.250000e-02 : f32
    %60 = vector.broadcast %cst_63 : f32 to vector<32x1xf32>
    %61 = arith.mulf %59, %60 : vector<32x1xf32>
    %62 = vector.broadcast %61 : vector<32x1xf32> to vector<32x128xf32>
    %63 = arith.subf %54, %62 : vector<32x128xf32>
    %64 = vector.broadcast %55 : vector<1x128xf32> to vector<32x128xf32>
    %65 = arith.mulf %63, %64 : vector<32x128xf32>
    %66 = arith.mulf %65, %65 : vector<32x128xf32>
    %cst_64 = arith.constant dense<0.000000e+00> : vector<32xf32>
    %67 = vector.multi_reduction <add>, %66, %cst_64 [1] : vector<32x128xf32> to vector<32xf32>
    %68 = vector.shape_cast %67 : vector<32xf32> to vector<32x1xf32>
    %cst_65 = arith.constant 6.250000e-02 : f32
    %69 = vector.broadcast %cst_65 : f32 to vector<32x1xf32>
    %70 = arith.mulf %68, %69 : vector<32x1xf32>
    %71 = vector.broadcast %61 : vector<32x1xf32> to vector<32x128xf32>
    %72 = arith.subf %54, %71 : vector<32x128xf32>
    %cst_66 = arith.constant 9.99999974E-6 : f32
    %73 = vector.broadcast %cst_66 : f32 to vector<32x1xf32>
    %74 = arith.addf %70, %73 : vector<32x1xf32>
    %75 = math.rsqrt %74 : vector<32x1xf32>
    %76 = vector.broadcast %75 : vector<32x1xf32> to vector<32x128xf32>
    %77 = arith.mulf %72, %76 : vector<32x128xf32>
    %c0_67 = arith.constant 0 : index
    %c0_68 = arith.constant 0 : index
    %c0_69 = arith.constant 0 : index
    %78 = vector.load %arg4[%c0_67, %c0_68, %c0_69] : memref<1x32x128xf32, #tpu.memory_space<vmem>>, vector<1x32x128xf32>
    %79 = vector.shape_cast %78 : vector<1x32x128xf32> to vector<32x128xf32>
    %80 = arith.addf %77, %79 : vector<32x128xf32>
    %c0_70 = arith.constant 0 : index
    %c0_71 = arith.constant 0 : index
    %c0_72 = arith.constant 0 : index
    %81 = vector.load %arg6[%c0_70, %c0_71, %c0_72] : memref<1x32x128xf32, #tpu.memory_space<vmem>>, vector<1x32x128xf32>
    %82 = vector.shape_cast %81 : vector<1x32x128xf32> to vector<32x128xf32>
    %83 = vector.shape_cast %80 : vector<32x128xf32> to vector<1x32x128xf32>
    tpu.vector_store %arg6[%c0_70, %c0_71, %c0_72], %83 {strides = array<i32>} : memref<1x32x128xf32, #tpu.memory_space<vmem>>, vector<1x32x128xf32>,
    %c0_73 = arith.constant 0 : index
    %c0_74 = arith.constant 0 : index
    %c0_75 = arith.constant 0 : index
    %84 = vector.load %arg5[%c0_73, %c0_74, %c0_75] : memref<1x32x128xf32, #tpu.memory_space<vmem>>, vector<1x32x128xf32>
    %85 = vector.shape_cast %84 : vector<1x32x128xf32> to vector<32x128xf32>
    %86 = arith.addf %80, %85 : vector<32x128xf32>
    %c0_76 = arith.constant 0 : index
    %c0_77 = arith.constant 0 : index
    %c0_78 = arith.constant 0 : index
    %87 = vector.load %arg7[%c0_76, %c0_77, %c0_78] : memref<1x32x128xf32, #tpu.memory_space<vmem>>, vector<1x32x128xf32>
    %88 = vector.shape_cast %87 : vector<1x32x128xf32> to vector<32x128xf32>
    %89 = vector.shape_cast %86 : vector<32x128xf32> to vector<1x32x128xf32>
    tpu.vector_store %arg7[%c0_76, %c0_77, %c0_78], %89 {strides = array<i32>} : memref<1x32x128xf32, #tpu.memory_space<vmem>>, vector<1x32x128xf32>,
    return
  }
  func.func @transform_0(%arg0: i32) -> (i32, i32, i32, i32) {
    %c0_i32 = arith.constant 0 : i32
    %c0_i32_0 = arith.constant 0 : i32
    %c0_i32_1 = arith.constant 0 : i32
    %c0_i32_2 = arith.constant 0 : i32
    return %arg0, %c0_i32, %c0_i32_0, %c0_i32_1 : i32, i32, i32, i32
  }
  func.func @transform_1(%arg0: i32) -> (i32, i32, i32) {
    %c0_i32 = arith.constant 0 : i32
    %c0_i32_0 = arith.constant 0 : i32
    %c0_i32_1 = arith.constant 0 : i32
    %c0_i32_2 = arith.constant 0 : i32
    return %c0_i32, %c0_i32_0, %c0_i32_1 : i32, i32, i32
  }
  func.func @transform_2(%arg0: i32) -> (i32, i32) {
    %c0_i32 = arith.constant 0 : i32
    %c0_i32_0 = arith.constant 0 : i32
    %c0_i32_1 = arith.constant 0 : i32
    return %c0_i32, %c0_i32_0 : i32, i32
  }
  func.func @transform_3(%arg0: i32) -> (i32, i32, i32) {
    %c0_i32 = arith.constant 0 : i32
    %c0_i32_0 = arith.constant 0 : i32
    %c0_i32_1 = arith.constant 0 : i32
    return %arg0, %c0_i32, %c0_i32_0 : i32, i32, i32
  }
  func.func @transform_4(%arg0: i32) -> (i32, i32, i32) {
    %c0_i32 = arith.constant 0 : i32
    %c0_i32_0 = arith.constant 0 : i32
    %c0_i32_1 = arith.constant 0 : i32
    return %arg0, %c0_i32, %c0_i32_0 : i32, i32, i32
  }
  func.func @transform_5(%arg0: i32) -> (i32, i32, i32) {
    %c0_i32 = arith.constant 0 : i32
    %c0_i32_0 = arith.constant 0 : i32
    %c0_i32_1 = arith.constant 0 : i32
    return %arg0, %c0_i32, %c0_i32_0 : i32, i32, i32
  }
  func.func @transform_6(%arg0: i32) -> (i32, i32, i32) {
    %c0_i32 = arith.constant 0 : i32
    %c0_i32_0 = arith.constant 0 : i32
    %c0_i32_1 = arith.constant 0 : i32
    return %arg0, %c0_i32, %c0_i32_0 : i32, i32, i32
  }
}

</mosaic_0001>

<bundles_post_ra>
// kernel: encoder_forward.12
= control target key start
LH: loop header
LB: loop body
LE: loop exit
PB: predicated region body
PF: predicated region fallthrough
CT: control target
= control target key end

     0   :  { %s1023_s12 = smov 0   ;;  %s1128_s0 = inlined_call_operand.vmem [shape: bf16[2,4,8,138], index: 0, kind: input, shape index: {}]   ;;  %s1129_s1 = inlined_call_operand.vmem [shape: bf16[9,16,8], index: 1, kind: input, shape index: {}]   ;;  %s1130_s2 = inlined_call_operand.vmem [shape: f32[1,128], index: 2, kind: input, shape index: {}]   ;;  %s1131_s3 = inlined_call_operand.vmem [shape: f32[2,16,128], index: 3, kind: output, shape index: {}]  }
   0x1 LB: > { %s827_s13 = sadd.s32 4294967295, %s996_s12   ;;  %p831_p0 = scmp.ge.s32.totalorder %s996_s12, 1  ;;  %s996_s12 = sphi %s1023_s12, %s13_s12  }
   0x2   : > { %p137_p1 = scmp.lt.s32.totalorder %s996_s12, 3 }
   0x4   : > { %p138_p2 = pnand %p831_p0, %p137_p1 }
   0x5   : > { %p161_p3 = scmp.lt.s32.totalorder (!%p138_p2), %s827_s13, 1  ;;  %s1000_s22 = smov (!%p138_p2), 127  }
   0x6   : > { %141 = sbr.rel (%p138_p2) target bundleno = 673 (0x2a1), region = 32  ;;  %s1001_s23 = smov (!%p138_p2), 119  }
   0x7   : > { %s1002_s26 = smov (!%p138_p2), 118  }
   0xb   : > { %v998_v0 = vmov 0.0   ;;  %s1133_s13 = smov (!%p161_p3, %s827_s13), 1  ;;  %vm999_vm0 = vmmov 0   ;;  %vm189_vm1 = vcmask 1043456   ;;  %v977_v9 = vld [vmem:[%s1129_s1 + $0x8] sm:$0xff]   ;;  %v978_v10 = vld [vmem:[%s1129_s1] sm:$0xff]  }
   0xc   : > { %904 = vmatprep.subr.bf16.mxu0 %v998_v0  ;;  %910 = vmatprep.subr.bf16.mxu1 %v998_v0  ;;  %s884_s14 = sshll.u32 %s1133_s13, 5  ;;  %vm185_vm2 = vcmask 64512   ;;  %v980_v18 = vld [vmem:[%s1129_s1 + $0x18] sm:$0xff]   ;;  %vm304_vm3 = vcmask 1039360   ;;  %v979_v27 = vld [vmem:[%s1129_s1 + $0x10] sm:$0xff]   ;;  %v982_v29 = vld [vmem:[%s1129_s1 + $0x28] sm:$0xff]  }
   0xd   : > { %906 = vmatprep.mubr.msk.bf16.mxu0 %vm999_vm0, %v998_v0  ;;  %912 = vmatprep.mubr.msk.bf16.mxu1 %vm999_vm0, %v998_v0  ;;  %s1043_s17 = scalar_lea.vmem %s1128_s0, %s884_s14  ;;  %vm553_vm4 = vcmask 973824   ;;  %v981_v37 = vld [vmem:[%s1129_s1 + $0x20] sm:$0xff]   ;;  %v984_v39 = vld [vmem:[%s1129_s1 + $0x38] sm:$0xff]   ;;  %vm684_vm5 = vcmask 965632   ;;  %v983_v44 = vld [vmem:[%s1129_s1 + $0x30] sm:$0xff]   ;;  %s885_s16 = sshll.u32 %s1133_s13, 4 }
   0xe   : > { %v286_v1 = vld [vmem:[%s1043_s17] sm:$0xff]  ;;  %v859_v2 = vld [vmem:[%s1043_s17 + $0x10] sm:$0xff]  ;;  %v836_v5 = vld [vmem:[%s1043_s17 + $0x8] sm:$0xf]  ;;  %s170_s19 = scalar_lea.vmem %s1131_s3, %s885_s16 }
   0xf   : > { %v846_v3 = vcombine.low %v286_v1, %v286_v1  ;;  %v863_v4 = vcombine.low %v859_v2, %v859_v2  ;;  %v172_v6 = vld [vmem:[%s1043_s17] sm:$0xf]  ;;  %v191_v7 = vsel %vm189_vm1, %v836_v5, 0  ;;  %v849_v11 = vld [vmem:[%s1043_s17 + $0x10] sm:$0xf]  ;;  %v847_v12 = vcombine.high %v286_v1, %v286_v1  ;;  %v870_v15 = vld [vmem:[%s1043_s17 + $0x8] sm:$0xff] }
  0x10   : > { %v243_v8 = vsel %vm189_vm1, %v172_v6, 0  ;;  %v864_v13 = vcombine.high %v859_v2, %v859_v2  ;;  %905 = vmatpush3.bf16.msra.mxu0 %v191_v7  ;;  %v369_v14 = vsel %vm189_vm1, %v849_v11, 0  ;;  %v875_v16 = vcombine.high %v870_v15, %v870_v15  ;;  %v854_v25 = vld [vmem:[%s1043_s17 + $0x18] sm:$0xf]  ;;  %v985_v46 = vld [vmem:[%s1129_s1 + $0x40] sm:$0xff]  }
  0x11   : > { %300 = vrot.lane.b32.xlu0 %v846_v3, %s1000_s22  ;;  %487 = vrot.lane.b32.xlu1 %v863_v4, %s1000_s22  ;;  %v874_v17 = vcombine.low %v870_v15, %v870_v15  ;;  %v428_v30 = vsel %vm189_vm1, %v854_v25, 0 }
  0x12   : > { %911 = vmatpush3.bf16.msra.mxu1 %v243_v8  ;;  %916 = vmatprep.subr.bf16.mxu0 %v998_v0 }
  0x13   : > { %922 = vmatprep.subr.bf16.mxu1 %v998_v0  ;;  %907 = vmatmul.mubr.msk.bf16.vlgmr.msra.gmra.mxu0 %vm185_vm2, %v977_v9 }
  0x14   : > { %918 = vmatprep.mubr.msk.bf16.mxu0 %vm999_vm0, %v998_v0 }
  0x15   : > { %302 = vrot.lane.b32.xlu0 %v847_v12, %s1000_s22  ;;  %489 = vrot.lane.b32.xlu1 %v864_v13, %s1000_s22 }
  0x16   : > { %913 = vmatmul.mubr.msk.bf16.vlgmr.msra.gmra.mxu1 %vm185_vm2, %v978_v10 }
  0x17   : > { %923 = vmatpush3.bf16.msra.mxu1 %v369_v14  ;;  %924 = vmatprep.mubr.msk.bf16.mxu1 %vm999_vm0, %v998_v0 }
  0x18   : > { %934 = vmatprep.subr.bf16.mxu1 %v998_v0 }
  0x19   : > { %551 = vrot.lane.b32.xlu1 %v847_v12, %s1001_s23  ;;  %549 = vrot.lane.b32.xlu0 %v846_v3, %s1001_s23 }
  0x1d   : > { %620 = vrot.lane.b32.xlu1 %v875_v16, %s1001_s23  ;;  %618 = vrot.lane.b32.xlu0 %v874_v17, %s1001_s23 }
  0x1e   : > { %925 = vmatmul.mubr.msk.bf16.vlgmr.msra.gmra.mxu1 %vm185_vm2, %v980_v18 }
  0x1f   : > { %936 = vmatprep.mubr.msk.bf16.mxu1 %vm999_vm0, %v998_v0 }
  0x21   : > { %682 = vrot.lane.b32.xlu1 %v847_v12, %s1002_s26  ;;  %680 = vrot.lane.b32.xlu0 %v846_v3, %s1002_s26 }
  0x83   : > { %v301_v19 = vpop.permute.xlu0 %300  ;;  %v488_v20 = vpop.permute.xlu1 %487 }
  0x87   : > { %v303_v21 = vpop.permute.xlu0 %302  ;;  %v490_v22 = vpop.permute.xlu1 %489 }
  0x88   : > { %v305_v23 = vsel %vm304_vm3, %v301_v19, %v303_v21  ;;  %v491_v24 = vsel %vm304_vm3, %v488_v20, %v490_v22 }
  0x89   : > { %v310_v26 = vsel %vm189_vm1, %v305_v23, 0  ;;  %v496_v28 = vsel %vm189_vm1, %v491_v24, 0 }
  0x8a   : > { %917 = vmatpush3.bf16.msra.mxu0 %v310_v26  ;;  %935 = vmatpush3.bf16.msra.mxu1 %v496_v28 }
  0x8b   : > { %928 = vmatprep.subr.bf16.mxu0 %v998_v0  ;;  %v552_v31 = vpop.permute.xlu1 %551  ;;  %v550_v32 = vpop.permute.xlu0 %549  ;;  %946 = vmatprep.subr.bf16.mxu1 %v998_v0 }
  0x8c   : > { %v554_v35 = vsel %vm553_vm4, %v550_v32, %v552_v31 }
  0x8d   : > { %919 = vmatmul.mubr.msk.bf16.vlgmr.msra.gmra.mxu0 %vm185_vm2, %v979_v27  ;;  %937 = vmatmul.mubr.msk.bf16.vlgmr.msra.gmra.mxu1 %vm185_vm2, %v982_v29  ;;  %v559_v40 = vsel %vm189_vm1, %v554_v35, 0  ;;  %v881_v29 = vld [vmem:[%s1130_s2] ss:$0 sm:$0xff] }
  0x8e   : > { %929 = vmatpush3.bf16.msra.mxu0 %v428_v30  ;;  %930 = vmatprep.mubr.msk.bf16.mxu0 %vm999_vm0, %v998_v0 }
  0x8f   : > { %v621_v33 = vpop.permute.xlu1 %620  ;;  %v619_v34 = vpop.permute.xlu0 %618  ;;  %940 = vmatprep.subr.bf16.mxu0 %v998_v0  ;;  %948 = vmatprep.mubr.msk.bf16.mxu1 %vm999_vm0, %v998_v0 }
  0x90   : > { %v622_v36 = vsel %vm553_vm4, %v619_v34, %v621_v33 }
  0x91   : > { %v627_v38 = vsel %vm189_vm1, %v622_v36, 0 }
  0x92   : > { %947 = vmatpush3.bf16.msra.mxu1 %v627_v38 }
  0x93   : > { %v683_v41 = vpop.permute.xlu1 %682  ;;  %v681_v42 = vpop.permute.xlu0 %680 }
  0x94   : > { %v685_v43 = vsel %vm684_vm5, %v681_v42, %v683_v41 }
  0x95   : > { %931 = vmatmul.mubr.msk.bf16.vlgmr.msra.gmra.mxu0 %vm185_vm2, %v981_v37  ;;  %949 = vmatmul.mubr.msk.bf16.vlgmr.msra.gmra.mxu1 %vm185_vm2, %v984_v39  ;;  %v690_v45 = vsel %vm189_vm1, %v685_v43, 0 }
  0x96   : > { %941 = vmatpush3.bf16.msra.mxu0 %v559_v40  ;;  %942 = vmatprep.mubr.msk.bf16.mxu0 %vm999_vm0, %v998_v0 }
  0x97   : > { %952 = vmatprep.subr.bf16.mxu0 %v998_v0 }
  0x9d   : > { %943 = vmatmul.mubr.msk.bf16.vlgmr.msra.gmra.mxu0 %vm185_vm2, %v983_v44 }
  0x9e   : > { %953 = vmatpush3.bf16.msra.mxu0 %v690_v45  ;;  %954 = vmatprep.mubr.msk.bf16.mxu0 %vm999_vm0, %v998_v0 }
  0xa5   : > { %955 = vmatmul.mubr.msk.bf16.vlgmr.msra.gmra.mxu0 %vm185_vm2, %v985_v46 }
  0xd3   : > { %v227_v47 = vpop.f32.mrf.mxu0 }
  0xd5   : > { %v908_v50 = vpop.f32.mrf.mxu0 }
  0xd6   : > { %v279_v48 = vpop.f32.mrf.mxu1 }
  0xd7   : > { %v280_v49 = vadd.f32 %v279_v48, %v227_v47  ;;  %v230_v52 = vpop.f32.mrf.mxu0 }
  0xd8   : > { %v914_v51 = vpop.f32.mrf.mxu1 }
  0xd9   : > { %v909_v55 = vpop.f32.mrf.mxu0 }
  0xda   : > { %v282_v53 = vpop.f32.mrf.mxu1 }
  0xdb   : > { %v283_v54 = vadd.f32 %v282_v53, %v230_v52 }
  0xdc   : > { %v915_v56 = vpop.f32.mrf.mxu1 }
  0xde   : > { %v405_v57 = vpop.f32.mrf.mxu1 }
  0xe0   : > { %v926_v58 = vpop.f32.mrf.mxu1 }
  0xe2   : > { %v408_v59 = vpop.f32.mrf.mxu1 }
  0xe4   : > { %v927_v60 = vpop.f32.mrf.mxu1 }
 0x14d   : > { %v346_v61 = vpop.f32.mrf.mxu0  ;;  %v532_v62 = vpop.f32.mrf.mxu1 }
 0x14e   : > { %v353_v5 = vadd.f32 %v346_v61, %v280_v49 }
 0x14f   : > { %v920_v63 = vpop.f32.mrf.mxu0  ;;  %v938_v0 = vpop.f32.mrf.mxu1 }
 0x150   : > { %v412_v10 = vadd.f32 %v405_v57, %v353_v5 }
 0x151   : > { %v349_v1 = vpop.f32.mrf.mxu0  ;;  %v535_v2 = vpop.f32.mrf.mxu1 }
 0x152   : > { %v354_v11 = vadd.f32 %v349_v1, %v283_v54 }
 0x153   : > { %v921_v3 = vpop.f32.mrf.mxu0  ;;  %v939_v4 = vpop.f32.mrf.mxu1 }
 0x154   : > { %v413_v17 = vadd.f32 %v408_v59, %v354_v11 }
 0x155   : > { %v464_v6 = vpop.f32.mrf.mxu0  ;;  %v663_v7 = vpop.f32.mrf.mxu1 }
 0x156   : > { %v471_v14 = vadd.f32 %v464_v6, %v412_v10 }
 0x157   : > { %v932_v8 = vpop.f32.mrf.mxu0  ;;  %v950_v9 = vpop.f32.mrf.mxu1 }
 0x158   : > { %v539_v19 = vadd.f32 %v532_v62, %v471_v14 }
 0x159   : > { %v467_v12 = vpop.f32.mrf.mxu0  ;;  %v666_v13 = vpop.f32.mrf.mxu1 }
 0x15a   : > { %v472_v20 = vadd.f32 %v467_v12, %v413_v17 }
 0x15b   : > { %v933_v15 = vpop.f32.mrf.mxu0  ;;  %v951_v16 = vpop.f32.mrf.mxu1 }
 0x15c   : > { %v540_v24 = vadd.f32 %v535_v2, %v472_v20 }
 0x15d   : > { %v595_v18 = vpop.f32.mrf.mxu0 }
 0x15e   : > { %v602_v22 = vadd.f32 %v595_v18, %v539_v19 }
 0x15f   : > { %v944_v21 = vpop.f32.mrf.mxu0 }
 0x160   : > { %v670_v26 = vadd.f32 %v663_v7, %v602_v22 }
 0x161   : > { %v598_v23 = vpop.f32.mrf.mxu0 }
 0x162   : > { %v603_v27 = vadd.f32 %v598_v23, %v540_v24 }
 0x163   : > { %v945_v25 = vpop.f32.mrf.mxu0 }
 0x164   : > { %v671_v32 = vadd.f32 %v666_v13, %v603_v27 }
 0x165   : > { %v726_v28 = vpop.f32.mrf.mxu0 }
 0x166   : > { %v733_v30 = vadd.f32 %v726_v28, %v670_v26 }
 0x167   : > { %v956_v31 = vpop.f32.mrf.mxu0 }
 0x168   : > { %v742_v33 = vmul.f32 %v881_v29, %v733_v30 }
 0x169   : > { %v729_v34 = vpop.f32.mrf.mxu0 }
 0x16a   : > { %v734_v35 = vadd.f32 %v729_v34, %v671_v32  ;;  %744 = vadd.xlane.f32.xlu0 %v742_v33 }
 0x16b   : > { %v957_v36 = vpop.f32.mrf.mxu0 }
 0x16c   : > { %v743_v37 = vmul.f32 %v881_v29, %v734_v35 }
 0x16e   : > { %746 = vadd.xlane.f32.xlu1 %v743_v37 }
 0x1f3   : > { %v745_v38 = vpop.xlane.xlu0 %744 }
 0x1f4   : > { %v748_v39 = vmul.f32 0.015625, %v745_v38 }
 0x1f6   : > { %v750_v40 = vsub.f32 %v733_v30, %v748_v39 }
 0x1f7   : > { %v747_v41 = vpop.xlane.xlu1 %746 }
 0x1f8   : > { %v749_v42 = vmul.f32 0.015625, %v747_v41  ;;  %v752_v43 = vmul.f32 %v881_v29, %v750_v40 }
 0x1fa   : > { %v751_v44 = vsub.f32 %v734_v35, %v749_v42  ;;  %v754_v45 = vmul.f32 %v752_v43, %v752_v43 }
 0x1fc   : > { %756 = vadd.xlane.f32.xlu0 %v754_v45  ;;  %v753_v46 = vmul.f32 %v881_v29, %v751_v44 }
 0x1fe   : > { %v755_v47 = vmul.f32 %v753_v46, %v753_v46 }
 0x200   : > { %758 = vadd.xlane.f32.xlu0 %v755_v47 }
 0x285   : > { %v757_v48 = vpop.xlane.xlu0 %756 }
 0x286   : > { %v760_v49 = vmul.f32 0.015625, %v757_v48 }
 0x288   : > { %v762_v50 = vadd.f32 1e-05, %v760_v49 }
 0x289   : > { %v759_v51 = vpop.xlane.xlu0 %758 }
 0x28a   : > { %986 = vrsqrt.f32 %v762_v50  ;;  %v761_v52 = vmul.f32 0.015625, %v759_v51 }
 0x28c   : > { %v763_v53 = vadd.f32 1e-05, %v761_v52 }
 0x28e   : > { %988 = vrsqrt.f32 %v763_v53 }
 0x297   : > { %v987_v54 = vpop.eup %986 }
 0x298   : > { %v766_v55 = vmul.f32 %v987_v54, %v750_v40 }
 0x29a   : > { %v768_v56 = vmax.f32 %v766_v55, 0.0 }
 0x29b   : > { %v989_v57 = vpop.eup %988 }
 0x29c   : > { %770 = vst [vmem:[%s170_s19] sm:$0xff] %v768_v56  ;;  %v767_v58 = vmul.f32 %v989_v57, %v751_v44 }
 0x29e   : > { %v769_v59 = vmax.f32 %v767_v58, 0.0 }
 0x2a0   : > { %771 = vst [vmem:[%s170_s19 + $0x8] sm:$0xff] %v769_v59 }
 0x2a1 PF: > { %s13_s12 = sadd.s32 1, %s996_s12  }
 0x2a2   : > { %p10_p4 = scmp.ge.s32.totalorder %s13_s12, 4  }
 0x2a4   :  { %12 = sbr.rel (!%p10_p4) target bundleno = 1 (0x1), region = 73 }

// kernel: encoder_forward.11
= control target key start
LH: loop header
LB: loop body
LE: loop exit
PB: predicated region body
PF: predicated region fallthrough
CT: control target
= control target key end

     0   :  { %s6431_s12 = smov 0   ;;  %s7377_s0 = inlined_call_operand.vmem [shape: bf16[2,1,8,522], index: 0, kind: input, shape index: {}]   ;;  %s7378_s1 = inlined_call_operand.vmem [shape: bf16[49,8,8], index: 1, kind: input, shape index: {}]   ;;  %s7379_s2 = inlined_call_operand.vmem [shape: f32[1,384], index: 2, kind: input, shape index: {}]   ;;  %s7380_s3 = inlined_call_operand.vmem [shape: f32[2,8,384], index: 3, kind: output, shape index: {}]  }
   0x1 LB: > { %s5681_s13 = sadd.s32 4294967295, %s6361_s12   ;;  %p5685_p0 = scmp.ge.s32.totalorder %s6361_s12, 1  ;;  %s6361_s12 = sphi %s6431_s12, %s13_s12  }
   0x2   : > { %p137_p1 = scmp.lt.s32.totalorder %s6361_s12, 3 }
   0x4   : > { %p138_p2 = pnand %p5685_p0, %p137_p1 }
   0x5   : > { %p161_p3 = scmp.lt.s32.totalorder (!%p138_p2), %s5681_s13, 1  ;;  %s6366_s18 = smov (!%p138_p2), 127  }
   0x6   : > { %141 = sbr.rel (%p138_p2) target bundleno = 1042 (0x412), region = 32  ;;  %s6367_s19 = smov (!%p138_p2), 126  }
   0x7   : > { %s6368_s20 = smov (!%p138_p2), 125   ;;  %s6369_s21 = smov (!%p138_p2), 124  }
   0x8   : > { %s6370_s22 = smov (!%p138_p2), 123   ;;  %s6371_s23 = smov (!%p138_p2), 122  }
   0x9   : > { %s6372_s24 = smov (!%p138_p2), 106   ;;  %s6373_s25 = smov (!%p138_p2), 105  }
   0xa   : > { %s6374_s26 = smov (!%p138_p2), 104   ;;  %s6375_s27 = smov (!%p138_p2), 103  }
   0xb   : > { %v6363_v0 = vmov 0.0   ;;  %s7382_s13 = smov (!%p161_p3, %s5681_s13), 1  ;;  %v6364_v1 = vmov 0   ;;  %vm6365_vm0 = vmmov 0   ;;  %s6376_s28 = smov 102   ;;  %vm196_vm1 = vcmask 1039360  }
   0xc   : > { %5992 = vmatprep.subr.bf16.mxu1 %v6363_v0  ;;  %s6286_s14 = smul.u32 20, %s7382_s13  ;;  %246 = vmatprep.mubr.bf16.mxu0 %v6364_v1  ;;  %s6377_s29 = smov 101   ;;  %vm204_vm2 = vcmask 1043456   ;;  %v5688_v18 = vld [vmem:[%s7378_s1 + $0x4] sm:$0xf]  ;;  %vm200_vm3 = vcmask 64512  }
   0xd   : > { %5994 = vmatprep.mubr.msk.bf16.mxu1 %vm6365_vm0, %v6363_v0  ;;  %s6378_s30 = smov 100   ;;  %s6379_s4 = smov 84   ;;  %vm401_vm4 = vcmask 1031168   ;;  %v174_v28 = vld [vmem:[%s7378_s1] sm:$0xf]  ;;  %vm511_vm5 = vcmask 1022976  }
   0xe   : > { %s6449_s17 = scalar_lea.vmem %s7377_s0, %s6286_s14  ;;  %s6380_s5 = smov 83   ;;  %v5700_v38 = vld [vmem:[%s7378_s1 + $0x8] sm:$0xf]  ;;  %vm621_vm6 = vcmask 1014784   ;;  %v5704_v48 = vld [vmem:[%s7378_s1 + $0xc] sm:$0xf] }
   0xf   : > { %v175_v2 = vld [vmem:[%s6449_s17 + $0x8] sm:$0xff]  ;;  %v172_v3 = vld [vmem:[%s6449_s17] sm:$0xff]  ;;  %s6381_s6 = smov 82   ;;  %s6382_s9 = smov 81   ;;  %vm731_vm7 = vcmask 1006592   ;;  %vm841_vm8 = vcmask 998400  }
  0x10   : > { %v6453_v4 = vcombine.low %v175_v2, %v175_v2  ;;  %v6455_v5 = vcombine.low %v172_v3, %v172_v3  ;;  %v6458_v6 = vcombine.high %v172_v3, %v172_v3  ;;  %v6461_v7 = vcombine.high %v175_v2, %v175_v2  ;;  %v6348_v15 = vld [vmem:[%s6449_s17 + $0x8] ss:$0 sps:$4 sm:$0xff]   ;;  %s6383_s16 = smov 80   ;;  %v5708_v58 = vld [vmem:[%s7378_s1 + $0x10] sm:$0xf]  ;;  %s6388_s8 = smov 60  }
  0x11   : > { %v308_v22 = vsel %vm204_vm2, %v6348_v15, 0  ;;  %vm951_vm9 = vcmask 867328   ;;  %vm1061_vm10 = vcmask 859136   ;;  %vm1171_vm11 = vcmask 850944   ;;  %s6389_s11 = smov 59   ;;  %s6408_s7 = smov 120  }
  0x12   : > { %192 = vrot.lane.b32.xlu1 %v6453_v4, %s6366_s18  ;;  %188 = vrot.lane.b32.xlu0 %v6455_v5, %s6366_s18  ;;  %v302_v20 = vsel %vm204_vm2, %v6455_v5, 0  ;;  %vm1281_vm12 = vcmask 842752   ;;  %vm1391_vm13 = vcmask 834560   ;;  %vm1501_vm14 = vcmask 826368   ;;  %s6409_s10 = smov 119   ;;  %s6410_s15 = smov 118  }
  0x13   : > { %vm1611_vm15 = vcmask 818176  }
  0x16   : > { %194 = vrot.lane.b32.xlu1 %v6461_v7, %s6366_s18  ;;  %190 = vrot.lane.b32.xlu0 %v6458_v6, %s6366_s18 }
  0x1a   : > { %393 = vrot.lane.b32.xlu0 %v6455_v5, %s6367_s19  ;;  %395 = vrot.lane.b32.xlu1 %v6458_v6, %s6367_s19 }
  0x1e   : > { %397 = vrot.lane.b32.xlu0 %v6453_v4, %s6367_s19  ;;  %399 = vrot.lane.b32.xlu1 %v6461_v7, %s6367_s19 }
  0x22   : > { %503 = vrot.lane.b32.xlu0 %v6455_v5, %s6368_s20  ;;  %505 = vrot.lane.b32.xlu1 %v6458_v6, %s6368_s20 }
  0x26   : > { %507 = vrot.lane.b32.xlu0 %v6453_v4, %s6368_s20  ;;  %509 = vrot.lane.b32.xlu1 %v6461_v7, %s6368_s20  ;;  %s6384_s20 = smov 79  }
  0x2a   : > { %613 = vrot.lane.b32.xlu0 %v6455_v5, %s6369_s21  ;;  %615 = vrot.lane.b32.xlu1 %v6458_v6, %s6369_s21 }
  0x2e   : > { %617 = vrot.lane.b32.xlu0 %v6453_v4, %s6369_s21  ;;  %619 = vrot.lane.b32.xlu1 %v6461_v7, %s6369_s21 }
  0x32   : > { %723 = vrot.lane.b32.xlu0 %v6455_v5, %s6370_s22  ;;  %725 = vrot.lane.b32.xlu1 %v6458_v6, %s6370_s22 }
  0x36   : > { %727 = vrot.lane.b32.xlu0 %v6453_v4, %s6370_s22  ;;  %729 = vrot.lane.b32.xlu1 %v6461_v7, %s6370_s22 }
  0x3a   : > { %833 = vrot.lane.b32.xlu0 %v6455_v5, %s6371_s23  ;;  %835 = vrot.lane.b32.xlu1 %v6458_v6, %s6371_s23 }
  0x3e   : > { %837 = vrot.lane.b32.xlu0 %v6453_v4, %s6371_s23  ;;  %839 = vrot.lane.b32.xlu1 %v6461_v7, %s6371_s23 }
  0x42   : > { %943 = vrot.lane.b32.xlu0 %v6455_v5, %s6372_s24  ;;  %945 = vrot.lane.b32.xlu1 %v6458_v6, %s6372_s24 }
  0x46   : > { %947 = vrot.lane.b32.xlu0 %v6453_v4, %s6372_s24  ;;  %949 = vrot.lane.b32.xlu1 %v6461_v7, %s6372_s24 }
  0x4a   : > { %1053 = vrot.lane.b32.xlu0 %v6455_v5, %s6373_s25  ;;  %1055 = vrot.lane.b32.xlu1 %v6458_v6, %s6373_s25 }
  0x4e   : > { %1057 = vrot.lane.b32.xlu0 %v6453_v4, %s6373_s25  ;;  %1059 = vrot.lane.b32.xlu1 %v6461_v7, %s6373_s25 }
  0x52   : > { %1163 = vrot.lane.b32.xlu0 %v6455_v5, %s6374_s26  ;;  %1165 = vrot.lane.b32.xlu1 %v6458_v6, %s6374_s26 }
  0x56   : > { %1167 = vrot.lane.b32.xlu0 %v6453_v4, %s6374_s26  ;;  %1169 = vrot.lane.b32.xlu1 %v6461_v7, %s6374_s26  ;;  %s6385_s26 = smov 78  }
  0x5a   : > { %1273 = vrot.lane.b32.xlu0 %v6455_v5, %s6375_s27  ;;  %1275 = vrot.lane.b32.xlu1 %v6458_v6, %s6375_s27 }
  0x5e   : > { %1277 = vrot.lane.b32.xlu0 %v6453_v4, %s6375_s27  ;;  %1279 = vrot.lane.b32.xlu1 %v6461_v7, %s6375_s27 }
  0x62   : > { %1383 = vrot.lane.b32.xlu0 %v6455_v5, %s6376_s28  ;;  %1385 = vrot.lane.b32.xlu1 %v6458_v6, %s6376_s28 }
  0x66   : > { %1387 = vrot.lane.b32.xlu0 %v6453_v4, %s6376_s28  ;;  %1389 = vrot.lane.b32.xlu1 %v6461_v7, %s6376_s28 }
  0x6a   : > { %1493 = vrot.lane.b32.xlu0 %v6455_v5, %s6377_s29  ;;  %1495 = vrot.lane.b32.xlu1 %v6458_v6, %s6377_s29 }
  0x6e   : > { %1497 = vrot.lane.b32.xlu0 %v6453_v4, %s6377_s29  ;;  %1499 = vrot.lane.b32.xlu1 %v6461_v7, %s6377_s29  ;;  %s6386_s29 = smov 62  }
  0x72   : > { %1603 = vrot.lane.b32.xlu0 %v6455_v5, %s6378_s30  ;;  %1605 = vrot.lane.b32.xlu1 %v6458_v6, %s6378_s30 }
  0x76   : > { %1607 = vrot.lane.b32.xlu0 %v6453_v4, %s6378_s30  ;;  %1609 = vrot.lane.b32.xlu1 %v6461_v7, %s6378_s30 }
  0x7a   : > { %1713 = vrot.lane.b32.xlu0 %v6455_v5, %s6379_s4  ;;  %1715 = vrot.lane.b32.xlu1 %v6458_v6, %s6379_s4 }
  0x7e   : > { %1717 = vrot.lane.b32.xlu0 %v6453_v4, %s6379_s4  ;;  %1719 = vrot.lane.b32.xlu1 %v6461_v7, %s6379_s4 }
  0x82   : > { %1823 = vrot.lane.b32.xlu0 %v6455_v5, %s6380_s5  ;;  %1825 = vrot.lane.b32.xlu1 %v6458_v6, %s6380_s5 }
  0x84   : > { %v193_v8 = vpop.permute.xlu1 %192  ;;  %v189_v9 = vpop.permute.xlu0 %188 }
  0x86   : > { %1827 = vrot.lane.b32.xlu0 %v6453_v4, %s6380_s5  ;;  %1829 = vrot.lane.b32.xlu1 %v6461_v7, %s6380_s5  ;;  %s6387_s5 = smov 61  }
  0x88   : > { %v195_v10 = vpop.permute.xlu1 %194  ;;  %v191_v11 = vpop.permute.xlu0 %190 }
  0x89   : > { %v198_v12 = vsel %vm196_vm1, %v191_v11, %v193_v8  ;;  %v197_v13 = vsel %vm196_vm1, %v189_v9, %v191_v11  ;;  %v199_v14 = vsel %vm196_vm1, %v193_v8, %v195_v10  ;;  %v5712_v10 = vld [vmem:[%s7378_s1 + $0x14] sm:$0xf]  ;;  %vm1721_vm1 = vcmask 687104  }
  0x8a   : > { %5693 = vmatprep.subr.msk.bf16.mxu0 %vm204_vm2, %v198_v12  ;;  %v206_v16 = vsel %vm204_vm2, %v197_v13, 0  ;;  %v212_v17 = vsel %vm204_vm2, %v199_v14, 0  ;;  %1933 = vrot.lane.b32.xlu0 %v6455_v5, %s6381_s6 }
  0x8b   : > { %229 = vmatpush1.bf16.msra.mxu0 %v206_v16  ;;  %5993 = vmatpush3.bf16.msra.mxu1 %v212_v17 }
  0x8c   : > { %1935 = vrot.lane.b32.xlu1 %v6458_v6, %s6381_s6  ;;  %5697 = vmatprep.subr.msk.bf16.mxu0 %vm204_vm2, %v6458_v6  ;;  %v394_v19 = vpop.permute.xlu0 %393  ;;  %v396_v21 = vpop.permute.xlu1 %395 }
  0x8d   : > { %5998 = vmatprep.subr.bf16.mxu1 %v6363_v0  ;;  %v402_v25 = vsel %vm401_vm4, %v394_v19, %v396_v21 }
  0x8e   : > { %5995 = vmatmul.mubr.msk.bf16.vlgmr.msra.gmra.mxu1 %vm200_vm3, %v5688_v18  ;;  %5694 = vmatmul.mubr.msk.bf16.vlgmr.msra.gmra.mxu0 %vm200_vm3, %v5688_v18  ;;  %v409_v30 = vsel %vm204_vm2, %v402_v25, 0 }
  0x8f   : > { %325 = vmatpush1.bf16.msra.mxu0 %v302_v20  ;;  %1937 = vrot.lane.b32.xlu0 %v6453_v4, %s6381_s6  ;;  %v5716_v20 = vld [vmem:[%s7378_s1 + $0x18] sm:$0xf] }
  0x90   : > { %1939 = vrot.lane.b32.xlu1 %v6461_v7, %s6381_s6  ;;  %5999 = vmatpush3.bf16.msra.mxu1 %v308_v22  ;;  %v398_v23 = vpop.permute.xlu0 %397  ;;  %v400_v24 = vpop.permute.xlu1 %399 }
  0x91   : > { %v404_v26 = vsel %vm401_vm4, %v398_v23, %v400_v24  ;;  %6000 = vmatprep.mubr.msk.bf16.mxu1 %vm6365_vm0, %v6363_v0  ;;  %342 = vmatprep.mubr.bf16.mxu0 %v6364_v1  ;;  %v403_v27 = vsel %vm401_vm4, %v396_v21, %v398_v23  ;;  %vm1831_vm4 = vcmask 678912  }
  0x92   : > { %5701 = vmatprep.subr.msk.bf16.mxu0 %vm204_vm2, %v403_v27  ;;  %6004 = vmatprep.subr.bf16.mxu1 %v6363_v0  ;;  %v415_v29 = vsel %vm204_vm2, %v404_v26, 0 }
  0x93   : > { %2043 = vrot.lane.b32.xlu0 %v6455_v5, %s6382_s9 }
  0x94   : > { %2045 = vrot.lane.b32.xlu1 %v6458_v6, %s6382_s9  ;;  %v504_v31 = vpop.permute.xlu0 %503  ;;  %v506_v32 = vpop.permute.xlu1 %505 }
  0x95   : > { %v512_v35 = vsel %vm511_vm5, %v504_v31, %v506_v32 }
  0x96   : > { %6001 = vmatmul.mubr.msk.bf16.vlgmr.msra.gmra.mxu1 %vm200_vm3, %v174_v28  ;;  %5698 = vmatmul.mubr.msk.bf16.vlgmr.msra.gmra.mxu0 %vm200_vm3, %v174_v28  ;;  %v519_v40 = vsel %vm204_vm2, %v512_v35, 0 }
  0x97   : > { %432 = vmatpush1.bf16.msra.mxu0 %v409_v30  ;;  %6005 = vmatpush3.bf16.msra.mxu1 %v415_v29  ;;  %v5720_v30 = vld [vmem:[%s7378_s1 + $0x1c] sm:$0xf] }
  0x98   : > { %2047 = vrot.lane.b32.xlu0 %v6453_v4, %s6382_s9  ;;  %2049 = vrot.lane.b32.xlu1 %v6461_v7, %s6382_s9  ;;  %v508_v33 = vpop.permute.xlu0 %507  ;;  %v510_v34 = vpop.permute.xlu1 %509 }
  0x99   : > { %v514_v36 = vsel %vm511_vm5, %v508_v33, %v510_v34  ;;  %6006 = vmatprep.mubr.msk.bf16.mxu1 %vm6365_vm0, %v6363_v0  ;;  %449 = vmatprep.mubr.bf16.mxu0 %v6364_v1  ;;  %v513_v37 = vsel %vm511_vm5, %v506_v32, %v508_v33  ;;  %vm1941_vm5 = vcmask 670720  }
  0x9a   : > { %5705 = vmatprep.subr.msk.bf16.mxu0 %vm204_vm2, %v513_v37  ;;  %6010 = vmatprep.subr.bf16.mxu1 %v6363_v0  ;;  %v525_v39 = vsel %vm204_vm2, %v514_v36, 0 }
  0x9c   : > { %2153 = vrot.lane.b32.xlu0 %v6455_v5, %s6383_s16  ;;  %2155 = vrot.lane.b32.xlu1 %v6458_v6, %s6383_s16  ;;  %v614_v41 = vpop.permute.xlu0 %613  ;;  %v616_v42 = vpop.permute.xlu1 %615 }
  0x9d   : > { %v622_v45 = vsel %vm621_vm6, %v614_v41, %v616_v42 }
  0x9e   : > { %5702 = vmatmul.mubr.msk.bf16.vlgmr.msra.gmra.mxu0 %vm200_vm3, %v5700_v38  ;;  %6007 = vmatmul.mubr.msk.bf16.vlgmr.msra.gmra.mxu1 %vm200_vm3, %v5700_v38  ;;  %v629_v50 = vsel %vm204_vm2, %v622_v45, 0 }
  0x9f   : > { %542 = vmatpush1.bf16.msra.mxu0 %v519_v40  ;;  %6011 = vmatpush3.bf16.msra.mxu1 %v525_v39  ;;  %v5724_v40 = vld [vmem:[%s7378_s1 + $0x20] sm:$0xf] }
  0xa0   : > { %2157 = vrot.lane.b32.xlu0 %v6453_v4, %s6383_s16  ;;  %2159 = vrot.lane.b32.xlu1 %v6461_v7, %s6383_s16  ;;  %v618_v43 = vpop.permute.xlu0 %617  ;;  %v620_v44 = vpop.permute.xlu1 %619  ;;  %s6390_s16 = smov 58  }
  0xa1   : > { %v624_v46 = vsel %vm621_vm6, %v618_v43, %v620_v44  ;;  %559 = vmatprep.mubr.bf16.mxu0 %v6364_v1  ;;  %6012 = vmatprep.mubr.msk.bf16.mxu1 %vm6365_vm0, %v6363_v0  ;;  %v623_v47 = vsel %vm621_vm6, %v616_v42, %v618_v43 }
  0xa2   : > { %5709 = vmatprep.subr.msk.bf16.mxu0 %vm204_vm2, %v623_v47  ;;  %6016 = vmatprep.subr.bf16.mxu1 %v6363_v0  ;;  %v635_v49 = vsel %vm204_vm2, %v624_v46, 0 }
  0xa4   : > { %2263 = vrot.lane.b32.xlu0 %v6455_v5, %s6384_s20  ;;  %2265 = vrot.lane.b32.xlu1 %v6458_v6, %s6384_s20  ;;  %v724_v51 = vpop.permute.xlu0 %723  ;;  %v726_v52 = vpop.permute.xlu1 %725 }
  0xa5   : > { %v732_v55 = vsel %vm731_vm7, %v724_v51, %v726_v52 }
  0xa6   : > { %5706 = vmatmul.mubr.msk.bf16.vlgmr.msra.gmra.mxu0 %vm200_vm3, %v5704_v48  ;;  %6013 = vmatmul.mubr.msk.bf16.vlgmr.msra.gmra.mxu1 %vm200_vm3, %v5704_v48  ;;  %v739_v60 = vsel %vm204_vm2, %v732_v55, 0 }
  0xa7   : > { %652 = vmatpush1.bf16.msra.mxu0 %v629_v50  ;;  %6017 = vmatpush3.bf16.msra.mxu1 %v635_v49  ;;  %v5728_v50 = vld [vmem:[%s7378_s1 + $0x24] sm:$0xf] }
  0xa8   : > { %2267 = vrot.lane.b32.xlu0 %v6453_v4, %s6384_s20  ;;  %2269 = vrot.lane.b32.xlu1 %v6461_v7, %s6384_s20  ;;  %v728_v53 = vpop.permute.xlu0 %727  ;;  %v730_v54 = vpop.permute.xlu1 %729  ;;  %s6391_s20 = smov 57  }
  0xa9   : > { %v734_v56 = vsel %vm731_vm7, %v728_v53, %v730_v54  ;;  %669 = vmatprep.mubr.bf16.mxu0 %v6364_v1  ;;  %6018 = vmatprep.mubr.msk.bf16.mxu1 %vm6365_vm0, %v6363_v0  ;;  %v733_v57 = vsel %vm731_vm7, %v726_v52, %v728_v53 }
  0xaa   : > { %5713 = vmatprep.subr.msk.bf16.mxu0 %vm204_vm2, %v733_v57  ;;  %6022 = vmatprep.subr.bf16.mxu1 %v6363_v0  ;;  %v745_v59 = vsel %vm204_vm2, %v734_v56, 0 }
  0xac   : > { %2373 = vrot.lane.b32.xlu0 %v6455_v5, %s6385_s26  ;;  %2375 = vrot.lane.b32.xlu1 %v6458_v6, %s6385_s26  ;;  %v834_v61 = vpop.permute.xlu0 %833  ;;  %v836_v62 = vpop.permute.xlu1 %835 }
  0xad   : > { %v842_v3 = vsel %vm841_vm8, %v834_v61, %v836_v62 }
  0xae   : > { %5710 = vmatmul.mubr.msk.bf16.vlgmr.msra.gmra.mxu0 %vm200_vm3, %v5708_v58  ;;  %6019 = vmatmul.mubr.msk.bf16.vlgmr.msra.gmra.mxu1 %vm200_vm3, %v5708_v58  ;;  %v849_v12 = vsel %vm204_vm2, %v842_v3, 0 }
  0xaf   : > { %762 = vmatpush1.bf16.msra.mxu0 %v739_v60  ;;  %6023 = vmatpush3.bf16.msra.mxu1 %v745_v59  ;;  %v5732_v60 = vld [vmem:[%s7378_s1 + $0x28] sm:$0xf] }
  0xb0   : > { %2377 = vrot.lane.b32.xlu0 %v6453_v4, %s6385_s26  ;;  %2379 = vrot.lane.b32.xlu1 %v6461_v7, %s6385_s26  ;;  %v838_v63 = vpop.permute.xlu0 %837  ;;  %v840_v2 = vpop.permute.xlu1 %839  ;;  %s6392_s26 = smov 56  }
  0xb1   : > { %v844_v8 = vsel %vm841_vm8, %v838_v63, %v840_v2  ;;  %779 = vmatprep.mubr.bf16.mxu0 %v6364_v1  ;;  %6024 = vmatprep.mubr.msk.bf16.mxu1 %vm6365_vm0, %v6363_v0  ;;  %v843_v9 = vsel %vm841_vm8, %v836_v62, %v838_v63 }
  0xb2   : > { %5717 = vmatprep.subr.msk.bf16.mxu0 %vm204_vm2, %v843_v9  ;;  %6028 = vmatprep.subr.bf16.mxu1 %v6363_v0  ;;  %v855_v11 = vsel %vm204_vm2, %v844_v8, 0 }
  0xb4   : > { %2483 = vrot.lane.b32.xlu0 %v6455_v5, %s6386_s29  ;;  %2485 = vrot.lane.b32.xlu1 %v6458_v6, %s6386_s29  ;;  %v944_v13 = vpop.permute.xlu0 %943  ;;  %v946_v14 = vpop.permute.xlu1 %945 }
  0xb5   : > { %v952_v17 = vsel %vm951_vm9, %v944_v13, %v946_v14 }
  0xb6   : > { %5714 = vmatmul.mubr.msk.bf16.vlgmr.msra.gmra.mxu0 %vm200_vm3, %v5712_v10  ;;  %6025 = vmatmul.mubr.msk.bf16.vlgmr.msra.gmra.mxu1 %vm200_vm3, %v5712_v10  ;;  %v959_v22 = vsel %vm204_vm2, %v952_v17, 0 }
  0xb7   : > { %872 = vmatpush1.bf16.msra.mxu0 %v849_v12  ;;  %6029 = vmatpush3.bf16.msra.mxu1 %v855_v11  ;;  %v5736_v12 = vld [vmem:[%s7378_s1 + $0x2c] sm:$0xf] }
  0xb8   : > { %2487 = vrot.lane.b32.xlu0 %v6453_v4, %s6386_s29  ;;  %2489 = vrot.lane.b32.xlu1 %v6461_v7, %s6386_s29  ;;  %v948_v15 = vpop.permute.xlu0 %947  ;;  %v950_v16 = vpop.permute.xlu1 %949  ;;  %s6393_s29 = smov 40  }
  0xb9   : > { %v954_v18 = vsel %vm951_vm9, %v948_v15, %v950_v16  ;;  %889 = vmatprep.mubr.bf16.mxu0 %v6364_v1  ;;  %6030 = vmatprep.mubr.msk.bf16.mxu1 %vm6365_vm0, %v6363_v0  ;;  %v953_v19 = vsel %vm951_vm9, %v946_v14, %v948_v15  ;;  %vm2051_vm9 = vcmask 662528  }
  0xba   : > { %5721 = vmatprep.subr.msk.bf16.mxu0 %vm204_vm2, %v953_v19  ;;  %6034 = vmatprep.subr.bf16.mxu1 %v6363_v0  ;;  %v965_v21 = vsel %vm204_vm2, %v954_v18, 0 }
  0xbc   : > { %2593 = vrot.lane.b32.xlu0 %v6455_v5, %s6387_s5  ;;  %2595 = vrot.lane.b32.xlu1 %v6458_v6, %s6387_s5  ;;  %v1054_v23 = vpop.permute.xlu0 %1053  ;;  %v1056_v24 = vpop.permute.xlu1 %1055 }
  0xbd   : > { %v1062_v27 = vsel %vm1061_vm10, %v1054_v23, %v1056_v24 }
  0xbe   : > { %5718 = vmatmul.mubr.msk.bf16.vlgmr.msra.gmra.mxu0 %vm200_vm3, %v5716_v20  ;;  %6031 = vmatmul.mubr.msk.bf16.vlgmr.msra.gmra.mxu1 %vm200_vm3, %v5716_v20  ;;  %v1069_v32 = vsel %vm204_vm2, %v1062_v27, 0 }
  0xbf   : > { %982 = vmatpush1.bf16.msra.mxu0 %v959_v22  ;;  %6035 = vmatpush3.bf16.msra.mxu1 %v965_v21  ;;  %v5740_v22 = vld [vmem:[%s7378_s1 + $0x30] sm:$0xf] }
  0xc0   : > { %2597 = vrot.lane.b32.xlu0 %v6453_v4, %s6387_s5  ;;  %2599 = vrot.lane.b32.xlu1 %v6461_v7, %s6387_s5  ;;  %v1058_v25 = vpop.permute.xlu0 %1057  ;;  %v1060_v26 = vpop.permute.xlu1 %1059  ;;  %s6394_s5 = smov 39  }
  0xc1   : > { %v1064_v28 = vsel %vm1061_vm10, %v1058_v25, %v1060_v26  ;;  %999 = vmatprep.mubr.bf16.mxu0 %v6364_v1  ;;  %6036 = vmatprep.mubr.msk.bf16.mxu1 %vm6365_vm0, %v6363_v0  ;;  %v1063_v29 = vsel %vm1061_vm10, %v1056_v24, %v1058_v25  ;;  %vm2161_vm10 = vcmask 654336  }
  0xc2   : > { %5725 = vmatprep.subr.msk.bf16.mxu0 %vm204_vm2, %v1063_v29  ;;  %6040 = vmatprep.subr.bf16.mxu1 %v6363_v0  ;;  %v1075_v31 = vsel %vm204_vm2, %v1064_v28, 0 }
  0xc4   : > { %2703 = vrot.lane.b32.xlu0 %v6455_v5, %s6388_s8  ;;  %2705 = vrot.lane.b32.xlu1 %v6458_v6, %s6388_s8  ;;  %v1164_v33 = vpop.permute.xlu0 %1163  ;;  %v1166_v34 = vpop.permute.xlu1 %1165 }
  0xc5   : > { %v1172_v37 = vsel %vm1171_vm11, %v1164_v33, %v1166_v34 }
  0xc6   : > { %5722 = vmatmul.mubr.msk.bf16.vlgmr.msra.gmra.mxu0 %vm200_vm3, %v5720_v30  ;;  %6037 = vmatmul.mubr.msk.bf16.vlgmr.msra.gmra.mxu1 %vm200_vm3, %v5720_v30  ;;  %v1179_v42 = vsel %vm204_vm2, %v1172_v37, 0 }
  0xc7   : > { %1092 = vmatpush1.bf16.msra.mxu0 %v1069_v32  ;;  %6041 = vmatpush3.bf16.msra.mxu1 %v1075_v31  ;;  %v5744_v32 = vld [vmem:[%s7378_s1 + $0x34] sm:$0xf] }
  0xc8   : > { %2707 = vrot.lane.b32.xlu0 %v6453_v4, %s6388_s8  ;;  %2709 = vrot.lane.b32.xlu1 %v6461_v7, %s6388_s8  ;;  %v1168_v35 = vpop.permute.xlu0 %1167  ;;  %v1170_v36 = vpop.permute.xlu1 %1169  ;;  %s6395_s8 = smov 38  }
  0xc9   : > { %v1174_v38 = vsel %vm1171_vm11, %v1168_v35, %v1170_v36  ;;  %1109 = vmatprep.mubr.bf16.mxu0 %v6364_v1  ;;  %6042 = vmatprep.mubr.msk.bf16.mxu1 %vm6365_vm0, %v6363_v0  ;;  %v1173_v39 = vsel %vm1171_vm11, %v1166_v34, %v1168_v35  ;;  %vm2271_vm11 = vcmask 646144  }
  0xca   : > { %5729 = vmatprep.subr.msk.bf16.mxu0 %vm204_vm2, %v1173_v39  ;;  %6046 = vmatprep.subr.bf16.mxu1 %v6363_v0  ;;  %v1185_v41 = vsel %vm204_vm2, %v1174_v38, 0 }
  0xcc   : > { %2813 = vrot.lane.b32.xlu0 %v6455_v5, %s6389_s11  ;;  %2815 = vrot.lane.b32.xlu1 %v6458_v6, %s6389_s11  ;;  %v1274_v43 = vpop.permute.xlu0 %1273  ;;  %v1276_v44 = vpop.permute.xlu1 %1275 }
  0xcd   : > { %v1282_v47 = vsel %vm1281_vm12, %v1274_v43, %v1276_v44 }
  0xce   : > { %5726 = vmatmul.mubr.msk.bf16.vlgmr.msra.gmra.mxu0 %vm200_vm3, %v5724_v40  ;;  %6043 = vmatmul.mubr.msk.bf16.vlgmr.msra.gmra.mxu1 %vm200_vm3, %v5724_v40  ;;  %v1289_v52 = vsel %vm204_vm2, %v1282_v47, 0 }
  0xcf   : > { %1202 = vmatpush1.bf16.msra.mxu0 %v1179_v42  ;;  %6047 = vmatpush3.bf16.msra.mxu1 %v1185_v41  ;;  %v5748_v42 = vld [vmem:[%s7378_s1 + $0x38] sm:$0xf] }
  0xd0   : > { %2817 = vrot.lane.b32.xlu0 %v6453_v4, %s6389_s11  ;;  %2819 = vrot.lane.b32.xlu1 %v6461_v7, %s6389_s11  ;;  %v1278_v45 = vpop.permute.xlu0 %1277  ;;  %v1280_v46 = vpop.permute.xlu1 %1279  ;;  %s6396_s11 = smov 37  }
  0xd1   : > { %v1284_v48 = vsel %vm1281_vm12, %v1278_v45, %v1280_v46  ;;  %1219 = vmatprep.mubr.bf16.mxu0 %v6364_v1  ;;  %6048 = vmatprep.mubr.msk.bf16.mxu1 %vm6365_vm0, %v6363_v0  ;;  %v1283_v49 = vsel %vm1281_vm12, %v1276_v44, %v1278_v45  ;;  %vm2381_vm12 = vcmask 637952  }
  0xd2   : > { %5733 = vmatprep.subr.msk.bf16.mxu0 %vm204_vm2, %v1283_v49  ;;  %6052 = vmatprep.subr.bf16.mxu1 %v6363_v0  ;;  %v1295_v51 = vsel %vm204_vm2, %v1284_v48, 0 }
  0xd4   : > { %2923 = vrot.lane.b32.xlu0 %v6455_v5, %s6390_s16  ;;  %2925 = vrot.lane.b32.xlu1 %v6458_v6, %s6390_s16  ;;  %v1384_v53 = vpop.permute.xlu0 %1383  ;;  %v1386_v54 = vpop.permute.xlu1 %1385 }
  0xd5   : > { %v1392_v57 = vsel %vm1391_vm13, %v1384_v53, %v1386_v54 }
  0xd6   : > { %5730 = vmatmul.mubr.msk.bf16.vlgmr.msra.gmra.mxu0 %vm200_vm3, %v5728_v50  ;;  %6049 = vmatmul.mubr.msk.bf16.vlgmr.msra.gmra.mxu1 %vm200_vm3, %v5728_v50  ;;  %v1399_v62 = vsel %vm204_vm2, %v1392_v57, 0 }
  0xd7   : > { %1312 = vmatpush1.bf16.msra.mxu0 %v1289_v52  ;;  %6053 = vmatpush3.bf16.msra.mxu1 %v1295_v51  ;;  %v5752_v52 = vld [vmem:[%s7378_s1 + $0x3c] sm:$0xf] }
  0xd8   : > { %2927 = vrot.lane.b32.xlu0 %v6453_v4, %s6390_s16  ;;  %2929 = vrot.lane.b32.xlu1 %v6461_v7, %s6390_s16  ;;  %v1388_v55 = vpop.permute.xlu0 %1387  ;;  %v1390_v56 = vpop.permute.xlu1 %1389  ;;  %s6397_s16 = smov 36  }
  0xd9   : > { %v1394_v58 = vsel %vm1391_vm13, %v1388_v55, %v1390_v56  ;;  %1329 = vmatprep.mubr.bf16.mxu0 %v6364_v1  ;;  %6054 = vmatprep.mubr.msk.bf16.mxu1 %vm6365_vm0, %v6363_v0  ;;  %v1393_v59 = vsel %vm1391_vm13, %v1386_v54, %v1388_v55  ;;  %vm2491_vm13 = vcmask 506880  }
  0xda   : > { %5737 = vmatprep.subr.msk.bf16.mxu0 %vm204_vm2, %v1393_v59  ;;  %6058 = vmatprep.subr.bf16.mxu1 %v6363_v0  ;;  %v1405_v61 = vsel %vm204_vm2, %v1394_v58, 0 }
  0xdc   : > { %3033 = vrot.lane.b32.xlu0 %v6455_v5, %s6391_s20  ;;  %3035 = vrot.lane.b32.xlu1 %v6458_v6, %s6391_s20  ;;  %v1494_v63 = vpop.permute.xlu0 %1493  ;;  %v1496_v2 = vpop.permute.xlu1 %1495 }
  0xdd   : > { %v1502_v9 = vsel %vm1501_vm14, %v1494_v63, %v1496_v2 }
  0xde   : > { %5734 = vmatmul.mubr.msk.bf16.vlgmr.msra.gmra.mxu0 %vm200_vm3, %v5732_v60  ;;  %6055 = vmatmul.mubr.msk.bf16.vlgmr.msra.gmra.mxu1 %vm200_vm3, %v5732_v60  ;;  %v1509_v14 = vsel %vm204_vm2, %v1502_v9, 0 }
  0xdf   : > { %1422 = vmatpush1.bf16.msra.mxu0 %v1399_v62  ;;  %6059 = vmatpush3.bf16.msra.mxu1 %v1405_v61  ;;  %v5756_v62 = vld [vmem:[%s7378_s1 + $0x40] sm:$0xf] }
  0xe0   : > { %3037 = vrot.lane.b32.xlu0 %v6453_v4, %s6391_s20  ;;  %3039 = vrot.lane.b32.xlu1 %v6461_v7, %s6391_s20  ;;  %v1498_v3 = vpop.permute.xlu0 %1497  ;;  %v1500_v8 = vpop.permute.xlu1 %1499  ;;  %s6398_s20 = smov 35  }
  0xe1   : > { %v1504_v10 = vsel %vm1501_vm14, %v1498_v3, %v1500_v8  ;;  %1439 = vmatprep.mubr.bf16.mxu0 %v6364_v1  ;;  %6060 = vmatprep.mubr.msk.bf16.mxu1 %vm6365_vm0, %v6363_v0  ;;  %v1503_v11 = vsel %vm1501_vm14, %v1496_v2, %v1498_v3  ;;  %vm2601_vm14 = vcmask 498688  }
  0xe2   : > { %5741 = vmatprep.subr.msk.bf16.mxu0 %vm204_vm2, %v1503_v11  ;;  %6064 = vmatprep.subr.bf16.mxu1 %v6363_v0  ;;  %v1515_v13 = vsel %vm204_vm2, %v1504_v10, 0 }
  0xe4   : > { %3143 = vrot.lane.b32.xlu0 %v6455_v5, %s6392_s26  ;;  %3145 = vrot.lane.b32.xlu1 %v6458_v6, %s6392_s26  ;;  %v1604_v15 = vpop.permute.xlu0 %1603  ;;  %v1606_v16 = vpop.permute.xlu1 %1605 }
  0xe5   : > { %v1612_v19 = vsel %vm1611_vm15, %v1604_v15, %v1606_v16 }
  0xe6   : > { %5738 = vmatmul.mubr.msk.bf16.vlgmr.msra.gmra.mxu0 %vm200_vm3, %v5736_v12  ;;  %6061 = vmatmul.mubr.msk.bf16.vlgmr.msra.gmra.mxu1 %vm200_vm3, %v5736_v12  ;;  %v1619_v24 = vsel %vm204_vm2, %v1612_v19, 0 }
  0xe7   : > { %1532 = vmatpush1.bf16.msra.mxu0 %v1509_v14  ;;  %6065 = vmatpush3.bf16.msra.mxu1 %v1515_v13  ;;  %v5760_v14 = vld [vmem:[%s7378_s1 + $0x44] sm:$0xf] }
  0xe8   : > { %3147 = vrot.lane.b32.xlu0 %v6453_v4, %s6392_s26  ;;  %3149 = vrot.lane.b32.xlu1 %v6461_v7, %s6392_s26  ;;  %v1608_v17 = vpop.permute.xlu0 %1607  ;;  %v1610_v18 = vpop.permute.xlu1 %1609  ;;  %s6399_s26 = smov 34  }
  0xe9   : > { %v1614_v20 = vsel %vm1611_vm15, %v1608_v17, %v1610_v18  ;;  %1549 = vmatprep.mubr.bf16.mxu0 %v6364_v1  ;;  %6066 = vmatprep.mubr.msk.bf16.mxu1 %vm6365_vm0, %v6363_v0  ;;  %v1613_v21 = vsel %vm1611_vm15, %v1606_v16, %v1608_v17  ;;  %vm2711_vm15 = vcmask 490496  }
  0xea   : > { %5745 = vmatprep.subr.msk.bf16.mxu0 %vm204_vm2, %v1613_v21  ;;  %6070 = vmatprep.subr.bf16.mxu1 %v6363_v0  ;;  %v1625_v23 = vsel %vm204_vm2, %v1614_v20, 0 }
  0xec   : > { %3253 = vrot.lane.b32.xlu0 %v6455_v5, %s6393_s29  ;;  %3255 = vrot.lane.b32.xlu1 %v6458_v6, %s6393_s29  ;;  %v1714_v25 = vpop.permute.xlu0 %1713  ;;  %v1716_v26 = vpop.permute.xlu1 %1715 }
  0xed   : > { %v1722_v29 = vsel %vm1721_vm1, %v1714_v25, %v1716_v26 }
  0xee   : > { %5742 = vmatmul.mubr.msk.bf16.vlgmr.msra.gmra.mxu0 %vm200_vm3, %v5740_v22  ;;  %6067 = vmatmul.mubr.msk.bf16.vlgmr.msra.gmra.mxu1 %vm200_vm3, %v5740_v22  ;;  %v1729_v34 = vsel %vm204_vm2, %v1722_v29, 0 }
  0xef   : > { %1642 = vmatpush1.bf16.msra.mxu0 %v1619_v24  ;;  %6071 = vmatpush3.bf16.msra.mxu1 %v1625_v23  ;;  %v5764_v24 = vld [vmem:[%s7378_s1 + $0x48] sm:$0xf] }
  0xf0   : > { %3257 = vrot.lane.b32.xlu0 %v6453_v4, %s6393_s29  ;;  %3259 = vrot.lane.b32.xlu1 %v6461_v7, %s6393_s29  ;;  %v1718_v27 = vpop.permute.xlu0 %1717  ;;  %v1720_v28 = vpop.permute.xlu1 %1719  ;;  %s6400_s29 = smov 18  }
  0xf1   : > { %v1724_v30 = vsel %vm1721_vm1, %v1718_v27, %v1720_v28  ;;  %1659 = vmatprep.mubr.bf16.mxu0 %v6364_v1  ;;  %6072 = vmatprep.mubr.msk.bf16.mxu1 %vm6365_vm0, %v6363_v0  ;;  %v1723_v31 = vsel %vm1721_vm1, %v1716_v26, %v1718_v27  ;;  %vm2821_vm1 = vcmask 482304  }
  0xf2   : > { %5749 = vmatprep.subr.msk.bf16.mxu0 %vm204_vm2, %v1723_v31  ;;  %6076 = vmatprep.subr.bf16.mxu1 %v6363_v0  ;;  %v1735_v33 = vsel %vm204_vm2, %v1724_v30, 0 }
  0xf4   : > { %3363 = vrot.lane.b32.xlu0 %v6455_v5, %s6394_s5  ;;  %3365 = vrot.lane.b32.xlu1 %v6458_v6, %s6394_s5  ;;  %v1824_v35 = vpop.permute.xlu0 %1823  ;;  %v1826_v36 = vpop.permute.xlu1 %1825 }
  0xf5   : > { %v1832_v39 = vsel %vm1831_vm4, %v1824_v35, %v1826_v36 }
  0xf6   : > { %5746 = vmatmul.mubr.msk.bf16.vlgmr.msra.gmra.mxu0 %vm200_vm3, %v5744_v32  ;;  %6073 = vmatmul.mubr.msk.bf16.vlgmr.msra.gmra.mxu1 %vm200_vm3, %v5744_v32  ;;  %v1839_v44 = vsel %vm204_vm2, %v1832_v39, 0 }
  0xf7   : > { %1752 = vmatpush1.bf16.msra.mxu0 %v1729_v34  ;;  %6077 = vmatpush3.bf16.msra.mxu1 %v1735_v33  ;;  %v5768_v34 = vld [vmem:[%s7378_s1 + $0x4c] sm:$0xf] }
  0xf8   : > { %3367 = vrot.lane.b32.xlu0 %v6453_v4, %s6394_s5  ;;  %3369 = vrot.lane.b32.xlu1 %v6461_v7, %s6394_s5  ;;  %v1828_v37 = vpop.permute.xlu0 %1827  ;;  %v1830_v38 = vpop.permute.xlu1 %1829  ;;  %s6401_s5 = smov 17  }
  0xf9   : > { %v1834_v40 = vsel %vm1831_vm4, %v1828_v37, %v1830_v38  ;;  %1769 = vmatprep.mubr.bf16.mxu0 %v6364_v1  ;;  %6078 = vmatprep.mubr.msk.bf16.mxu1 %vm6365_vm0, %v6363_v0  ;;  %v1833_v41 = vsel %vm1831_vm4, %v1826_v36, %v1828_v37  ;;  %vm2931_vm4 = vcmask 474112  }
  0xfa   : > { %5753 = vmatprep.subr.msk.bf16.mxu0 %vm204_vm2, %v1833_v41  ;;  %6082 = vmatprep.subr.bf16.mxu1 %v6363_v0  ;;  %v1845_v43 = vsel %vm204_vm2, %v1834_v40, 0 }
  0xfc   : > { %3473 = vrot.lane.b32.xlu0 %v6455_v5, %s6395_s8  ;;  %3475 = vrot.lane.b32.xlu1 %v6458_v6, %s6395_s8  ;;  %v1934_v45 = vpop.permute.xlu0 %1933 }
  0xfe   : > { %5750 = vmatmul.mubr.msk.bf16.vlgmr.msra.gmra.mxu0 %vm200_vm3, %v5748_v42  ;;  %6079 = vmatmul.mubr.msk.bf16.vlgmr.msra.gmra.mxu1 %vm200_vm3, %v5748_v42  ;;  %v1936_v46 = vpop.permute.xlu1 %1935 }
  0xff   : > { %1862 = vmatpush1.bf16.msra.mxu0 %v1839_v44  ;;  %6083 = vmatpush3.bf16.msra.mxu1 %v1845_v43  ;;  %v1942_v47 = vsel %vm1941_vm5, %v1934_v45, %v1936_v46  ;;  %v5772_v44 = vld [vmem:[%s7378_s1 + $0x50] sm:$0xf] }
 0x100   : > { %3477 = vrot.lane.b32.xlu0 %v6453_v4, %s6395_s8  ;;  %3479 = vrot.lane.b32.xlu1 %v6461_v7, %s6395_s8  ;;  %v1949_v54 = vsel %vm204_vm2, %v1942_v47, 0  ;;  %s6402_s8 = smov 16  }
 0x101   : > { %v1938_v48 = vpop.permute.xlu0 %1937  ;;  %1879 = vmatprep.mubr.bf16.mxu0 %v6364_v1  ;;  %6084 = vmatprep.mubr.msk.bf16.mxu1 %vm6365_vm0, %v6363_v0 }
 0x102   : > { %v1940_v49 = vpop.permute.xlu1 %1939  ;;  %v1943_v50 = vsel %vm1941_vm5, %v1936_v46, %v1938_v48  ;;  %6088 = vmatprep.subr.bf16.mxu1 %v6363_v0 }
 0x103   : > { %v1944_v51 = vsel %vm1941_vm5, %v1938_v48, %v1940_v49  ;;  %5757 = vmatprep.subr.msk.bf16.mxu0 %vm204_vm2, %v1943_v50  ;;  %vm3041_vm5 = vcmask 465920  }
 0x104   : > { %v1955_v53 = vsel %vm204_vm2, %v1944_v51, 0  ;;  %3583 = vrot.lane.b32.xlu0 %v6455_v5, %s6396_s11  ;;  %3585 = vrot.lane.b32.xlu1 %v6458_v6, %s6396_s11 }
 0x105   : > { %v2044_v55 = vpop.permute.xlu0 %2043 }
 0x106   : > { %5754 = vmatmul.mubr.msk.bf16.vlgmr.msra.gmra.mxu0 %vm200_vm3, %v5752_v52  ;;  %6085 = vmatmul.mubr.msk.bf16.vlgmr.msra.gmra.mxu1 %vm200_vm3, %v5752_v52  ;;  %v2046_v56 = vpop.permute.xlu1 %2045 }
 0x107   : > { %1972 = vmatpush1.bf16.msra.mxu0 %v1949_v54  ;;  %6089 = vmatpush3.bf16.msra.mxu1 %v1955_v53  ;;  %v2052_v57 = vsel %vm2051_vm9, %v2044_v55, %v2046_v56  ;;  %v5776_v54 = vld [vmem:[%s7378_s1 + $0x54] sm:$0xf] }
 0x108   : > { %3587 = vrot.lane.b32.xlu0 %v6453_v4, %s6396_s11  ;;  %3589 = vrot.lane.b32.xlu1 %v6461_v7, %s6396_s11  ;;  %v2059_v2 = vsel %vm204_vm2, %v2052_v57, 0  ;;  %s6403_s11 = smov 15  }
 0x109   : > { %1989 = vmatprep.mubr.bf16.mxu0 %v6364_v1  ;;  %6090 = vmatprep.mubr.msk.bf16.mxu1 %vm6365_vm0, %v6363_v0 }
 0x10a   : > { %v2048_v58 = vpop.permute.xlu0 %2047  ;;  %v2050_v59 = vpop.permute.xlu1 %2049  ;;  %6094 = vmatprep.subr.bf16.mxu1 %v6363_v0 }
 0x10b   : > { %v2054_v60 = vsel %vm2051_vm9, %v2048_v58, %v2050_v59  ;;  %v2053_v61 = vsel %vm2051_vm9, %v2046_v56, %v2048_v58  ;;  %vm3151_vm9 = vcmask 457728  }
 0x10c   : > { %v2065_v63 = vsel %vm204_vm2, %v2054_v60, 0  ;;  %3693 = vrot.lane.b32.xlu0 %v6455_v5, %s6397_s16  ;;  %5761 = vmatprep.subr.msk.bf16.mxu0 %vm204_vm2, %v2053_v61 }
 0x10d   : > { %3695 = vrot.lane.b32.xlu1 %v6458_v6, %s6397_s16 }
 0x10e   : > { %5758 = vmatmul.mubr.msk.bf16.vlgmr.msra.gmra.mxu0 %vm200_vm3, %v5756_v62  ;;  %6091 = vmatmul.mubr.msk.bf16.vlgmr.msra.gmra.mxu1 %vm200_vm3, %v5756_v62  ;;  %v2154_v3 = vpop.permute.xlu0 %2153  ;;  %v2156_v8 = vpop.permute.xlu1 %2155 }
 0x10f   : > { %2082 = vmatpush1.bf16.msra.mxu0 %v2059_v2  ;;  %6095 = vmatpush3.bf16.msra.mxu1 %v2065_v63  ;;  %v2162_v9 = vsel %vm2161_vm10, %v2154_v3, %v2156_v8  ;;  %v5780_v2 = vld [vmem:[%s7378_s1 + $0x58] sm:$0xf] }
 0x110   : > { %3697 = vrot.lane.b32.xlu0 %v6453_v4, %s6397_s16  ;;  %2099 = vmatprep.mubr.bf16.mxu0 %v6364_v1  ;;  %v2169_v16 = vsel %vm204_vm2, %v2162_v9, 0 }
 0x111   : > { %3699 = vrot.lane.b32.xlu1 %v6461_v7, %s6397_s16  ;;  %6096 = vmatprep.mubr.msk.bf16.mxu1 %vm6365_vm0, %v6363_v0  ;;  %s6404_s16 = smov 14  }
 0x112   : > { %v2158_v10 = vpop.permute.xlu0 %2157  ;;  %v2160_v11 = vpop.permute.xlu1 %2159  ;;  %6100 = vmatprep.subr.bf16.mxu1 %v6363_v0 }
 0x113   : > { %v2164_v12 = vsel %vm2161_vm10, %v2158_v10, %v2160_v11  ;;  %v2163_v13 = vsel %vm2161_vm10, %v2156_v8, %v2158_v10  ;;  %vm3261_vm10 = vcmask 326656  }
 0x114   : > { %v2175_v15 = vsel %vm204_vm2, %v2164_v12, 0  ;;  %3803 = vrot.lane.b32.xlu0 %v6455_v5, %s6398_s20  ;;  %5765 = vmatprep.subr.msk.bf16.mxu0 %vm204_vm2, %v2163_v13 }
 0x115   : > { %3805 = vrot.lane.b32.xlu1 %v6458_v6, %s6398_s20 }
 0x116   : > { %5762 = vmatmul.mubr.msk.bf16.vlgmr.msra.gmra.mxu0 %vm200_vm3, %v5760_v14  ;;  %6097 = vmatmul.mubr.msk.bf16.vlgmr.msra.gmra.mxu1 %vm200_vm3, %v5760_v14  ;;  %v2264_v17 = vpop.permute.xlu0 %2263  ;;  %v2266_v18 = vpop.permute.xlu1 %2265 }
 0x117   : > { %2192 = vmatpush1.bf16.msra.mxu0 %v2169_v16  ;;  %6101 = vmatpush3.bf16.msra.mxu1 %v2175_v15  ;;  %v2272_v19 = vsel %vm2271_vm11, %v2264_v17, %v2266_v18  ;;  %v5784_v16 = vld [vmem:[%s7378_s1 + $0x5c] sm:$0xf] }
 0x118   : > { %3807 = vrot.lane.b32.xlu0 %v6453_v4, %s6398_s20  ;;  %2209 = vmatprep.mubr.bf16.mxu0 %v6364_v1  ;;  %v2279_v26 = vsel %vm204_vm2, %v2272_v19, 0 }
 0x119   : > { %3809 = vrot.lane.b32.xlu1 %v6461_v7, %s6398_s20  ;;  %6102 = vmatprep.mubr.msk.bf16.mxu1 %vm6365_vm0, %v6363_v0  ;;  %s6405_s20 = smov 13  }
 0x11a   : > { %v2268_v20 = vpop.permute.xlu0 %2267  ;;  %v2270_v21 = vpop.permute.xlu1 %2269  ;;  %6106 = vmatprep.subr.bf16.mxu1 %v6363_v0 }
 0x11b   : > { %v2274_v22 = vsel %vm2271_vm11, %v2268_v20, %v2270_v21  ;;  %v2273_v23 = vsel %vm2271_vm11, %v2266_v18, %v2268_v20  ;;  %vm3371_vm11 = vcmask 318464  }
 0x11c   : > { %v2285_v25 = vsel %vm204_vm2, %v2274_v22, 0  ;;  %3913 = vrot.lane.b32.xlu0 %v6455_v5, %s6399_s26  ;;  %5769 = vmatprep.subr.msk.bf16.mxu0 %vm204_vm2, %v2273_v23 }
 0x11d   : > { %3915 = vrot.lane.b32.xlu1 %v6458_v6, %s6399_s26 }
 0x11e   : > { %5766 = vmatmul.mubr.msk.bf16.vlgmr.msra.gmra.mxu0 %vm200_vm3, %v5764_v24  ;;  %6103 = vmatmul.mubr.msk.bf16.vlgmr.msra.gmra.mxu1 %vm200_vm3, %v5764_v24  ;;  %v2374_v27 = vpop.permute.xlu0 %2373  ;;  %v2376_v28 = vpop.permute.xlu1 %2375 }
 0x11f   : > { %2302 = vmatpush1.bf16.msra.mxu0 %v2279_v26  ;;  %6107 = vmatpush3.bf16.msra.mxu1 %v2285_v25  ;;  %v2382_v29 = vsel %vm2381_vm12, %v2374_v27, %v2376_v28  ;;  %v5788_v26 = vld [vmem:[%s7378_s1 + $0x60] sm:$0xf] }
 0x120   : > { %3917 = vrot.lane.b32.xlu0 %v6453_v4, %s6399_s26  ;;  %2319 = vmatprep.mubr.bf16.mxu0 %v6364_v1  ;;  %v2389_v36 = vsel %vm204_vm2, %v2382_v29, 0 }
 0x121   : > { %3919 = vrot.lane.b32.xlu1 %v6461_v7, %s6399_s26  ;;  %6108 = vmatprep.mubr.msk.bf16.mxu1 %vm6365_vm0, %v6363_v0  ;;  %s6406_s26 = smov 12  }
 0x122   : > { %v2378_v30 = vpop.permute.xlu0 %2377  ;;  %v2380_v31 = vpop.permute.xlu1 %2379  ;;  %6112 = vmatprep.subr.bf16.mxu1 %v6363_v0 }
 0x123   : > { %v2384_v32 = vsel %vm2381_vm12, %v2378_v30, %v2380_v31  ;;  %v2383_v33 = vsel %vm2381_vm12, %v2376_v28, %v2378_v30  ;;  %vm3481_vm12 = vcmask 310272  }
 0x124   : > { %v2395_v35 = vsel %vm204_vm2, %v2384_v32, 0  ;;  %4023 = vrot.lane.b32.xlu0 %v6455_v5, %s6400_s29  ;;  %5773 = vmatprep.subr.msk.bf16.mxu0 %vm204_vm2, %v2383_v33 }
 0x125   : > { %4025 = vrot.lane.b32.xlu1 %v6458_v6, %s6400_s29 }
 0x126   : > { %5770 = vmatmul.mubr.msk.bf16.vlgmr.msra.gmra.mxu0 %vm200_vm3, %v5768_v34  ;;  %6109 = vmatmul.mubr.msk.bf16.vlgmr.msra.gmra.mxu1 %vm200_vm3, %v5768_v34  ;;  %v2484_v37 = vpop.permute.xlu0 %2483  ;;  %v2486_v38 = vpop.permute.xlu1 %2485 }
 0x127   : > { %2412 = vmatpush1.bf16.msra.mxu0 %v2389_v36  ;;  %6113 = vmatpush3.bf16.msra.mxu1 %v2395_v35  ;;  %v2492_v39 = vsel %vm2491_vm13, %v2484_v37, %v2486_v38 }
 0x128   : > { %4027 = vrot.lane.b32.xlu0 %v6453_v4, %s6400_s29  ;;  %2429 = vmatprep.mubr.bf16.mxu0 %v6364_v1  ;;  %v2499_v46 = vsel %vm204_vm2, %v2492_v39, 0 }
 0x129   : > { %4029 = vrot.lane.b32.xlu1 %v6461_v7, %s6400_s29  ;;  %6114 = vmatprep.mubr.msk.bf16.mxu1 %vm6365_vm0, %v6363_v0 }
 0x12a   : > { %v2488_v40 = vpop.permute.xlu0 %2487  ;;  %v2490_v41 = vpop.permute.xlu1 %2489  ;;  %6118 = vmatprep.subr.bf16.mxu1 %v6363_v0 }
 0x12b   : > { %v2494_v42 = vsel %vm2491_vm13, %v2488_v40, %v2490_v41  ;;  %v2493_v43 = vsel %vm2491_vm13, %v2486_v38, %v2488_v40  ;;  %v5792_v40 = vld [vmem:[%s7378_s1 + $0x64] sm:$0xf]  ;;  %vm3591_vm13 = vcmask 302080  }
 0x12c   : > { %v2505_v45 = vsel %vm204_vm2, %v2494_v42, 0  ;;  %4133 = vrot.lane.b32.xlu0 %v6455_v5, %s6401_s5  ;;  %5777 = vmatprep.subr.msk.bf16.mxu0 %vm204_vm2, %v2493_v43 }
 0x12d   : > { %4135 = vrot.lane.b32.xlu1 %v6458_v6, %s6401_s5 }
 0x12e   : > { %5774 = vmatmul.mubr.msk.bf16.vlgmr.msra.gmra.mxu0 %vm200_vm3, %v5772_v44  ;;  %6115 = vmatmul.mubr.msk.bf16.vlgmr.msra.gmra.mxu1 %vm200_vm3, %v5772_v44  ;;  %v2594_v47 = vpop.permute.xlu0 %2593  ;;  %v2596_v48 = vpop.permute.xlu1 %2595 }
 0x12f   : > { %2522 = vmatpush1.bf16.msra.mxu0 %v2499_v46  ;;  %6119 = vmatpush3.bf16.msra.mxu1 %v2505_v45  ;;  %v2602_v49 = vsel %vm2601_vm14, %v2594_v47, %v2596_v48  ;;  %v4791_v47 = vld [vmem:[%s6449_s17 + $0x4] sm:$0xff] }
 0x130   : > { %4137 = vrot.lane.b32.xlu0 %v6453_v4, %s6401_s5  ;;  %2539 = vmatprep.mubr.bf16.mxu0 %v6364_v1  ;;  %v2609_v56 = vsel %vm204_vm2, %v2602_v49, 0 }
 0x131   : > { %4139 = vrot.lane.b32.xlu1 %v6461_v7, %s6401_s5  ;;  %6120 = vmatprep.mubr.msk.bf16.mxu1 %vm6365_vm0, %v6363_v0 }
 0x132   : > { %v2598_v50 = vpop.permute.xlu0 %2597  ;;  %v2600_v51 = vpop.permute.xlu1 %2599  ;;  %6124 = vmatprep.subr.bf16.mxu1 %v6363_v0 }
 0x133   : > { %v2604_v52 = vsel %vm2601_vm14, %v2598_v50, %v2600_v51  ;;  %v2603_v53 = vsel %vm2601_vm14, %v2596_v48, %v2598_v50  ;;  %vm3701_vm14 = vcmask 293888  }
 0x134   : > { %v2615_v55 = vsel %vm204_vm2, %v2604_v52, 0  ;;  %4243 = vrot.lane.b32.xlu0 %v6455_v5, %s6402_s8  ;;  %5781 = vmatprep.subr.msk.bf16.mxu0 %vm204_vm2, %v2603_v53 }
 0x135   : > { %4245 = vrot.lane.b32.xlu1 %v6458_v6, %s6402_s8 }
 0x136   : > { %5778 = vmatmul.mubr.msk.bf16.vlgmr.msra.gmra.mxu0 %vm200_vm3, %v5776_v54  ;;  %6121 = vmatmul.mubr.msk.bf16.vlgmr.msra.gmra.mxu1 %vm200_vm3, %v5776_v54  ;;  %v2704_v57 = vpop.permute.xlu0 %2703  ;;  %v2706_v58 = vpop.permute.xlu1 %2705 }
 0x137   : > { %2632 = vmatpush1.bf16.msra.mxu0 %v2609_v56  ;;  %6125 = vmatpush3.bf16.msra.mxu1 %v2615_v55  ;;  %v2712_v59 = vsel %vm2711_vm15, %v2704_v57, %v2706_v58  ;;  %v6971_v57 = vcombine.high %v4791_v47, %v4791_v47 }
 0x138   : > { %4247 = vrot.lane.b32.xlu0 %v6453_v4, %s6402_s8  ;;  %2649 = vmatprep.mubr.bf16.mxu0 %v6364_v1  ;;  %v2719_v8 = vsel %vm204_vm2, %v2712_v59, 0 }
 0x139   : > { %4249 = vrot.lane.b32.xlu1 %v6461_v7, %s6402_s8  ;;  %6126 = vmatprep.mubr.msk.bf16.mxu1 %vm6365_vm0, %v6363_v0 }
 0x13a   : > { %v2708_v60 = vpop.permute.xlu0 %2707  ;;  %v2710_v61 = vpop.permute.xlu1 %2709  ;;  %6130 = vmatprep.subr.bf16.mxu1 %v6363_v0 }
 0x13b   : > { %v2714_v62 = vsel %vm2711_vm15, %v2708_v60, %v2710_v61  ;;  %v2713_v63 = vsel %vm2711_vm15, %v2706_v58, %v2708_v60  ;;  %v4792_v58 = vld [vmem:[%s6449_s17 + $0xc] sm:$0xff]  ;;  %vm3811_vm15 = vcmask 285696   ;;  %s6287_s17 = smul.u32 24, %s7382_s13 }
 0x13c   : > { %v2725_v3 = vsel %vm204_vm2, %v2714_v62, 0  ;;  %4353 = vrot.lane.b32.xlu0 %v6455_v5, %s6403_s11  ;;  %5785 = vmatprep.subr.msk.bf16.mxu0 %vm204_vm2, %v2713_v63  ;;  %v5796_v62 = vld [vmem:[%s7378_s1 + $0x68] sm:$0xf] }
 0x13d   : > { %4355 = vrot.lane.b32.xlu1 %v6458_v6, %s6403_s11  ;;  %s170_s30 = scalar_lea.vmem %s7380_s3, %s6287_s17 }
 0x13e   : > { %5782 = vmatmul.mubr.msk.bf16.vlgmr.msra.gmra.mxu0 %vm200_vm3, %v5780_v2  ;;  %6127 = vmatmul.mubr.msk.bf16.vlgmr.msra.gmra.mxu1 %vm200_vm3, %v5780_v2  ;;  %v2814_v9 = vpop.permute.xlu0 %2813  ;;  %v2816_v10 = vpop.permute.xlu1 %2815 }
 0x13f   : > { %2742 = vmatpush1.bf16.msra.mxu0 %v2719_v8  ;;  %6131 = vmatpush3.bf16.msra.mxu1 %v2725_v3  ;;  %v2822_v11 = vsel %vm2821_vm1, %v2814_v9, %v2816_v10  ;;  %v6983_v9 = vcombine.low %v4792_v58, %v4792_v58 }
 0x140   : > { %4357 = vrot.lane.b32.xlu0 %v6453_v4, %s6403_s11  ;;  %2759 = vmatprep.mubr.bf16.mxu0 %v6364_v1  ;;  %v2829_v18 = vsel %vm204_vm2, %v2822_v11, 0  ;;  %v6989_v11 = vcombine.high %v4792_v58, %v4792_v58 }
 0x141   : > { %4359 = vrot.lane.b32.xlu1 %v6461_v7, %s6403_s11  ;;  %6132 = vmatprep.mubr.msk.bf16.mxu1 %vm6365_vm0, %v6363_v0 }
 0x142   : > { %v2818_v12 = vpop.permute.xlu0 %2817  ;;  %v2820_v13 = vpop.permute.xlu1 %2819  ;;  %6136 = vmatprep.subr.bf16.mxu1 %v6363_v0 }
 0x143   : > { %v2824_v14 = vsel %vm2821_vm1, %v2818_v12, %v2820_v13  ;;  %v2823_v15 = vsel %vm2821_vm1, %v2816_v10, %v2818_v12  ;;  %vm3921_vm1 = vcmask 277504  }
 0x144   : > { %v2835_v17 = vsel %vm204_vm2, %v2824_v14, 0  ;;  %4463 = vrot.lane.b32.xlu0 %v6455_v5, %s6404_s16  ;;  %5789 = vmatprep.subr.msk.bf16.mxu0 %vm204_vm2, %v2823_v15 }
 0x145   : > { %4465 = vrot.lane.b32.xlu1 %v6458_v6, %s6404_s16 }
 0x146   : > { %5786 = vmatmul.mubr.msk.bf16.vlgmr.msra.gmra.mxu0 %vm200_vm3, %v5784_v16  ;;  %6133 = vmatmul.mubr.msk.bf16.vlgmr.msra.gmra.mxu1 %vm200_vm3, %v5784_v16  ;;  %v2924_v19 = vpop.permute.xlu0 %2923  ;;  %v2926_v20 = vpop.permute.xlu1 %2925 }
 0x147   : > { %2852 = vmatpush1.bf16.msra.mxu0 %v2829_v18  ;;  %6137 = vmatpush3.bf16.msra.mxu1 %v2835_v17  ;;  %v2932_v21 = vsel %vm2931_vm4, %v2924_v19, %v2926_v20 }
 0x148   : > { %4467 = vrot.lane.b32.xlu0 %v6453_v4, %s6404_s16  ;;  %2869 = vmatprep.mubr.bf16.mxu0 %v6364_v1  ;;  %v2939_v27 = vsel %vm204_vm2, %v2932_v21, 0 }
 0x149   : > { %4469 = vrot.lane.b32.xlu1 %v6461_v7, %s6404_s16  ;;  %6138 = vmatprep.mubr.msk.bf16.mxu1 %vm6365_vm0, %v6363_v0 }
 0x14a   : > { %v2928_v22 = vpop.permute.xlu0 %2927  ;;  %v2930_v23 = vpop.permute.xlu1 %2929  ;;  %6142 = vmatprep.subr.bf16.mxu1 %v6363_v0 }
 0x14b   : > { %v2933_v24 = vsel %vm2931_vm4, %v2926_v20, %v2928_v22  ;;  %v2934_v25 = vsel %vm2931_vm4, %v2928_v22, %v2930_v23  ;;  %vm4031_vm4 = vcmask 146432  }
 0x14c   : > { %v2945_v28 = vsel %vm204_vm2, %v2934_v25, 0  ;;  %4573 = vrot.lane.b32.xlu0 %v6455_v5, %s6405_s20  ;;  %5793 = vmatprep.subr.msk.bf16.mxu0 %vm204_vm2, %v2933_v24 }
 0x14d   : > { %4575 = vrot.lane.b32.xlu1 %v6458_v6, %s6405_s20 }
 0x14e   : > { %v289_v29 = vpop.f32.mrf.mxu1  ;;  %v248_v30 = vpop.f32.mrf.mxu0  ;;  %5790 = vmatmul.mubr.msk.bf16.vlgmr.msra.gmra.mxu0 %vm200_vm3, %v5788_v26  ;;  %6139 = vmatmul.mubr.msk.bf16.vlgmr.msra.gmra.mxu1 %vm200_vm3, %v5788_v26  ;;  %v5800_v26 = vld [vmem:[%s7378_s1 + $0x6c] sm:$0xf] }
 0x14f   : > { %2962 = vmatpush1.bf16.msra.mxu0 %v2939_v27  ;;  %6143 = vmatpush3.bf16.msra.mxu1 %v2945_v28  ;;  %v3034_v31 = vpop.permute.xlu0 %3033  ;;  %v3036_v32 = vpop.permute.xlu1 %3035 }
 0x150   : > { %v5996_v33 = vpop.f32.mrf.mxu1  ;;  %v250_v34 = vpop.f32.mrf.mxu0  ;;  %4577 = vrot.lane.b32.xlu0 %v6453_v4, %s6405_s20  ;;  %2979 = vmatprep.mubr.bf16.mxu0 %v6364_v1  ;;  %v3042_v35 = vsel %vm3041_vm5, %v3034_v31, %v3036_v32 }
 0x151   : > { %4579 = vrot.lane.b32.xlu1 %v6461_v7, %s6405_s20  ;;  %6144 = vmatprep.mubr.msk.bf16.mxu1 %vm6365_vm0, %v6363_v0  ;;  %v3049_v41 = vsel %vm204_vm2, %v3042_v35, 0 }
 0x152   : > { %v292_v36 = vpop.f32.mrf.mxu1  ;;  %v252_v37 = vpop.f32.mrf.mxu0  ;;  %6148 = vmatprep.subr.bf16.mxu1 %v6363_v0 }
 0x153   : > { %v3038_v38 = vpop.permute.xlu0 %3037  ;;  %v3040_v39 = vpop.permute.xlu1 %3039 }
 0x154   : > { %v3043_v42 = vsel %vm3041_vm5, %v3036_v32, %v3038_v38  ;;  %v5997_v43 = vpop.f32.mrf.mxu1  ;;  %v3044_v44 = vsel %vm3041_vm5, %v3038_v38, %v3040_v39  ;;  %v253_v45 = vpop.f32.mrf.mxu0  ;;  %4683 = vrot.lane.b32.xlu0 %v6455_v5, %s6406_s26  ;;  %vm4141_vm5 = vcmask 138240  }
 0x155   : > { %v3055_v46 = vsel %vm204_vm2, %v3044_v44, 0  ;;  %5797 = vmatprep.subr.msk.bf16.mxu0 %vm204_vm2, %v3043_v42  ;;  %4685 = vrot.lane.b32.xlu1 %v6458_v6, %s6406_s26  ;;  %v6964_v6 = vcombine.low %v4791_v47, %v4791_v47  ;;  %v5804_v47 = vld [vmem:[%s7378_s1 + $0x70] sm:$0xf] }
 0x156   : > { %v385_v48 = vpop.f32.mrf.mxu1  ;;  %v344_v49 = vpop.f32.mrf.mxu0  ;;  %5794 = vmatmul.mubr.msk.bf16.vlgmr.msra.gmra.mxu0 %vm200_vm3, %v5792_v40  ;;  %6145 = vmatmul.mubr.msk.bf16.vlgmr.msra.gmra.mxu1 %vm200_vm3, %v5792_v40 }
 0x157   : > { %v386_v50 = vadd.f32 %v385_v48, %v289_v29  ;;  %v345_v51 = vadd.f32 %v344_v49, %v248_v30  ;;  %3072 = vmatpush1.bf16.msra.mxu0 %v3049_v41  ;;  %6149 = vmatpush3.bf16.msra.mxu1 %v3055_v46  ;;  %v3144_v5 = vpop.permute.xlu0 %3143  ;;  %v3146_v52 = vpop.permute.xlu1 %3145 }
 0x158   : > { %v6002_v53 = vpop.f32.mrf.mxu1  ;;  %v346_v54 = vpop.f32.mrf.mxu0  ;;  %4687 = vrot.lane.b32.xlu0 %v6453_v4, %s6406_s26  ;;  %3089 = vmatprep.mubr.bf16.mxu0 %v6364_v1  ;;  %v3152_v55 = vsel %vm3151_vm9, %v3144_v5, %v3146_v52 }
 0x159   : > { %v347_v56 = vadd.f32 %v346_v54, %v250_v34  ;;  %4689 = vrot.lane.b32.xlu1 %v6461_v7, %s6406_s26  ;;  %6150 = vmatprep.mubr.msk.bf16.mxu1 %vm6365_vm0, %v6363_v0  ;;  %v3159_v63 = vsel %vm204_vm2, %v3152_v55, 0 }
 0x15a   : > { %v388_v59 = vpop.f32.mrf.mxu1  ;;  %v348_v60 = vpop.f32.mrf.mxu0  ;;  %6154 = vmatprep.subr.bf16.mxu1 %v6363_v0 }
 0x15b   : > { %v3148_v4 = vpop.permute.xlu0 %3147  ;;  %v3150_v61 = vpop.permute.xlu1 %3149 }
 0x15c   : > { %v3153_v7 = vsel %vm3151_vm9, %v3146_v52, %v3148_v4  ;;  %v6003_v2 = vpop.f32.mrf.mxu1  ;;  %v3154_v3 = vsel %vm3151_vm9, %v3148_v4, %v3150_v61  ;;  %v349_v8 = vpop.f32.mrf.mxu0  ;;  %4805 = vrot.lane.b32.xlu0 %v6964_v6, %s6369_s21  ;;  %vm4251_vm9 = vcmask 130048  }
 0x15d   : > { %v3165_v10 = vsel %vm204_vm2, %v3154_v3, 0  ;;  %5801 = vmatprep.subr.msk.bf16.mxu0 %vm204_vm2, %v3153_v7  ;;  %4807 = vrot.lane.b32.xlu1 %v6971_v57, %s6369_s21  ;;  %v5808_v8 = vld [vmem:[%s7378_s1 + $0x74] sm:$0xf] }
 0x15e   : > { %v451_v12 = vpop.f32.mrf.mxu0  ;;  %v492_v13 = vpop.f32.mrf.mxu1  ;;  %5798 = vmatmul.mubr.msk.bf16.vlgmr.msra.gmra.mxu0 %vm200_vm3, %v5796_v62  ;;  %6151 = vmatmul.mubr.msk.bf16.vlgmr.msra.gmra.mxu1 %vm200_vm3, %v5796_v62 }
 0x15f   : > { %v498_v14 = vadd.f32 %v451_v12, %v345_v51  ;;  %v500_v15 = vadd.f32 %v492_v13, %v386_v50  ;;  %3182 = vmatpush1.bf16.msra.mxu0 %v3159_v63  ;;  %6155 = vmatpush3.bf16.msra.mxu1 %v3165_v10  ;;  %v3254_v16 = vpop.permute.xlu0 %3253  ;;  %v3256_v17 = vpop.permute.xlu1 %3255 }
 0x160   : > { %v453_v18 = vpop.f32.mrf.mxu0  ;;  %v6008_v19 = vpop.f32.mrf.mxu1  ;;  %4809 = vrot.lane.b32.xlu0 %v6983_v9, %s6369_s21  ;;  %3199 = vmatprep.mubr.bf16.mxu0 %v6364_v1  ;;  %v3262_v20 = vsel %vm3261_vm10, %v3254_v16, %v3256_v17 }
 0x161   : > { %v499_v21 = vadd.f32 %v453_v18, %v347_v56  ;;  %4811 = vrot.lane.b32.xlu1 %v6989_v11, %s6369_s21  ;;  %6156 = vmatprep.mubr.msk.bf16.mxu1 %vm6365_vm0, %v6363_v0  ;;  %v3269_v27 = vsel %vm204_vm2, %v3262_v20, 0 }
 0x162   : > { %v455_v22 = vpop.f32.mrf.mxu0  ;;  %v495_v23 = vpop.f32.mrf.mxu1  ;;  %6160 = vmatprep.subr.bf16.mxu1 %v6363_v0 }
 0x163   : > { %v3258_v24 = vpop.permute.xlu0 %3257  ;;  %v3260_v25 = vpop.permute.xlu1 %3259 }
 0x164   : > { %v3263_v28 = vsel %vm3261_vm10, %v3256_v17, %v3258_v24  ;;  %v3264_v29 = vsel %vm3261_vm10, %v3258_v24, %v3260_v25  ;;  %v456_v30 = vpop.f32.mrf.mxu0  ;;  %v6009_v31 = vpop.f32.mrf.mxu1  ;;  %4914 = vrot.lane.b32.xlu0 %v6964_v6, %s6370_s22  ;;  %vm4361_vm10 = vcmask 121856  }
 0x165   : > { %v3275_v32 = vsel %vm204_vm2, %v3264_v29, 0  ;;  %5805 = vmatprep.subr.msk.bf16.mxu0 %vm204_vm2, %v3263_v28  ;;  %4916 = vrot.lane.b32.xlu1 %v6971_v57, %s6370_s22  ;;  %v5812_v31 = vld [vmem:[%s7378_s1 + $0x78] sm:$0xf] }
 0x166   : > { %v561_v33 = vpop.f32.mrf.mxu0  ;;  %v602_v34 = vpop.f32.mrf.mxu1  ;;  %5802 = vmatmul.mubr.msk.bf16.vlgmr.msra.gmra.mxu0 %vm200_vm3, %v5800_v26  ;;  %6157 = vmatmul.mubr.msk.bf16.vlgmr.msra.gmra.mxu1 %vm200_vm3, %v5800_v26 }
 0x167   : > { %v608_v35 = vadd.f32 %v561_v33, %v498_v14  ;;  %v610_v36 = vadd.f32 %v602_v34, %v500_v15  ;;  %3292 = vmatpush1.bf16.msra.mxu0 %v3269_v27  ;;  %6161 = vmatpush3.bf16.msra.mxu1 %v3275_v32  ;;  %v3364_v37 = vpop.permute.xlu0 %3363  ;;  %v3366_v38 = vpop.permute.xlu1 %3365 }
 0x168   : > { %v563_v39 = vpop.f32.mrf.mxu0  ;;  %v6014_v40 = vpop.f32.mrf.mxu1  ;;  %4918 = vrot.lane.b32.xlu0 %v6983_v9, %s6370_s22  ;;  %3309 = vmatprep.mubr.bf16.mxu0 %v6364_v1  ;;  %v3372_v41 = vsel %vm3371_vm11, %v3364_v37, %v3366_v38 }
 0x169   : > { %v609_v42 = vadd.f32 %v563_v39, %v499_v21  ;;  %4920 = vrot.lane.b32.xlu1 %v6989_v11, %s6370_s22  ;;  %6162 = vmatprep.mubr.msk.bf16.mxu1 %vm6365_vm0, %v6363_v0  ;;  %v3379_v48 = vsel %vm204_vm2, %v3372_v41, 0 }
 0x16a   : > { %v565_v43 = vpop.f32.mrf.mxu0  ;;  %v605_v44 = vpop.f32.mrf.mxu1  ;;  %6166 = vmatprep.subr.bf16.mxu1 %v6363_v0 }
 0x16b   : > { %v3368_v45 = vpop.permute.xlu0 %3367  ;;  %v3370_v46 = vpop.permute.xlu1 %3369 }
 0x16c   : > { %v3373_v49 = vsel %vm3371_vm11, %v3366_v38, %v3368_v45  ;;  %v3374_v50 = vsel %vm3371_vm11, %v3368_v45, %v3370_v46  ;;  %v566_v51 = vpop.f32.mrf.mxu0  ;;  %v6015_v5 = vpop.f32.mrf.mxu1  ;;  %5023 = vrot.lane.b32.xlu0 %v6964_v6, %s6371_s23  ;;  %vm4471_vm11 = vcmask 113664  }
 0x16d   : > { %v3385_v52 = vsel %vm204_vm2, %v3374_v50, 0  ;;  %5809 = vmatprep.subr.msk.bf16.mxu0 %vm204_vm2, %v3373_v49  ;;  %5025 = vrot.lane.b32.xlu1 %v6971_v57, %s6371_s23  ;;  %v5816_v5 = vld [vmem:[%s7378_s1 + $0x7c] sm:$0xf] }
 0x16e   : > { %v671_v53 = vpop.f32.mrf.mxu0  ;;  %v712_v54 = vpop.f32.mrf.mxu1  ;;  %5806 = vmatmul.mubr.msk.bf16.vlgmr.msra.gmra.mxu0 %vm200_vm3, %v5804_v47  ;;  %6163 = vmatmul.mubr.msk.bf16.vlgmr.msra.gmra.mxu1 %vm200_vm3, %v5804_v47 }
 0x16f   : > { %v718_v55 = vadd.f32 %v671_v53, %v608_v35  ;;  %v720_v56 = vadd.f32 %v712_v54, %v610_v36  ;;  %3402 = vmatpush1.bf16.msra.mxu0 %v3379_v48  ;;  %6167 = vmatpush3.bf16.msra.mxu1 %v3385_v52  ;;  %v3474_v58 = vpop.permute.xlu0 %3473  ;;  %v3476_v59 = vpop.permute.xlu1 %3475 }
 0x170   : > { %v673_v60 = vpop.f32.mrf.mxu0  ;;  %v6020_v4 = vpop.f32.mrf.mxu1  ;;  %5027 = vrot.lane.b32.xlu0 %v6983_v9, %s6371_s23  ;;  %3419 = vmatprep.mubr.bf16.mxu0 %v6364_v1  ;;  %v3482_v61 = vsel %vm3481_vm12, %v3474_v58, %v3476_v59 }
 0x171   : > { %v719_v62 = vadd.f32 %v673_v60, %v609_v42  ;;  %5029 = vrot.lane.b32.xlu1 %v6989_v11, %s6371_s23  ;;  %6168 = vmatprep.mubr.msk.bf16.mxu1 %vm6365_vm0, %v6363_v0  ;;  %v3489_v10 = vsel %vm204_vm2, %v3482_v61, 0  ;;  %s6407_s23 = smov 121  }
 0x172   : > { %v675_v63 = vpop.f32.mrf.mxu0  ;;  %v715_v7 = vpop.f32.mrf.mxu1  ;;  %6172 = vmatprep.subr.bf16.mxu1 %v6363_v0 }
 0x173   : > { %v3478_v2 = vpop.permute.xlu0 %3477  ;;  %v3480_v3 = vpop.permute.xlu1 %3479 }
 0x174   : > { %v3483_v12 = vsel %vm3481_vm12, %v3476_v59, %v3478_v2  ;;  %v3484_v13 = vsel %vm3481_vm12, %v3478_v2, %v3480_v3  ;;  %v676_v14 = vpop.f32.mrf.mxu0  ;;  %v6021_v15 = vpop.f32.mrf.mxu1  ;;  %5132 = vrot.lane.b32.xlu0 %v6964_v6, %s6407_s23  ;;  %vm4581_vm12 = vcmask 105472  }
 0x175   : > { %v3495_v16 = vsel %vm204_vm2, %v3484_v13, 0  ;;  %5813 = vmatprep.subr.msk.bf16.mxu0 %vm204_vm2, %v3483_v12  ;;  %5134 = vrot.lane.b32.xlu1 %v6971_v57, %s6407_s23  ;;  %v5820_v15 = vld [vmem:[%s7378_s1 + $0x80] sm:$0xf] }
 0x176   : > { %v781_v17 = vpop.f32.mrf.mxu0  ;;  %v822_v18 = vpop.f32.mrf.mxu1  ;;  %5810 = vmatmul.mubr.msk.bf16.vlgmr.msra.gmra.mxu0 %vm200_vm3, %v5808_v8  ;;  %6169 = vmatmul.mubr.msk.bf16.vlgmr.msra.gmra.mxu1 %vm200_vm3, %v5808_v8 }
 0x177   : > { %v828_v19 = vadd.f32 %v781_v17, %v718_v55  ;;  %v830_v20 = vadd.f32 %v822_v18, %v720_v56  ;;  %3512 = vmatpush1.bf16.msra.mxu0 %v3489_v10  ;;  %6173 = vmatpush3.bf16.msra.mxu1 %v3495_v16  ;;  %v3584_v21 = vpop.permute.xlu0 %3583  ;;  %v3586_v22 = vpop.permute.xlu1 %3585 }
 0x178   : > { %v783_v23 = vpop.f32.mrf.mxu0  ;;  %v6026_v24 = vpop.f32.mrf.mxu1  ;;  %5136 = vrot.lane.b32.xlu0 %v6983_v9, %s6407_s23  ;;  %3529 = vmatprep.mubr.bf16.mxu0 %v6364_v1  ;;  %v3592_v25 = vsel %vm3591_vm13, %v3584_v21, %v3586_v22 }
 0x179   : > { %v829_v26 = vadd.f32 %v783_v23, %v719_v62  ;;  %5138 = vrot.lane.b32.xlu1 %v6989_v11, %s6407_s23  ;;  %6174 = vmatprep.mubr.msk.bf16.mxu1 %vm6365_vm0, %v6363_v0  ;;  %v3599_v32 = vsel %vm204_vm2, %v3592_v25, 0 }
 0x17a   : > { %v785_v27 = vpop.f32.mrf.mxu0  ;;  %v825_v28 = vpop.f32.mrf.mxu1  ;;  %6178 = vmatprep.subr.bf16.mxu1 %v6363_v0 }
 0x17b   : > { %v3588_v29 = vpop.permute.xlu0 %3587  ;;  %v3590_v30 = vpop.permute.xlu1 %3589 }
 0x17c   : > { %v3593_v33 = vsel %vm3591_vm13, %v3586_v22, %v3588_v29  ;;  %v3594_v34 = vsel %vm3591_vm13, %v3588_v29, %v3590_v30  ;;  %v786_v35 = vpop.f32.mrf.mxu0  ;;  %v6027_v36 = vpop.f32.mrf.mxu1  ;;  %5242 = vrot.lane.b32.xlu0 %v6964_v6, %s6408_s7  ;;  %vm4691_vm13 = vcmask 97280  }
 0x17d   : > { %v3605_v37 = vsel %vm204_vm2, %v3594_v34, 0  ;;  %5817 = vmatprep.subr.msk.bf16.mxu0 %vm204_vm2, %v3593_v33  ;;  %5244 = vrot.lane.b32.xlu1 %v6971_v57, %s6408_s7 }
 0x17e   : > { %v891_v38 = vpop.f32.mrf.mxu0  ;;  %v932_v39 = vpop.f32.mrf.mxu1  ;;  %5814 = vmatmul.mubr.msk.bf16.vlgmr.msra.gmra.mxu0 %vm200_vm3, %v5812_v31  ;;  %6175 = vmatmul.mubr.msk.bf16.vlgmr.msra.gmra.mxu1 %vm200_vm3, %v5812_v31 }
 0x17f   : > { %v938_v40 = vadd.f32 %v891_v38, %v828_v19  ;;  %v940_v41 = vadd.f32 %v932_v39, %v830_v20  ;;  %3622 = vmatpush1.bf16.msra.mxu0 %v3599_v32  ;;  %6179 = vmatpush3.bf16.msra.mxu1 %v3605_v37  ;;  %v3694_v42 = vpop.permute.xlu0 %3693  ;;  %v3696_v43 = vpop.permute.xlu1 %3695 }
 0x180   : > { %v893_v44 = vpop.f32.mrf.mxu0  ;;  %v6032_v45 = vpop.f32.mrf.mxu1  ;;  %5246 = vrot.lane.b32.xlu0 %v6983_v9, %s6408_s7  ;;  %3639 = vmatprep.mubr.bf16.mxu0 %v6364_v1  ;;  %v3702_v46 = vsel %vm3701_vm14, %v3694_v42, %v3696_v43 }
 0x181   : > { %v939_v47 = vadd.f32 %v893_v44, %v829_v26  ;;  %5248 = vrot.lane.b32.xlu1 %v6989_v11, %s6408_s7  ;;  %6180 = vmatprep.mubr.msk.bf16.mxu1 %vm6365_vm0, %v6363_v0  ;;  %v3709_v52 = vsel %vm204_vm2, %v3702_v46, 0 }
 0x182   : > { %v895_v48 = vpop.f32.mrf.mxu0  ;;  %v935_v49 = vpop.f32.mrf.mxu1  ;;  %6184 = vmatprep.subr.bf16.mxu1 %v6363_v0 }
 0x183   : > { %v3698_v50 = vpop.permute.xlu0 %3697  ;;  %v3700_v51 = vpop.permute.xlu1 %3699 }
 0x184   : > { %v3703_v53 = vsel %vm3701_vm14, %v3696_v43, %v3698_v50  ;;  %v3704_v54 = vsel %vm3701_vm14, %v3698_v50, %v3700_v51  ;;  %v896_v55 = vpop.f32.mrf.mxu0  ;;  %v6033_v56 = vpop.f32.mrf.mxu1  ;;  %5352 = vrot.lane.b32.xlu0 %v6964_v6, %s6409_s10  ;;  %vm5470_vm14 = vcmask 965632  }
 0x185   : > { %v3715_v58 = vsel %vm204_vm2, %v3704_v54, 0  ;;  %5821 = vmatprep.subr.msk.bf16.mxu0 %vm204_vm2, %v3703_v53  ;;  %5354 = vrot.lane.b32.xlu1 %v6971_v57, %s6409_s10 }
 0x186   : > { %v1001_v59 = vpop.f32.mrf.mxu0  ;;  %v1042_v60 = vpop.f32.mrf.mxu1  ;;  %5818 = vmatmul.mubr.msk.bf16.vlgmr.msra.gmra.mxu0 %vm200_vm3, %v5816_v5  ;;  %6181 = vmatmul.mubr.msk.bf16.vlgmr.msra.gmra.mxu1 %vm200_vm3, %v5816_v5 }
 0x187   : > { %v1048_v4 = vadd.f32 %v1001_v59, %v938_v40  ;;  %v1050_v61 = vadd.f32 %v1042_v60, %v940_v41  ;;  %3732 = vmatpush1.bf16.msra.mxu0 %v3709_v52  ;;  %6185 = vmatpush3.bf16.msra.mxu1 %v3715_v58  ;;  %v3804_v62 = vpop.permute.xlu0 %3803  ;;  %v3806_v63 = vpop.permute.xlu1 %3805  ;;  %v5828_v52 = vld [vmem:[%s7378_s1 + $0x88] sm:$0xf] }
 0x188   : > { %v1003_v7 = vpop.f32.mrf.mxu0  ;;  %v6038_v2 = vpop.f32.mrf.mxu1  ;;  %5356 = vrot.lane.b32.xlu0 %v6983_v9, %s6409_s10  ;;  %3749 = vmatprep.mubr.bf16.mxu0 %v6364_v1  ;;  %v3812_v3 = vsel %vm3811_vm15, %v3804_v62, %v3806_v63 }
 0x189   : > { %v1049_v8 = vadd.f32 %v1003_v7, %v939_v47  ;;  %5358 = vrot.lane.b32.xlu1 %v6989_v11, %s6409_s10  ;;  %6186 = vmatprep.mubr.msk.bf16.mxu1 %vm6365_vm0, %v6363_v0  ;;  %v3819_v16 = vsel %vm204_vm2, %v3812_v3, 0 }
 0x18a   : > { %v1005_v10 = vpop.f32.mrf.mxu0  ;;  %v1045_v12 = vpop.f32.mrf.mxu1  ;;  %6190 = vmatprep.subr.bf16.mxu1 %v6363_v0 }
 0x18b   : > { %v3808_v13 = vpop.permute.xlu0 %3807  ;;  %v3810_v14 = vpop.permute.xlu1 %3809 }
 0x18c   : > { %v3813_v17 = vsel %vm3811_vm15, %v3806_v63, %v3808_v13  ;;  %v3814_v18 = vsel %vm3811_vm15, %v3808_v13, %v3810_v14  ;;  %v1006_v19 = vpop.f32.mrf.mxu0  ;;  %v6039_v20 = vpop.f32.mrf.mxu1  ;;  %5462 = vrot.lane.b32.xlu0 %v6964_v6, %s6410_s15 }
 0x18d   : > { %v3825_v21 = vsel %vm204_vm2, %v3814_v18, 0  ;;  %5825 = vmatprep.subr.msk.bf16.mxu0 %vm204_vm2, %v3813_v17  ;;  %5464 = vrot.lane.b32.xlu1 %v6971_v57, %s6410_s15 }
 0x18e   : > { %v1111_v22 = vpop.f32.mrf.mxu0  ;;  %v1152_v23 = vpop.f32.mrf.mxu1  ;;  %5822 = vmatmul.mubr.msk.bf16.vlgmr.msra.gmra.mxu0 %vm200_vm3, %v5820_v15  ;;  %6187 = vmatmul.mubr.msk.bf16.vlgmr.msra.gmra.mxu1 %vm200_vm3, %v5820_v15 }
 0x18f   : > { %v1158_v24 = vadd.f32 %v1111_v22, %v1048_v4  ;;  %v1160_v25 = vadd.f32 %v1152_v23, %v1050_v61  ;;  %3842 = vmatpush1.bf16.msra.mxu0 %v3819_v16  ;;  %6191 = vmatpush3.bf16.msra.mxu1 %v3825_v21  ;;  %v3914_v26 = vpop.permute.xlu0 %3913  ;;  %v3916_v27 = vpop.permute.xlu1 %3915  ;;  %v5832_v16 = vld [vmem:[%s7378_s1 + $0x8c] sm:$0xf] }
 0x190   : > { %v1113_v6 = vpop.f32.mrf.mxu0  ;;  %v6044_v28 = vpop.f32.mrf.mxu1  ;;  %5466 = vrot.lane.b32.xlu0 %v6983_v9, %s6410_s15  ;;  %3859 = vmatprep.mubr.bf16.mxu0 %v6364_v1  ;;  %v3922_v57 = vsel %vm3921_vm1, %v3914_v26, %v3916_v27  ;;  %v5824_v9 = vld [vmem:[%s7378_s1 + $0x84] sm:$0xf] }
 0x191   : > { %v1159_v29 = vadd.f32 %v1113_v6, %v1049_v8  ;;  %5468 = vrot.lane.b32.xlu1 %v6989_v11, %s6410_s15  ;;  %6192 = vmatprep.mubr.msk.bf16.mxu1 %vm6365_vm0, %v6363_v0  ;;  %v3929_v34 = vsel %vm204_vm2, %v3922_v57, 0 }
 0x192   : > { %v1115_v30 = vpop.f32.mrf.mxu0  ;;  %v1155_v31 = vpop.f32.mrf.mxu1  ;;  %6196 = vmatprep.subr.bf16.mxu1 %v6363_v0 }
 0x193   : > { %v3918_v32 = vpop.permute.xlu0 %3917  ;;  %v3920_v33 = vpop.permute.xlu1 %3919 }
 0x194   : > { %v3923_v35 = vsel %vm3921_vm1, %v3916_v27, %v3918_v32  ;;  %v3924_v36 = vsel %vm3921_vm1, %v3918_v32, %v3920_v33  ;;  %v1116_v11 = vpop.f32.mrf.mxu0  ;;  %v6045_v37 = vpop.f32.mrf.mxu1 }
 0x195   : > { %v3935_v38 = vsel %vm204_vm2, %v3924_v36, 0  ;;  %5829 = vmatprep.subr.msk.bf16.mxu0 %vm204_vm2, %v3923_v35 }
 0x196   : > { %v1221_v39 = vpop.f32.mrf.mxu0  ;;  %v1262_v40 = vpop.f32.mrf.mxu1  ;;  %5826 = vmatmul.mubr.msk.bf16.vlgmr.msra.gmra.mxu0 %vm200_vm3, %v5824_v9  ;;  %6193 = vmatmul.mubr.msk.bf16.vlgmr.msra.gmra.mxu1 %vm200_vm3, %v5824_v9 }
 0x197   : > { %v1268_v41 = vadd.f32 %v1221_v39, %v1158_v24  ;;  %v1270_v42 = vadd.f32 %v1262_v40, %v1160_v25  ;;  %3952 = vmatpush1.bf16.msra.mxu0 %v3929_v34  ;;  %6197 = vmatpush3.bf16.msra.mxu1 %v3935_v38  ;;  %v4024_v43 = vpop.permute.xlu0 %4023  ;;  %v4026_v44 = vpop.permute.xlu1 %4025  ;;  %v5836_v34 = vld [vmem:[%s7378_s1 + $0x90] sm:$0xf] }
 0x198   : > { %v1223_v45 = vpop.f32.mrf.mxu0  ;;  %v6050_v46 = vpop.f32.mrf.mxu1  ;;  %3969 = vmatprep.mubr.bf16.mxu0 %v6364_v1  ;;  %6198 = vmatprep.mubr.msk.bf16.mxu1 %vm6365_vm0, %v6363_v0  ;;  %v4032_v47 = vsel %vm4031_vm4, %v4024_v43, %v4026_v44 }
 0x199   : > { %v1269_v48 = vadd.f32 %v1223_v45, %v1159_v29  ;;  %6202 = vmatprep.subr.bf16.mxu1 %v6363_v0  ;;  %v4039_v53 = vsel %vm204_vm2, %v4032_v47, 0 }
 0x19a   : > { %v1225_v49 = vpop.f32.mrf.mxu0  ;;  %v1265_v50 = vpop.f32.mrf.mxu1 }
 0x19b   : > { %v4028_v51 = vpop.permute.xlu0 %4027  ;;  %v4030_v5 = vpop.permute.xlu1 %4029 }
 0x19c   : > { %v4033_v54 = vsel %vm4031_vm4, %v4026_v44, %v4028_v51  ;;  %v4034_v55 = vsel %vm4031_vm4, %v4028_v51, %v4030_v5  ;;  %v1226_v56 = vpop.f32.mrf.mxu0  ;;  %v6051_v58 = vpop.f32.mrf.mxu1 }
 0x19d   : > { %v4045_v59 = vsel %vm204_vm2, %v4034_v55, 0  ;;  %5833 = vmatprep.subr.msk.bf16.mxu0 %vm204_vm2, %v4033_v54 }
 0x19e   : > { %v1331_v60 = vpop.f32.mrf.mxu0  ;;  %v1372_v4 = vpop.f32.mrf.mxu1  ;;  %5830 = vmatmul.mubr.msk.bf16.vlgmr.msra.gmra.mxu0 %vm200_vm3, %v5828_v52  ;;  %6199 = vmatmul.mubr.msk.bf16.vlgmr.msra.gmra.mxu1 %vm200_vm3, %v5828_v52 }
 0x19f   : > { %v1378_v61 = vadd.f32 %v1331_v60, %v1268_v41  ;;  %v1380_v62 = vadd.f32 %v1372_v4, %v1270_v42  ;;  %4062 = vmatpush1.bf16.msra.mxu0 %v4039_v53  ;;  %6203 = vmatpush3.bf16.msra.mxu1 %v4045_v59  ;;  %v4134_v63 = vpop.permute.xlu0 %4133  ;;  %v4136_v7 = vpop.permute.xlu1 %4135  ;;  %v5840_v53 = vld [vmem:[%s7378_s1 + $0x94] sm:$0xf] }
 0x1a0   : > { %v1333_v2 = vpop.f32.mrf.mxu0  ;;  %v6056_v3 = vpop.f32.mrf.mxu1  ;;  %4079 = vmatprep.mubr.bf16.mxu0 %v6364_v1  ;;  %6204 = vmatprep.mubr.msk.bf16.mxu1 %vm6365_vm0, %v6363_v0  ;;  %v4142_v8 = vsel %vm4141_vm5, %v4134_v63, %v4136_v7 }
 0x1a1   : > { %v1379_v10 = vadd.f32 %v1333_v2, %v1269_v48  ;;  %6208 = vmatprep.subr.bf16.mxu1 %v6363_v0  ;;  %v4149_v17 = vsel %vm204_vm2, %v4142_v8, 0 }
 0x1a2   : > { %v1335_v12 = vpop.f32.mrf.mxu0  ;;  %v1375_v13 = vpop.f32.mrf.mxu1 }
 0x1a3   : > { %v4138_v14 = vpop.permute.xlu0 %4137  ;;  %v4140_v15 = vpop.permute.xlu1 %4139 }
 0x1a4   : > { %v4143_v18 = vsel %vm4141_vm5, %v4136_v7, %v4138_v14  ;;  %v4144_v19 = vsel %vm4141_vm5, %v4138_v14, %v4140_v15  ;;  %v1336_v20 = vpop.f32.mrf.mxu0  ;;  %v6057_v21 = vpop.f32.mrf.mxu1 }
 0x1a5   : > { %v4155_v22 = vsel %vm204_vm2, %v4144_v19, 0  ;;  %5837 = vmatprep.subr.msk.bf16.mxu0 %vm204_vm2, %v4143_v18 }
 0x1a6   : > { %v1441_v23 = vpop.f32.mrf.mxu0  ;;  %v1482_v24 = vpop.f32.mrf.mxu1  ;;  %5834 = vmatmul.mubr.msk.bf16.vlgmr.msra.gmra.mxu0 %vm200_vm3, %v5832_v16  ;;  %6205 = vmatmul.mubr.msk.bf16.vlgmr.msra.gmra.mxu1 %vm200_vm3, %v5832_v16 }
 0x1a7   : > { %v1488_v25 = vadd.f32 %v1441_v23, %v1378_v61  ;;  %v1490_v26 = vadd.f32 %v1482_v24, %v1380_v62  ;;  %4172 = vmatpush1.bf16.msra.mxu0 %v4149_v17  ;;  %6209 = vmatpush3.bf16.msra.mxu1 %v4155_v22  ;;  %v4244_v27 = vpop.permute.xlu0 %4243  ;;  %v4246_v6 = vpop.permute.xlu1 %4245  ;;  %v5844_v17 = vld [vmem:[%s7378_s1 + $0x98] sm:$0xf] }
 0x1a8   : > { %v1443_v28 = vpop.f32.mrf.mxu0  ;;  %v6062_v57 = vpop.f32.mrf.mxu1  ;;  %4189 = vmatprep.mubr.bf16.mxu0 %v6364_v1  ;;  %6210 = vmatprep.mubr.msk.bf16.mxu1 %vm6365_vm0, %v6363_v0  ;;  %v4252_v29 = vsel %vm4251_vm9, %v4244_v27, %v4246_v6 }
 0x1a9   : > { %v1489_v30 = vadd.f32 %v1443_v28, %v1379_v10  ;;  %6214 = vmatprep.subr.bf16.mxu1 %v6363_v0  ;;  %v4259_v35 = vsel %vm204_vm2, %v4252_v29, 0 }
 0x1aa   : > { %v1445_v31 = vpop.f32.mrf.mxu0  ;;  %v1485_v32 = vpop.f32.mrf.mxu1 }
 0x1ab   : > { %v4248_v33 = vpop.permute.xlu0 %4247  ;;  %v4250_v9 = vpop.permute.xlu1 %4249 }
 0x1ac   : > { %v4253_v36 = vsel %vm4251_vm9, %v4246_v6, %v4248_v33  ;;  %v4254_v11 = vsel %vm4251_vm9, %v4248_v33, %v4250_v9  ;;  %v1446_v37 = vpop.f32.mrf.mxu0  ;;  %v6063_v38 = vpop.f32.mrf.mxu1 }
 0x1ad   : > { %v4265_v39 = vsel %vm204_vm2, %v4254_v11, 0  ;;  %5841 = vmatprep.subr.msk.bf16.mxu0 %vm204_vm2, %v4253_v36 }
 0x1ae   : > { %v1551_v40 = vpop.f32.mrf.mxu0  ;;  %v1592_v41 = vpop.f32.mrf.mxu1  ;;  %5838 = vmatmul.mubr.msk.bf16.vlgmr.msra.gmra.mxu0 %vm200_vm3, %v5836_v34  ;;  %6211 = vmatmul.mubr.msk.bf16.vlgmr.msra.gmra.mxu1 %vm200_vm3, %v5836_v34 }
 0x1af   : > { %v1598_v42 = vadd.f32 %v1551_v40, %v1488_v25  ;;  %v1600_v43 = vadd.f32 %v1592_v41, %v1490_v26  ;;  %4282 = vmatpush1.bf16.msra.mxu0 %v4259_v35  ;;  %6215 = vmatpush3.bf16.msra.mxu1 %v4265_v39  ;;  %v4354_v44 = vpop.permute.xlu0 %4353  ;;  %v4356_v45 = vpop.permute.xlu1 %4355  ;;  %v5848_v35 = vld [vmem:[%s7378_s1 + $0x9c] sm:$0xf] }
 0x1b0   : > { %v1553_v46 = vpop.f32.mrf.mxu0  ;;  %v6068_v47 = vpop.f32.mrf.mxu1  ;;  %4299 = vmatprep.mubr.bf16.mxu0 %v6364_v1  ;;  %6216 = vmatprep.mubr.msk.bf16.mxu1 %vm6365_vm0, %v6363_v0  ;;  %v4362_v48 = vsel %vm4361_vm10, %v4354_v44, %v4356_v45 }
 0x1b1   : > { %v1599_v49 = vadd.f32 %v1553_v46, %v1489_v30  ;;  %6220 = vmatprep.subr.bf16.mxu1 %v6363_v0  ;;  %v4369_v54 = vsel %vm204_vm2, %v4362_v48, 0 }
 0x1b2   : > { %v1555_v50 = vpop.f32.mrf.mxu0  ;;  %v1595_v51 = vpop.f32.mrf.mxu1 }
 0x1b3   : > { %v4358_v5 = vpop.permute.xlu0 %4357  ;;  %v4360_v52 = vpop.permute.xlu1 %4359 }
 0x1b4   : > { %v4363_v55 = vsel %vm4361_vm10, %v4356_v45, %v4358_v5  ;;  %v4364_v56 = vsel %vm4361_vm10, %v4358_v5, %v4360_v52  ;;  %v1556_v58 = vpop.f32.mrf.mxu0  ;;  %v6069_v59 = vpop.f32.mrf.mxu1 }
 0x1b5   : > { %v4375_v60 = vsel %vm204_vm2, %v4364_v56, 0  ;;  %5845 = vmatprep.subr.msk.bf16.mxu0 %vm204_vm2, %v4363_v55 }
 0x1b6   : > { %v1661_v4 = vpop.f32.mrf.mxu0  ;;  %v1702_v61 = vpop.f32.mrf.mxu1  ;;  %5842 = vmatmul.mubr.msk.bf16.vlgmr.msra.gmra.mxu0 %vm200_vm3, %v5840_v53  ;;  %6217 = vmatmul.mubr.msk.bf16.vlgmr.msra.gmra.mxu1 %vm200_vm3, %v5840_v53 }
 0x1b7   : > { %v1708_v62 = vadd.f32 %v1661_v4, %v1598_v42  ;;  %v1710_v63 = vadd.f32 %v1702_v61, %v1600_v43  ;;  %4392 = vmatpush1.bf16.msra.mxu0 %v4369_v54  ;;  %6221 = vmatpush3.bf16.msra.mxu1 %v4375_v60  ;;  %v4464_v7 = vpop.permute.xlu0 %4463  ;;  %v4466_v2 = vpop.permute.xlu1 %4465  ;;  %v5852_v54 = vld [vmem:[%s7378_s1 + $0xa0] sm:$0xf] }
 0x1b8   : > { %v1663_v3 = vpop.f32.mrf.mxu0  ;;  %v6074_v8 = vpop.f32.mrf.mxu1  ;;  %4409 = vmatprep.mubr.bf16.mxu0 %v6364_v1  ;;  %6222 = vmatprep.mubr.msk.bf16.mxu1 %vm6365_vm0, %v6363_v0  ;;  %v4472_v10 = vsel %vm4471_vm11, %v4464_v7, %v4466_v2 }
 0x1b9   : > { %v1709_v12 = vadd.f32 %v1663_v3, %v1599_v49  ;;  %6226 = vmatprep.subr.bf16.mxu1 %v6363_v0  ;;  %v4479_v18 = vsel %vm204_vm2, %v4472_v10, 0 }
 0x1ba   : > { %v1665_v13 = vpop.f32.mrf.mxu0  ;;  %v1705_v14 = vpop.f32.mrf.mxu1 }
 0x1bb   : > { %v4468_v15 = vpop.permute.xlu0 %4467  ;;  %v4470_v16 = vpop.permute.xlu1 %4469 }
 0x1bc   : > { %v4473_v19 = vsel %vm4471_vm11, %v4466_v2, %v4468_v15  ;;  %v4474_v20 = vsel %vm4471_vm11, %v4468_v15, %v4470_v16  ;;  %v1666_v21 = vpop.f32.mrf.mxu0  ;;  %v6075_v22 = vpop.f32.mrf.mxu1 }
 0x1bd   : > { %v4485_v23 = vsel %vm204_vm2, %v4474_v20, 0  ;;  %5849 = vmatprep.subr.msk.bf16.mxu0 %vm204_vm2, %v4473_v19 }
 0x1be   : > { %v1771_v24 = vpop.f32.mrf.mxu0  ;;  %v1812_v25 = vpop.f32.mrf.mxu1  ;;  %5846 = vmatmul.mubr.msk.bf16.vlgmr.msra.gmra.mxu0 %vm200_vm3, %v5844_v17  ;;  %6223 = vmatmul.mubr.msk.bf16.vlgmr.msra.gmra.mxu1 %vm200_vm3, %v5844_v17 }
 0x1bf   : > { %v1818_v26 = vadd.f32 %v1771_v24, %v1708_v62  ;;  %v1820_v27 = vadd.f32 %v1812_v25, %v1710_v63  ;;  %4502 = vmatpush1.bf16.msra.mxu0 %v4479_v18  ;;  %6227 = vmatpush3.bf16.msra.mxu1 %v4485_v23  ;;  %v4574_v6 = vpop.permute.xlu0 %4573  ;;  %v4576_v28 = vpop.permute.xlu1 %4575  ;;  %v5856_v18 = vld [vmem:[%s7378_s1 + $0xa4] sm:$0xf] }
 0x1c0   : > { %v1773_v57 = vpop.f32.mrf.mxu0  ;;  %v6080_v29 = vpop.f32.mrf.mxu1  ;;  %4519 = vmatprep.mubr.bf16.mxu0 %v6364_v1  ;;  %6228 = vmatprep.mubr.msk.bf16.mxu1 %vm6365_vm0, %v6363_v0  ;;  %v4582_v30 = vsel %vm4581_vm12, %v4574_v6, %v4576_v28 }
 0x1c1   : > { %v1819_v31 = vadd.f32 %v1773_v57, %v1709_v12  ;;  %6232 = vmatprep.subr.bf16.mxu1 %v6363_v0  ;;  %v4589_v36 = vsel %vm204_vm2, %v4582_v30, 0 }
 0x1c2   : > { %v1775_v32 = vpop.f32.mrf.mxu0  ;;  %v1815_v33 = vpop.f32.mrf.mxu1 }
 0x1c3   : > { %v4578_v9 = vpop.permute.xlu0 %4577  ;;  %v4580_v34 = vpop.permute.xlu1 %4579 }
 0x1c4   : > { %v4583_v11 = vsel %vm4581_vm12, %v4576_v28, %v4578_v9  ;;  %v4584_v37 = vsel %vm4581_vm12, %v4578_v9, %v4580_v34  ;;  %v1776_v38 = vpop.f32.mrf.mxu0  ;;  %v6081_v39 = vpop.f32.mrf.mxu1 }
 0x1c5   : > { %v4595_v40 = vsel %vm204_vm2, %v4584_v37, 0  ;;  %5853 = vmatprep.subr.msk.bf16.mxu0 %vm204_vm2, %v4583_v11 }
 0x1c6   : > { %v1881_v41 = vpop.f32.mrf.mxu0  ;;  %v1922_v42 = vpop.f32.mrf.mxu1  ;;  %5850 = vmatmul.mubr.msk.bf16.vlgmr.msra.gmra.mxu0 %vm200_vm3, %v5848_v35  ;;  %6229 = vmatmul.mubr.msk.bf16.vlgmr.msra.gmra.mxu1 %vm200_vm3, %v5848_v35 }
 0x1c7   : > { %v1928_v43 = vadd.f32 %v1881_v41, %v1818_v26  ;;  %v1930_v44 = vadd.f32 %v1922_v42, %v1820_v27  ;;  %4612 = vmatpush1.bf16.msra.mxu0 %v4589_v36  ;;  %6233 = vmatpush3.bf16.msra.mxu1 %v4595_v40  ;;  %v4684_v45 = vpop.permute.xlu0 %4683  ;;  %v4686_v46 = vpop.permute.xlu1 %4685  ;;  %v5860_v36 = vld [vmem:[%s7378_s1 + $0xa8] sm:$0xf] }
 0x1c8   : > { %v1883_v47 = vpop.f32.mrf.mxu0  ;;  %v6086_v48 = vpop.f32.mrf.mxu1  ;;  %4629 = vmatprep.mubr.bf16.mxu0 %v6364_v1  ;;  %6234 = vmatprep.mubr.msk.bf16.mxu1 %vm6365_vm0, %v6363_v0  ;;  %v4692_v49 = vsel %vm4691_vm13, %v4684_v45, %v4686_v46 }
 0x1c9   : > { %v1929_v50 = vadd.f32 %v1883_v47, %v1819_v31  ;;  %6238 = vmatprep.subr.bf16.mxu1 %v6363_v0  ;;  %v4699_v55 = vsel %vm204_vm2, %v4692_v49, 0 }
 0x1ca   : > { %v1885_v51 = vpop.f32.mrf.mxu0  ;;  %v1925_v5 = vpop.f32.mrf.mxu1 }
 0x1cb   : > { %v4688_v52 = vpop.permute.xlu0 %4687  ;;  %v4690_v53 = vpop.permute.xlu1 %4689 }
 0x1cc   : > { %v4693_v56 = vsel %vm4691_vm13, %v4686_v46, %v4688_v52  ;;  %v4694_v58 = vsel %vm4691_vm13, %v4688_v52, %v4690_v53  ;;  %v1886_v59 = vpop.f32.mrf.mxu0  ;;  %v6087_v60 = vpop.f32.mrf.mxu1 }
 0x1cd   : > { %v4705_v4 = vsel %vm204_vm2, %v4694_v58, 0  ;;  %5857 = vmatprep.subr.msk.bf16.mxu0 %vm204_vm2, %v4693_v56 }
 0x1ce   : > { %v1991_v61 = vpop.f32.mrf.mxu0  ;;  %v2032_v62 = vpop.f32.mrf.mxu1  ;;  %5854 = vmatmul.mubr.msk.bf16.vlgmr.msra.gmra.mxu0 %vm200_vm3, %v5852_v54  ;;  %6235 = vmatmul.mubr.msk.bf16.vlgmr.msra.gmra.mxu1 %vm200_vm3, %v5852_v54 }
 0x1cf   : > { %v2038_v63 = vadd.f32 %v1991_v61, %v1928_v43  ;;  %v2040_v7 = vadd.f32 %v2032_v62, %v1930_v44  ;;  %4722 = vmatpush1.bf16.msra.mxu0 %v4699_v55  ;;  %6239 = vmatpush3.bf16.msra.mxu1 %v4705_v4  ;;  %v4806_v2 = vpop.permute.xlu0 %4805  ;;  %v4808_v3 = vpop.permute.xlu1 %4807  ;;  %v5868_v55 = vld [vmem:[%s7378_s1 + $0xac] sm:$0xf] }
 0x1d0   : > { %v1993_v8 = vpop.f32.mrf.mxu0  ;;  %v6092_v10 = vpop.f32.mrf.mxu1  ;;  %4739 = vmatprep.mubr.bf16.mxu0 %v6364_v1  ;;  %6240 = vmatprep.mubr.msk.bf16.mxu1 %vm6365_vm0, %v6363_v0  ;;  %v4813_v12 = vsel %vm621_vm6, %v4806_v2, %v4808_v3 }
 0x1d1   : > { %v2039_v13 = vadd.f32 %v1993_v8, %v1929_v50  ;;  %6244 = vmatprep.subr.bf16.mxu1 %v6363_v0  ;;  %v4820_v19 = vsel %vm204_vm2, %v4813_v12, 0 }
 0x1d2   : > { %v1995_v14 = vpop.f32.mrf.mxu0  ;;  %v2035_v15 = vpop.f32.mrf.mxu1 }
 0x1d3   : > { %v4810_v16 = vpop.permute.xlu0 %4809  ;;  %v4812_v17 = vpop.permute.xlu1 %4811 }
 0x1d4   : > { %v4814_v20 = vsel %vm621_vm6, %v4808_v3, %v4810_v16  ;;  %v4815_v21 = vsel %vm621_vm6, %v4810_v16, %v4812_v17  ;;  %v1996_v22 = vpop.f32.mrf.mxu0  ;;  %v6093_v23 = vpop.f32.mrf.mxu1  ;;  %vm5140_vm6 = vcmask 990208  }
 0x1d5   : > { %v4826_v24 = vsel %vm204_vm2, %v4815_v21, 0  ;;  %5865 = vmatprep.subr.msk.bf16.mxu0 %vm204_vm2, %v4814_v20 }
 0x1d6   : > { %v2101_v25 = vpop.f32.mrf.mxu0  ;;  %v2142_v26 = vpop.f32.mrf.mxu1  ;;  %5858 = vmatmul.mubr.msk.bf16.vlgmr.msra.gmra.mxu0 %vm200_vm3, %v5856_v18  ;;  %6241 = vmatmul.mubr.msk.bf16.vlgmr.msra.gmra.mxu1 %vm200_vm3, %v5856_v18 }
 0x1d7   : > { %v2148_v27 = vadd.f32 %v2101_v25, %v2038_v63  ;;  %v2150_v6 = vadd.f32 %v2142_v26, %v2040_v7  ;;  %4843 = vmatpush1.bf16.msra.mxu0 %v4820_v19  ;;  %6245 = vmatpush3.bf16.msra.mxu1 %v4826_v24  ;;  %v4915_v28 = vpop.permute.xlu0 %4914  ;;  %v4917_v57 = vpop.permute.xlu1 %4916  ;;  %v5872_v19 = vld [vmem:[%s7378_s1 + $0xb0] sm:$0xf] }
 0x1d8   : > { %v2103_v29 = vpop.f32.mrf.mxu0  ;;  %v6098_v30 = vpop.f32.mrf.mxu1  ;;  %4860 = vmatprep.mubr.bf16.mxu0 %v6364_v1  ;;  %6246 = vmatprep.mubr.msk.bf16.mxu1 %vm6365_vm0, %v6363_v0  ;;  %v4922_v31 = vsel %vm731_vm7, %v4915_v28, %v4917_v57 }
 0x1d9   : > { %v2149_v32 = vadd.f32 %v2103_v29, %v2039_v13  ;;  %6250 = vmatprep.subr.bf16.mxu1 %v6363_v0  ;;  %v4929_v11 = vsel %vm204_vm2, %v4922_v31, 0 }
 0x1da   : > { %v2105_v33 = vpop.f32.mrf.mxu0  ;;  %v2145_v9 = vpop.f32.mrf.mxu1 }
 0x1db   : > { %v4919_v34 = vpop.permute.xlu0 %4918  ;;  %v4921_v35 = vpop.permute.xlu1 %4920 }
 0x1dc   : > { %v4923_v37 = vsel %vm731_vm7, %v4917_v57, %v4919_v34  ;;  %v4924_v38 = vsel %vm731_vm7, %v4919_v34, %v4921_v35  ;;  %v2106_v39 = vpop.f32.mrf.mxu0  ;;  %v6099_v40 = vpop.f32.mrf.mxu1  ;;  %vm5250_vm7 = vcmask 982016  }
 0x1dd   : > { %v4935_v41 = vsel %vm204_vm2, %v4924_v38, 0  ;;  %5869 = vmatprep.subr.msk.bf16.mxu0 %vm204_vm2, %v4923_v37 }
 0x1de   : > { %v2211_v42 = vpop.f32.mrf.mxu0  ;;  %v2252_v43 = vpop.f32.mrf.mxu1  ;;  %5866 = vmatmul.mubr.msk.bf16.vlgmr.msra.gmra.mxu0 %vm200_vm3, %v5860_v36  ;;  %6247 = vmatmul.mubr.msk.bf16.vlgmr.msra.gmra.mxu1 %vm200_vm3, %v5860_v36 }
 0x1df   : > { %v2258_v44 = vadd.f32 %v2211_v42, %v2148_v27  ;;  %v2260_v45 = vadd.f32 %v2252_v43, %v2150_v6  ;;  %4952 = vmatpush1.bf16.msra.mxu0 %v4929_v11  ;;  %6251 = vmatpush3.bf16.msra.mxu1 %v4935_v41  ;;  %v5024_v46 = vpop.permute.xlu0 %5023  ;;  %v5026_v47 = vpop.permute.xlu1 %5025  ;;  %v5876_v11 = vld [vmem:[%s7378_s1 + $0xb4] sm:$0xf] }
 0x1e0   : > { %v2213_v48 = vpop.f32.mrf.mxu0  ;;  %v6104_v49 = vpop.f32.mrf.mxu1  ;;  %4969 = vmatprep.mubr.bf16.mxu0 %v6364_v1  ;;  %6252 = vmatprep.mubr.msk.bf16.mxu1 %vm6365_vm0, %v6363_v0  ;;  %v5031_v50 = vsel %vm841_vm8, %v5024_v46, %v5026_v47 }
 0x1e1   : > { %v2259_v51 = vadd.f32 %v2213_v48, %v2149_v32  ;;  %6256 = vmatprep.subr.bf16.mxu1 %v6363_v0  ;;  %v5038_v56 = vsel %vm204_vm2, %v5031_v50, 0 }
 0x1e2   : > { %v2215_v5 = vpop.f32.mrf.mxu0  ;;  %v2255_v52 = vpop.f32.mrf.mxu1 }
 0x1e3   : > { %v5028_v53 = vpop.permute.xlu0 %5027  ;;  %v5030_v54 = vpop.permute.xlu1 %5029 }
 0x1e4   : > { %v5032_v58 = vsel %vm841_vm8, %v5026_v47, %v5028_v53  ;;  %v5033_v59 = vsel %vm841_vm8, %v5028_v53, %v5030_v54  ;;  %v2216_v60 = vpop.f32.mrf.mxu0  ;;  %v6105_v4 = vpop.f32.mrf.mxu1  ;;  %vm5360_vm8 = vcmask 973824  }
 0x1e5   : > { %v5044_v61 = vsel %vm204_vm2, %v5033_v59, 0  ;;  %5873 = vmatprep.subr.msk.bf16.mxu0 %vm204_vm2, %v5032_v58 }
 0x1e6   : > { %v2321_v62 = vpop.f32.mrf.mxu0  ;;  %v2362_v63 = vpop.f32.mrf.mxu1  ;;  %5870 = vmatmul.mubr.msk.bf16.vlgmr.msra.gmra.mxu0 %vm200_vm3, %v5868_v55  ;;  %6253 = vmatmul.mubr.msk.bf16.vlgmr.msra.gmra.mxu1 %vm200_vm3, %v5868_v55 }
 0x1e7   : > { %v2368_v7 = vadd.f32 %v2321_v62, %v2258_v44  ;;  %v2370_v2 = vadd.f32 %v2362_v63, %v2260_v45  ;;  %5061 = vmatpush1.bf16.msra.mxu0 %v5038_v56  ;;  %6257 = vmatpush3.bf16.msra.mxu1 %v5044_v61  ;;  %v5133_v3 = vpop.permute.xlu0 %5132  ;;  %v5135_v8 = vpop.permute.xlu1 %5134  ;;  %v5880_v56 = vld [vmem:[%s7378_s1 + $0xb8] sm:$0xf] }
 0x1e8   : > { %v2323_v10 = vpop.f32.mrf.mxu0  ;;  %v6110_v12 = vpop.f32.mrf.mxu1  ;;  %5078 = vmatprep.mubr.bf16.mxu0 %v6364_v1  ;;  %6258 = vmatprep.mubr.msk.bf16.mxu1 %vm6365_vm0, %v6363_v0  ;;  %v5141_v13 = vsel %vm5140_vm6, %v5133_v3, %v5135_v8 }
 0x1e9   : > { %v2369_v14 = vadd.f32 %v2323_v10, %v2259_v51  ;;  %6262 = vmatprep.subr.bf16.mxu1 %v6363_v0  ;;  %v5148_v20 = vsel %vm204_vm2, %v5141_v13, 0 }
 0x1ea   : > { %v2325_v15 = vpop.f32.mrf.mxu0  ;;  %v2365_v16 = vpop.f32.mrf.mxu1 }
 0x1eb   : > { %v5137_v17 = vpop.permute.xlu0 %5136  ;;  %v5139_v18 = vpop.permute.xlu1 %5138 }
 0x1ec   : > { %v5142_v21 = vsel %vm5140_vm6, %v5135_v8, %v5137_v17  ;;  %v5143_v22 = vsel %vm5140_vm6, %v5137_v17, %v5139_v18  ;;  %v2326_v23 = vpop.f32.mrf.mxu0  ;;  %v6111_v24 = vpop.f32.mrf.mxu1 }
 0x1ed   : > { %v5154_v25 = vsel %vm204_vm2, %v5143_v22, 0  ;;  %5877 = vmatprep.subr.msk.bf16.mxu0 %vm204_vm2, %v5142_v21 }
 0x1ee   : > { %v2431_v26 = vpop.f32.mrf.mxu0  ;;  %v2472_v27 = vpop.f32.mrf.mxu1  ;;  %5874 = vmatmul.mubr.msk.bf16.vlgmr.msra.gmra.mxu0 %vm200_vm3, %v5872_v19  ;;  %6259 = vmatmul.mubr.msk.bf16.vlgmr.msra.gmra.mxu1 %vm200_vm3, %v5872_v19 }
 0x1ef   : > { %v2478_v6 = vadd.f32 %v2431_v26, %v2368_v7  ;;  %v2480_v28 = vadd.f32 %v2472_v27, %v2370_v2  ;;  %5171 = vmatpush1.bf16.msra.mxu0 %v5148_v20  ;;  %6263 = vmatpush3.bf16.msra.mxu1 %v5154_v25  ;;  %v5243_v57 = vpop.permute.xlu0 %5242  ;;  %v5245_v29 = vpop.permute.xlu1 %5244  ;;  %v5884_v20 = vld [vmem:[%s7378_s1 + $0xbc] sm:$0xf] }
 0x1f0   : > { %v2433_v30 = vpop.f32.mrf.mxu0  ;;  %v6116_v31 = vpop.f32.mrf.mxu1  ;;  %5188 = vmatprep.mubr.bf16.mxu0 %v6364_v1  ;;  %6264 = vmatprep.mubr.msk.bf16.mxu1 %vm6365_vm0, %v6363_v0  ;;  %v5251_v32 = vsel %vm5250_vm7, %v5243_v57, %v5245_v29 }
 0x1f1   : > { %v2479_v33 = vadd.f32 %v2433_v30, %v2369_v14  ;;  %6268 = vmatprep.subr.bf16.mxu1 %v6363_v0  ;;  %v5258_v37 = vsel %vm204_vm2, %v5251_v32, 0 }
 0x1f2   : > { %v2435_v9 = vpop.f32.mrf.mxu0  ;;  %v2475_v34 = vpop.f32.mrf.mxu1 }
 0x1f3   : > { %v5247_v35 = vpop.permute.xlu0 %5246  ;;  %v5249_v36 = vpop.permute.xlu1 %5248  ;;  %v5888_v9 = vld [vmem:[%s7378_s1 + $0xc0] sm:$0xf] }
 0x1f4   : > { %v5252_v38 = vsel %vm5250_vm7, %v5245_v29, %v5247_v35  ;;  %v5253_v39 = vsel %vm5250_vm7, %v5247_v35, %v5249_v36  ;;  %v2436_v40 = vpop.f32.mrf.mxu0  ;;  %v6117_v41 = vpop.f32.mrf.mxu1 }
 0x1f5   : > { %v5264_v42 = vsel %vm204_vm2, %v5253_v39, 0  ;;  %5881 = vmatprep.subr.msk.bf16.mxu0 %vm204_vm2, %v5252_v38 }
 0x1f6   : > { %v2541_v43 = vpop.f32.mrf.mxu0  ;;  %v2582_v44 = vpop.f32.mrf.mxu1  ;;  %5878 = vmatmul.mubr.msk.bf16.vlgmr.msra.gmra.mxu0 %vm200_vm3, %v5876_v11  ;;  %6265 = vmatmul.mubr.msk.bf16.vlgmr.msra.gmra.mxu1 %vm200_vm3, %v5876_v11 }
 0x1f7   : > { %v2588_v45 = vadd.f32 %v2541_v43, %v2478_v6  ;;  %v2590_v46 = vadd.f32 %v2582_v44, %v2480_v28  ;;  %5281 = vmatpush1.bf16.msra.mxu0 %v5258_v37  ;;  %6269 = vmatpush3.bf16.msra.mxu1 %v5264_v42  ;;  %v5353_v47 = vpop.permute.xlu0 %5352  ;;  %v5355_v48 = vpop.permute.xlu1 %5354 }
 0x1f8   : > { %v2543_v49 = vpop.f32.mrf.mxu0  ;;  %v6122_v50 = vpop.f32.mrf.mxu1  ;;  %5298 = vmatprep.mubr.bf16.mxu0 %v6364_v1  ;;  %6270 = vmatprep.mubr.msk.bf16.mxu1 %vm6365_vm0, %v6363_v0  ;;  %v5361_v51 = vsel %vm5360_vm8, %v5353_v47, %v5355_v48 }
 0x1f9   : > { %v2589_v5 = vadd.f32 %v2543_v49, %v2479_v33  ;;  %6274 = vmatprep.subr.bf16.mxu1 %v6363_v0  ;;  %v5368_v58 = vsel %vm204_vm2, %v5361_v51, 0 }
 0x1fa   : > { %v2545_v52 = vpop.f32.mrf.mxu0  ;;  %v2585_v53 = vpop.f32.mrf.mxu1 }
 0x1fb   : > { %v5357_v54 = vpop.permute.xlu0 %5356  ;;  %v5359_v55 = vpop.permute.xlu1 %5358 }
 0x1fc   : > { %v5362_v59 = vsel %vm5360_vm8, %v5355_v48, %v5357_v54  ;;  %v5363_v60 = vsel %vm5360_vm8, %v5357_v54, %v5359_v55  ;;  %v2546_v4 = vpop.f32.mrf.mxu0  ;;  %v6123_v61 = vpop.f32.mrf.mxu1 }
 0x1fd   : > { %v5374_v62 = vsel %vm204_vm2, %v5363_v60, 0  ;;  %5885 = vmatprep.subr.msk.bf16.mxu0 %vm204_vm2, %v5362_v59 }
 0x1fe   : > { %v2651_v63 = vpop.f32.mrf.mxu0  ;;  %v2692_v7 = vpop.f32.mrf.mxu1  ;;  %5882 = vmatmul.mubr.msk.bf16.vlgmr.msra.gmra.mxu0 %vm200_vm3, %v5880_v56  ;;  %6271 = vmatmul.mubr.msk.bf16.vlgmr.msra.gmra.mxu1 %vm200_vm3, %v5880_v56 }
 0x1ff   : > { %v2698_v2 = vadd.f32 %v2651_v63, %v2588_v45  ;;  %v2700_v3 = vadd.f32 %v2692_v7, %v2590_v46  ;;  %5391 = vmatpush1.bf16.msra.mxu0 %v5368_v58  ;;  %6275 = vmatpush3.bf16.msra.mxu1 %v5374_v62  ;;  %v5463_v8 = vpop.permute.xlu0 %5462  ;;  %v5465_v10 = vpop.permute.xlu1 %5464 }
 0x200   : > { %v2653_v12 = vpop.f32.mrf.mxu0  ;;  %v6128_v13 = vpop.f32.mrf.mxu1  ;;  %5408 = vmatprep.mubr.bf16.mxu0 %v6364_v1  ;;  %6276 = vmatprep.mubr.msk.bf16.mxu1 %vm6365_vm0, %v6363_v0  ;;  %v5471_v14 = vsel %vm5470_vm14, %v5463_v8, %v5465_v10 }
 0x201   : > { %v2699_v15 = vadd.f32 %v2653_v12, %v2589_v5  ;;  %6280 = vmatprep.subr.bf16.mxu1 %v6363_v0  ;;  %v5478_v21 = vsel %vm204_vm2, %v5471_v14, 0 }
 0x202   : > { %v2655_v16 = vpop.f32.mrf.mxu0  ;;  %v2695_v17 = vpop.f32.mrf.mxu1 }
 0x203   : > { %v5467_v18 = vpop.permute.xlu0 %5466  ;;  %v5469_v19 = vpop.permute.xlu1 %5468 }
 0x204   : > { %v5472_v22 = vsel %vm5470_vm14, %v5465_v10, %v5467_v18  ;;  %v5473_v23 = vsel %vm5470_vm14, %v5467_v18, %v5469_v19  ;;  %v2656_v24 = vpop.f32.mrf.mxu0  ;;  %v6129_v25 = vpop.f32.mrf.mxu1 }
 0x205   : > { %v5484_v26 = vsel %vm204_vm2, %v5473_v23, 0  ;;  %5889 = vmatprep.subr.msk.bf16.mxu0 %vm204_vm2, %v5472_v22 }
 0x206   : > { %v2761_v27 = vpop.f32.mrf.mxu0  ;;  %v2802_v6 = vpop.f32.mrf.mxu1  ;;  %5886 = vmatmul.mubr.msk.bf16.vlgmr.msra.gmra.mxu0 %vm200_vm3, %v5884_v20  ;;  %6277 = vmatmul.mubr.msk.bf16.vlgmr.msra.gmra.mxu1 %vm200_vm3, %v5884_v20 }
 0x207   : > { %v2808_v28 = vadd.f32 %v2761_v27, %v2698_v2  ;;  %v2810_v57 = vadd.f32 %v2802_v6, %v2700_v3  ;;  %5501 = vmatpush1.bf16.msra.mxu0 %v5478_v21  ;;  %6281 = vmatpush3.bf16.msra.mxu1 %v5484_v26 }
 0x208   : > { %v2763_v29 = vpop.f32.mrf.mxu0  ;;  %v6134_v30 = vpop.f32.mrf.mxu1  ;;  %5518 = vmatprep.mubr.bf16.mxu0 %v6364_v1  ;;  %6282 = vmatprep.mubr.msk.bf16.mxu1 %vm6365_vm0, %v6363_v0 }
 0x209   : > { %v2809_v31 = vadd.f32 %v2763_v29, %v2699_v15 }
 0x20a   : > { %v2765_v32 = vpop.f32.mrf.mxu0  ;;  %v2805_v33 = vpop.f32.mrf.mxu1 }
 0x20c   : > { %v2766_v34 = vpop.f32.mrf.mxu0  ;;  %v6135_v35 = vpop.f32.mrf.mxu1 }
 0x20e   : > { %v2871_v36 = vpop.f32.mrf.mxu0  ;;  %v2912_v11 = vpop.f32.mrf.mxu1  ;;  %5890 = vmatmul.mubr.msk.bf16.vlgmr.msra.gmra.mxu0 %vm200_vm3, %v5888_v9  ;;  %6283 = vmatmul.mubr.msk.bf16.vlgmr.msra.gmra.mxu1 %vm200_vm3, %v5888_v9 }
 0x20f   : > { %v2918_v37 = vadd.f32 %v2871_v36, %v2808_v28  ;;  %v2920_v1 = vadd.f32 %v2912_v11, %v2810_v57 }
 0x210   : > { %v2873_v38 = vpop.f32.mrf.mxu0  ;;  %v6140_v39 = vpop.f32.mrf.mxu1 }
 0x211   : > { %v2919_v0 = vadd.f32 %v2873_v38, %v2809_v31 }
 0x212   : > { %v2875_v40 = vpop.f32.mrf.mxu0  ;;  %v2915_v41 = vpop.f32.mrf.mxu1 }
 0x214   : > { %v2876_v42 = vpop.f32.mrf.mxu0  ;;  %v6141_v43 = vpop.f32.mrf.mxu1 }
 0x216   : > { %v2981_v44 = vpop.f32.mrf.mxu0  ;;  %v3022_v45 = vpop.f32.mrf.mxu1 }
 0x217   : > { %v3028_v46 = vadd.f32 %v2981_v44, %v2918_v37  ;;  %v3030_v47 = vadd.f32 %v3022_v45, %v2920_v1 }
 0x218   : > { %v2983_v48 = vpop.f32.mrf.mxu0  ;;  %v6146_v49 = vpop.f32.mrf.mxu1 }
 0x219   : > { %v3029_v50 = vadd.f32 %v2983_v48, %v2919_v0 }
 0x21a   : > { %v2985_v51 = vpop.f32.mrf.mxu0  ;;  %v3025_v5 = vpop.f32.mrf.mxu1 }
 0x21c   : > { %v2986_v52 = vpop.f32.mrf.mxu0  ;;  %v6147_v53 = vpop.f32.mrf.mxu1 }
 0x21e   : > { %v3091_v54 = vpop.f32.mrf.mxu0  ;;  %v3132_v55 = vpop.f32.mrf.mxu1 }
 0x21f   : > { %v3138_v56 = vadd.f32 %v3091_v54, %v3028_v46  ;;  %v3140_v58 = vadd.f32 %v3132_v55, %v3030_v47 }
 0x220   : > { %v3093_v59 = vpop.f32.mrf.mxu0  ;;  %v6152_v60 = vpop.f32.mrf.mxu1 }
 0x221   : > { %v3139_v4 = vadd.f32 %v3093_v59, %v3029_v50 }
 0x222   : > { %v3095_v61 = vpop.f32.mrf.mxu0  ;;  %v3135_v62 = vpop.f32.mrf.mxu1 }
 0x224   : > { %v3096_v63 = vpop.f32.mrf.mxu0  ;;  %v6153_v7 = vpop.f32.mrf.mxu1 }
 0x226   : > { %v3201_v2 = vpop.f32.mrf.mxu0  ;;  %v3242_v3 = vpop.f32.mrf.mxu1 }
 0x227   : > { %v3248_v8 = vadd.f32 %v3201_v2, %v3138_v56  ;;  %v3250_v10 = vadd.f32 %v3242_v3, %v3140_v58 }
 0x228   : > { %v3203_v12 = vpop.f32.mrf.mxu0  ;;  %v6158_v13 = vpop.f32.mrf.mxu1 }
 0x229   : > { %v3249_v14 = vadd.f32 %v3203_v12, %v3139_v4 }
 0x22a   : > { %v3205_v15 = vpop.f32.mrf.mxu0  ;;  %v3245_v16 = vpop.f32.mrf.mxu1 }
 0x22c   : > { %v3206_v17 = vpop.f32.mrf.mxu0  ;;  %v6159_v18 = vpop.f32.mrf.mxu1 }
 0x22e   : > { %v3311_v19 = vpop.f32.mrf.mxu0  ;;  %v3352_v20 = vpop.f32.mrf.mxu1 }
 0x22f   : > { %v3358_v21 = vadd.f32 %v3311_v19, %v3248_v8  ;;  %v3360_v22 = vadd.f32 %v3352_v20, %v3250_v10 }
 0x230   : > { %v3313_v23 = vpop.f32.mrf.mxu0  ;;  %v6164_v24 = vpop.f32.mrf.mxu1 }
 0x231   : > { %v3359_v25 = vadd.f32 %v3313_v23, %v3249_v14 }
 0x232   : > { %v3315_v26 = vpop.f32.mrf.mxu0  ;;  %v3355_v27 = vpop.f32.mrf.mxu1 }
 0x234   : > { %v3316_v6 = vpop.f32.mrf.mxu0  ;;  %v6165_v28 = vpop.f32.mrf.mxu1 }
 0x236   : > { %v3421_v57 = vpop.f32.mrf.mxu0  ;;  %v3462_v29 = vpop.f32.mrf.mxu1 }
 0x237   : > { %v3468_v30 = vadd.f32 %v3421_v57, %v3358_v21  ;;  %v3470_v31 = vadd.f32 %v3462_v29, %v3360_v22 }
 0x238   : > { %v3423_v32 = vpop.f32.mrf.mxu0  ;;  %v6170_v33 = vpop.f32.mrf.mxu1 }
 0x239   : > { %v3469_v9 = vadd.f32 %v3423_v32, %v3359_v25 }
 0x23a   : > { %v3425_v34 = vpop.f32.mrf.mxu0  ;;  %v3465_v35 = vpop.f32.mrf.mxu1 }
 0x23c   : > { %v3426_v36 = vpop.f32.mrf.mxu0  ;;  %v6171_v11 = vpop.f32.mrf.mxu1 }
 0x23e   : > { %v3531_v37 = vpop.f32.mrf.mxu0  ;;  %v3572_v1 = vpop.f32.mrf.mxu1 }
 0x23f   : > { %v3578_v38 = vadd.f32 %v3531_v37, %v3468_v30  ;;  %v3580_v39 = vadd.f32 %v3572_v1, %v3470_v31 }
 0x240   : > { %v3533_v0 = vpop.f32.mrf.mxu0  ;;  %v6176_v40 = vpop.f32.mrf.mxu1 }
 0x241   : > { %v3579_v41 = vadd.f32 %v3533_v0, %v3469_v9 }
 0x242   : > { %v3535_v42 = vpop.f32.mrf.mxu0  ;;  %v3575_v43 = vpop.f32.mrf.mxu1 }
 0x244   : > { %v3536_v44 = vpop.f32.mrf.mxu0  ;;  %v6177_v45 = vpop.f32.mrf.mxu1 }
 0x246   : > { %v3641_v46 = vpop.f32.mrf.mxu0  ;;  %v3682_v47 = vpop.f32.mrf.mxu1 }
 0x247   : > { %v3688_v48 = vadd.f32 %v3641_v46, %v3578_v38  ;;  %v3690_v49 = vadd.f32 %v3682_v47, %v3580_v39 }
 0x248   : > { %v3643_v50 = vpop.f32.mrf.mxu0  ;;  %v6182_v51 = vpop.f32.mrf.mxu1 }
 0x249   : > { %v3689_v5 = vadd.f32 %v3643_v50, %v3579_v41 }
 0x24a   : > { %v3645_v52 = vpop.f32.mrf.mxu0  ;;  %v3685_v53 = vpop.f32.mrf.mxu1 }
 0x24c   : > { %v3646_v54 = vpop.f32.mrf.mxu0  ;;  %v6183_v55 = vpop.f32.mrf.mxu1 }
 0x24e   : > { %v3751_v56 = vpop.f32.mrf.mxu0  ;;  %v3792_v58 = vpop.f32.mrf.mxu1 }
 0x24f   : > { %v3798_v59 = vadd.f32 %v3751_v56, %v3688_v48  ;;  %v3800_v60 = vadd.f32 %v3792_v58, %v3690_v49 }
 0x250   : > { %v3753_v4 = vpop.f32.mrf.mxu0  ;;  %v6188_v61 = vpop.f32.mrf.mxu1 }
 0x251   : > { %v3799_v62 = vadd.f32 %v3753_v4, %v3689_v5 }
 0x252   : > { %v3755_v63 = vpop.f32.mrf.mxu0  ;;  %v3795_v7 = vpop.f32.mrf.mxu1 }
 0x254   : > { %v3756_v2 = vpop.f32.mrf.mxu0  ;;  %v6189_v3 = vpop.f32.mrf.mxu1 }
 0x256   : > { %v3861_v8 = vpop.f32.mrf.mxu0  ;;  %v3902_v10 = vpop.f32.mrf.mxu1 }
 0x257   : > { %v3908_v12 = vadd.f32 %v3861_v8, %v3798_v59  ;;  %v3910_v13 = vadd.f32 %v3902_v10, %v3800_v60 }
 0x258   : > { %v3863_v14 = vpop.f32.mrf.mxu0  ;;  %v6194_v15 = vpop.f32.mrf.mxu1 }
 0x259   : > { %v3909_v16 = vadd.f32 %v3863_v14, %v3799_v62 }
 0x25a   : > { %v3865_v17 = vpop.f32.mrf.mxu0  ;;  %v3905_v18 = vpop.f32.mrf.mxu1 }
 0x25c   : > { %v3866_v19 = vpop.f32.mrf.mxu0  ;;  %v6195_v20 = vpop.f32.mrf.mxu1 }
 0x25e   : > { %v3971_v21 = vpop.f32.mrf.mxu0  ;;  %v4012_v22 = vpop.f32.mrf.mxu1 }
 0x25f   : > { %v4018_v23 = vadd.f32 %v3971_v21, %v3908_v12  ;;  %v4020_v24 = vadd.f32 %v4012_v22, %v3910_v13 }
 0x260   : > { %v3973_v25 = vpop.f32.mrf.mxu0  ;;  %v6200_v26 = vpop.f32.mrf.mxu1 }
 0x261   : > { %v4019_v27 = vadd.f32 %v3973_v25, %v3909_v16 }
 0x262   : > { %v3975_v6 = vpop.f32.mrf.mxu0  ;;  %v4015_v28 = vpop.f32.mrf.mxu1 }
 0x264   : > { %v3976_v57 = vpop.f32.mrf.mxu0  ;;  %v6201_v29 = vpop.f32.mrf.mxu1 }
 0x266   : > { %v4081_v30 = vpop.f32.mrf.mxu0  ;;  %v4122_v31 = vpop.f32.mrf.mxu1 }
 0x267   : > { %v4128_v32 = vadd.f32 %v4081_v30, %v4018_v23  ;;  %v4130_v33 = vadd.f32 %v4122_v31, %v4020_v24 }
 0x268   : > { %v4083_v9 = vpop.f32.mrf.mxu0  ;;  %v6206_v34 = vpop.f32.mrf.mxu1 }
 0x269   : > { %v4129_v35 = vadd.f32 %v4083_v9, %v4019_v27 }
 0x26a   : > { %v4085_v36 = vpop.f32.mrf.mxu0  ;;  %v4125_v11 = vpop.f32.mrf.mxu1 }
 0x26c   : > { %v4086_v37 = vpop.f32.mrf.mxu0  ;;  %v6207_v1 = vpop.f32.mrf.mxu1 }
 0x26e   : > { %v4191_v38 = vpop.f32.mrf.mxu0  ;;  %v4232_v39 = vpop.f32.mrf.mxu1 }
 0x26f   : > { %v4238_v0 = vadd.f32 %v4191_v38, %v4128_v32  ;;  %v4240_v40 = vadd.f32 %v4232_v39, %v4130_v33 }
 0x270   : > { %v4193_v41 = vpop.f32.mrf.mxu0  ;;  %v6212_v42 = vpop.f32.mrf.mxu1 }
 0x271   : > { %v4239_v43 = vadd.f32 %v4193_v41, %v4129_v35 }
 0x272   : > { %v4195_v44 = vpop.f32.mrf.mxu0  ;;  %v4235_v45 = vpop.f32.mrf.mxu1 }
 0x274   : > { %v4196_v46 = vpop.f32.mrf.mxu0  ;;  %v6213_v47 = vpop.f32.mrf.mxu1 }
 0x276   : > { %v4301_v48 = vpop.f32.mrf.mxu0  ;;  %v4342_v49 = vpop.f32.mrf.mxu1 }
 0x277   : > { %v7352_v50 = vadd.f32 %v4301_v48, %v4238_v0  ;;  %v4350_v51 = vadd.f32 %v4342_v49, %v4240_v40 }
 0x278   : > { %v4303_v5 = vpop.f32.mrf.mxu0  ;;  %v6218_v52 = vpop.f32.mrf.mxu1 }
 0x279   : > { %v7354_v53 = vadd.f32 %v4303_v5, %v4239_v43 }
 0x27a   : > { %v4305_v54 = vpop.f32.mrf.mxu0  ;;  %v4345_v55 = vpop.f32.mrf.mxu1 }
 0x27c   : > { %v4306_v56 = vpop.f32.mrf.mxu0  ;;  %v6219_v58 = vpop.f32.mrf.mxu1 }
 0x27e   : > { %v7356_v59 = vpop.f32.mrf.mxu0  ;;  %v4452_v60 = vpop.f32.mrf.mxu1 }
 0x27f   : > { %v7358_v4 = vadd.f32 %v4452_v60, %v4350_v51 }
 0x280   : > { %v7360_v61 = vpop.f32.mrf.mxu0  ;;  %v6224_v62 = vpop.f32.mrf.mxu1 }
 0x281   : > { %v4458_v62 = vadd.f32 %v7356_v59, %v7352_v50  ;;  %v5572_v50 = vlaneseq }
 0x282   : > { %v4415_v63 = vpop.f32.mrf.mxu0  ;;  %v4455_v7 = vpop.f32.mrf.mxu1 }
 0x284   : > { %v4416_v2 = vpop.f32.mrf.mxu0  ;;  %v6225_v3 = vpop.f32.mrf.mxu1 }
 0x285   : > { %v4459_v2 = vadd.f32 %v7360_v61, %v7354_v53 }
 0x286   : > { %v4521_v8 = vpop.f32.mrf.mxu0  ;;  %v4562_v10 = vpop.f32.mrf.mxu1 }
 0x287   : > { %v4568_v3 = vadd.f32 %v4521_v8, %v4458_v62 }
 0x288   : > { %v4523_v12 = vpop.f32.mrf.mxu0  ;;  %v6230_v13 = vpop.f32.mrf.mxu1 }
 0x28a   : > { %v4525_v14 = vpop.f32.mrf.mxu0  ;;  %v4565_v15 = vpop.f32.mrf.mxu1 }
 0x28b   : > { %v4570_v15 = vadd.f32 %v4562_v10, %v7358_v4  ;;  %v5573_v10 = vshrl.u32 %v5572_v50, 7 }
 0x28c   : > { %v4526_v16 = vpop.f32.mrf.mxu0  ;;  %v6231_v17 = vpop.f32.mrf.mxu1 }
 0x28d   : > { %v4569_v16 = vadd.f32 %v4523_v12, %v4459_v2 }
 0x28e   : > { %v4631_v18 = vpop.f32.mrf.mxu0  ;;  %v4672_v19 = vpop.f32.mrf.mxu1 }
 0x28f   : > { %v4678_v17 = vadd.f32 %v4631_v18, %v4568_v3 }
 0x290   : > { %v4633_v20 = vpop.f32.mrf.mxu0  ;;  %v6236_v21 = vpop.f32.mrf.mxu1 }
 0x292   : > { %v4635_v22 = vpop.f32.mrf.mxu0  ;;  %v4675_v23 = vpop.f32.mrf.mxu1 }
 0x293   : > { %v4680_v23 = vadd.f32 %v4672_v19, %v4570_v15 }
 0x294   : > { %v4636_v24 = vpop.f32.mrf.mxu0  ;;  %v6237_v25 = vpop.f32.mrf.mxu1 }
 0x295   : > { %v4679_v24 = vadd.f32 %v4633_v20, %v4569_v16 }
 0x296   : > { %v4741_v26 = vpop.f32.mrf.mxu0  ;;  %v4782_v27 = vpop.f32.mrf.mxu1 }
 0x297   : > { %v4788_v25 = vadd.f32 %v4741_v26, %v4678_v17  ;;  %v4790_v59 = vadd.f32 %v4782_v27, %v4680_v23 }
 0x298   : > { %v4743_v6 = vpop.f32.mrf.mxu0  ;;  %v6242_v28 = vpop.f32.mrf.mxu1 }
 0x29a   : > { %v4745_v57 = vpop.f32.mrf.mxu0  ;;  %v4785_v29 = vpop.f32.mrf.mxu1 }
 0x29b   : > { %v4789_v29 = vadd.f32 %v4743_v6, %v4679_v24  ;;  %v5574_v6 = vsub.s32 0, %v5573_v10 }
 0x29c   : > { %v4746_v30 = vpop.f32.mrf.mxu0  ;;  %v6243_v31 = vpop.f32.mrf.mxu1 }
 0x29e   : > { %v4862_v32 = vpop.f32.mrf.mxu0  ;;  %v4903_v33 = vpop.f32.mrf.mxu1 }
 0x29f   : > { %v4909_v30 = vadd.f32 %v4862_v32, %v4788_v25  ;;  %v4911_v61 = vadd.f32 %v4903_v33, %v4790_v59  ;;  %v5570_v33 = vld [vmem:[%s7379_s2] sm:$0x7] }
 0x2a0   : > { %v4864_v9 = vpop.f32.mrf.mxu0  ;;  %v6248_v34 = vpop.f32.mrf.mxu1 }
 0x2a1   : > { %v4910_v8 = vadd.f32 %v4864_v9, %v4789_v29  ;;  %v5578_v9 = vsub.s32 1, %v5573_v10 }
 0x2a2   : > { %v4866_v35 = vpop.f32.mrf.mxu0  ;;  %v4906_v36 = vpop.f32.mrf.mxu1 }
 0x2a4   : > { %v4867_v11 = vpop.f32.mrf.mxu0  ;;  %v6249_v37 = vpop.f32.mrf.mxu1 }
 0x2a6   : > { %v4971_v1 = vpop.f32.mrf.mxu0  ;;  %v5012_v38 = vpop.f32.mrf.mxu1 }
 0x2a7   : > { %v5018_v34 = vadd.f32 %v4971_v1, %v4909_v30  ;;  %v5020_v12 = vadd.f32 %v5012_v38, %v4911_v61 }
 0x2a8   : > { %v4973_v39 = vpop.f32.mrf.mxu0  ;;  %v6254_v0 = vpop.f32.mrf.mxu1 }
 0x2a9   : > { %v5019_v18 = vadd.f32 %v4973_v39, %v4910_v8 }
 0x2aa   : > { %v4975_v40 = vpop.f32.mrf.mxu0  ;;  %v5015_v41 = vpop.f32.mrf.mxu1 }
 0x2ac   : > { %v4976_v42 = vpop.f32.mrf.mxu0  ;;  %v6255_v43 = vpop.f32.mrf.mxu1 }
 0x2ae   : > { %v5080_v44 = vpop.f32.mrf.mxu0  ;;  %v5121_v45 = vpop.f32.mrf.mxu1 }
 0x2af   : > { %v5127_v36 = vadd.f32 %v5080_v44, %v5018_v34  ;;  %v5129_v26 = vadd.f32 %v5121_v45, %v5020_v12  ;;  %v5582_v44 = vsub.s32 2, %v5573_v10 }
 0x2b0   : > { %v5082_v46 = vpop.f32.mrf.mxu0  ;;  %v6260_v47 = vpop.f32.mrf.mxu1 }
 0x2b1   : > { %v5128_v11 = vadd.f32 %v5082_v46, %v5019_v18  ;;  %v5575_v46 = vrot.slane %v5570_v33, %v5574_v6 }
 0x2b2   : > { %v5084_v48 = vpop.f32.mrf.mxu0  ;;  %v5124_v49 = vpop.f32.mrf.mxu1 }
 0x2b4   : > { %v5085_v51 = vpop.f32.mrf.mxu0  ;;  %v6261_v5 = vpop.f32.mrf.mxu1 }
 0x2b5   : > { %v5579_v5 = vrot.slane %v5570_v33, %v5578_v9 }
 0x2b6   : > { %v5190_v52 = vpop.f32.mrf.mxu0  ;;  %v5231_v54 = vpop.f32.mrf.mxu1 }
 0x2b7   : > { %v5237_v37 = vadd.f32 %v5190_v52, %v5127_v36  ;;  %v5239_v32 = vadd.f32 %v5231_v54, %v5129_v26 }
 0x2b8   : > { %v5192_v55 = vpop.f32.mrf.mxu0  ;;  %v6266_v56 = vpop.f32.mrf.mxu1 }
 0x2b9   : > { %v5238_v40 = vadd.f32 %v5192_v55, %v5128_v11  ;;  %v5583_v56 = vrot.slane %v5570_v33, %v5582_v44 }
 0x2ba   : > { %v5194_v58 = vpop.f32.mrf.mxu0  ;;  %v5234_v60 = vpop.f32.mrf.mxu1 }
 0x2bc   : > { %v5195_v63 = vpop.f32.mrf.mxu0  ;;  %v6267_v7 = vpop.f32.mrf.mxu1 }
 0x2be   : > { %v5300_v13 = vpop.f32.mrf.mxu0  ;;  %v5341_v14 = vpop.f32.mrf.mxu1 }
 0x2bf   : > { %v5347_v41 = vadd.f32 %v5300_v13, %v5237_v37  ;;  %v5349_v39 = vadd.f32 %v5341_v14, %v5239_v32 }
 0x2c0   : > { %v5302_v21 = vpop.f32.mrf.mxu0  ;;  %v6272_v22 = vpop.f32.mrf.mxu1 }
 0x2c1   : > { %v5348_v42 = vadd.f32 %v5302_v21, %v5238_v40 }
 0x2c2   : > { %v5304_v28 = vpop.f32.mrf.mxu0  ;;  %v5344_v57 = vpop.f32.mrf.mxu1 }
 0x2c4   : > { %v5305_v31 = vpop.f32.mrf.mxu0  ;;  %v6273_v53 = vpop.f32.mrf.mxu1 }
 0x2c6   : > { %v5410_v35 = vpop.f32.mrf.mxu0  ;;  %v5451_v4 = vpop.f32.mrf.mxu1 }
 0x2c7   : > { %v5457_v43 = vadd.f32 %v5410_v35, %v5347_v41  ;;  %v5459_v48 = vadd.f32 %v5451_v4, %v5349_v39 }
 0x2c8   : > { %v5412_v19 = vpop.f32.mrf.mxu0  ;;  %v6278_v20 = vpop.f32.mrf.mxu1 }
 0x2c9   : > { %v5458_v49 = vadd.f32 %v5412_v19, %v5348_v42 }
 0x2ca   : > { %v5414_v0 = vpop.f32.mrf.mxu0  ;;  %v5454_v27 = vpop.f32.mrf.mxu1 }
 0x2cc   : > { %v5415_v1 = vpop.f32.mrf.mxu0  ;;  %v6279_v38 = vpop.f32.mrf.mxu1 }
 0x2ce   : > { %v5520_v45 = vpop.f32.mrf.mxu0  ;;  %v5561_v47 = vpop.f32.mrf.mxu1 }
 0x2cf   : > { %v5567_v51 = vadd.f32 %v5520_v45, %v5457_v43  ;;  %v5569_v55 = vadd.f32 %v5561_v47, %v5459_v48 }
 0x2d0   : > { %v5522_v52 = vpop.f32.mrf.mxu0  ;;  %v6284_v54 = vpop.f32.mrf.mxu1 }
 0x2d1   : > { %v5568_v58 = vadd.f32 %v5522_v52, %v5458_v49  ;;  %v5587_v63 = vmul.f32 %v5575_v46, %v5567_v51  ;;  %v5589_v13 = vmul.f32 %v5583_v56, %v5569_v55 }
 0x2d2   : > { %v5524_v60 = vpop.f32.mrf.mxu0  ;;  %v5564_v62 = vpop.f32.mrf.mxu1 }
 0x2d3   : > { %v5588_v7 = vmul.f32 %v5579_v5, %v5568_v58 }
 0x2d4   : > { %v5525_v2 = vpop.f32.mrf.mxu0  ;;  %v6285_v3 = vpop.f32.mrf.mxu1 }
 0x2d5   : > { %v5590_v14 = vadd.f32 %v5588_v7, %v5587_v63 }
 0x2d7   : > { %v5591_v15 = vadd.f32 %v5590_v14, %v5589_v13 }
 0x2d9   : > { %5592 = vadd.xlane.f32.xlu0 %v5591_v15 }
 0x362   : > { %v5593_v16 = vpop.xlane.xlu0 %5592 }
 0x363   : > { %v5594_v17 = vmul.f32 0.00390625, %v5593_v16 }
 0x365   : > { %v5595_v21 = vsub.f32 %v5567_v51, %v5594_v17  ;;  %v5596_v22 = vsub.f32 %v5568_v58, %v5594_v17  ;;  %v5597_v23 = vsub.f32 %v5569_v55, %v5594_v17 }
 0x367   : > { %v5598_v24 = vmul.f32 %v5595_v21, %v5575_v46  ;;  %v5599_v25 = vmul.f32 %v5596_v22, %v5579_v5  ;;  %v5600_v28 = vmul.f32 %v5597_v23, %v5583_v56 }
 0x369   : > { %v5601_v57 = vmul.f32 %v5598_v24, %v5598_v24  ;;  %v5602_v50 = vmul.f32 %v5599_v25, %v5599_v25  ;;  %v5603_v59 = vmul.f32 %v5600_v28, %v5600_v28 }
 0x36b   : > { %v5604_v29 = vadd.f32 %v5602_v50, %v5601_v57 }
 0x36d   : > { %v5605_v30 = vadd.f32 %v5604_v29, %v5603_v59 }
 0x36f   : > { %5606 = vadd.xlane.f32.xlu1 %v5605_v30 }
 0x3f8   : > { %v5607_v31 = vpop.xlane.xlu1 %5606 }
 0x3f9   : > { %v5608_v53 = vmul.f32 0.00390625, %v5607_v31 }
 0x3fb   : > { %v5609_v61 = vadd.f32 1e-05, %v5608_v53 }
 0x3fd   : > { %6353 = vrsqrt.f32 %v5609_v61 }
 0x40a   : > { %v6354_v8 = vpop.eup %6353 }
 0x40b   : > { %v5611_v34 = vmul.f32 %v6354_v8, %v5595_v21  ;;  %v5612_v35 = vmul.f32 %v6354_v8, %v5596_v22  ;;  %v5613_v4 = vmul.f32 %v6354_v8, %v5597_v23 }
 0x40d   : > { %vm5614_vm0 = vcmp.gt.f32.partialorder %v5611_v34, 0.0  ;;  %vm5615_vm2 = vcmp.gt.f32.partialorder %v5612_v35, 0.0  ;;  %vm5616_vm3 = vcmp.gt.f32.partialorder %v5613_v4, 0.0  ;;  %v5617_v10 = vmul.f32 0.2, %v5611_v34 }
 0x40e   : > { %v5618_v12 = vmul.f32 0.2, %v5612_v35  ;;  %v5619_v18 = vmul.f32 0.2, %v5613_v4 }
 0x40f   : > { %v5620_v36 = vsel %vm5614_vm0, %v5611_v34, %v5617_v10 }
 0x410   : > { %v5621_v19 = vsel %vm5615_vm2, %v5612_v35, %v5618_v12  ;;  %v5622_v20 = vsel %vm5616_vm3, %v5613_v4, %v5619_v18  ;;  %5623 = vst [vmem:[%s170_s30] sm:$0xff] %v5620_v36 }
 0x411   : > { %5624 = vst [vmem:[%s170_s30 + $0x8] sm:$0xff] %v5621_v19  ;;  %5625 = vst [vmem:[%s170_s30 + $0x10] sm:$0xff] %v5622_v20 }
 0x412 PF: > { %s13_s12 = sadd.s32 1, %s6361_s12  }
 0x413   : > { %p10_p4 = scmp.ge.s32.totalorder %s13_s12, 4  }
 0x415   :  { %12 = sbr.rel (!%p10_p4) target bundleno = 1 (0x1), region = 110 }

// kernel: encoder_forward.13
= control target key start
LH: loop header
LB: loop body
LE: loop exit
PB: predicated region body
PF: predicated region fallthrough
CT: control target
= control target key end

     0   :  { %s1314_s12 = smov 0   ;;  %s1422_s0 = inlined_call_operand.vmem [shape: bf16[2,4,16,134], index: 0, kind: input, shape index: {}]   ;;  %s1423_s1 = inlined_call_operand.vmem [shape: bf16[9,32,16], index: 1, kind: input, shape index: {}]   ;;  %s1424_s2 = inlined_call_operand.vmem [shape: f32[1,128], index: 2, kind: input, shape index: {}]   ;;  %s1425_s3 = inlined_call_operand.vmem [shape: f32[2,32,128], index: 3, kind: output, shape index: {}]  }
   0x1 LB: > { %s1050_s13 = sadd.s32 4294967295, %s1289_s12   ;;  %p1054_p0 = scmp.ge.s32.totalorder %s1289_s12, 1  ;;  %s1289_s12 = sphi %s1314_s12, %s13_s12  }
   0x2   : > { %p137_p1 = scmp.lt.s32.totalorder %s1289_s12, 3 }
   0x4   : > { %p138_p2 = pnand %p1054_p0, %p137_p1 }
   0x5   : > { %p161_p3 = scmp.lt.s32.totalorder (!%p138_p2), %s1050_s13, 1  ;;  %s1291_s22 = smov (!%p138_p2), 127  }
   0x6   : > { %141 = sbr.rel (%p138_p2) target bundleno = 677 (0x2a5), region = 32  ;;  %s1292_s4 = smov (!%p138_p2), 123  }
   0x7   : > { %s1293_s9 = smov (!%p138_p2), 122  }
   0xb   : > { %v1255_v0 = vld [vmem:[%s1423_s1 + $0x10] sm:$0xff]   ;;  %vm202_vm0 = vcmask 130048   ;;  %s1427_s13 = smov (!%p161_p3, %s1050_s13), 1  ;;  %v1256_v1 = vld [vmem:[%s1423_s1] sm:$0xff]   ;;  %v1257_v7 = vld [vmem:[%s1423_s1 + $0x18] sm:$0xff]   ;;  %vm358_vm1 = vcmask 1039360  }
   0xc   : > { %1181 = vmatprep.mubr.msk.bf16.mxu0 %vm202_vm0, %v1255_v0  ;;  %s1150_s18 = sshll.u32 %s1427_s13, 6  ;;  %1187 = vmatprep.mubr.msk.bf16.mxu1 %vm202_vm0, %v1256_v1  ;;  %v1258_v9 = vld [vmem:[%s1423_s1 + $0x8] sm:$0xff]   ;;  %v1260_v11 = vld [vmem:[%s1423_s1 + $0x20] sm:$0xff]   ;;  %v1262_v12 = vld [vmem:[%s1423_s1 + $0x30] sm:$0xff]   ;;  %vm695_vm2 = vcmask 1006592   ;;  %vm866_vm3 = vcmask 998400  }
   0xd   : > { %s1336_s21 = scalar_lea.vmem %s1422_s0, %s1150_s18  ;;  %v1263_v15 = vld [vmem:[%s1423_s1 + $0x38] sm:$0xff]   ;;  %v1267_v16 = vld [vmem:[%s1423_s1 + $0x50] sm:$0xff]   ;;  %v1261_v22 = vld [vmem:[%s1423_s1 + $0x28] sm:$0xff]   ;;  %s1151_s7 = sshll.u32 %s1427_s13, 5 }
   0xe   : > { %v1244_v2 = vld [vmem:[%s1336_s21] ss:$8 sps:$4 sm:$0xff]   ;;  %v1246_v3 = vld [vmem:[%s1336_s21 + $0x4] ss:$8 sps:$4 sm:$0xff]   ;;  %v1253_v6 = vld [vmem:[%s1336_s21 + $0x10] ss:$8 sps:$4 sm:$0xff]   ;;  %s170_s10 = scalar_lea.vmem %s1425_s3, %s1151_s7 }
   0xf   : > { %354 = vrot.lane.b32.xlu0 %v1244_v2, %s1291_s22  ;;  %v1247_v4 = vld [vmem:[%s1336_s21 + $0x20] ss:$8 sps:$4 sm:$0xff]   ;;  %v1249_v5 = vld [vmem:[%s1336_s21 + $0x24] ss:$8 sps:$4 sm:$0xff]   ;;  %1179 = vmatprep.subr.bf16.mxu0 %v1253_v6  ;;  %v1252_v13 = vld [vmem:[%s1336_s21 + $0x10] ss:$8 sps:$4 sm:$0xff]  }
  0x10   : > { %611 = vrot.lane.b32.xlu1 %v1247_v4, %s1291_s22  ;;  %v1254_v8 = vld [vmem:[%s1336_s21] ss:$8 sps:$4 sm:$0xff]   ;;  %1180 = vmatpush3.bf16.msra.mxu0 %v1253_v6  ;;  %v1250_v14 = vld [vmem:[%s1336_s21 + $0x14] ss:$8 sps:$4 sm:$0xff]   ;;  %v1264_v20 = vld [vmem:[%s1336_s21 + $0x30] ss:$8 sps:$4 sm:$0xff]  }
  0x11   : > { %v1259_v10 = vld [vmem:[%s1336_s21 + $0x20] ss:$8 sps:$4 sm:$0xff]   ;;  %1185 = vmatprep.subr.bf16.mxu1 %v1254_v8  ;;  %v1268_v27 = vld [vmem:[%s1423_s1 + $0x58] sm:$0xff]   ;;  %v1271_v28 = vld [vmem:[%s1423_s1 + $0x70] sm:$0xff]  }
  0x12   : > { %1186 = vmatpush3.bf16.msra.mxu1 %v1254_v8  ;;  %v1265_v25 = vld [vmem:[%s1423_s1 + $0x40] sm:$0xff]   ;;  %v1266_v32 = vld [vmem:[%s1423_s1 + $0x48] sm:$0xff]   ;;  %v1272_v37 = vld [vmem:[%s1423_s1 + $0x78] sm:$0xff]  }
  0x13   : > { %356 = vrot.lane.b32.xlu0 %v1246_v3, %s1291_s22  ;;  %1197 = vmatprep.subr.bf16.mxu1 %v1259_v10  ;;  %v1269_v35 = vld [vmem:[%s1423_s1 + $0x60] sm:$0xff]   ;;  %v1270_v40 = vld [vmem:[%s1423_s1 + $0x68] sm:$0xff]  }
  0x14   : > { %613 = vrot.lane.b32.xlu1 %v1249_v5, %s1291_s22  ;;  %1182 = vmatmul.mubr.msk.bf16.vlgmr.msra.gmra.mxu0 %vm202_vm0, %v1257_v7  ;;  %v1273_v41 = vld [vmem:[%s1423_s1 + $0x80] sm:$0xff]   ;;  %v1274_v42 = vld [vmem:[%s1423_s1 + $0x88] sm:$0xff]  }
  0x15   : > { %1188 = vmatmul.mubr.msk.bf16.vlgmr.msra.gmra.mxu1 %vm202_vm0, %v1258_v9  ;;  %1193 = vmatprep.mubr.msk.bf16.mxu0 %vm202_vm0, %v1260_v11 }
  0x16   : > { %1198 = vmatpush3.bf16.msra.mxu1 %v1259_v10  ;;  %1199 = vmatprep.mubr.msk.bf16.mxu1 %vm202_vm0, %v1262_v12 }
  0x17   : > { %691 = vrot.lane.b32.xlu0 %v1244_v2, %s1292_s4 }
  0x18   : > { %693 = vrot.lane.b32.xlu1 %v1246_v3, %s1292_s4 }
  0x1b   : > { %782 = vrot.lane.b32.xlu0 %v1252_v13, %s1292_s4 }
  0x1c   : > { %784 = vrot.lane.b32.xlu1 %v1250_v14, %s1292_s4 }
  0x1d   : > { %1200 = vmatmul.mubr.msk.bf16.vlgmr.msra.gmra.mxu1 %vm202_vm0, %v1263_v15 }
  0x1e   : > { %1211 = vmatprep.mubr.msk.bf16.mxu1 %vm202_vm0, %v1267_v16 }
  0x1f   : > { %862 = vrot.lane.b32.xlu0 %v1244_v2, %s1293_s9 }
  0x20   : > { %864 = vrot.lane.b32.xlu1 %v1246_v3, %s1293_s9 }
  0x81   : > { %v355_v17 = vpop.permute.xlu0 %354 }
  0x82   : > { %v612_v18 = vpop.permute.xlu1 %611 }
  0x85   : > { %v357_v19 = vpop.permute.xlu0 %356 }
  0x86   : > { %v359_v21 = vsel %vm358_vm1, %v355_v17, %v357_v19  ;;  %v614_v23 = vpop.permute.xlu1 %613 }
  0x87   : > { %1191 = vmatprep.subr.bf16.mxu0 %v359_v21  ;;  %v615_v24 = vsel %vm358_vm1, %v612_v18, %v614_v23 }
  0x88   : > { %1192 = vmatpush3.bf16.msra.mxu0 %v359_v21  ;;  %1209 = vmatprep.subr.bf16.mxu1 %v615_v24 }
  0x89   : > { %1203 = vmatprep.subr.bf16.mxu0 %v1264_v20  ;;  %v692_v26 = vpop.permute.xlu0 %691  ;;  %1210 = vmatpush3.bf16.msra.mxu1 %v615_v24 }
  0x8a   : > { %v694_v29 = vpop.permute.xlu1 %693 }
  0x8b   : > { %1194 = vmatmul.mubr.msk.bf16.vlgmr.msra.gmra.mxu0 %vm202_vm0, %v1261_v22  ;;  %v696_v30 = vsel %vm695_vm2, %v692_v26, %v694_v29 }
  0x8c   : > { %1204 = vmatpush3.bf16.msra.mxu0 %v1264_v20  ;;  %1205 = vmatprep.mubr.msk.bf16.mxu0 %vm202_vm0, %v1265_v25 }
  0x8d   : > { %1212 = vmatmul.mubr.msk.bf16.vlgmr.msra.gmra.mxu1 %vm202_vm0, %v1268_v27  ;;  %1215 = vmatprep.subr.bf16.mxu0 %v696_v30  ;;  %v783_v31 = vpop.permute.xlu0 %782 }
  0x8e   : > { %1223 = vmatprep.mubr.msk.bf16.mxu1 %vm202_vm0, %v1271_v28  ;;  %v785_v33 = vpop.permute.xlu1 %784 }
  0x8f   : > { %v786_v34 = vsel %vm695_vm2, %v783_v31, %v785_v33 }
  0x90   : > { %1221 = vmatprep.subr.bf16.mxu1 %v786_v34 }
  0x91   : > { %v863_v36 = vpop.permute.xlu0 %862  ;;  %1222 = vmatpush3.bf16.msra.mxu1 %v786_v34 }
  0x92   : > { %v865_v38 = vpop.permute.xlu1 %864 }
  0x93   : > { %1206 = vmatmul.mubr.msk.bf16.vlgmr.msra.gmra.mxu0 %vm202_vm0, %v1266_v32  ;;  %v867_v39 = vsel %vm866_vm3, %v863_v36, %v865_v38 }
  0x94   : > { %1216 = vmatpush3.bf16.msra.mxu0 %v696_v30  ;;  %1217 = vmatprep.mubr.msk.bf16.mxu0 %vm202_vm0, %v1269_v35 }
  0x95   : > { %1224 = vmatmul.mubr.msk.bf16.vlgmr.msra.gmra.mxu1 %vm202_vm0, %v1272_v37  ;;  %1227 = vmatprep.subr.bf16.mxu0 %v867_v39 }
  0x9b   : > { %1218 = vmatmul.mubr.msk.bf16.vlgmr.msra.gmra.mxu0 %vm202_vm0, %v1270_v40 }
  0x9c   : > { %1228 = vmatpush3.bf16.msra.mxu0 %v867_v39  ;;  %1229 = vmatprep.mubr.msk.bf16.mxu0 %vm202_vm0, %v1273_v41  ;;  %v1147_v41 = vld [vmem:[%s1424_s2] ss:$0 sm:$0xff] }
  0xa3   : > { %1230 = vmatmul.mubr.msk.bf16.vlgmr.msra.gmra.mxu0 %vm202_vm0, %v1274_v42 }
  0xd4   : > { %v1183_v47 = vpop.f32.mrf.mxu0 }
  0xd5   : > { %v1189_v43 = vpop.f32.mrf.mxu1 }
  0xd6   : > { %v243_v49 = vpop.f32.mrf.mxu0  ;;  %v323_v0 = vadd.f32 %v1189_v43, %v1183_v47 }
  0xd7   : > { %v314_v44 = vpop.f32.mrf.mxu1 }
  0xd8   : > { %v1184_v51 = vpop.f32.mrf.mxu0  ;;  %v315_v61 = vadd.f32 %v314_v44, %v243_v49 }
  0xd9   : > { %v1190_v45 = vpop.f32.mrf.mxu1 }
  0xda   : > { %v246_v53 = vpop.f32.mrf.mxu0  ;;  %v326_v7 = vadd.f32 %v1190_v45, %v1184_v51 }
  0xdb   : > { %v317_v46 = vpop.f32.mrf.mxu1 }
  0xdc   : > { %v318_v3 = vadd.f32 %v317_v46, %v246_v53 }
  0xdd   : > { %v1201_v48 = vpop.f32.mrf.mxu1 }
  0xdf   : > { %v484_v50 = vpop.f32.mrf.mxu1 }
  0xe1   : > { %v1202_v52 = vpop.f32.mrf.mxu1 }
  0xe3   : > { %v487_v54 = vpop.f32.mrf.mxu1 }
 0x14b   : > { %v1195_v55 = vpop.f32.mrf.mxu0 }
 0x14c   : > { %v418_v4 = vadd.f32 %v1195_v55, %v323_v0 }
 0x14d   : > { %v401_v56 = vpop.f32.mrf.mxu0  ;;  %v1213_v57 = vpop.f32.mrf.mxu1 }
 0x14e   : > { %v416_v1 = vadd.f32 %v401_v56, %v315_v61  ;;  %v501_v11 = vadd.f32 %v1201_v48, %v418_v4 }
 0x14f   : > { %v1196_v58 = vpop.f32.mrf.mxu0  ;;  %v657_v59 = vpop.f32.mrf.mxu1 }
 0x150   : > { %v499_v8 = vadd.f32 %v484_v50, %v416_v1  ;;  %v419_v12 = vadd.f32 %v1196_v58, %v326_v7 }
 0x151   : > { %v404_v60 = vpop.f32.mrf.mxu0  ;;  %v1214_v63 = vpop.f32.mrf.mxu1 }
 0x152   : > { %v417_v9 = vadd.f32 %v404_v60, %v318_v3  ;;  %v502_v19 = vadd.f32 %v1202_v52, %v419_v12 }
 0x153   : > { %v1207_v62 = vpop.f32.mrf.mxu0  ;;  %v660_v6 = vpop.f32.mrf.mxu1 }
 0x154   : > { %v500_v16 = vadd.f32 %v487_v54, %v417_v9  ;;  %v584_v17 = vadd.f32 %v1207_v62, %v501_v11 }
 0x155   : > { %v567_v2 = vpop.f32.mrf.mxu0  ;;  %v1225_v15 = vpop.f32.mrf.mxu1 }
 0x156   : > { %v582_v13 = vadd.f32 %v567_v2, %v499_v8  ;;  %v674_v24 = vadd.f32 %v1213_v57, %v584_v17 }
 0x157   : > { %v1208_v5 = vpop.f32.mrf.mxu0  ;;  %v828_v23 = vpop.f32.mrf.mxu1 }
 0x158   : > { %v672_v20 = vadd.f32 %v657_v59, %v582_v13  ;;  %v585_v25 = vadd.f32 %v1208_v5, %v502_v19 }
 0x159   : > { %v570_v10 = vpop.f32.mrf.mxu0  ;;  %v1226_v30 = vpop.f32.mrf.mxu1 }
 0x15a   : > { %v583_v21 = vadd.f32 %v570_v10, %v500_v16  ;;  %v675_v32 = vadd.f32 %v1214_v63, %v585_v25 }
 0x15b   : > { %v1219_v14 = vpop.f32.mrf.mxu0  ;;  %v831_v39 = vpop.f32.mrf.mxu1 }
 0x15c   : > { %v673_v28 = vadd.f32 %v660_v6, %v583_v21  ;;  %v755_v29 = vadd.f32 %v1219_v14, %v674_v24 }
 0x15d   : > { %v738_v18 = vpop.f32.mrf.mxu0 }
 0x15e   : > { %v753_v26 = vadd.f32 %v738_v18, %v672_v20  ;;  %v845_v36 = vadd.f32 %v1225_v15, %v755_v29 }
 0x15f   : > { %v1220_v22 = vpop.f32.mrf.mxu0 }
 0x160   : > { %v843_v33 = vadd.f32 %v828_v23, %v753_v26  ;;  %v756_v37 = vadd.f32 %v1220_v22, %v675_v32 }
 0x161   : > { %v741_v27 = vpop.f32.mrf.mxu0 }
 0x162   : > { %v754_v34 = vadd.f32 %v741_v27, %v673_v28  ;;  %v846_v46 = vadd.f32 %v1226_v30, %v756_v37 }
 0x163   : > { %v1231_v31 = vpop.f32.mrf.mxu0 }
 0x164   : > { %v844_v42 = vadd.f32 %v831_v39, %v754_v34  ;;  %v926_v43 = vadd.f32 %v1231_v31, %v845_v36 }
 0x165   : > { %v909_v35 = vpop.f32.mrf.mxu0 }
 0x166   : > { %v924_v38 = vadd.f32 %v909_v35, %v843_v33  ;;  %v937_v50 = vmul.f32 %v1147_v41, %v926_v43 }
 0x167   : > { %v1232_v40 = vpop.f32.mrf.mxu0 }
 0x168   : > { %v935_v44 = vmul.f32 %v1147_v41, %v924_v38  ;;  %v927_v48 = vadd.f32 %v1232_v40, %v846_v46 }
 0x169   : > { %v912_v45 = vpop.f32.mrf.mxu0 }
 0x16a   : > { %v925_v47 = vadd.f32 %v912_v45, %v844_v42  ;;  %939 = vadd.xlane.f32.xlu0 %v935_v44  ;;  %v938_v51 = vmul.f32 %v1147_v41, %v927_v48 }
 0x16c   : > { %v936_v49 = vmul.f32 %v1147_v41, %v925_v47 }
 0x16e   : > { %941 = vadd.xlane.f32.xlu1 %v936_v49  ;;  %943 = vadd.xlane.f32.xlu0 %v937_v50 }
 0x172   : > { %945 = vadd.xlane.f32.xlu0 %v938_v51 }
 0x1f3   : > { %v940_v52 = vpop.xlane.xlu0 %939 }
 0x1f4   : > { %v947_v53 = vmul.f32 0.0625, %v940_v52 }
 0x1f6   : > { %v951_v54 = vsub.f32 %v924_v38, %v947_v53 }
 0x1f7   : > { %v942_v55 = vpop.xlane.xlu1 %941  ;;  %v944_v56 = vpop.xlane.xlu0 %943 }
 0x1f8   : > { %v948_v57 = vmul.f32 0.0625, %v942_v55  ;;  %v949_v58 = vmul.f32 0.0625, %v944_v56  ;;  %v955_v59 = vmul.f32 %v1147_v41, %v951_v54 }
 0x1fa   : > { %v952_v60 = vsub.f32 %v925_v47, %v948_v57  ;;  %v953_v61 = vsub.f32 %v926_v43, %v949_v58  ;;  %v959_v62 = vmul.f32 %v955_v59, %v955_v59 }
 0x1fb   : > { %v946_v63 = vpop.xlane.xlu0 %945 }
 0x1fc   : > { %v950_v0 = vmul.f32 0.0625, %v946_v63  ;;  %963 = vadd.xlane.f32.xlu1 %v959_v62  ;;  %v956_v1 = vmul.f32 %v1147_v41, %v952_v60  ;;  %v957_v2 = vmul.f32 %v1147_v41, %v953_v61 }
 0x1fe   : > { %v954_v3 = vsub.f32 %v927_v48, %v950_v0  ;;  %v960_v4 = vmul.f32 %v956_v1, %v956_v1  ;;  %v961_v5 = vmul.f32 %v957_v2, %v957_v2 }
 0x200   : > { %965 = vadd.xlane.f32.xlu0 %v960_v4  ;;  %967 = vadd.xlane.f32.xlu1 %v961_v5  ;;  %v958_v6 = vmul.f32 %v1147_v41, %v954_v3 }
 0x202   : > { %v962_v7 = vmul.f32 %v958_v6, %v958_v6 }
 0x204   : > { %969 = vadd.xlane.f32.xlu0 %v962_v7 }
 0x285   : > { %v964_v8 = vpop.xlane.xlu1 %963 }
 0x286   : > { %v971_v9 = vmul.f32 0.0625, %v964_v8 }
 0x288   : > { %v975_v10 = vadd.f32 1e-05, %v971_v9 }
 0x289   : > { %v968_v11 = vpop.xlane.xlu1 %967  ;;  %v966_v12 = vpop.xlane.xlu0 %965 }
 0x28a   : > { %1275 = vrsqrt.f32 %v975_v10  ;;  %v973_v13 = vmul.f32 0.0625, %v968_v11  ;;  %v972_v14 = vmul.f32 0.0625, %v966_v12 }
 0x28c   : > { %v977_v15 = vadd.f32 1e-05, %v973_v13  ;;  %v976_v16 = vadd.f32 1e-05, %v972_v14 }
 0x28d   : > { %v970_v17 = vpop.xlane.xlu0 %969 }
 0x28e   : > { %1277 = vrsqrt.f32 %v977_v15  ;;  %v974_v18 = vmul.f32 0.0625, %v970_v17 }
 0x28f   : > { %1279 = vrsqrt.f32 %v976_v16 }
 0x290   : > { %v978_v19 = vadd.f32 1e-05, %v974_v18 }
 0x292   : > { %1281 = vrsqrt.f32 %v978_v19 }
 0x297   : > { %v1276_v20 = vpop.eup %1275 }
 0x298   : > { %v983_v21 = vmul.f32 %v1276_v20, %v951_v54 }
 0x29a   : > { %v987_v22 = vmax.f32 %v983_v21, 0.0 }
 0x29b   : > { %v1278_v23 = vpop.eup %1277 }
 0x29c   : > { %v1280_v24 = vpop.eup %1279  ;;  %991 = vst [vmem:[%s170_s10] sm:$0xff] %v987_v22  ;;  %v985_v25 = vmul.f32 %v1278_v23, %v953_v61 }
 0x29d   : > { %v984_v26 = vmul.f32 %v1280_v24, %v952_v60 }
 0x29e   : > { %v989_v27 = vmax.f32 %v985_v25, 0.0 }
 0x29f   : > { %v1282_v28 = vpop.eup %1281  ;;  %v988_v29 = vmax.f32 %v984_v26, 0.0 }
 0x2a0   : > { %993 = vst [vmem:[%s170_s10 + $0x10] sm:$0xff] %v989_v27  ;;  %v986_v30 = vmul.f32 %v1282_v28, %v954_v3 }
 0x2a1   : > { %992 = vst [vmem:[%s170_s10 + $0x8] sm:$0xff] %v988_v29 }
 0x2a2   : > { %v990_v31 = vmax.f32 %v986_v30, 0.0 }
 0x2a4   : > { %994 = vst [vmem:[%s170_s10 + $0x18] sm:$0xff] %v990_v31 }
 0x2a5 PF: > { %s13_s12 = sadd.s32 1, %s1289_s12  }
 0x2a6   : > { %p10_p4 = scmp.ge.s32.totalorder %s13_s12, 4  }
 0x2a8   :  { %12 = sbr.rel (!%p10_p4) target bundleno = 1 (0x1), region = 73 }

// kernel: encoder_forward.14
= control target key start
LH: loop header
LB: loop body
LE: loop exit
PB: predicated region body
PF: predicated region fallthrough
CT: control target
= control target key end

     0   :  { %s1374_s12 = smov 0   ;;  %s1485_s0 = inlined_call_operand.vmem [shape: bf16[2,1,32,142], index: 0, kind: input, shape index: {}]   ;;  %s1486_s1 = inlined_call_operand.vmem [shape: bf16[9,32,32], index: 1, kind: input, shape index: {}]   ;;  %s1487_s2 = inlined_call_operand.vmem [shape: f32[1,128], index: 2, kind: input, shape index: {}]   ;;  %s1488_s3 = inlined_call_operand.vmem [shape: f32[2,32,128], index: 3, kind: output, shape index: {}]  }
   0x1 LB: > { %s1092_s13 = sadd.s32 4294967295, %s1344_s12   ;;  %p1096_p0 = scmp.ge.s32.totalorder %s1344_s12, 1  ;;  %s1344_s12 = sphi %s1374_s12, %s13_s12  }
   0x2   : > { %p137_p1 = scmp.lt.s32.totalorder %s1344_s12, 3 }
   0x4   : > { %p138_p2 = pnand %p1096_p0, %p137_p1 }
   0x5   : > { %p161_p3 = scmp.lt.s32.totalorder (!%p138_p2), %s1092_s13, 1  ;;  %s1346_s18 = smov (!%p138_p2), 127  }
   0x6   : > { %141 = sbr.rel (%p138_p2) target bundleno = 709 (0x2c5), region = 32  ;;  %s1347_s25 = smov (!%p138_p2), 126  }
   0x7   : > { %s1348_s26 = smov (!%p138_p2), 122   ;;  %s1349_s29 = smov (!%p138_p2), 121  }
   0x8   : > { %s1350_s30 = smov (!%p138_p2), 120   ;;  %s1351_s4 = smov (!%p138_p2), 116  }
   0x9   : > { %s1352_s5 = smov (!%p138_p2), 115   ;;  %s1353_s6 = smov (!%p138_p2), 114  }
   0xb   : > { %s1490_s13 = smov (!%p161_p3, %s1092_s13), 1  ;;  %vm228_vm0 = vcmask 261120   ;;  %v1311_v5 = vld [vmem:[%s1486_s1 + $0x10] sm:$0xff]   ;;  %v1314_v7 = vld [vmem:[%s1486_s1] sm:$0xff]   ;;  %v1315_v8 = vld [vmem:[%s1486_s1 + $0x8] sm:$0xff]   ;;  %vm223_vm1 = vcmask 1039360  }
   0xc   : > { %s1178_s14 = sshll.u32 %s1490_s13, 5  ;;  %1220 = vmatprep.mubr.msk.bf16.mxu0 %vm228_vm0, %v1311_v5  ;;  %1228 = vmatprep.mubr.msk.bf16.mxu1 %vm228_vm0, %v1314_v7  ;;  %v1318_v9 = vld [vmem:[%s1486_s1 + $0x30] sm:$0xff]   ;;  %vm384_vm2 = vcmask 1031168   ;;  %v1313_v18 = vld [vmem:[%s1486_s1 + $0x18] sm:$0xff]   ;;  %v1316_v20 = vld [vmem:[%s1486_s1 + $0x20] sm:$0xff]   ;;  %vm471_vm3 = vcmask 998400  }
   0xd   : > { %s165_s17 = scalar_lea.vmem %s1485_s0, %s1178_s14  ;;  %v1317_v27 = vld [vmem:[%s1486_s1 + $0x28] sm:$0xff]   ;;  %vm558_vm4 = vcmask 990208   ;;  %v1320_v28 = vld [vmem:[%s1486_s1 + $0x40] sm:$0xff]   ;;  %v1319_v35 = vld [vmem:[%s1486_s1 + $0x38] sm:$0xff]   ;;  %vm645_vm5 = vcmask 982016   ;;  %vm732_vm6 = vcmask 949248  }
   0xe   : > { %v1304_v0 = vld [vmem:[%s165_s17 + $0x10] ss:$8 sps:$4 sm:$0xff]   ;;  %v1306_v1 = vld [vmem:[%s165_s17] ss:$8 sps:$4 sm:$0xff]   ;;  %v1308_v2 = vld [vmem:[%s165_s17 + $0x14] ss:$8 sps:$4 sm:$0xff]  }
   0xf   : > { %219 = vrot.lane.b32.xlu0 %v1304_v0, %s1346_s18  ;;  %v1309_v3 = vld [vmem:[%s165_s17 + $0x4] ss:$8 sps:$4 sm:$0xff]   ;;  %215 = vrot.lane.b32.xlu1 %v1306_v1, %s1346_s18  ;;  %v1310_v4 = vld [vmem:[%s165_s17 + $0x10] ss:$8 sps:$4 sm:$0xff]   ;;  %vm819_vm7 = vcmask 941056   ;;  %vm906_vm8 = vcmask 932864  }
  0x10   : > { %v1312_v6 = vld [vmem:[%s165_s17] ss:$8 sps:$4 sm:$0xff]   ;;  %1224 = vmatprep.subr.bf16.mxu1 %v1310_v4  ;;  %v1322_v37 = vld [vmem:[%s1486_s1 + $0x50] sm:$0xff]   ;;  %v1323_v51 = vld [vmem:[%s1486_s1 + $0x58] sm:$0xff]  }
  0x11   : > { %1225 = vmatpush3.bf16.msra.mxu1 %v1310_v4  ;;  %v1321_v40 = vld [vmem:[%s1486_s1 + $0x48] sm:$0xff]   ;;  %v1324_v42 = vld [vmem:[%s1486_s1 + $0x60] sm:$0xff]   ;;  %v1326_v53 = vld [vmem:[%s1486_s1 + $0x70] sm:$0xff]  }
  0x12   : > { %1226 = vmatprep.subr.bf16.mxu1 %v1312_v6  ;;  %v1325_v56 = vld [vmem:[%s1486_s1 + $0x68] sm:$0xff]   ;;  %v1328_v58 = vld [vmem:[%s1486_s1 + $0x80] sm:$0xff]  }
  0x13   : > { %221 = vrot.lane.b32.xlu0 %v1308_v2, %s1346_s18  ;;  %217 = vrot.lane.b32.xlu1 %v1309_v3, %s1346_s18  ;;  %v1329_v7 = vld [vmem:[%s1486_s1 + $0x88] sm:$0xff]   ;;  %s170_s18 = scalar_lea.vmem %s1488_s3, %s1178_s14 }
  0x15   : > { %1227 = vmatpush3.bf16.msra.mxu1 %v1312_v6 }
  0x17   : > { %380 = vrot.lane.b32.xlu0 %v1304_v0, %s1347_s25  ;;  %382 = vrot.lane.b32.xlu1 %v1308_v2, %s1347_s25 }
  0x18   : > { %1229 = vmatmul.mubr.msk.bf16.vlgmr.msra.gmra.mxu1 %vm228_vm0, %v1315_v8 }
  0x19   : > { %1244 = vmatprep.mubr.msk.bf16.mxu1 %vm228_vm0, %v1318_v9 }
  0x1b   : > { %376 = vrot.lane.b32.xlu0 %v1306_v1, %s1347_s25  ;;  %378 = vrot.lane.b32.xlu1 %v1309_v3, %s1347_s25 }
  0x1f   : > { %467 = vrot.lane.b32.xlu0 %v1304_v0, %s1348_s26  ;;  %469 = vrot.lane.b32.xlu1 %v1308_v2, %s1348_s26 }
  0x23   : > { %554 = vrot.lane.b32.xlu0 %v1304_v0, %s1349_s29  ;;  %556 = vrot.lane.b32.xlu1 %v1308_v2, %s1349_s29 }
  0x27   : > { %463 = vrot.lane.b32.xlu0 %v1306_v1, %s1348_s26  ;;  %465 = vrot.lane.b32.xlu1 %v1309_v3, %s1348_s26 }
  0x2b   : > { %550 = vrot.lane.b32.xlu0 %v1306_v1, %s1349_s29  ;;  %552 = vrot.lane.b32.xlu1 %v1309_v3, %s1349_s29 }
  0x2f   : > { %641 = vrot.lane.b32.xlu0 %v1304_v0, %s1350_s30  ;;  %643 = vrot.lane.b32.xlu1 %v1308_v2, %s1350_s30 }
  0x33   : > { %728 = vrot.lane.b32.xlu0 %v1304_v0, %s1351_s4  ;;  %730 = vrot.lane.b32.xlu1 %v1308_v2, %s1351_s4 }
  0x37   : > { %637 = vrot.lane.b32.xlu0 %v1306_v1, %s1350_s30  ;;  %639 = vrot.lane.b32.xlu1 %v1309_v3, %s1350_s30 }
  0x3b   : > { %724 = vrot.lane.b32.xlu0 %v1306_v1, %s1351_s4  ;;  %726 = vrot.lane.b32.xlu1 %v1309_v3, %s1351_s4 }
  0x3f   : > { %815 = vrot.lane.b32.xlu0 %v1304_v0, %s1352_s5  ;;  %817 = vrot.lane.b32.xlu1 %v1308_v2, %s1352_s5 }
  0x43   : > { %902 = vrot.lane.b32.xlu0 %v1304_v0, %s1353_s6  ;;  %904 = vrot.lane.b32.xlu1 %v1308_v2, %s1353_s6 }
  0x47   : > { %811 = vrot.lane.b32.xlu0 %v1306_v1, %s1352_s5  ;;  %813 = vrot.lane.b32.xlu1 %v1309_v3, %s1352_s5 }
  0x4b   : > { %898 = vrot.lane.b32.xlu0 %v1306_v1, %s1353_s6  ;;  %900 = vrot.lane.b32.xlu1 %v1309_v3, %s1353_s6  ;;  %v1327_v3 = vld [vmem:[%s1486_s1 + $0x78] sm:$0xff]  }
  0x81   : > { %v220_v10 = vpop.permute.xlu0 %219  ;;  %v216_v11 = vpop.permute.xlu1 %215 }
  0x85   : > { %v222_v12 = vpop.permute.xlu0 %221  ;;  %v218_v13 = vpop.permute.xlu1 %217 }
  0x86   : > { %v225_v14 = vsel %vm223_vm1, %v220_v10, %v222_v12  ;;  %v224_v15 = vsel %vm223_vm1, %v216_v11, %v218_v13 }
  0x87   : > { %1216 = vmatprep.subr.bf16.mxu0 %v225_v14 }
  0x88   : > { %1217 = vmatpush3.bf16.msra.mxu0 %v225_v14 }
  0x89   : > { %v381_v16 = vpop.permute.xlu0 %380  ;;  %1218 = vmatprep.subr.bf16.mxu0 %v224_v15  ;;  %v383_v17 = vpop.permute.xlu1 %382 }
  0x8a   : > { %v386_v19 = vsel %vm384_vm2, %v381_v16, %v383_v17 }
  0x8c   : > { %1219 = vmatpush3.bf16.msra.mxu0 %v224_v15 }
  0x8d   : > { %v377_v21 = vpop.permute.xlu0 %376  ;;  %1232 = vmatprep.subr.bf16.mxu0 %v386_v19  ;;  %v379_v22 = vpop.permute.xlu1 %378 }
  0x8e   : > { %v385_v23 = vsel %vm384_vm2, %v377_v21, %v379_v22 }
  0x8f   : > { %1221 = vmatmul.mubr.msk.bf16.vlgmr.msra.gmra.mxu0 %vm228_vm0, %v1313_v18 }
  0x90   : > { %1233 = vmatpush3.bf16.msra.mxu0 %v386_v19  ;;  %1236 = vmatprep.mubr.msk.bf16.mxu0 %vm228_vm0, %v1316_v20 }
  0x91   : > { %v468_v24 = vpop.permute.xlu0 %467  ;;  %1234 = vmatprep.subr.bf16.mxu0 %v385_v23  ;;  %v470_v25 = vpop.permute.xlu1 %469 }
  0x92   : > { %v473_v26 = vsel %vm471_vm3, %v468_v24, %v470_v25 }
  0x93   : > { %1240 = vmatprep.subr.bf16.mxu1 %v473_v26 }
  0x94   : > { %1235 = vmatpush3.bf16.msra.mxu0 %v385_v23  ;;  %1241 = vmatpush3.bf16.msra.mxu1 %v473_v26 }
  0x95   : > { %v555_v29 = vpop.permute.xlu0 %554  ;;  %v557_v30 = vpop.permute.xlu1 %556 }
  0x96   : > { %v560_v31 = vsel %vm558_vm4, %v555_v29, %v557_v30 }
  0x97   : > { %1237 = vmatmul.mubr.msk.bf16.vlgmr.msra.gmra.mxu0 %vm228_vm0, %v1317_v27  ;;  %1248 = vmatprep.subr.bf16.mxu0 %v560_v31 }
  0x98   : > { %1252 = vmatprep.mubr.msk.bf16.mxu0 %vm228_vm0, %v1320_v28  ;;  %1249 = vmatpush3.bf16.msra.mxu0 %v560_v31 }
  0x99   : > { %v464_v32 = vpop.permute.xlu0 %463  ;;  %v466_v33 = vpop.permute.xlu1 %465 }
  0x9a   : > { %v472_v34 = vsel %vm471_vm3, %v464_v32, %v466_v33 }
  0x9b   : > { %1242 = vmatprep.subr.bf16.mxu1 %v472_v34 }
  0x9c   : > { %1243 = vmatpush3.bf16.msra.mxu1 %v472_v34 }
  0x9d   : > { %v551_v36 = vpop.permute.xlu0 %550  ;;  %v553_v38 = vpop.permute.xlu1 %552 }
  0x9e   : > { %v559_v39 = vsel %vm558_vm4, %v551_v36, %v553_v38 }
  0x9f   : > { %1250 = vmatprep.subr.bf16.mxu0 %v559_v39  ;;  %1245 = vmatmul.mubr.msk.bf16.vlgmr.msra.gmra.mxu1 %vm228_vm0, %v1319_v35 }
  0xa0   : > { %1251 = vmatpush3.bf16.msra.mxu0 %v559_v39  ;;  %1260 = vmatprep.mubr.msk.bf16.mxu1 %vm228_vm0, %v1322_v37 }
  0xa1   : > { %v642_v41 = vpop.permute.xlu0 %641  ;;  %v644_v43 = vpop.permute.xlu1 %643 }
  0xa2   : > { %v647_v44 = vsel %vm645_vm5, %v642_v41, %v644_v43 }
  0xa3   : > { %1256 = vmatprep.subr.bf16.mxu1 %v647_v44  ;;  %1253 = vmatmul.mubr.msk.bf16.vlgmr.msra.gmra.mxu0 %vm228_vm0, %v1321_v40 }
  0xa4   : > { %1257 = vmatpush3.bf16.msra.mxu1 %v647_v44  ;;  %1268 = vmatprep.mubr.msk.bf16.mxu0 %vm228_vm0, %v1324_v42 }
  0xa5   : > { %v729_v45 = vpop.permute.xlu0 %728  ;;  %v731_v46 = vpop.permute.xlu1 %730 }
  0xa6   : > { %v734_v47 = vsel %vm732_vm6, %v729_v45, %v731_v46 }
  0xa7   : > { %1264 = vmatprep.subr.bf16.mxu0 %v734_v47 }
  0xa8   : > { %1265 = vmatpush3.bf16.msra.mxu0 %v734_v47 }
  0xa9   : > { %v638_v48 = vpop.permute.xlu0 %637  ;;  %v640_v49 = vpop.permute.xlu1 %639 }
  0xaa   : > { %v646_v50 = vsel %vm645_vm5, %v638_v48, %v640_v49 }
  0xab   : > { %1258 = vmatprep.subr.bf16.mxu1 %v646_v50 }
  0xac   : > { %1259 = vmatpush3.bf16.msra.mxu1 %v646_v50 }
  0xad   : > { %v725_v52 = vpop.permute.xlu0 %724  ;;  %v727_v54 = vpop.permute.xlu1 %726 }
  0xae   : > { %v733_v55 = vsel %vm732_vm6, %v725_v52, %v727_v54 }
  0xaf   : > { %1261 = vmatmul.mubr.msk.bf16.vlgmr.msra.gmra.mxu1 %vm228_vm0, %v1323_v51  ;;  %1266 = vmatprep.subr.bf16.mxu0 %v733_v55 }
  0xb0   : > { %1267 = vmatpush3.bf16.msra.mxu0 %v733_v55  ;;  %1276 = vmatprep.mubr.msk.bf16.mxu1 %vm228_vm0, %v1326_v53 }
  0xb1   : > { %v816_v57 = vpop.permute.xlu0 %815  ;;  %v818_v59 = vpop.permute.xlu1 %817 }
  0xb2   : > { %v821_v60 = vsel %vm819_vm7, %v816_v57, %v818_v59 }
  0xb3   : > { %1269 = vmatmul.mubr.msk.bf16.vlgmr.msra.gmra.mxu0 %vm228_vm0, %v1325_v56  ;;  %1272 = vmatprep.subr.bf16.mxu1 %v821_v60 }
  0xb4   : > { %1273 = vmatpush3.bf16.msra.mxu1 %v821_v60  ;;  %1284 = vmatprep.mubr.msk.bf16.mxu0 %vm228_vm0, %v1328_v58 }
  0xb5   : > { %v903_v61 = vpop.permute.xlu0 %902  ;;  %v905_v62 = vpop.permute.xlu1 %904 }
  0xb6   : > { %v908_v63 = vsel %vm906_vm8, %v903_v61, %v905_v62 }
  0xb7   : > { %1280 = vmatprep.subr.bf16.mxu0 %v908_v63 }
  0xb8   : > { %1281 = vmatpush3.bf16.msra.mxu0 %v908_v63 }
  0xb9   : > { %v812_v0 = vpop.permute.xlu0 %811  ;;  %v814_v1 = vpop.permute.xlu1 %813 }
  0xba   : > { %v820_v2 = vsel %vm819_vm7, %v812_v0, %v814_v1 }
  0xbb   : > { %1274 = vmatprep.subr.bf16.mxu1 %v820_v2 }
  0xbc   : > { %1275 = vmatpush3.bf16.msra.mxu1 %v820_v2 }
  0xbd   : > { %v899_v4 = vpop.permute.xlu0 %898  ;;  %v901_v5 = vpop.permute.xlu1 %900 }
  0xbe   : > { %v907_v6 = vsel %vm906_vm8, %v899_v4, %v901_v5  ;;  %v1175_v5 = vld [vmem:[%s1487_s2] ss:$0 sm:$0xff] }
  0xbf   : > { %1277 = vmatmul.mubr.msk.bf16.vlgmr.msra.gmra.mxu1 %vm228_vm0, %v1327_v3  ;;  %1282 = vmatprep.subr.bf16.mxu0 %v907_v6 }
  0xc0   : > { %1283 = vmatpush3.bf16.msra.mxu0 %v907_v6 }
  0xc3   : > { %1285 = vmatmul.mubr.msk.bf16.vlgmr.msra.gmra.mxu0 %vm228_vm0, %v1329_v7 }
  0xd8   : > { %v1230_v11 = vpop.f32.mrf.mxu1 }
  0xda   : > { %v346_v13 = vpop.f32.mrf.mxu1 }
  0xdc   : > { %v1231_v15 = vpop.f32.mrf.mxu1 }
  0xde   : > { %v349_v17 = vpop.f32.mrf.mxu1 }
 0x14f   : > { %v1222_v8 = vpop.f32.mrf.mxu0 }
 0x150   : > { %v355_v30 = vadd.f32 %v1230_v11, %v1222_v8 }
 0x151   : > { %v269_v9 = vpop.f32.mrf.mxu0 }
 0x152   : > { %v347_v28 = vadd.f32 %v346_v13, %v269_v9 }
 0x153   : > { %v1223_v10 = vpop.f32.mrf.mxu0 }
 0x154   : > { %v358_v36 = vadd.f32 %v1231_v15, %v1223_v10 }
 0x155   : > { %v272_v12 = vpop.f32.mrf.mxu0 }
 0x156   : > { %v350_v34 = vadd.f32 %v349_v17, %v272_v12 }
 0x157   : > { %v1238_v14 = vpop.f32.mrf.mxu0 }
 0x158   : > { %v446_v35 = vadd.f32 %v1238_v14, %v355_v30 }
 0x159   : > { %v429_v16 = vpop.f32.mrf.mxu0 }
 0x15a   : > { %v444_v33 = vadd.f32 %v429_v16, %v347_v28 }
 0x15b   : > { %v1239_v18 = vpop.f32.mrf.mxu0 }
 0x15c   : > { %v447_v41 = vadd.f32 %v1239_v18, %v358_v36 }
 0x15d   : > { %v432_v19 = vpop.f32.mrf.mxu0 }
 0x15e   : > { %v445_v39 = vadd.f32 %v432_v19, %v350_v34 }
 0x15f   : > { %v1246_v20 = vpop.f32.mrf.mxu1 }
 0x160   : > { %v533_v42 = vadd.f32 %v1246_v20, %v446_v35 }
 0x161   : > { %v516_v21 = vpop.f32.mrf.mxu1 }
 0x162   : > { %v531_v40 = vadd.f32 %v516_v21, %v444_v33 }
 0x163   : > { %v1254_v22 = vpop.f32.mrf.mxu0  ;;  %v1247_v23 = vpop.f32.mrf.mxu1 }
 0x164   : > { %v620_v48 = vadd.f32 %v1254_v22, %v533_v42  ;;  %v534_v49 = vadd.f32 %v1247_v23, %v447_v41 }
 0x165   : > { %v603_v24 = vpop.f32.mrf.mxu0  ;;  %v519_v25 = vpop.f32.mrf.mxu1 }
 0x166   : > { %v618_v45 = vadd.f32 %v603_v24, %v531_v40  ;;  %v532_v46 = vadd.f32 %v519_v25, %v445_v39 }
 0x167   : > { %v1255_v26 = vpop.f32.mrf.mxu0 }
 0x168   : > { %v621_v58 = vadd.f32 %v1255_v26, %v534_v49 }
 0x169   : > { %v606_v29 = vpop.f32.mrf.mxu0 }
 0x16a   : > { %v619_v53 = vadd.f32 %v606_v29, %v532_v46 }
 0x16f   : > { %v1262_v27 = vpop.f32.mrf.mxu1 }
 0x170   : > { %v707_v54 = vadd.f32 %v1262_v27, %v620_v48 }
 0x171   : > { %v690_v31 = vpop.f32.mrf.mxu1 }
 0x172   : > { %v705_v50 = vadd.f32 %v690_v31, %v618_v45 }
 0x173   : > { %v1270_v32 = vpop.f32.mrf.mxu0  ;;  %v1263_v37 = vpop.f32.mrf.mxu1 }
 0x174   : > { %v794_v59 = vadd.f32 %v1270_v32, %v707_v54  ;;  %v708_v0 = vadd.f32 %v1263_v37, %v621_v58 }
 0x175   : > { %v777_v38 = vpop.f32.mrf.mxu0  ;;  %v693_v43 = vpop.f32.mrf.mxu1 }
 0x176   : > { %v792_v55 = vadd.f32 %v777_v38, %v705_v50  ;;  %v706_v60 = vadd.f32 %v693_v43, %v619_v53 }
 0x177   : > { %v1271_v44 = vpop.f32.mrf.mxu0 }
 0x178   : > { %v795_v6 = vadd.f32 %v1271_v44, %v708_v0 }
 0x179   : > { %v780_v51 = vpop.f32.mrf.mxu0 }
 0x17a   : > { %v793_v1 = vadd.f32 %v780_v51, %v706_v60 }
 0x17f   : > { %v1278_v47 = vpop.f32.mrf.mxu1 }
 0x180   : > { %v881_v2 = vadd.f32 %v1278_v47, %v794_v59 }
 0x181   : > { %v864_v52 = vpop.f32.mrf.mxu1 }
 0x182   : > { %v879_v61 = vadd.f32 %v864_v52, %v792_v55 }
 0x183   : > { %v1279_v56 = vpop.f32.mrf.mxu1  ;;  %v1286_v57 = vpop.f32.mrf.mxu0 }
 0x184   : > { %v968_v7 = vadd.f32 %v1286_v57, %v881_v2  ;;  %v882_v11 = vadd.f32 %v1279_v56, %v795_v6 }
 0x185   : > { %v867_v62 = vpop.f32.mrf.mxu1  ;;  %v951_v63 = vpop.f32.mrf.mxu0 }
 0x186   : > { %v966_v3 = vadd.f32 %v951_v63, %v879_v61  ;;  %v880_v8 = vadd.f32 %v867_v62, %v793_v1  ;;  %v979_v15 = vmul.f32 %v1175_v5, %v968_v7 }
 0x187   : > { %v1287_v4 = vpop.f32.mrf.mxu0 }
 0x188   : > { %v977_v9 = vmul.f32 %v1175_v5, %v966_v3  ;;  %v969_v13 = vadd.f32 %v1287_v4, %v882_v11 }
 0x189   : > { %v954_v10 = vpop.f32.mrf.mxu0 }
 0x18a   : > { %v967_v12 = vadd.f32 %v954_v10, %v880_v8  ;;  %981 = vadd.xlane.f32.xlu0 %v977_v9  ;;  %v980_v16 = vmul.f32 %v1175_v5, %v969_v13 }
 0x18c   : > { %v978_v14 = vmul.f32 %v1175_v5, %v967_v12 }
 0x18e   : > { %983 = vadd.xlane.f32.xlu1 %v978_v14  ;;  %985 = vadd.xlane.f32.xlu0 %v979_v15 }
 0x192   : > { %987 = vadd.xlane.f32.xlu0 %v980_v16 }
 0x213   : > { %v982_v17 = vpop.xlane.xlu0 %981 }
 0x214   : > { %v989_v18 = vmul.f32 0.0625, %v982_v17 }
 0x216   : > { %v993_v19 = vsub.f32 %v966_v3, %v989_v18 }
 0x217   : > { %v984_v20 = vpop.xlane.xlu1 %983  ;;  %v986_v21 = vpop.xlane.xlu0 %985 }
 0x218   : > { %v990_v22 = vmul.f32 0.0625, %v984_v20  ;;  %v991_v23 = vmul.f32 0.0625, %v986_v21  ;;  %v997_v24 = vmul.f32 %v1175_v5, %v993_v19 }
 0x21a   : > { %v994_v25 = vsub.f32 %v967_v12, %v990_v22  ;;  %v995_v26 = vsub.f32 %v968_v7, %v991_v23  ;;  %v1001_v27 = vmul.f32 %v997_v24, %v997_v24 }
 0x21b   : > { %v988_v28 = vpop.xlane.xlu0 %987 }
 0x21c   : > { %v992_v29 = vmul.f32 0.0625, %v988_v28  ;;  %1005 = vadd.xlane.f32.xlu1 %v1001_v27  ;;  %v998_v30 = vmul.f32 %v1175_v5, %v994_v25  ;;  %v999_v31 = vmul.f32 %v1175_v5, %v995_v26 }
 0x21e   : > { %v996_v32 = vsub.f32 %v969_v13, %v992_v29  ;;  %v1002_v33 = vmul.f32 %v998_v30, %v998_v30  ;;  %v1003_v34 = vmul.f32 %v999_v31, %v999_v31 }
 0x220   : > { %1007 = vadd.xlane.f32.xlu0 %v1002_v33  ;;  %1009 = vadd.xlane.f32.xlu1 %v1003_v34  ;;  %v1000_v35 = vmul.f32 %v1175_v5, %v996_v32 }
 0x222   : > { %v1004_v36 = vmul.f32 %v1000_v35, %v1000_v35 }
 0x224   : > { %1011 = vadd.xlane.f32.xlu0 %v1004_v36 }
 0x2a5   : > { %v1006_v37 = vpop.xlane.xlu1 %1005 }
 0x2a6   : > { %v1013_v38 = vmul.f32 0.0625, %v1006_v37 }
 0x2a8   : > { %v1017_v39 = vadd.f32 1e-05, %v1013_v38 }
 0x2a9   : > { %v1010_v40 = vpop.xlane.xlu1 %1009  ;;  %v1008_v41 = vpop.xlane.xlu0 %1007 }
 0x2aa   : > { %1330 = vrsqrt.f32 %v1017_v39  ;;  %v1015_v42 = vmul.f32 0.0625, %v1010_v40  ;;  %v1014_v43 = vmul.f32 0.0625, %v1008_v41 }
 0x2ac   : > { %v1019_v44 = vadd.f32 1e-05, %v1015_v42  ;;  %v1018_v45 = vadd.f32 1e-05, %v1014_v43 }
 0x2ad   : > { %v1012_v46 = vpop.xlane.xlu0 %1011 }
 0x2ae   : > { %1332 = vrsqrt.f32 %v1019_v44  ;;  %v1016_v47 = vmul.f32 0.0625, %v1012_v46 }
 0x2af   : > { %1334 = vrsqrt.f32 %v1018_v45 }
 0x2b0   : > { %v1020_v48 = vadd.f32 1e-05, %v1016_v47 }
 0x2b2   : > { %1336 = vrsqrt.f32 %v1020_v48 }
 0x2b7   : > { %v1331_v49 = vpop.eup %1330 }
 0x2b8   : > { %v1025_v50 = vmul.f32 %v1331_v49, %v993_v19 }
 0x2ba   : > { %v1029_v51 = vmax.f32 %v1025_v50, 0.0 }
 0x2bb   : > { %v1333_v52 = vpop.eup %1332 }
 0x2bc   : > { %v1335_v53 = vpop.eup %1334  ;;  %1033 = vst [vmem:[%s170_s18] sm:$0xff] %v1029_v51  ;;  %v1027_v54 = vmul.f32 %v1333_v52, %v995_v26 }
 0x2bd   : > { %v1026_v55 = vmul.f32 %v1335_v53, %v994_v25 }
 0x2be   : > { %v1031_v56 = vmax.f32 %v1027_v54, 0.0 }
 0x2bf   : > { %v1337_v57 = vpop.eup %1336  ;;  %v1030_v58 = vmax.f32 %v1026_v55, 0.0 }
 0x2c0   : > { %1035 = vst [vmem:[%s170_s18 + $0x10] sm:$0xff] %v1031_v56  ;;  %v1028_v59 = vmul.f32 %v1337_v57, %v996_v32 }
 0x2c1   : > { %1034 = vst [vmem:[%s170_s18 + $0x8] sm:$0xff] %v1030_v58 }
 0x2c2   : > { %v1032_v60 = vmax.f32 %v1028_v59, 0.0 }
 0x2c4   : > { %1036 = vst [vmem:[%s170_s18 + $0x18] sm:$0xff] %v1032_v60 }
 0x2c5 PF: > { %s13_s12 = sadd.s32 1, %s1344_s12  }
 0x2c6   : > { %p10_p4 = scmp.ge.s32.totalorder %s13_s12, 4  }
 0x2c8   :  { %12 = sbr.rel (!%p10_p4) target bundleno = 1 (0x1), region = 70 }

// kernel: encoder_forward.15
= control target key start
LH: loop header
LB: loop body
LE: loop exit
PB: predicated region body
PF: predicated region fallthrough
CT: control target
= control target key end

     0   :  { %s1445_s15 = smov 0   ;;  %s1557_s0 = inlined_call_operand.vmem [shape: bf16[2,1,32,142], index: 0, kind: input, shape index: {}]   ;;  %s1558_s1 = inlined_call_operand.vmem [shape: bf16[9,32,32], index: 1, kind: input, shape index: {}]   ;;  %s1559_s2 = inlined_call_operand.vmem [shape: f32[1,128], index: 2, kind: input, shape index: {}]   ;;  %s1560_s3 = inlined_call_operand.vmem [shape: f32[2,32,128], index: 3, kind: input, shape index: {}]   ;;  %s1561_s4 = inlined_call_operand.vmem [shape: f32[2,32,128], index: 4, kind: output, shape index: {}]  }
   0x1 LB: > { %s1155_s16 = sadd.s32 4294967295, %s1410_s15   ;;  %p1159_p0 = scmp.ge.s32.totalorder %s1410_s15, 1  ;;  %s1410_s15 = sphi %s1445_s15, %s14_s15  }
   0x2   : > { %p172_p1 = scmp.lt.s32.totalorder %s1410_s15, 3 }
   0x4   : > { %p173_p2 = pnand %p1159_p0, %p172_p1 }
   0x5   : > { %p203_p3 = scmp.lt.s32.totalorder (!%p173_p2), %s1155_s16, 1  ;;  %s1412_s21 = smov (!%p173_p2), 127  }
   0x6   : > { %176 = sbr.rel (%p173_p2) target bundleno = 709 (0x2c5), region = 36  ;;  %s1413_s28 = smov (!%p173_p2), 126  }
   0x7   : > { %s1414_s29 = smov (!%p173_p2), 122   ;;  %s1415_s6 = smov (!%p173_p2), 121  }
   0x8   : > { %s1416_s7 = smov (!%p173_p2), 120   ;;  %s1417_s8 = smov (!%p173_p2), 116  }
   0x9   : > { %s1418_s9 = smov (!%p173_p2), 115   ;;  %s1419_s10 = smov (!%p173_p2), 114  }
   0xb   : > { %s1563_s16 = smov (!%p203_p3, %s1155_s16), 1  ;;  %vm275_vm0 = vcmask 261120   ;;  %v1377_v5 = vld [vmem:[%s1558_s1 + $0x10] sm:$0xff]   ;;  %v1380_v7 = vld [vmem:[%s1558_s1] sm:$0xff]   ;;  %v1381_v8 = vld [vmem:[%s1558_s1 + $0x8] sm:$0xff]   ;;  %vm270_vm1 = vcmask 1039360  }
   0xc   : > { %s1453_s17 = sshll.u32 %s1563_s16, 5  ;;  %1286 = vmatprep.mubr.msk.bf16.mxu0 %vm275_vm0, %v1377_v5  ;;  %1294 = vmatprep.mubr.msk.bf16.mxu1 %vm275_vm0, %v1380_v7  ;;  %v1384_v9 = vld [vmem:[%s1558_s1 + $0x30] sm:$0xff]   ;;  %vm431_vm2 = vcmask 1031168   ;;  %v1379_v18 = vld [vmem:[%s1558_s1 + $0x18] sm:$0xff]   ;;  %v1382_v20 = vld [vmem:[%s1558_s1 + $0x20] sm:$0xff]   ;;  %vm518_vm3 = vcmask 998400  }
   0xd   : > { %s207_s20 = scalar_lea.vmem %s1557_s0, %s1453_s17  ;;  %v1383_v27 = vld [vmem:[%s1558_s1 + $0x28] sm:$0xff]   ;;  %vm605_vm4 = vcmask 990208   ;;  %v1386_v28 = vld [vmem:[%s1558_s1 + $0x40] sm:$0xff]   ;;  %v1385_v35 = vld [vmem:[%s1558_s1 + $0x38] sm:$0xff]   ;;  %vm692_vm5 = vcmask 982016   ;;  %vm779_vm6 = vcmask 949248   ;;  %s217_s24 = scalar_lea.vmem %s1561_s4, %s1453_s17 }
   0xe   : > { %v1370_v0 = vld [vmem:[%s207_s20 + $0x10] ss:$8 sps:$4 sm:$0xff]   ;;  %v1372_v1 = vld [vmem:[%s207_s20] ss:$8 sps:$4 sm:$0xff]   ;;  %v1374_v2 = vld [vmem:[%s207_s20 + $0x14] ss:$8 sps:$4 sm:$0xff]  }
   0xf   : > { %266 = vrot.lane.b32.xlu0 %v1370_v0, %s1412_s21  ;;  %v1375_v3 = vld [vmem:[%s207_s20 + $0x4] ss:$8 sps:$4 sm:$0xff]   ;;  %262 = vrot.lane.b32.xlu1 %v1372_v1, %s1412_s21  ;;  %v1376_v4 = vld [vmem:[%s207_s20 + $0x10] ss:$8 sps:$4 sm:$0xff]   ;;  %vm866_vm7 = vcmask 941056   ;;  %vm953_vm8 = vcmask 932864  }
  0x10   : > { %v1378_v6 = vld [vmem:[%s207_s20] ss:$8 sps:$4 sm:$0xff]   ;;  %1290 = vmatprep.subr.bf16.mxu1 %v1376_v4  ;;  %v1388_v37 = vld [vmem:[%s1558_s1 + $0x50] sm:$0xff]   ;;  %v1389_v51 = vld [vmem:[%s1558_s1 + $0x58] sm:$0xff]  }
  0x11   : > { %1291 = vmatpush3.bf16.msra.mxu1 %v1376_v4  ;;  %v1387_v40 = vld [vmem:[%s1558_s1 + $0x48] sm:$0xff]   ;;  %v1390_v42 = vld [vmem:[%s1558_s1 + $0x60] sm:$0xff]   ;;  %v1392_v53 = vld [vmem:[%s1558_s1 + $0x70] sm:$0xff]  }
  0x12   : > { %1292 = vmatprep.subr.bf16.mxu1 %v1378_v6  ;;  %v1391_v56 = vld [vmem:[%s1558_s1 + $0x68] sm:$0xff]   ;;  %v1394_v58 = vld [vmem:[%s1558_s1 + $0x80] sm:$0xff]  }
  0x13   : > { %268 = vrot.lane.b32.xlu0 %v1374_v2, %s1412_s21  ;;  %264 = vrot.lane.b32.xlu1 %v1375_v3, %s1412_s21  ;;  %v1395_v7 = vld [vmem:[%s1558_s1 + $0x88] sm:$0xff]   ;;  %s212_s21 = scalar_lea.vmem %s1560_s3, %s1453_s17 }
  0x15   : > { %1293 = vmatpush3.bf16.msra.mxu1 %v1378_v6 }
  0x17   : > { %427 = vrot.lane.b32.xlu0 %v1370_v0, %s1413_s28  ;;  %429 = vrot.lane.b32.xlu1 %v1374_v2, %s1413_s28 }
  0x18   : > { %1295 = vmatmul.mubr.msk.bf16.vlgmr.msra.gmra.mxu1 %vm275_vm0, %v1381_v8 }
  0x19   : > { %1310 = vmatprep.mubr.msk.bf16.mxu1 %vm275_vm0, %v1384_v9 }
  0x1b   : > { %423 = vrot.lane.b32.xlu0 %v1372_v1, %s1413_s28  ;;  %425 = vrot.lane.b32.xlu1 %v1375_v3, %s1413_s28 }
  0x1f   : > { %514 = vrot.lane.b32.xlu0 %v1370_v0, %s1414_s29  ;;  %516 = vrot.lane.b32.xlu1 %v1374_v2, %s1414_s29 }
  0x23   : > { %601 = vrot.lane.b32.xlu0 %v1370_v0, %s1415_s6  ;;  %603 = vrot.lane.b32.xlu1 %v1374_v2, %s1415_s6 }
  0x27   : > { %510 = vrot.lane.b32.xlu0 %v1372_v1, %s1414_s29  ;;  %512 = vrot.lane.b32.xlu1 %v1375_v3, %s1414_s29 }
  0x2b   : > { %597 = vrot.lane.b32.xlu0 %v1372_v1, %s1415_s6  ;;  %599 = vrot.lane.b32.xlu1 %v1375_v3, %s1415_s6 }
  0x2f   : > { %688 = vrot.lane.b32.xlu0 %v1370_v0, %s1416_s7  ;;  %690 = vrot.lane.b32.xlu1 %v1374_v2, %s1416_s7 }
  0x33   : > { %775 = vrot.lane.b32.xlu0 %v1370_v0, %s1417_s8  ;;  %777 = vrot.lane.b32.xlu1 %v1374_v2, %s1417_s8 }
  0x37   : > { %684 = vrot.lane.b32.xlu0 %v1372_v1, %s1416_s7  ;;  %686 = vrot.lane.b32.xlu1 %v1375_v3, %s1416_s7 }
  0x3b   : > { %771 = vrot.lane.b32.xlu0 %v1372_v1, %s1417_s8  ;;  %773 = vrot.lane.b32.xlu1 %v1375_v3, %s1417_s8 }
  0x3f   : > { %862 = vrot.lane.b32.xlu0 %v1370_v0, %s1418_s9  ;;  %864 = vrot.lane.b32.xlu1 %v1374_v2, %s1418_s9 }
  0x43   : > { %949 = vrot.lane.b32.xlu0 %v1370_v0, %s1419_s10  ;;  %951 = vrot.lane.b32.xlu1 %v1374_v2, %s1419_s10 }
  0x47   : > { %858 = vrot.lane.b32.xlu0 %v1372_v1, %s1418_s9  ;;  %860 = vrot.lane.b32.xlu1 %v1375_v3, %s1418_s9 }
  0x4b   : > { %945 = vrot.lane.b32.xlu0 %v1372_v1, %s1419_s10  ;;  %947 = vrot.lane.b32.xlu1 %v1375_v3, %s1419_s10  ;;  %v1393_v3 = vld [vmem:[%s1558_s1 + $0x78] sm:$0xff]  }
  0x81   : > { %v267_v10 = vpop.permute.xlu0 %266  ;;  %v263_v11 = vpop.permute.xlu1 %262 }
  0x85   : > { %v269_v12 = vpop.permute.xlu0 %268  ;;  %v265_v13 = vpop.permute.xlu1 %264 }
  0x86   : > { %v272_v14 = vsel %vm270_vm1, %v267_v10, %v269_v12  ;;  %v271_v15 = vsel %vm270_vm1, %v263_v11, %v265_v13 }
  0x87   : > { %1282 = vmatprep.subr.bf16.mxu0 %v272_v14 }
  0x88   : > { %1283 = vmatpush3.bf16.msra.mxu0 %v272_v14 }
  0x89   : > { %v428_v16 = vpop.permute.xlu0 %427  ;;  %1284 = vmatprep.subr.bf16.mxu0 %v271_v15  ;;  %v430_v17 = vpop.permute.xlu1 %429 }
  0x8a   : > { %v433_v19 = vsel %vm431_vm2, %v428_v16, %v430_v17 }
  0x8c   : > { %1285 = vmatpush3.bf16.msra.mxu0 %v271_v15 }
  0x8d   : > { %v424_v21 = vpop.permute.xlu0 %423  ;;  %1298 = vmatprep.subr.bf16.mxu0 %v433_v19  ;;  %v426_v22 = vpop.permute.xlu1 %425 }
  0x8e   : > { %v432_v23 = vsel %vm431_vm2, %v424_v21, %v426_v22 }
  0x8f   : > { %1287 = vmatmul.mubr.msk.bf16.vlgmr.msra.gmra.mxu0 %vm275_vm0, %v1379_v18 }
  0x90   : > { %1299 = vmatpush3.bf16.msra.mxu0 %v433_v19  ;;  %1302 = vmatprep.mubr.msk.bf16.mxu0 %vm275_vm0, %v1382_v20 }
  0x91   : > { %v515_v24 = vpop.permute.xlu0 %514  ;;  %1300 = vmatprep.subr.bf16.mxu0 %v432_v23  ;;  %v517_v25 = vpop.permute.xlu1 %516 }
  0x92   : > { %v520_v26 = vsel %vm518_vm3, %v515_v24, %v517_v25 }
  0x93   : > { %1306 = vmatprep.subr.bf16.mxu1 %v520_v26 }
  0x94   : > { %1301 = vmatpush3.bf16.msra.mxu0 %v432_v23  ;;  %1307 = vmatpush3.bf16.msra.mxu1 %v520_v26 }
  0x95   : > { %v602_v29 = vpop.permute.xlu0 %601  ;;  %v604_v30 = vpop.permute.xlu1 %603 }
  0x96   : > { %v607_v31 = vsel %vm605_vm4, %v602_v29, %v604_v30 }
  0x97   : > { %1303 = vmatmul.mubr.msk.bf16.vlgmr.msra.gmra.mxu0 %vm275_vm0, %v1383_v27  ;;  %1314 = vmatprep.subr.bf16.mxu0 %v607_v31 }
  0x98   : > { %1318 = vmatprep.mubr.msk.bf16.mxu0 %vm275_vm0, %v1386_v28  ;;  %1315 = vmatpush3.bf16.msra.mxu0 %v607_v31 }
  0x99   : > { %v511_v32 = vpop.permute.xlu0 %510  ;;  %v513_v33 = vpop.permute.xlu1 %512 }
  0x9a   : > { %v519_v34 = vsel %vm518_vm3, %v511_v32, %v513_v33 }
  0x9b   : > { %1308 = vmatprep.subr.bf16.mxu1 %v519_v34 }
  0x9c   : > { %1309 = vmatpush3.bf16.msra.mxu1 %v519_v34 }
  0x9d   : > { %v598_v36 = vpop.permute.xlu0 %597  ;;  %v600_v38 = vpop.permute.xlu1 %599 }
  0x9e   : > { %v606_v39 = vsel %vm605_vm4, %v598_v36, %v600_v38 }
  0x9f   : > { %1316 = vmatprep.subr.bf16.mxu0 %v606_v39  ;;  %1311 = vmatmul.mubr.msk.bf16.vlgmr.msra.gmra.mxu1 %vm275_vm0, %v1385_v35 }
  0xa0   : > { %1317 = vmatpush3.bf16.msra.mxu0 %v606_v39  ;;  %1326 = vmatprep.mubr.msk.bf16.mxu1 %vm275_vm0, %v1388_v37 }
  0xa1   : > { %v689_v41 = vpop.permute.xlu0 %688  ;;  %v691_v43 = vpop.permute.xlu1 %690 }
  0xa2   : > { %v694_v44 = vsel %vm692_vm5, %v689_v41, %v691_v43 }
  0xa3   : > { %1322 = vmatprep.subr.bf16.mxu1 %v694_v44  ;;  %1319 = vmatmul.mubr.msk.bf16.vlgmr.msra.gmra.mxu0 %vm275_vm0, %v1387_v40 }
  0xa4   : > { %1323 = vmatpush3.bf16.msra.mxu1 %v694_v44  ;;  %1334 = vmatprep.mubr.msk.bf16.mxu0 %vm275_vm0, %v1390_v42 }
  0xa5   : > { %v776_v45 = vpop.permute.xlu0 %775  ;;  %v778_v46 = vpop.permute.xlu1 %777 }
  0xa6   : > { %v781_v47 = vsel %vm779_vm6, %v776_v45, %v778_v46 }
  0xa7   : > { %1330 = vmatprep.subr.bf16.mxu0 %v781_v47 }
  0xa8   : > { %1331 = vmatpush3.bf16.msra.mxu0 %v781_v47 }
  0xa9   : > { %v685_v48 = vpop.permute.xlu0 %684  ;;  %v687_v49 = vpop.permute.xlu1 %686 }
  0xaa   : > { %v693_v50 = vsel %vm692_vm5, %v685_v48, %v687_v49 }
  0xab   : > { %1324 = vmatprep.subr.bf16.mxu1 %v693_v50 }
  0xac   : > { %1325 = vmatpush3.bf16.msra.mxu1 %v693_v50 }
  0xad   : > { %v772_v52 = vpop.permute.xlu0 %771  ;;  %v774_v54 = vpop.permute.xlu1 %773 }
  0xae   : > { %v780_v55 = vsel %vm779_vm6, %v772_v52, %v774_v54 }
  0xaf   : > { %1327 = vmatmul.mubr.msk.bf16.vlgmr.msra.gmra.mxu1 %vm275_vm0, %v1389_v51  ;;  %1332 = vmatprep.subr.bf16.mxu0 %v780_v55 }
  0xb0   : > { %1333 = vmatpush3.bf16.msra.mxu0 %v780_v55  ;;  %1342 = vmatprep.mubr.msk.bf16.mxu1 %vm275_vm0, %v1392_v53 }
  0xb1   : > { %v863_v57 = vpop.permute.xlu0 %862  ;;  %v865_v59 = vpop.permute.xlu1 %864 }
  0xb2   : > { %v868_v60 = vsel %vm866_vm7, %v863_v57, %v865_v59 }
  0xb3   : > { %1335 = vmatmul.mubr.msk.bf16.vlgmr.msra.gmra.mxu0 %vm275_vm0, %v1391_v56  ;;  %1338 = vmatprep.subr.bf16.mxu1 %v868_v60 }
  0xb4   : > { %1339 = vmatpush3.bf16.msra.mxu1 %v868_v60  ;;  %1350 = vmatprep.mubr.msk.bf16.mxu0 %vm275_vm0, %v1394_v58 }
  0xb5   : > { %v950_v61 = vpop.permute.xlu0 %949  ;;  %v952_v62 = vpop.permute.xlu1 %951 }
  0xb6   : > { %v955_v63 = vsel %vm953_vm8, %v950_v61, %v952_v62 }
  0xb7   : > { %1346 = vmatprep.subr.bf16.mxu0 %v955_v63 }
  0xb8   : > { %1347 = vmatpush3.bf16.msra.mxu0 %v955_v63 }
  0xb9   : > { %v859_v0 = vpop.permute.xlu0 %858  ;;  %v861_v1 = vpop.permute.xlu1 %860 }
  0xba   : > { %v867_v2 = vsel %vm866_vm7, %v859_v0, %v861_v1 }
  0xbb   : > { %1340 = vmatprep.subr.bf16.mxu1 %v867_v2 }
  0xbc   : > { %1341 = vmatpush3.bf16.msra.mxu1 %v867_v2 }
  0xbd   : > { %v946_v4 = vpop.permute.xlu0 %945  ;;  %v948_v5 = vpop.permute.xlu1 %947 }
  0xbe   : > { %v954_v6 = vsel %vm953_vm8, %v946_v4, %v948_v5  ;;  %v1240_v5 = vld [vmem:[%s1559_s2] ss:$0 sm:$0xff] }
  0xbf   : > { %1343 = vmatmul.mubr.msk.bf16.vlgmr.msra.gmra.mxu1 %vm275_vm0, %v1393_v3  ;;  %1348 = vmatprep.subr.bf16.mxu0 %v954_v6 }
  0xc0   : > { %1349 = vmatpush3.bf16.msra.mxu0 %v954_v6 }
  0xc3   : > { %1351 = vmatmul.mubr.msk.bf16.vlgmr.msra.gmra.mxu0 %vm275_vm0, %v1395_v7 }
  0xd8   : > { %v1296_v11 = vpop.f32.mrf.mxu1 }
  0xda   : > { %v393_v13 = vpop.f32.mrf.mxu1 }
  0xdc   : > { %v1297_v15 = vpop.f32.mrf.mxu1 }
  0xde   : > { %v396_v17 = vpop.f32.mrf.mxu1 }
 0x14f   : > { %v1288_v8 = vpop.f32.mrf.mxu0 }
 0x150   : > { %v402_v30 = vadd.f32 %v1296_v11, %v1288_v8 }
 0x151   : > { %v316_v9 = vpop.f32.mrf.mxu0 }
 0x152   : > { %v394_v28 = vadd.f32 %v393_v13, %v316_v9 }
 0x153   : > { %v1289_v10 = vpop.f32.mrf.mxu0 }
 0x154   : > { %v405_v36 = vadd.f32 %v1297_v15, %v1289_v10 }
 0x155   : > { %v319_v12 = vpop.f32.mrf.mxu0 }
 0x156   : > { %v397_v34 = vadd.f32 %v396_v17, %v319_v12 }
 0x157   : > { %v1304_v14 = vpop.f32.mrf.mxu0 }
 0x158   : > { %v493_v35 = vadd.f32 %v1304_v14, %v402_v30 }
 0x159   : > { %v476_v16 = vpop.f32.mrf.mxu0 }
 0x15a   : > { %v491_v33 = vadd.f32 %v476_v16, %v394_v28 }
 0x15b   : > { %v1305_v18 = vpop.f32.mrf.mxu0 }
 0x15c   : > { %v494_v41 = vadd.f32 %v1305_v18, %v405_v36 }
 0x15d   : > { %v479_v19 = vpop.f32.mrf.mxu0 }
 0x15e   : > { %v492_v39 = vadd.f32 %v479_v19, %v397_v34 }
 0x15f   : > { %v1312_v20 = vpop.f32.mrf.mxu1 }
 0x160   : > { %v580_v42 = vadd.f32 %v1312_v20, %v493_v35 }
 0x161   : > { %v563_v21 = vpop.f32.mrf.mxu1 }
 0x162   : > { %v578_v40 = vadd.f32 %v563_v21, %v491_v33 }
 0x163   : > { %v1320_v22 = vpop.f32.mrf.mxu0  ;;  %v1313_v23 = vpop.f32.mrf.mxu1 }
 0x164   : > { %v667_v48 = vadd.f32 %v1320_v22, %v580_v42  ;;  %v581_v49 = vadd.f32 %v1313_v23, %v494_v41 }
 0x165   : > { %v650_v24 = vpop.f32.mrf.mxu0  ;;  %v566_v25 = vpop.f32.mrf.mxu1 }
 0x166   : > { %v665_v45 = vadd.f32 %v650_v24, %v578_v40  ;;  %v579_v46 = vadd.f32 %v566_v25, %v492_v39 }
 0x167   : > { %v1321_v26 = vpop.f32.mrf.mxu0 }
 0x168   : > { %v668_v58 = vadd.f32 %v1321_v26, %v581_v49 }
 0x169   : > { %v653_v29 = vpop.f32.mrf.mxu0 }
 0x16a   : > { %v666_v53 = vadd.f32 %v653_v29, %v579_v46 }
 0x16f   : > { %v1328_v27 = vpop.f32.mrf.mxu1 }
 0x170   : > { %v754_v54 = vadd.f32 %v1328_v27, %v667_v48 }
 0x171   : > { %v737_v31 = vpop.f32.mrf.mxu1 }
 0x172   : > { %v752_v50 = vadd.f32 %v737_v31, %v665_v45 }
 0x173   : > { %v1336_v32 = vpop.f32.mrf.mxu0  ;;  %v1329_v37 = vpop.f32.mrf.mxu1 }
 0x174   : > { %v841_v59 = vadd.f32 %v1336_v32, %v754_v54  ;;  %v755_v0 = vadd.f32 %v1329_v37, %v668_v58  ;;  %v1078_v54 = vld [vmem:[%s212_s21 + $0x10] sm:$0xff] }
 0x175   : > { %v824_v38 = vpop.f32.mrf.mxu0  ;;  %v740_v43 = vpop.f32.mrf.mxu1 }
 0x176   : > { %v839_v55 = vadd.f32 %v824_v38, %v752_v50  ;;  %v753_v60 = vadd.f32 %v740_v43, %v666_v53  ;;  %v1076_v50 = vld [vmem:[%s212_s21] sm:$0xff] }
 0x177   : > { %v1337_v44 = vpop.f32.mrf.mxu0 }
 0x178   : > { %v842_v6 = vadd.f32 %v1337_v44, %v755_v0 }
 0x179   : > { %v827_v51 = vpop.f32.mrf.mxu0 }
 0x17a   : > { %v840_v1 = vadd.f32 %v827_v51, %v753_v60 }
 0x17f   : > { %v1344_v47 = vpop.f32.mrf.mxu1 }
 0x180   : > { %v928_v2 = vadd.f32 %v1344_v47, %v841_v59 }
 0x181   : > { %v911_v52 = vpop.f32.mrf.mxu1 }
 0x182   : > { %v926_v61 = vadd.f32 %v911_v52, %v839_v55 }
 0x183   : > { %v1345_v56 = vpop.f32.mrf.mxu1  ;;  %v1352_v57 = vpop.f32.mrf.mxu0 }
 0x184   : > { %v1015_v7 = vadd.f32 %v1352_v57, %v928_v2  ;;  %v929_v11 = vadd.f32 %v1345_v56, %v842_v6  ;;  %v1077_v57 = vld [vmem:[%s212_s21 + $0x8] sm:$0xff] }
 0x185   : > { %v914_v62 = vpop.f32.mrf.mxu1  ;;  %v998_v63 = vpop.f32.mrf.mxu0 }
 0x186   : > { %v1013_v3 = vadd.f32 %v998_v63, %v926_v61  ;;  %v927_v8 = vadd.f32 %v914_v62, %v840_v1  ;;  %v1026_v15 = vmul.f32 %v1240_v5, %v1015_v7  ;;  %v1079_v62 = vld [vmem:[%s212_s21 + $0x18] sm:$0xff] }
 0x187   : > { %v1353_v4 = vpop.f32.mrf.mxu0 }
 0x188   : > { %v1024_v9 = vmul.f32 %v1240_v5, %v1013_v3  ;;  %v1016_v13 = vadd.f32 %v1353_v4, %v929_v11 }
 0x189   : > { %v1001_v10 = vpop.f32.mrf.mxu0 }
 0x18a   : > { %v1014_v12 = vadd.f32 %v1001_v10, %v927_v8  ;;  %1028 = vadd.xlane.f32.xlu0 %v1024_v9  ;;  %v1027_v16 = vmul.f32 %v1240_v5, %v1016_v13 }
 0x18c   : > { %v1025_v14 = vmul.f32 %v1240_v5, %v1014_v12 }
 0x18e   : > { %1030 = vadd.xlane.f32.xlu1 %v1025_v14  ;;  %1032 = vadd.xlane.f32.xlu0 %v1026_v15 }
 0x192   : > { %1034 = vadd.xlane.f32.xlu0 %v1027_v16 }
 0x213   : > { %v1029_v17 = vpop.xlane.xlu0 %1028 }
 0x214   : > { %v1036_v18 = vmul.f32 0.0625, %v1029_v17 }
 0x216   : > { %v1040_v19 = vsub.f32 %v1013_v3, %v1036_v18 }
 0x217   : > { %v1031_v20 = vpop.xlane.xlu1 %1030  ;;  %v1033_v21 = vpop.xlane.xlu0 %1032 }
 0x218   : > { %v1037_v22 = vmul.f32 0.0625, %v1031_v20  ;;  %v1038_v23 = vmul.f32 0.0625, %v1033_v21  ;;  %v1044_v24 = vmul.f32 %v1240_v5, %v1040_v19 }
 0x21a   : > { %v1041_v25 = vsub.f32 %v1014_v12, %v1037_v22  ;;  %v1042_v26 = vsub.f32 %v1015_v7, %v1038_v23  ;;  %v1048_v27 = vmul.f32 %v1044_v24, %v1044_v24 }
 0x21b   : > { %v1035_v28 = vpop.xlane.xlu0 %1034 }
 0x21c   : > { %v1039_v29 = vmul.f32 0.0625, %v1035_v28  ;;  %1052 = vadd.xlane.f32.xlu1 %v1048_v27  ;;  %v1045_v30 = vmul.f32 %v1240_v5, %v1041_v25  ;;  %v1046_v31 = vmul.f32 %v1240_v5, %v1042_v26 }
 0x21e   : > { %v1043_v32 = vsub.f32 %v1016_v13, %v1039_v29  ;;  %v1049_v33 = vmul.f32 %v1045_v30, %v1045_v30  ;;  %v1050_v34 = vmul.f32 %v1046_v31, %v1046_v31 }
 0x220   : > { %1054 = vadd.xlane.f32.xlu0 %v1049_v33  ;;  %1056 = vadd.xlane.f32.xlu1 %v1050_v34  ;;  %v1047_v35 = vmul.f32 %v1240_v5, %v1043_v32 }
 0x222   : > { %v1051_v36 = vmul.f32 %v1047_v35, %v1047_v35 }
 0x224   : > { %1058 = vadd.xlane.f32.xlu0 %v1051_v36 }
 0x2a5   : > { %v1053_v37 = vpop.xlane.xlu1 %1052 }
 0x2a6   : > { %v1060_v38 = vmul.f32 0.0625, %v1053_v37 }
 0x2a8   : > { %v1064_v39 = vadd.f32 1e-05, %v1060_v38 }
 0x2a9   : > { %v1057_v40 = vpop.xlane.xlu1 %1056  ;;  %v1055_v41 = vpop.xlane.xlu0 %1054 }
 0x2aa   : > { %1396 = vrsqrt.f32 %v1064_v39  ;;  %v1062_v42 = vmul.f32 0.0625, %v1057_v40  ;;  %v1061_v43 = vmul.f32 0.0625, %v1055_v41 }
 0x2ac   : > { %v1066_v44 = vadd.f32 1e-05, %v1062_v42  ;;  %v1065_v45 = vadd.f32 1e-05, %v1061_v43 }
 0x2ad   : > { %v1059_v46 = vpop.xlane.xlu0 %1058 }
 0x2ae   : > { %1398 = vrsqrt.f32 %v1066_v44  ;;  %v1063_v47 = vmul.f32 0.0625, %v1059_v46 }
 0x2af   : > { %1400 = vrsqrt.f32 %v1065_v45 }
 0x2b0   : > { %v1067_v48 = vadd.f32 1e-05, %v1063_v47 }
 0x2b2   : > { %1402 = vrsqrt.f32 %v1067_v48 }
 0x2b7   : > { %v1397_v49 = vpop.eup %1396 }
 0x2b8   : > { %v1072_v51 = vmul.f32 %v1397_v49, %v1040_v19 }
 0x2ba   : > { %v1080_v52 = vadd.f32 %v1076_v50, %v1072_v51 }
 0x2bb   : > { %v1399_v53 = vpop.eup %1398 }
 0x2bc   : > { %v1401_v55 = vpop.eup %1400  ;;  %1084 = vst [vmem:[%s217_s24] sm:$0xff] %v1080_v52  ;;  %v1074_v56 = vmul.f32 %v1399_v53, %v1042_v26 }
 0x2bd   : > { %v1073_v58 = vmul.f32 %v1401_v55, %v1041_v25 }
 0x2be   : > { %v1082_v59 = vadd.f32 %v1078_v54, %v1074_v56 }
 0x2bf   : > { %v1403_v60 = vpop.eup %1402  ;;  %v1081_v61 = vadd.f32 %v1077_v57, %v1073_v58 }
 0x2c0   : > { %1086 = vst [vmem:[%s217_s24 + $0x10] sm:$0xff] %v1082_v59  ;;  %v1075_v63 = vmul.f32 %v1403_v60, %v1043_v32 }
 0x2c1   : > { %1085 = vst [vmem:[%s217_s24 + $0x8] sm:$0xff] %v1081_v61 }
 0x2c2   : > { %v1083_v0 = vadd.f32 %v1079_v62, %v1075_v63 }
 0x2c4   : > { %1087 = vst [vmem:[%s217_s24 + $0x18] sm:$0xff] %v1083_v0 }
 0x2c5 PF: > { %s14_s15 = sadd.s32 1, %s1410_s15  }
 0x2c6   : > { %p11_p4 = scmp.ge.s32.totalorder %s14_s15, 4  }
 0x2c8   :  { %13 = sbr.rel (!%p11_p4) target bundleno = 1 (0x1), region = 77 }

// kernel: encoder_forward.21
= control target key start
LH: loop header
LB: loop body
LE: loop exit
PB: predicated region body
PF: predicated region fallthrough
CT: control target
= control target key end

     0   :  { %s1605_s21 = smov 0   ;;  %s1725_s0 = inlined_call_operand.vmem [shape: bf16[2,1,32,142], index: 0, kind: input, shape index: {}]   ;;  %s1726_s1 = inlined_call_operand.vmem [shape: bf16[9,32,32], index: 1, kind: input, shape index: {}]   ;;  %s1727_s2 = inlined_call_operand.vmem [shape: f32[1,128], index: 2, kind: input, shape index: {}]   ;;  %s1728_s3 = inlined_call_operand.vmem [shape: f32[2,32,128], index: 3, kind: input, shape index: {}]   ;;  %s1729_s4 = inlined_call_operand.vmem [shape: f32[2,32,128], index: 4, kind: input, shape index: {}]   ;;  %s1730_s5 = inlined_call_operand.vmem [shape: f32[2,32,128], index: 5, kind: output, shape index: {0}]   ;;  %s1731_s6 = inlined_call_operand.vmem [shape: f32[2,32,128], index: 6, kind: output, shape index: {1}]  }
   0x1 LB: > { %s1299_s22 = sadd.s32 4294967295, %s1560_s21   ;;  %p1303_p0 = scmp.ge.s32.totalorder %s1560_s21, 1  ;;  %s1560_s21 = sphi %s1605_s21, %s17_s21  }
   0x2   : > { %p235_p1 = scmp.lt.s32.totalorder %s1560_s21, 3 }
   0x4   : > { %p236_p2 = pnand %p1303_p0, %p235_p1 }
   0x5   : > { %p280_p3 = scmp.lt.s32.totalorder (!%p236_p2), %s1299_s22, 1  ;;  %s1562_s27 = smov (!%p236_p2), 127  }
   0x6   : > { %239 = sbr.rel (%p236_p2) target bundleno = 711 (0x2c7), region = 40  ;;  %s1563_s10 = smov (!%p236_p2), 126  }
   0x7   : > { %s1564_s11 = smov (!%p236_p2), 122   ;;  %s1565_s14 = smov (!%p236_p2), 121  }
   0x8   : > { %s1566_s15 = smov (!%p236_p2), 120   ;;  %s1567_s16 = smov (!%p236_p2), 116  }
   0x9   : > { %s1568_s17 = smov (!%p236_p2), 115   ;;  %s1569_s18 = smov (!%p236_p2), 114  }
   0xb   : > { %s1733_s22 = smov (!%p280_p3, %s1299_s22), 1  ;;  %vm362_vm0 = vcmask 261120   ;;  %v1527_v5 = vld [vmem:[%s1726_s1 + $0x10] sm:$0xff]   ;;  %v1530_v7 = vld [vmem:[%s1726_s1] sm:$0xff]   ;;  %v1531_v8 = vld [vmem:[%s1726_s1 + $0x8] sm:$0xff]   ;;  %vm357_vm1 = vcmask 1039360  }
   0xc   : > { %s1613_s23 = sshll.u32 %s1733_s22, 5  ;;  %1436 = vmatprep.mubr.msk.bf16.mxu0 %vm362_vm0, %v1527_v5  ;;  %1444 = vmatprep.mubr.msk.bf16.mxu1 %vm362_vm0, %v1530_v7  ;;  %v1534_v9 = vld [vmem:[%s1726_s1 + $0x30] sm:$0xff]   ;;  %vm518_vm2 = vcmask 1031168   ;;  %v1529_v18 = vld [vmem:[%s1726_s1 + $0x18] sm:$0xff]   ;;  %v1532_v20 = vld [vmem:[%s1726_s1 + $0x20] sm:$0xff]   ;;  %vm605_vm3 = vcmask 998400  }
   0xd   : > { %s284_s26 = scalar_lea.vmem %s1725_s0, %s1613_s23  ;;  %v1533_v27 = vld [vmem:[%s1726_s1 + $0x28] sm:$0xff]   ;;  %vm692_vm4 = vcmask 990208   ;;  %v1536_v28 = vld [vmem:[%s1726_s1 + $0x40] sm:$0xff]   ;;  %v1535_v35 = vld [vmem:[%s1726_s1 + $0x38] sm:$0xff]   ;;  %vm779_vm5 = vcmask 982016   ;;  %vm866_vm6 = vcmask 949248   ;;  %s289_s7 = scalar_lea.vmem %s1728_s3, %s1613_s23 }
   0xe   : > { %v1520_v0 = vld [vmem:[%s284_s26 + $0x10] ss:$8 sps:$4 sm:$0xff]   ;;  %v1522_v1 = vld [vmem:[%s284_s26] ss:$8 sps:$4 sm:$0xff]   ;;  %v1524_v2 = vld [vmem:[%s284_s26 + $0x14] ss:$8 sps:$4 sm:$0xff]   ;;  %s299_s13 = scalar_lea.vmem %s1730_s5, %s1613_s23 }
   0xf   : > { %353 = vrot.lane.b32.xlu0 %v1520_v0, %s1562_s27  ;;  %v1525_v3 = vld [vmem:[%s284_s26 + $0x4] ss:$8 sps:$4 sm:$0xff]   ;;  %349 = vrot.lane.b32.xlu1 %v1522_v1, %s1562_s27  ;;  %v1526_v4 = vld [vmem:[%s284_s26 + $0x10] ss:$8 sps:$4 sm:$0xff]   ;;  %vm953_vm7 = vcmask 941056   ;;  %vm1040_vm8 = vcmask 932864  }
  0x10   : > { %v1528_v6 = vld [vmem:[%s284_s26] ss:$8 sps:$4 sm:$0xff]   ;;  %1440 = vmatprep.subr.bf16.mxu1 %v1526_v4  ;;  %v1538_v37 = vld [vmem:[%s1726_s1 + $0x50] sm:$0xff]   ;;  %v1539_v51 = vld [vmem:[%s1726_s1 + $0x58] sm:$0xff]  }
  0x11   : > { %1441 = vmatpush3.bf16.msra.mxu1 %v1526_v4  ;;  %v1537_v40 = vld [vmem:[%s1726_s1 + $0x48] sm:$0xff]   ;;  %v1540_v42 = vld [vmem:[%s1726_s1 + $0x60] sm:$0xff]   ;;  %v1542_v53 = vld [vmem:[%s1726_s1 + $0x70] sm:$0xff]  }
  0x12   : > { %1442 = vmatprep.subr.bf16.mxu1 %v1528_v6  ;;  %v1541_v56 = vld [vmem:[%s1726_s1 + $0x68] sm:$0xff]   ;;  %v1544_v58 = vld [vmem:[%s1726_s1 + $0x80] sm:$0xff]  }
  0x13   : > { %355 = vrot.lane.b32.xlu0 %v1524_v2, %s1562_s27  ;;  %351 = vrot.lane.b32.xlu1 %v1525_v3, %s1562_s27  ;;  %v1545_v7 = vld [vmem:[%s1726_s1 + $0x88] sm:$0xff]  }
  0x15   : > { %1443 = vmatpush3.bf16.msra.mxu1 %v1528_v6 }
  0x17   : > { %514 = vrot.lane.b32.xlu0 %v1520_v0, %s1563_s10  ;;  %516 = vrot.lane.b32.xlu1 %v1524_v2, %s1563_s10 }
  0x18   : > { %1445 = vmatmul.mubr.msk.bf16.vlgmr.msra.gmra.mxu1 %vm362_vm0, %v1531_v8 }
  0x19   : > { %1460 = vmatprep.mubr.msk.bf16.mxu1 %vm362_vm0, %v1534_v9 }
  0x1b   : > { %510 = vrot.lane.b32.xlu0 %v1522_v1, %s1563_s10  ;;  %512 = vrot.lane.b32.xlu1 %v1525_v3, %s1563_s10  ;;  %s294_s10 = scalar_lea.vmem %s1729_s4, %s1613_s23 }
  0x1f   : > { %601 = vrot.lane.b32.xlu0 %v1520_v0, %s1564_s11  ;;  %603 = vrot.lane.b32.xlu1 %v1524_v2, %s1564_s11 }
  0x23   : > { %688 = vrot.lane.b32.xlu0 %v1520_v0, %s1565_s14  ;;  %690 = vrot.lane.b32.xlu1 %v1524_v2, %s1565_s14 }
  0x27   : > { %597 = vrot.lane.b32.xlu0 %v1522_v1, %s1564_s11  ;;  %599 = vrot.lane.b32.xlu1 %v1525_v3, %s1564_s11 }
  0x2b   : > { %684 = vrot.lane.b32.xlu0 %v1522_v1, %s1565_s14  ;;  %686 = vrot.lane.b32.xlu1 %v1525_v3, %s1565_s14 }
  0x2f   : > { %775 = vrot.lane.b32.xlu0 %v1520_v0, %s1566_s15  ;;  %777 = vrot.lane.b32.xlu1 %v1524_v2, %s1566_s15 }
  0x33   : > { %862 = vrot.lane.b32.xlu0 %v1520_v0, %s1567_s16  ;;  %864 = vrot.lane.b32.xlu1 %v1524_v2, %s1567_s16 }
  0x37   : > { %771 = vrot.lane.b32.xlu0 %v1522_v1, %s1566_s15  ;;  %773 = vrot.lane.b32.xlu1 %v1525_v3, %s1566_s15 }
  0x3b   : > { %858 = vrot.lane.b32.xlu0 %v1522_v1, %s1567_s16  ;;  %860 = vrot.lane.b32.xlu1 %v1525_v3, %s1567_s16  ;;  %s304_s16 = scalar_lea.vmem %s1731_s6, %s1613_s23 }
  0x3f   : > { %949 = vrot.lane.b32.xlu0 %v1520_v0, %s1568_s17  ;;  %951 = vrot.lane.b32.xlu1 %v1524_v2, %s1568_s17 }
  0x43   : > { %1036 = vrot.lane.b32.xlu0 %v1520_v0, %s1569_s18  ;;  %1038 = vrot.lane.b32.xlu1 %v1524_v2, %s1569_s18 }
  0x47   : > { %945 = vrot.lane.b32.xlu0 %v1522_v1, %s1568_s17  ;;  %947 = vrot.lane.b32.xlu1 %v1525_v3, %s1568_s17 }
  0x4b   : > { %1032 = vrot.lane.b32.xlu0 %v1522_v1, %s1569_s18  ;;  %1034 = vrot.lane.b32.xlu1 %v1525_v3, %s1569_s18  ;;  %v1543_v3 = vld [vmem:[%s1726_s1 + $0x78] sm:$0xff]  }
  0x81   : > { %v354_v10 = vpop.permute.xlu0 %353  ;;  %v350_v11 = vpop.permute.xlu1 %349 }
  0x85   : > { %v356_v12 = vpop.permute.xlu0 %355  ;;  %v352_v13 = vpop.permute.xlu1 %351 }
  0x86   : > { %v359_v14 = vsel %vm357_vm1, %v354_v10, %v356_v12  ;;  %v358_v15 = vsel %vm357_vm1, %v350_v11, %v352_v13 }
  0x87   : > { %1432 = vmatprep.subr.bf16.mxu0 %v359_v14 }
  0x88   : > { %1433 = vmatpush3.bf16.msra.mxu0 %v359_v14 }
  0x89   : > { %v515_v16 = vpop.permute.xlu0 %514  ;;  %1434 = vmatprep.subr.bf16.mxu0 %v358_v15  ;;  %v517_v17 = vpop.permute.xlu1 %516 }
  0x8a   : > { %v520_v19 = vsel %vm518_vm2, %v515_v16, %v517_v17 }
  0x8c   : > { %1435 = vmatpush3.bf16.msra.mxu0 %v358_v15 }
  0x8d   : > { %v511_v21 = vpop.permute.xlu0 %510  ;;  %1448 = vmatprep.subr.bf16.mxu0 %v520_v19  ;;  %v513_v22 = vpop.permute.xlu1 %512 }
  0x8e   : > { %v519_v23 = vsel %vm518_vm2, %v511_v21, %v513_v22 }
  0x8f   : > { %1437 = vmatmul.mubr.msk.bf16.vlgmr.msra.gmra.mxu0 %vm362_vm0, %v1529_v18 }
  0x90   : > { %1449 = vmatpush3.bf16.msra.mxu0 %v520_v19  ;;  %1452 = vmatprep.mubr.msk.bf16.mxu0 %vm362_vm0, %v1532_v20 }
  0x91   : > { %v602_v24 = vpop.permute.xlu0 %601  ;;  %1450 = vmatprep.subr.bf16.mxu0 %v519_v23  ;;  %v604_v25 = vpop.permute.xlu1 %603 }
  0x92   : > { %v607_v26 = vsel %vm605_vm3, %v602_v24, %v604_v25 }
  0x93   : > { %1456 = vmatprep.subr.bf16.mxu1 %v607_v26 }
  0x94   : > { %1451 = vmatpush3.bf16.msra.mxu0 %v519_v23  ;;  %1457 = vmatpush3.bf16.msra.mxu1 %v607_v26 }
  0x95   : > { %v689_v29 = vpop.permute.xlu0 %688  ;;  %v691_v30 = vpop.permute.xlu1 %690 }
  0x96   : > { %v694_v31 = vsel %vm692_vm4, %v689_v29, %v691_v30 }
  0x97   : > { %1453 = vmatmul.mubr.msk.bf16.vlgmr.msra.gmra.mxu0 %vm362_vm0, %v1533_v27  ;;  %1464 = vmatprep.subr.bf16.mxu0 %v694_v31 }
  0x98   : > { %1468 = vmatprep.mubr.msk.bf16.mxu0 %vm362_vm0, %v1536_v28  ;;  %1465 = vmatpush3.bf16.msra.mxu0 %v694_v31 }
  0x99   : > { %v598_v32 = vpop.permute.xlu0 %597  ;;  %v600_v33 = vpop.permute.xlu1 %599 }
  0x9a   : > { %v606_v34 = vsel %vm605_vm3, %v598_v32, %v600_v33 }
  0x9b   : > { %1458 = vmatprep.subr.bf16.mxu1 %v606_v34 }
  0x9c   : > { %1459 = vmatpush3.bf16.msra.mxu1 %v606_v34 }
  0x9d   : > { %v685_v36 = vpop.permute.xlu0 %684  ;;  %v687_v38 = vpop.permute.xlu1 %686 }
  0x9e   : > { %v693_v39 = vsel %vm692_vm4, %v685_v36, %v687_v38 }
  0x9f   : > { %1466 = vmatprep.subr.bf16.mxu0 %v693_v39  ;;  %1461 = vmatmul.mubr.msk.bf16.vlgmr.msra.gmra.mxu1 %vm362_vm0, %v1535_v35 }
  0xa0   : > { %1467 = vmatpush3.bf16.msra.mxu0 %v693_v39  ;;  %1476 = vmatprep.mubr.msk.bf16.mxu1 %vm362_vm0, %v1538_v37 }
  0xa1   : > { %v776_v41 = vpop.permute.xlu0 %775  ;;  %v778_v43 = vpop.permute.xlu1 %777 }
  0xa2   : > { %v781_v44 = vsel %vm779_vm5, %v776_v41, %v778_v43 }
  0xa3   : > { %1472 = vmatprep.subr.bf16.mxu1 %v781_v44  ;;  %1469 = vmatmul.mubr.msk.bf16.vlgmr.msra.gmra.mxu0 %vm362_vm0, %v1537_v40 }
  0xa4   : > { %1473 = vmatpush3.bf16.msra.mxu1 %v781_v44  ;;  %1484 = vmatprep.mubr.msk.bf16.mxu0 %vm362_vm0, %v1540_v42 }
  0xa5   : > { %v863_v45 = vpop.permute.xlu0 %862  ;;  %v865_v46 = vpop.permute.xlu1 %864 }
  0xa6   : > { %v868_v47 = vsel %vm866_vm6, %v863_v45, %v865_v46 }
  0xa7   : > { %1480 = vmatprep.subr.bf16.mxu0 %v868_v47 }
  0xa8   : > { %1481 = vmatpush3.bf16.msra.mxu0 %v868_v47 }
  0xa9   : > { %v772_v48 = vpop.permute.xlu0 %771  ;;  %v774_v49 = vpop.permute.xlu1 %773 }
  0xaa   : > { %v780_v50 = vsel %vm779_vm5, %v772_v48, %v774_v49 }
  0xab   : > { %1474 = vmatprep.subr.bf16.mxu1 %v780_v50 }
  0xac   : > { %1475 = vmatpush3.bf16.msra.mxu1 %v780_v50 }
  0xad   : > { %v859_v52 = vpop.permute.xlu0 %858  ;;  %v861_v54 = vpop.permute.xlu1 %860 }
  0xae   : > { %v867_v55 = vsel %vm866_vm6, %v859_v52, %v861_v54 }
  0xaf   : > { %1477 = vmatmul.mubr.msk.bf16.vlgmr.msra.gmra.mxu1 %vm362_vm0, %v1539_v51  ;;  %1482 = vmatprep.subr.bf16.mxu0 %v867_v55 }
  0xb0   : > { %1483 = vmatpush3.bf16.msra.mxu0 %v867_v55  ;;  %1492 = vmatprep.mubr.msk.bf16.mxu1 %vm362_vm0, %v1542_v53 }
  0xb1   : > { %v950_v57 = vpop.permute.xlu0 %949  ;;  %v952_v59 = vpop.permute.xlu1 %951 }
  0xb2   : > { %v955_v60 = vsel %vm953_vm7, %v950_v57, %v952_v59 }
  0xb3   : > { %1485 = vmatmul.mubr.msk.bf16.vlgmr.msra.gmra.mxu0 %vm362_vm0, %v1541_v56  ;;  %1488 = vmatprep.subr.bf16.mxu1 %v955_v60 }
  0xb4   : > { %1489 = vmatpush3.bf16.msra.mxu1 %v955_v60  ;;  %1500 = vmatprep.mubr.msk.bf16.mxu0 %vm362_vm0, %v1544_v58 }
  0xb5   : > { %v1037_v61 = vpop.permute.xlu0 %1036  ;;  %v1039_v62 = vpop.permute.xlu1 %1038 }
  0xb6   : > { %v1042_v63 = vsel %vm1040_vm8, %v1037_v61, %v1039_v62 }
  0xb7   : > { %1496 = vmatprep.subr.bf16.mxu0 %v1042_v63 }
  0xb8   : > { %1497 = vmatpush3.bf16.msra.mxu0 %v1042_v63 }
  0xb9   : > { %v946_v0 = vpop.permute.xlu0 %945  ;;  %v948_v1 = vpop.permute.xlu1 %947 }
  0xba   : > { %v954_v2 = vsel %vm953_vm7, %v946_v0, %v948_v1 }
  0xbb   : > { %1490 = vmatprep.subr.bf16.mxu1 %v954_v2 }
  0xbc   : > { %1491 = vmatpush3.bf16.msra.mxu1 %v954_v2 }
  0xbd   : > { %v1033_v4 = vpop.permute.xlu0 %1032  ;;  %v1035_v5 = vpop.permute.xlu1 %1034 }
  0xbe   : > { %v1041_v6 = vsel %vm1040_vm8, %v1033_v4, %v1035_v5  ;;  %v1388_v5 = vld [vmem:[%s1727_s2] ss:$0 sm:$0xff] }
  0xbf   : > { %1493 = vmatmul.mubr.msk.bf16.vlgmr.msra.gmra.mxu1 %vm362_vm0, %v1543_v3  ;;  %1498 = vmatprep.subr.bf16.mxu0 %v1041_v6 }
  0xc0   : > { %1499 = vmatpush3.bf16.msra.mxu0 %v1041_v6 }
  0xc3   : > { %1501 = vmatmul.mubr.msk.bf16.vlgmr.msra.gmra.mxu0 %vm362_vm0, %v1545_v7 }
  0xd8   : > { %v1446_v11 = vpop.f32.mrf.mxu1 }
  0xda   : > { %v480_v13 = vpop.f32.mrf.mxu1 }
  0xdc   : > { %v1447_v15 = vpop.f32.mrf.mxu1 }
  0xde   : > { %v483_v17 = vpop.f32.mrf.mxu1 }
 0x14f   : > { %v1438_v8 = vpop.f32.mrf.mxu0 }
 0x150   : > { %v489_v30 = vadd.f32 %v1446_v11, %v1438_v8 }
 0x151   : > { %v403_v9 = vpop.f32.mrf.mxu0 }
 0x152   : > { %v481_v28 = vadd.f32 %v480_v13, %v403_v9 }
 0x153   : > { %v1439_v10 = vpop.f32.mrf.mxu0 }
 0x154   : > { %v492_v36 = vadd.f32 %v1447_v15, %v1439_v10 }
 0x155   : > { %v406_v12 = vpop.f32.mrf.mxu0 }
 0x156   : > { %v484_v34 = vadd.f32 %v483_v17, %v406_v12 }
 0x157   : > { %v1454_v14 = vpop.f32.mrf.mxu0 }
 0x158   : > { %v580_v35 = vadd.f32 %v1454_v14, %v489_v30 }
 0x159   : > { %v563_v16 = vpop.f32.mrf.mxu0 }
 0x15a   : > { %v578_v33 = vadd.f32 %v563_v16, %v481_v28 }
 0x15b   : > { %v1455_v18 = vpop.f32.mrf.mxu0 }
 0x15c   : > { %v581_v41 = vadd.f32 %v1455_v18, %v492_v36 }
 0x15d   : > { %v566_v19 = vpop.f32.mrf.mxu0 }
 0x15e   : > { %v579_v39 = vadd.f32 %v566_v19, %v484_v34 }
 0x15f   : > { %v1462_v20 = vpop.f32.mrf.mxu1 }
 0x160   : > { %v667_v42 = vadd.f32 %v1462_v20, %v580_v35 }
 0x161   : > { %v650_v21 = vpop.f32.mrf.mxu1 }
 0x162   : > { %v665_v40 = vadd.f32 %v650_v21, %v578_v33 }
 0x163   : > { %v1470_v22 = vpop.f32.mrf.mxu0  ;;  %v1463_v23 = vpop.f32.mrf.mxu1 }
 0x164   : > { %v754_v48 = vadd.f32 %v1470_v22, %v667_v42  ;;  %v668_v49 = vadd.f32 %v1463_v23, %v581_v41 }
 0x165   : > { %v737_v24 = vpop.f32.mrf.mxu0  ;;  %v653_v25 = vpop.f32.mrf.mxu1 }
 0x166   : > { %v752_v45 = vadd.f32 %v737_v24, %v665_v40  ;;  %v666_v46 = vadd.f32 %v653_v25, %v579_v39 }
 0x167   : > { %v1471_v26 = vpop.f32.mrf.mxu0 }
 0x168   : > { %v755_v58 = vadd.f32 %v1471_v26, %v668_v49 }
 0x169   : > { %v740_v29 = vpop.f32.mrf.mxu0 }
 0x16a   : > { %v753_v53 = vadd.f32 %v740_v29, %v666_v46 }
 0x16f   : > { %v1478_v27 = vpop.f32.mrf.mxu1 }
 0x170   : > { %v841_v54 = vadd.f32 %v1478_v27, %v754_v48 }
 0x171   : > { %v824_v31 = vpop.f32.mrf.mxu1 }
 0x172   : > { %v839_v50 = vadd.f32 %v824_v31, %v752_v45 }
 0x173   : > { %v1486_v32 = vpop.f32.mrf.mxu0  ;;  %v1479_v37 = vpop.f32.mrf.mxu1 }
 0x174   : > { %v928_v59 = vadd.f32 %v1486_v32, %v841_v54  ;;  %v842_v0 = vadd.f32 %v1479_v37, %v755_v58 }
 0x175   : > { %v911_v38 = vpop.f32.mrf.mxu0  ;;  %v827_v43 = vpop.f32.mrf.mxu1 }
 0x176   : > { %v926_v55 = vadd.f32 %v911_v38, %v839_v50  ;;  %v840_v60 = vadd.f32 %v827_v43, %v753_v53  ;;  %v1163_v50 = vld [vmem:[%s289_s7] sm:$0xff] }
 0x177   : > { %v1487_v44 = vpop.f32.mrf.mxu0 }
 0x178   : > { %v929_v6 = vadd.f32 %v1487_v44, %v842_v0 }
 0x179   : > { %v914_v51 = vpop.f32.mrf.mxu0 }
 0x17a   : > { %v927_v1 = vadd.f32 %v914_v51, %v840_v60  ;;  %v1177_v60 = vld [vmem:[%s294_s10 + $0x10] sm:$0xff] }
 0x17f   : > { %v1494_v47 = vpop.f32.mrf.mxu1 }
 0x180   : > { %v1015_v2 = vadd.f32 %v1494_v47, %v928_v59  ;;  %v1164_v59 = vld [vmem:[%s289_s7 + $0x8] sm:$0xff] }
 0x181   : > { %v998_v52 = vpop.f32.mrf.mxu1 }
 0x182   : > { %v1013_v61 = vadd.f32 %v998_v52, %v926_v55  ;;  %v1175_v52 = vld [vmem:[%s294_s10] sm:$0xff]  ;;  %v1165_v55 = vld [vmem:[%s289_s7 + $0x10] sm:$0xff] }
 0x183   : > { %v1495_v56 = vpop.f32.mrf.mxu1  ;;  %v1502_v57 = vpop.f32.mrf.mxu0 }
 0x184   : > { %v1102_v7 = vadd.f32 %v1502_v57, %v1015_v2  ;;  %v1016_v11 = vadd.f32 %v1495_v56, %v929_v6  ;;  %v1166_v2 = vld [vmem:[%s289_s7 + $0x18] sm:$0xff] }
 0x185   : > { %v1001_v62 = vpop.f32.mrf.mxu1  ;;  %v1085_v63 = vpop.f32.mrf.mxu0  ;;  %v1178_v6 = vld [vmem:[%s294_s10 + $0x18] sm:$0xff] }
 0x186   : > { %v1100_v3 = vadd.f32 %v1085_v63, %v1013_v61  ;;  %v1014_v8 = vadd.f32 %v1001_v62, %v927_v1  ;;  %v1113_v15 = vmul.f32 %v1388_v5, %v1102_v7  ;;  %v1176_v63 = vld [vmem:[%s294_s10 + $0x8] sm:$0xff] }
 0x187   : > { %v1503_v4 = vpop.f32.mrf.mxu0 }
 0x188   : > { %v1111_v9 = vmul.f32 %v1388_v5, %v1100_v3  ;;  %v1103_v13 = vadd.f32 %v1503_v4, %v1016_v11 }
 0x189   : > { %v1088_v10 = vpop.f32.mrf.mxu0 }
 0x18a   : > { %v1101_v12 = vadd.f32 %v1088_v10, %v1014_v8  ;;  %1115 = vadd.xlane.f32.xlu0 %v1111_v9  ;;  %v1114_v16 = vmul.f32 %v1388_v5, %v1103_v13 }
 0x18c   : > { %v1112_v14 = vmul.f32 %v1388_v5, %v1101_v12 }
 0x18e   : > { %1117 = vadd.xlane.f32.xlu1 %v1112_v14  ;;  %1119 = vadd.xlane.f32.xlu0 %v1113_v15 }
 0x192   : > { %1121 = vadd.xlane.f32.xlu0 %v1114_v16 }
 0x213   : > { %v1116_v17 = vpop.xlane.xlu0 %1115 }
 0x214   : > { %v1123_v18 = vmul.f32 0.0625, %v1116_v17 }
 0x216   : > { %v1127_v19 = vsub.f32 %v1100_v3, %v1123_v18 }
 0x217   : > { %v1118_v20 = vpop.xlane.xlu1 %1117  ;;  %v1120_v21 = vpop.xlane.xlu0 %1119 }
 0x218   : > { %v1124_v22 = vmul.f32 0.0625, %v1118_v20  ;;  %v1125_v23 = vmul.f32 0.0625, %v1120_v21  ;;  %v1131_v24 = vmul.f32 %v1388_v5, %v1127_v19 }
 0x21a   : > { %v1128_v25 = vsub.f32 %v1101_v12, %v1124_v22  ;;  %v1129_v26 = vsub.f32 %v1102_v7, %v1125_v23  ;;  %v1135_v27 = vmul.f32 %v1131_v24, %v1131_v24 }
 0x21b   : > { %v1122_v28 = vpop.xlane.xlu0 %1121 }
 0x21c   : > { %v1126_v29 = vmul.f32 0.0625, %v1122_v28  ;;  %1139 = vadd.xlane.f32.xlu1 %v1135_v27  ;;  %v1132_v30 = vmul.f32 %v1388_v5, %v1128_v25  ;;  %v1133_v31 = vmul.f32 %v1388_v5, %v1129_v26 }
 0x21e   : > { %v1130_v32 = vsub.f32 %v1103_v13, %v1126_v29  ;;  %v1136_v33 = vmul.f32 %v1132_v30, %v1132_v30  ;;  %v1137_v34 = vmul.f32 %v1133_v31, %v1133_v31 }
 0x220   : > { %1141 = vadd.xlane.f32.xlu0 %v1136_v33  ;;  %1143 = vadd.xlane.f32.xlu1 %v1137_v34  ;;  %v1134_v35 = vmul.f32 %v1388_v5, %v1130_v32 }
 0x222   : > { %v1138_v36 = vmul.f32 %v1134_v35, %v1134_v35 }
 0x224   : > { %1145 = vadd.xlane.f32.xlu0 %v1138_v36 }
 0x2a5   : > { %v1140_v37 = vpop.xlane.xlu1 %1139 }
 0x2a6   : > { %v1147_v38 = vmul.f32 0.0625, %v1140_v37 }
 0x2a8   : > { %v1151_v39 = vadd.f32 1e-05, %v1147_v38 }
 0x2a9   : > { %v1144_v40 = vpop.xlane.xlu1 %1143  ;;  %v1142_v41 = vpop.xlane.xlu0 %1141 }
 0x2aa   : > { %1546 = vrsqrt.f32 %v1151_v39  ;;  %v1149_v42 = vmul.f32 0.0625, %v1144_v40  ;;  %v1148_v43 = vmul.f32 0.0625, %v1142_v41 }
 0x2ac   : > { %v1153_v44 = vadd.f32 1e-05, %v1149_v42  ;;  %v1152_v45 = vadd.f32 1e-05, %v1148_v43 }
 0x2ad   : > { %v1146_v46 = vpop.xlane.xlu0 %1145 }
 0x2ae   : > { %1548 = vrsqrt.f32 %v1153_v44  ;;  %v1150_v47 = vmul.f32 0.0625, %v1146_v46 }
 0x2af   : > { %1550 = vrsqrt.f32 %v1152_v45 }
 0x2b0   : > { %v1154_v48 = vadd.f32 1e-05, %v1150_v47 }
 0x2b2   : > { %1552 = vrsqrt.f32 %v1154_v48 }
 0x2b7   : > { %v1547_v49 = vpop.eup %1546 }
 0x2b8   : > { %v1159_v51 = vmul.f32 %v1547_v49, %v1127_v19 }
 0x2ba   : > { %v1167_v53 = vadd.f32 %v1163_v50, %v1159_v51 }
 0x2bb   : > { %v1549_v54 = vpop.eup %1548 }
 0x2bc   : > { %v1551_v56 = vpop.eup %1550  ;;  %1171 = vst [vmem:[%s299_s13] sm:$0xff] %v1167_v53  ;;  %v1179_v57 = vadd.f32 %v1175_v52, %v1167_v53  ;;  %v1161_v58 = vmul.f32 %v1549_v54, %v1129_v26 }
 0x2bd   : > { %v1160_v61 = vmul.f32 %v1551_v56, %v1128_v25 }
 0x2be   : > { %1183 = vst [vmem:[%s304_s16] sm:$0xff] %v1179_v57  ;;  %v1169_v62 = vadd.f32 %v1165_v55, %v1161_v58 }
 0x2bf   : > { %v1553_v0 = vpop.eup %1552  ;;  %v1168_v1 = vadd.f32 %v1164_v59, %v1160_v61 }
 0x2c0   : > { %1173 = vst [vmem:[%s299_s13 + $0x10] sm:$0xff] %v1169_v62  ;;  %v1181_v3 = vadd.f32 %v1177_v60, %v1169_v62  ;;  %v1162_v4 = vmul.f32 %v1553_v0, %v1130_v32 }
 0x2c1   : > { %1172 = vst [vmem:[%s299_s13 + $0x8] sm:$0xff] %v1168_v1  ;;  %v1180_v5 = vadd.f32 %v1176_v63, %v1168_v1 }
 0x2c2   : > { %1185 = vst [vmem:[%s304_s16 + $0x10] sm:$0xff] %v1181_v3  ;;  %v1170_v7 = vadd.f32 %v1166_v2, %v1162_v4 }
 0x2c3   : > { %1184 = vst [vmem:[%s304_s16 + $0x8] sm:$0xff] %v1180_v5 }
 0x2c4   : > { %1174 = vst [vmem:[%s299_s13 + $0x18] sm:$0xff] %v1170_v7  ;;  %v1182_v8 = vadd.f32 %v1178_v6, %v1170_v7 }
 0x2c6   : > { %1186 = vst [vmem:[%s304_s16 + $0x18] sm:$0xff] %v1182_v8 }
 0x2c7 PF: > { %s17_s21 = sadd.s32 1, %s1560_s21  }
 0x2c8   : > { %p14_p4 = scmp.ge.s32.totalorder %s17_s21, 4  }
 0x2ca   :  { %16 = sbr.rel (!%p14_p4) target bundleno = 1 (0x1), region = 96 }

</bundles_post_ra>
